<compile_context>
chip_gen: v6e
topology: v6e:2x2x1
jax: 0.10.0
libtpu: 0.0.40
codegen_flags: <defaults>
</compile_context>

<pallas_src>
import functools

import jax
import jax.numpy as jnp
from jax.experimental import pallas as pl
from jax.experimental.pallas import tpu as pltpu

L_IN = 310            # input length (so that Flatten yields 3060 = 10 * 306)
L1 = L_IN - 2         # 308 after conv1 (kernel 3, stride 1, valid)
L2 = L1 - 2           # 306 after conv2
C1, C2 = 5, 10
FLAT = C2 * L2        # 3060
HID, NCLS = 64, 5
NEG_SLOPE = 0.3
BN_EPS = 1e-5

VMEM_LIMIT_BYTES = 40 * 1024 * 1024   # > worst-case ~26 MB @ bt=512, < 64 MiB (v7x)


def _round_up(n, m):
    return ((n + m - 1) // m) * m


def _lrelu(a):
    # Exact LeakyReLU(0.3) for slope in (0,1): mul+max (2 VALU ops) instead of
    # cmp+mul+select (3 VALU ops) on the saturating VALU slot.
    return jnp.maximum(a, NEG_SLOPE * a)


def _conv_eeg_kernel(x_ref, w1_ref, b1_ref, w2_ref, b2_ref,
                     fc1w_ref, fc1b_ref, fc2w_ref, fc2b_ref, out_ref):
    # x_ref   : (Bt, 310)   VMEM  input batch tile (channel dim squeezed)
    # w1_ref  : (15,)       SMEM  folded conv1 weights, flat [c, k]
    # b1_ref  : (5,)        SMEM  folded conv1 bias
    # w2_ref  : (150,)      SMEM  folded conv2 weights, flat [o, c, k]
    # b2_ref  : (10,)       SMEM  folded conv2 bias
    # fc1w_ref: (10,306,64) VMEM  fc1 weight, reshaped transposed
    # fc1b_ref: (1, 64)     VMEM
    # fc2w_ref: (64, 5)     VMEM  fc2 weight, transposed
    # fc2b_ref: (1, 5)      VMEM
    # out_ref : (Bt, 5)     VMEM  logits
    x = x_ref[...]                                        # (Bt, L_IN) f32
    bt = x.shape[0]

    # ---- conv1 (+ folded BN1) + LeakyReLU(0.3) -------------------------
    x_taps = [x[:, k:k + L1] for k in range(3)]           # 3 lane shifts total
    h1_chans = []
    for c in range(C1):
        a = b1_ref[c]
        for k in range(3):
            a = a + w1_ref[c * 3 + k] * x_taps[k]
        h1_chans.append(_lrelu(a))                        # (Bt, L1)
    h1 = jnp.stack(h1_chans, axis=0)                      # (C1, Bt, L1)

    # ---- conv2 (+ folded BN2) + LeakyReLU(0.3), fused with Flatten+FC1 --
    # Per-tap slices hoisted (3 lane shifts of the whole 5-channel block).
    h1_taps = [h1[:, :, k:k + L2] for k in range(3)]      # each (C1, Bt, L2)
    hidden = jnp.zeros((bt, HID), jnp.float32)
    for o in range(C2):
        # o-outer FMA chain: the accumulator stays register-resident across
        # all 15 taps for each output vreg (single store per output vreg).
        a = b2_ref[o]
        for k in range(3):
            hk = h1_taps[k]                               # (C1, Bt, L2)
            for c in range(C1):
                a = a + w2_ref[(o * C1 + c) * 3 + k] * hk[c]
        h2o = _lrelu(a)                                   # (Bt, L2)
        # Flatten is channel-major: flat[:, o*L2:(o+1)*L2] @ fc1_w.T slab,
        # done as a (Bt,306)x(306,64) MXU matmul per channel (no reshape).
        hidden = hidden + jnp.dot(h2o, fc1w_ref[o],
                                  preferred_element_type=jnp.float32)

    # ---- classifier tail -------------------------------------------------
    hidden = jnp.maximum(hidden + fc1b_ref[...], 0.0)     # ReLU
    # TODO(synk): nn.Dropout(0.5) implemented as eval-mode identity.
    out_ref[...] = (jnp.dot(hidden, fc2w_ref[...],
                            preferred_element_type=jnp.float32)
                    + fc2b_ref[...])


def prepare_conv_eeg_params(params):
    """One-time (outside the jitted forward) weight prep: BN folding, fc transposes."""
    s1 = params['bn1_gamma'] / jnp.sqrt(params['bn1_var'] + BN_EPS)
    t1 = params['bn1_beta'] - params['bn1_mean'] * s1
    s2 = params['bn2_gamma'] / jnp.sqrt(params['bn2_var'] + BN_EPS)
    t2 = params['bn2_beta'] - params['bn2_mean'] * s2

    w1_eff = (s1[:, None, None] * params['conv1_w']).reshape(-1)   # (15,)  [c,k]
    b1_eff = s1 * params['conv1_b'] + t1                           # (5,)
    w2_eff = (s2[:, None, None] * params['conv2_w']).reshape(-1)   # (150,) [o,c,k]
    b2_eff = s2 * params['conv2_b'] + t2                           # (10,)

    fc1_w3 = params['fc1_w'].T.reshape(C2, L2, HID)                # (10,306,64)
    fc2_wt = params['fc2_w'].T                                     # (64, 5)
    return {
        'w1': w1_eff, 'b1': b1_eff, 'w2': w2_eff, 'b2': b2_eff,
        'fc1_w3': fc1_w3, 'fc1_b': params['fc1_b'][None, :],
        'fc2_wt': fc2_wt, 'fc2_b': params['fc2_b'][None, :],
    }


def _choose_batch_tile(B, block_b):
    """Batch tile: multiple of 8 sublanes, capped at block_b.  For large B that
    would otherwise fit in a single tile, split into two so the "parallel"
    batch axis has >=2 grid steps (v7x megacore sharding)."""
    bt = _round_up(min(block_b, _round_up(B, 8)), 8)
    if B >= 128 and _round_up(B, bt) == bt:        # single tile, enough work
        bt = _round_up((B + 1) // 2, 8)
    return bt


@functools.partial(jax.jit, static_argnums=(2,))
def conv_eeg_forward(x, prep, block_b=256):
    """x: (B, 1, 310) float32 (PyTorch NCW). prep: prepare_conv_eeg_params(...).
    Returns logits (B, 5).  block_b may be raised to 512 under the same
    vmem_limit_bytes."""
    B = x.shape[0]
    x2d = x[:, 0, :].astype(jnp.float32)                  # (B, 310)

    bt = _choose_batch_tile(B, block_b)
    b_pad = _round_up(B, bt)
    if b_pad != B:
        x2d = jnp.pad(x2d, ((0, b_pad - B), (0, 0)))

    smem = pl.BlockSpec(memory_space=pltpu.MemorySpace.SMEM)

    out = pl.pallas_call(
        _conv_eeg_kernel,
        out_shape=jax.ShapeDtypeStruct((b_pad, NCLS), jnp.float32),
        grid=(b_pad // bt,),
        in_specs=[
            pl.BlockSpec((bt, L_IN), lambda i: (i, 0)),            # x batch tile
            smem, smem, smem, smem,                                # conv w/b
            pl.BlockSpec((C2, L2, HID), lambda i: (0, 0, 0)),      # fc1 (resident)
            pl.BlockSpec((1, HID), lambda i: (0, 0)),              # fc1 bias
            pl.BlockSpec((HID, NCLS), lambda i: (0, 0)),           # fc2 (resident)
            pl.BlockSpec((1, NCLS), lambda i: (0, 0)),             # fc2 bias
        ],
        out_specs=pl.BlockSpec((bt, NCLS), lambda i: (i, 0)),
        compiler_params=pltpu.CompilerParams(
            dimension_semantics=("parallel",),
            vmem_limit_bytes=VMEM_LIMIT_BYTES),
    )(x2d, prep['w1'], prep['b1'], prep['w2'], prep['b2'],
      prep['fc1_w3'], prep['fc1_b'], prep['fc2_wt'], prep['fc2_b'])

    return out[:B]


def _reference_forward(x, params):
    """Pure-JAX reference (same eval-mode semantics) for checking."""
    hp = jax.lax.Precision.HIGHEST

    def conv1d(h, w, b):
        y = jax.lax.conv_general_dilated(
            h, w, window_strides=(1,), padding='VALID',
            dimension_numbers=('NCW', 'OIW', 'NCW'), precision=hp)
        return y + b[None, :, None]

    def bn(h, g, beta, m, v):
        return g[None, :, None] * (h - m[None, :, None]) / \
            jnp.sqrt(v[None, :, None] + BN_EPS) + beta[None, :, None]

    lrelu = lambda z: jnp.where(z > 0, z, NEG_SLOPE * z)

    h = lrelu(bn(conv1d(x, params['conv1_w'], params['conv1_b']),
                 params['bn1_gamma'], params['bn1_beta'],
                 params['bn1_mean'], params['bn1_var']))
    h = lrelu(bn(conv1d(h, params['conv2_w'], params['conv2_b']),
                 params['bn2_gamma'], params['bn2_beta'],
                 params['bn2_mean'], params['bn2_var']))
    flat = h.reshape(h.shape[0], -1)
    h = jnp.maximum(jnp.dot(flat, params['fc1_w'].T, precision=hp)
                    + params['fc1_b'], 0.0)
    return jnp.dot(h, params['fc2_w'].T, precision=hp) + params['fc2_b']


if __name__ == "__main__":
    key = jax.random.PRNGKey(0)
    ks = jax.random.split(key, 9)

    def u(k, shape, fan_in):
        bound = 1.0 / (fan_in ** 0.5)
        return jax.random.uniform(k, shape, jnp.float32, -bound, bound)

    params = {
        'conv1_w': u(ks[0], (C1, 1, 3), 1 * 3),
        'conv1_b': u(ks[1], (C1,), 1 * 3),
        'conv2_w': u(ks[2], (C2, C1, 3), C1 * 3),
        'conv2_b': u(ks[3], (C2,), C1 * 3),
        'bn1_gamma': jnp.ones((C1,), jnp.float32),
        'bn1_beta': jnp.zeros((C1,), jnp.float32),
        'bn1_mean': jnp.zeros((C1,), jnp.float32),
        'bn1_var': jnp.ones((C1,), jnp.float32),
        'bn2_gamma': jnp.ones((C2,), jnp.float32),
        'bn2_beta': jnp.zeros((C2,), jnp.float32),
        'bn2_mean': jnp.zeros((C2,), jnp.float32),
        'bn2_var': jnp.ones((C2,), jnp.float32),
        'fc1_w': u(ks[4], (HID, FLAT), FLAT),
        'fc1_b': u(ks[5], (HID,), FLAT),
        'fc2_w': u(ks[6], (NCLS, HID), HID),
        'fc2_b': u(ks[7], (NCLS,), HID),
    }

    # Input length must be 310 so that Flatten produces 3060 features.
    x = jax.random.normal(ks[8], (2, 1, L_IN), jnp.float32)

    prep = prepare_conv_eeg_params(params)
    out = jax.block_until_ready(conv_eeg_forward(x, prep))
    assert out.shape == (2, NCLS), out.shape

    ref = jax.block_until_ready(_reference_forward(x, params))
    assert jnp.allclose(out, ref, rtol=1e-3, atol=1e-3), \
        f"max abs diff {jnp.max(jnp.abs(out - ref))}"

    print("KERNEL_OK")
</pallas_src>

<mosaic_0001>
module attributes {stable_mosaic.version = 11 : i64} {
  func.func @_conv_eeg_kernel(%arg0: i32, %arg1: memref<8x310xf32, #tpu.memory_space<vmem>>, %arg2: memref<15xf32, #tpu.memory_space<smem>>, %arg3: memref<5xf32, #tpu.memory_space<smem>>, %arg4: memref<150xf32, #tpu.memory_space<smem>>, %arg5: memref<10xf32, #tpu.memory_space<smem>>, %arg6: memref<10x306x64xf32, #tpu.memory_space<vmem>>, %arg7: memref<1x64xf32, #tpu.memory_space<vmem>>, %arg8: memref<64x5xf32, #tpu.memory_space<vmem>>, %arg9: memref<1x5xf32, #tpu.memory_space<vmem>>, %arg10: memref<8x5xf32, #tpu.memory_space<vmem>>) attributes {dimension_semantics = [#tpu.dimension_semantics<parallel>], iteration_bounds = array<i64: 1>, scalar_prefetch = 0 : i64, scratch_operands = 0 : i64, tpu.core_type = #tpu.core_type<tc>, window_params = [{transform_indices = @transform_0, window_bounds = array<i64: 8, 310>}, {transform_indices = @transform_1, window_bounds = array<i64: 15>}, {transform_indices = @transform_2, window_bounds = array<i64: 5>}, {transform_indices = @transform_3, window_bounds = array<i64: 150>}, {transform_indices = @transform_4, window_bounds = array<i64: 10>}, {pipeline_mode = #tpu.pipeline_mode<synchronous>, transform_indices = @transform_5, window_bounds = array<i64: 10, 306, 64>}, {pipeline_mode = #tpu.pipeline_mode<synchronous>, transform_indices = @transform_6, window_bounds = array<i64: 1, 64>}, {pipeline_mode = #tpu.pipeline_mode<synchronous>, transform_indices = @transform_7, window_bounds = array<i64: 64, 5>}, {pipeline_mode = #tpu.pipeline_mode<synchronous>, transform_indices = @transform_8, window_bounds = array<i64: 1, 5>}, {transform_indices = @transform_9, window_bounds = array<i64: 8, 5>}]} {
    %c0 = arith.constant 0 : index
    %c0_0 = arith.constant 0 : index
    %0 = vector.load %arg1[%c0, %c0_0] : memref<8x310xf32, #tpu.memory_space<vmem>>, vector<8x310xf32>
    %1 = vector.extract_strided_slice %0 {offsets = [0, 0], sizes = [8, 308], strides = [1, 1]} : vector<8x310xf32> to vector<8x308xf32>
    %2 = vector.extract_strided_slice %0 {offsets = [0, 1], sizes = [8, 308], strides = [1, 1]} : vector<8x310xf32> to vector<8x308xf32>
    %3 = vector.extract_strided_slice %0 {offsets = [0, 2], sizes = [8, 308], strides = [1, 1]} : vector<8x310xf32> to vector<8x308xf32>
    %c0_1 = arith.constant 0 : index
    %4 = memref.load %arg3[%c0_1] : memref<5xf32, #tpu.memory_space<smem>>
    %c0_2 = arith.constant 0 : index
    %5 = memref.load %arg2[%c0_2] : memref<15xf32, #tpu.memory_space<smem>>
    %6 = vector.broadcast %5 : f32 to vector<8x308xf32>
    %7 = arith.mulf %6, %1 : vector<8x308xf32>
    %8 = vector.broadcast %4 : f32 to vector<8x308xf32>
    %9 = arith.addf %8, %7 : vector<8x308xf32>
    %c1 = arith.constant 1 : index
    %10 = memref.load %arg2[%c1] : memref<15xf32, #tpu.memory_space<smem>>
    %11 = vector.broadcast %10 : f32 to vector<8x308xf32>
    %12 = arith.mulf %11, %2 : vector<8x308xf32>
    %13 = arith.addf %9, %12 : vector<8x308xf32>
    %c2 = arith.constant 2 : index
    %14 = memref.load %arg2[%c2] : memref<15xf32, #tpu.memory_space<smem>>
    %15 = vector.broadcast %14 : f32 to vector<8x308xf32>
    %16 = arith.mulf %15, %3 : vector<8x308xf32>
    %17 = arith.addf %13, %16 : vector<8x308xf32>
    %cst = arith.constant 3.000000e-01 : f32
    %18 = vector.broadcast %cst : f32 to vector<8x308xf32>
    %19 = arith.mulf %18, %17 : vector<8x308xf32>
    %20 = arith.maximumf %17, %19 : vector<8x308xf32>
    %c1_3 = arith.constant 1 : index
    %21 = memref.load %arg3[%c1_3] : memref<5xf32, #tpu.memory_space<smem>>
    %c3 = arith.constant 3 : index
    %22 = memref.load %arg2[%c3] : memref<15xf32, #tpu.memory_space<smem>>
    %23 = vector.broadcast %22 : f32 to vector<8x308xf32>
    %24 = arith.mulf %23, %1 : vector<8x308xf32>
    %25 = vector.broadcast %21 : f32 to vector<8x308xf32>
    %26 = arith.addf %25, %24 : vector<8x308xf32>
    %c4 = arith.constant 4 : index
    %27 = memref.load %arg2[%c4] : memref<15xf32, #tpu.memory_space<smem>>
    %28 = vector.broadcast %27 : f32 to vector<8x308xf32>
    %29 = arith.mulf %28, %2 : vector<8x308xf32>
    %30 = arith.addf %26, %29 : vector<8x308xf32>
    %c5 = arith.constant 5 : index
    %31 = memref.load %arg2[%c5] : memref<15xf32, #tpu.memory_space<smem>>
    %32 = vector.broadcast %31 : f32 to vector<8x308xf32>
    %33 = arith.mulf %32, %3 : vector<8x308xf32>
    %34 = arith.addf %30, %33 : vector<8x308xf32>
    %cst_4 = arith.constant 3.000000e-01 : f32
    %35 = vector.broadcast %cst_4 : f32 to vector<8x308xf32>
    %36 = arith.mulf %35, %34 : vector<8x308xf32>
    %37 = arith.maximumf %34, %36 : vector<8x308xf32>
    %c2_5 = arith.constant 2 : index
    %38 = memref.load %arg3[%c2_5] : memref<5xf32, #tpu.memory_space<smem>>
    %c6 = arith.constant 6 : index
    %39 = memref.load %arg2[%c6] : memref<15xf32, #tpu.memory_space<smem>>
    %40 = vector.broadcast %39 : f32 to vector<8x308xf32>
    %41 = arith.mulf %40, %1 : vector<8x308xf32>
    %42 = vector.broadcast %38 : f32 to vector<8x308xf32>
    %43 = arith.addf %42, %41 : vector<8x308xf32>
    %c7 = arith.constant 7 : index
    %44 = memref.load %arg2[%c7] : memref<15xf32, #tpu.memory_space<smem>>
    %45 = vector.broadcast %44 : f32 to vector<8x308xf32>
    %46 = arith.mulf %45, %2 : vector<8x308xf32>
    %47 = arith.addf %43, %46 : vector<8x308xf32>
    %c8 = arith.constant 8 : index
    %48 = memref.load %arg2[%c8] : memref<15xf32, #tpu.memory_space<smem>>
    %49 = vector.broadcast %48 : f32 to vector<8x308xf32>
    %50 = arith.mulf %49, %3 : vector<8x308xf32>
    %51 = arith.addf %47, %50 : vector<8x308xf32>
    %cst_6 = arith.constant 3.000000e-01 : f32
    %52 = vector.broadcast %cst_6 : f32 to vector<8x308xf32>
    %53 = arith.mulf %52, %51 : vector<8x308xf32>
    %54 = arith.maximumf %51, %53 : vector<8x308xf32>
    %c3_7 = arith.constant 3 : index
    %55 = memref.load %arg3[%c3_7] : memref<5xf32, #tpu.memory_space<smem>>
    %c9 = arith.constant 9 : index
    %56 = memref.load %arg2[%c9] : memref<15xf32, #tpu.memory_space<smem>>
    %57 = vector.broadcast %56 : f32 to vector<8x308xf32>
    %58 = arith.mulf %57, %1 : vector<8x308xf32>
    %59 = vector.broadcast %55 : f32 to vector<8x308xf32>
    %60 = arith.addf %59, %58 : vector<8x308xf32>
    %c10 = arith.constant 10 : index
    %61 = memref.load %arg2[%c10] : memref<15xf32, #tpu.memory_space<smem>>
    %62 = vector.broadcast %61 : f32 to vector<8x308xf32>
    %63 = arith.mulf %62, %2 : vector<8x308xf32>
    %64 = arith.addf %60, %63 : vector<8x308xf32>
    %c11 = arith.constant 11 : index
    %65 = memref.load %arg2[%c11] : memref<15xf32, #tpu.memory_space<smem>>
    %66 = vector.broadcast %65 : f32 to vector<8x308xf32>
    %67 = arith.mulf %66, %3 : vector<8x308xf32>
    %68 = arith.addf %64, %67 : vector<8x308xf32>
    %cst_8 = arith.constant 3.000000e-01 : f32
    %69 = vector.broadcast %cst_8 : f32 to vector<8x308xf32>
    %70 = arith.mulf %69, %68 : vector<8x308xf32>
    %71 = arith.maximumf %68, %70 : vector<8x308xf32>
    %c4_9 = arith.constant 4 : index
    %72 = memref.load %arg3[%c4_9] : memref<5xf32, #tpu.memory_space<smem>>
    %c12 = arith.constant 12 : index
    %73 = memref.load %arg2[%c12] : memref<15xf32, #tpu.memory_space<smem>>
    %74 = vector.broadcast %73 : f32 to vector<8x308xf32>
    %75 = arith.mulf %74, %1 : vector<8x308xf32>
    %76 = vector.broadcast %72 : f32 to vector<8x308xf32>
    %77 = arith.addf %76, %75 : vector<8x308xf32>
    %c13 = arith.constant 13 : index
    %78 = memref.load %arg2[%c13] : memref<15xf32, #tpu.memory_space<smem>>
    %79 = vector.broadcast %78 : f32 to vector<8x308xf32>
    %80 = arith.mulf %79, %2 : vector<8x308xf32>
    %81 = arith.addf %77, %80 : vector<8x308xf32>
    %c14 = arith.constant 14 : index
    %82 = memref.load %arg2[%c14] : memref<15xf32, #tpu.memory_space<smem>>
    %83 = vector.broadcast %82 : f32 to vector<8x308xf32>
    %84 = arith.mulf %83, %3 : vector<8x308xf32>
    %85 = arith.addf %81, %84 : vector<8x308xf32>
    %cst_10 = arith.constant 3.000000e-01 : f32
    %86 = vector.broadcast %cst_10 : f32 to vector<8x308xf32>
    %87 = arith.mulf %86, %85 : vector<8x308xf32>
    %88 = arith.maximumf %85, %87 : vector<8x308xf32>
    %89 = vector.shape_cast %20 : vector<8x308xf32> to vector<1x8x308xf32>
    %90 = vector.shape_cast %37 : vector<8x308xf32> to vector<1x8x308xf32>
    %91 = vector.shape_cast %54 : vector<8x308xf32> to vector<1x8x308xf32>
    %92 = vector.shape_cast %71 : vector<8x308xf32> to vector<1x8x308xf32>
    %93 = vector.shape_cast %88 : vector<8x308xf32> to vector<1x8x308xf32>
    %94 = tpu.concatenate %89, %90, %91, %92, %93 in 0 : vector<1x8x308xf32>, vector<1x8x308xf32>, vector<1x8x308xf32>, vector<1x8x308xf32>, vector<1x8x308xf32> -> vector<5x8x308xf32>
    %95 = vector.extract_strided_slice %94 {offsets = [0, 0, 0], sizes = [5, 8, 306], strides = [1, 1, 1]} : vector<5x8x308xf32> to vector<5x8x306xf32>
    %96 = vector.extract_strided_slice %94 {offsets = [0, 0, 1], sizes = [5, 8, 306], strides = [1, 1, 1]} : vector<5x8x308xf32> to vector<5x8x306xf32>
    %97 = vector.extract_strided_slice %94 {offsets = [0, 0, 2], sizes = [5, 8, 306], strides = [1, 1, 1]} : vector<5x8x308xf32> to vector<5x8x306xf32>
    %cst_11 = arith.constant 0.000000e+00 : f32
    %98 = vector.broadcast %cst_11 : f32 to vector<8x64xf32>
    %c0_12 = arith.constant 0 : index
    %99 = memref.load %arg5[%c0_12] : memref<10xf32, #tpu.memory_space<smem>>
    %c0_13 = arith.constant 0 : index
    %100 = memref.load %arg4[%c0_13] : memref<150xf32, #tpu.memory_space<smem>>
    %101 = vector.extract_strided_slice %95 {offsets = [0, 0, 0], sizes = [1, 8, 306], strides = [1, 1, 1]} : vector<5x8x306xf32> to vector<1x8x306xf32>
    %102 = vector.shape_cast %101 : vector<1x8x306xf32> to vector<8x306xf32>
    %103 = vector.broadcast %100 : f32 to vector<8x306xf32>
    %104 = arith.mulf %103, %102 : vector<8x306xf32>
    %105 = vector.broadcast %99 : f32 to vector<8x306xf32>
    %106 = arith.addf %105, %104 : vector<8x306xf32>
    %c3_14 = arith.constant 3 : index
    %107 = memref.load %arg4[%c3_14] : memref<150xf32, #tpu.memory_space<smem>>
    %108 = vector.extract_strided_slice %95 {offsets = [1, 0, 0], sizes = [1, 8, 306], strides = [1, 1, 1]} : vector<5x8x306xf32> to vector<1x8x306xf32>
    %109 = vector.shape_cast %108 : vector<1x8x306xf32> to vector<8x306xf32>
    %110 = vector.broadcast %107 : f32 to vector<8x306xf32>
    %111 = arith.mulf %110, %109 : vector<8x306xf32>
    %112 = arith.addf %106, %111 : vector<8x306xf32>
    %c6_15 = arith.constant 6 : index
    %113 = memref.load %arg4[%c6_15] : memref<150xf32, #tpu.memory_space<smem>>
    %114 = vector.extract_strided_slice %95 {offsets = [2, 0, 0], sizes = [1, 8, 306], strides = [1, 1, 1]} : vector<5x8x306xf32> to vector<1x8x306xf32>
    %115 = vector.shape_cast %114 : vector<1x8x306xf32> to vector<8x306xf32>
    %116 = vector.broadcast %113 : f32 to vector<8x306xf32>
    %117 = arith.mulf %116, %115 : vector<8x306xf32>
    %118 = arith.addf %112, %117 : vector<8x306xf32>
    %c9_16 = arith.constant 9 : index
    %119 = memref.load %arg4[%c9_16] : memref<150xf32, #tpu.memory_space<smem>>
    %120 = vector.extract_strided_slice %95 {offsets = [3, 0, 0], sizes = [1, 8, 306], strides = [1, 1, 1]} : vector<5x8x306xf32> to vector<1x8x306xf32>
    %121 = vector.shape_cast %120 : vector<1x8x306xf32> to vector<8x306xf32>
    %122 = vector.broadcast %119 : f32 to vector<8x306xf32>
    %123 = arith.mulf %122, %121 : vector<8x306xf32>
    %124 = arith.addf %118, %123 : vector<8x306xf32>
    %c12_17 = arith.constant 12 : index
    %125 = memref.load %arg4[%c12_17] : memref<150xf32, #tpu.memory_space<smem>>
    %126 = vector.extract_strided_slice %95 {offsets = [4, 0, 0], sizes = [1, 8, 306], strides = [1, 1, 1]} : vector<5x8x306xf32> to vector<1x8x306xf32>
    %127 = vector.shape_cast %126 : vector<1x8x306xf32> to vector<8x306xf32>
    %128 = vector.broadcast %125 : f32 to vector<8x306xf32>
    %129 = arith.mulf %128, %127 : vector<8x306xf32>
    %130 = arith.addf %124, %129 : vector<8x306xf32>
    %c1_18 = arith.constant 1 : index
    %131 = memref.load %arg4[%c1_18] : memref<150xf32, #tpu.memory_space<smem>>
    %132 = vector.extract_strided_slice %96 {offsets = [0, 0, 0], sizes = [1, 8, 306], strides = [1, 1, 1]} : vector<5x8x306xf32> to vector<1x8x306xf32>
    %133 = vector.shape_cast %132 : vector<1x8x306xf32> to vector<8x306xf32>
    %134 = vector.broadcast %131 : f32 to vector<8x306xf32>
    %135 = arith.mulf %134, %133 : vector<8x306xf32>
    %136 = arith.addf %130, %135 : vector<8x306xf32>
    %c4_19 = arith.constant 4 : index
    %137 = memref.load %arg4[%c4_19] : memref<150xf32, #tpu.memory_space<smem>>
    %138 = vector.extract_strided_slice %96 {offsets = [1, 0, 0], sizes = [1, 8, 306], strides = [1, 1, 1]} : vector<5x8x306xf32> to vector<1x8x306xf32>
    %139 = vector.shape_cast %138 : vector<1x8x306xf32> to vector<8x306xf32>
    %140 = vector.broadcast %137 : f32 to vector<8x306xf32>
    %141 = arith.mulf %140, %139 : vector<8x306xf32>
    %142 = arith.addf %136, %141 : vector<8x306xf32>
    %c7_20 = arith.constant 7 : index
    %143 = memref.load %arg4[%c7_20] : memref<150xf32, #tpu.memory_space<smem>>
    %144 = vector.extract_strided_slice %96 {offsets = [2, 0, 0], sizes = [1, 8, 306], strides = [1, 1, 1]} : vector<5x8x306xf32> to vector<1x8x306xf32>
    %145 = vector.shape_cast %144 : vector<1x8x306xf32> to vector<8x306xf32>
    %146 = vector.broadcast %143 : f32 to vector<8x306xf32>
    %147 = arith.mulf %146, %145 : vector<8x306xf32>
    %148 = arith.addf %142, %147 : vector<8x306xf32>
    %c10_21 = arith.constant 10 : index
    %149 = memref.load %arg4[%c10_21] : memref<150xf32, #tpu.memory_space<smem>>
    %150 = vector.extract_strided_slice %96 {offsets = [3, 0, 0], sizes = [1, 8, 306], strides = [1, 1, 1]} : vector<5x8x306xf32> to vector<1x8x306xf32>
    %151 = vector.shape_cast %150 : vector<1x8x306xf32> to vector<8x306xf32>
    %152 = vector.broadcast %149 : f32 to vector<8x306xf32>
    %153 = arith.mulf %152, %151 : vector<8x306xf32>
    %154 = arith.addf %148, %153 : vector<8x306xf32>
    %c13_22 = arith.constant 13 : index
    %155 = memref.load %arg4[%c13_22] : memref<150xf32, #tpu.memory_space<smem>>
    %156 = vector.extract_strided_slice %96 {offsets = [4, 0, 0], sizes = [1, 8, 306], strides = [1, 1, 1]} : vector<5x8x306xf32> to vector<1x8x306xf32>
    %157 = vector.shape_cast %156 : vector<1x8x306xf32> to vector<8x306xf32>
    %158 = vector.broadcast %155 : f32 to vector<8x306xf32>
    %159 = arith.mulf %158, %157 : vector<8x306xf32>
    %160 = arith.addf %154, %159 : vector<8x306xf32>
    %c2_23 = arith.constant 2 : index
    %161 = memref.load %arg4[%c2_23] : memref<150xf32, #tpu.memory_space<smem>>
    %162 = vector.extract_strided_slice %97 {offsets = [0, 0, 0], sizes = [1, 8, 306], strides = [1, 1, 1]} : vector<5x8x306xf32> to vector<1x8x306xf32>
    %163 = vector.shape_cast %162 : vector<1x8x306xf32> to vector<8x306xf32>
    %164 = vector.broadcast %161 : f32 to vector<8x306xf32>
    %165 = arith.mulf %164, %163 : vector<8x306xf32>
    %166 = arith.addf %160, %165 : vector<8x306xf32>
    %c5_24 = arith.constant 5 : index
    %167 = memref.load %arg4[%c5_24] : memref<150xf32, #tpu.memory_space<smem>>
    %168 = vector.extract_strided_slice %97 {offsets = [1, 0, 0], sizes = [1, 8, 306], strides = [1, 1, 1]} : vector<5x8x306xf32> to vector<1x8x306xf32>
    %169 = vector.shape_cast %168 : vector<1x8x306xf32> to vector<8x306xf32>
    %170 = vector.broadcast %167 : f32 to vector<8x306xf32>
    %171 = arith.mulf %170, %169 : vector<8x306xf32>
    %172 = arith.addf %166, %171 : vector<8x306xf32>
    %c8_25 = arith.constant 8 : index
    %173 = memref.load %arg4[%c8_25] : memref<150xf32, #tpu.memory_space<smem>>
    %174 = vector.extract_strided_slice %97 {offsets = [2, 0, 0], sizes = [1, 8, 306], strides = [1, 1, 1]} : vector<5x8x306xf32> to vector<1x8x306xf32>
    %175 = vector.shape_cast %174 : vector<1x8x306xf32> to vector<8x306xf32>
    %176 = vector.broadcast %173 : f32 to vector<8x306xf32>
    %177 = arith.mulf %176, %175 : vector<8x306xf32>
    %178 = arith.addf %172, %177 : vector<8x306xf32>
    %c11_26 = arith.constant 11 : index
    %179 = memref.load %arg4[%c11_26] : memref<150xf32, #tpu.memory_space<smem>>
    %180 = vector.extract_strided_slice %97 {offsets = [3, 0, 0], sizes = [1, 8, 306], strides = [1, 1, 1]} : vector<5x8x306xf32> to vector<1x8x306xf32>
    %181 = vector.shape_cast %180 : vector<1x8x306xf32> to vector<8x306xf32>
    %182 = vector.broadcast %179 : f32 to vector<8x306xf32>
    %183 = arith.mulf %182, %181 : vector<8x306xf32>
    %184 = arith.addf %178, %183 : vector<8x306xf32>
    %c14_27 = arith.constant 14 : index
    %185 = memref.load %arg4[%c14_27] : memref<150xf32, #tpu.memory_space<smem>>
    %186 = vector.extract_strided_slice %97 {offsets = [4, 0, 0], sizes = [1, 8, 306], strides = [1, 1, 1]} : vector<5x8x306xf32> to vector<1x8x306xf32>
    %187 = vector.shape_cast %186 : vector<1x8x306xf32> to vector<8x306xf32>
    %188 = vector.broadcast %185 : f32 to vector<8x306xf32>
    %189 = arith.mulf %188, %187 : vector<8x306xf32>
    %190 = arith.addf %184, %189 : vector<8x306xf32>
    %cst_28 = arith.constant 3.000000e-01 : f32
    %191 = vector.broadcast %cst_28 : f32 to vector<8x306xf32>
    %192 = arith.mulf %191, %190 : vector<8x306xf32>
    %193 = arith.maximumf %190, %192 : vector<8x306xf32>
    %c0_29 = arith.constant 0 : index
    %c0_30 = arith.constant 0 : index
    %c0_31 = arith.constant 0 : index
    %194 = vector.load %arg6[%c0_29, %c0_30, %c0_31] : memref<10x306x64xf32, #tpu.memory_space<vmem>>, vector<1x306x64xf32>
    %195 = vector.shape_cast %194 : vector<1x306x64xf32> to vector<306x64xf32>
    %cst_32 = arith.constant dense<0.000000e+00> : vector<8x64xf32>
    %196 = tpu.matmul %193, %195, %cst_32 {dimension_numbers = #tpu.dot_dimension_numbers<[1], [0], [0], [1], [0, 0, 1, 1], [], []>} : vector<8x306xf32>, vector<306x64xf32>, vector<8x64xf32> -> vector<8x64xf32>
    %197 = arith.addf %98, %196 : vector<8x64xf32>
    %c1_33 = arith.constant 1 : index
    %198 = memref.load %arg5[%c1_33] : memref<10xf32, #tpu.memory_space<smem>>
    %c15 = arith.constant 15 : index
    %199 = memref.load %arg4[%c15] : memref<150xf32, #tpu.memory_space<smem>>
    %200 = vector.extract_strided_slice %95 {offsets = [0, 0, 0], sizes = [1, 8, 306], strides = [1, 1, 1]} : vector<5x8x306xf32> to vector<1x8x306xf32>
    %201 = vector.shape_cast %200 : vector<1x8x306xf32> to vector<8x306xf32>
    %202 = vector.broadcast %199 : f32 to vector<8x306xf32>
    %203 = arith.mulf %202, %201 : vector<8x306xf32>
    %204 = vector.broadcast %198 : f32 to vector<8x306xf32>
    %205 = arith.addf %204, %203 : vector<8x306xf32>
    %c18 = arith.constant 18 : index
    %206 = memref.load %arg4[%c18] : memref<150xf32, #tpu.memory_space<smem>>
    %207 = vector.extract_strided_slice %95 {offsets = [1, 0, 0], sizes = [1, 8, 306], strides = [1, 1, 1]} : vector<5x8x306xf32> to vector<1x8x306xf32>
    %208 = vector.shape_cast %207 : vector<1x8x306xf32> to vector<8x306xf32>
    %209 = vector.broadcast %206 : f32 to vector<8x306xf32>
    %210 = arith.mulf %209, %208 : vector<8x306xf32>
    %211 = arith.addf %205, %210 : vector<8x306xf32>
    %c21 = arith.constant 21 : index
    %212 = memref.load %arg4[%c21] : memref<150xf32, #tpu.memory_space<smem>>
    %213 = vector.extract_strided_slice %95 {offsets = [2, 0, 0], sizes = [1, 8, 306], strides = [1, 1, 1]} : vector<5x8x306xf32> to vector<1x8x306xf32>
    %214 = vector.shape_cast %213 : vector<1x8x306xf32> to vector<8x306xf32>
    %215 = vector.broadcast %212 : f32 to vector<8x306xf32>
    %216 = arith.mulf %215, %214 : vector<8x306xf32>
    %217 = arith.addf %211, %216 : vector<8x306xf32>
    %c24 = arith.constant 24 : index
    %218 = memref.load %arg4[%c24] : memref<150xf32, #tpu.memory_space<smem>>
    %219 = vector.extract_strided_slice %95 {offsets = [3, 0, 0], sizes = [1, 8, 306], strides = [1, 1, 1]} : vector<5x8x306xf32> to vector<1x8x306xf32>
    %220 = vector.shape_cast %219 : vector<1x8x306xf32> to vector<8x306xf32>
    %221 = vector.broadcast %218 : f32 to vector<8x306xf32>
    %222 = arith.mulf %221, %220 : vector<8x306xf32>
    %223 = arith.addf %217, %222 : vector<8x306xf32>
    %c27 = arith.constant 27 : index
    %224 = memref.load %arg4[%c27] : memref<150xf32, #tpu.memory_space<smem>>
    %225 = vector.extract_strided_slice %95 {offsets = [4, 0, 0], sizes = [1, 8, 306], strides = [1, 1, 1]} : vector<5x8x306xf32> to vector<1x8x306xf32>
    %226 = vector.shape_cast %225 : vector<1x8x306xf32> to vector<8x306xf32>
    %227 = vector.broadcast %224 : f32 to vector<8x306xf32>
    %228 = arith.mulf %227, %226 : vector<8x306xf32>
    %229 = arith.addf %223, %228 : vector<8x306xf32>
    %c16 = arith.constant 16 : index
    %230 = memref.load %arg4[%c16] : memref<150xf32, #tpu.memory_space<smem>>
    %231 = vector.extract_strided_slice %96 {offsets = [0, 0, 0], sizes = [1, 8, 306], strides = [1, 1, 1]} : vector<5x8x306xf32> to vector<1x8x306xf32>
    %232 = vector.shape_cast %231 : vector<1x8x306xf32> to vector<8x306xf32>
    %233 = vector.broadcast %230 : f32 to vector<8x306xf32>
    %234 = arith.mulf %233, %232 : vector<8x306xf32>
    %235 = arith.addf %229, %234 : vector<8x306xf32>
    %c19 = arith.constant 19 : index
    %236 = memref.load %arg4[%c19] : memref<150xf32, #tpu.memory_space<smem>>
    %237 = vector.extract_strided_slice %96 {offsets = [1, 0, 0], sizes = [1, 8, 306], strides = [1, 1, 1]} : vector<5x8x306xf32> to vector<1x8x306xf32>
    %238 = vector.shape_cast %237 : vector<1x8x306xf32> to vector<8x306xf32>
    %239 = vector.broadcast %236 : f32 to vector<8x306xf32>
    %240 = arith.mulf %239, %238 : vector<8x306xf32>
    %241 = arith.addf %235, %240 : vector<8x306xf32>
    %c22 = arith.constant 22 : index
    %242 = memref.load %arg4[%c22] : memref<150xf32, #tpu.memory_space<smem>>
    %243 = vector.extract_strided_slice %96 {offsets = [2, 0, 0], sizes = [1, 8, 306], strides = [1, 1, 1]} : vector<5x8x306xf32> to vector<1x8x306xf32>
    %244 = vector.shape_cast %243 : vector<1x8x306xf32> to vector<8x306xf32>
    %245 = vector.broadcast %242 : f32 to vector<8x306xf32>
    %246 = arith.mulf %245, %244 : vector<8x306xf32>
    %247 = arith.addf %241, %246 : vector<8x306xf32>
    %c25 = arith.constant 25 : index
    %248 = memref.load %arg4[%c25] : memref<150xf32, #tpu.memory_space<smem>>
    %249 = vector.extract_strided_slice %96 {offsets = [3, 0, 0], sizes = [1, 8, 306], strides = [1, 1, 1]} : vector<5x8x306xf32> to vector<1x8x306xf32>
    %250 = vector.shape_cast %249 : vector<1x8x306xf32> to vector<8x306xf32>
    %251 = vector.broadcast %248 : f32 to vector<8x306xf32>
    %252 = arith.mulf %251, %250 : vector<8x306xf32>
    %253 = arith.addf %247, %252 : vector<8x306xf32>
    %c28 = arith.constant 28 : index
    %254 = memref.load %arg4[%c28] : memref<150xf32, #tpu.memory_space<smem>>
    %255 = vector.extract_strided_slice %96 {offsets = [4, 0, 0], sizes = [1, 8, 306], strides = [1, 1, 1]} : vector<5x8x306xf32> to vector<1x8x306xf32>
    %256 = vector.shape_cast %255 : vector<1x8x306xf32> to vector<8x306xf32>
    %257 = vector.broadcast %254 : f32 to vector<8x306xf32>
    %258 = arith.mulf %257, %256 : vector<8x306xf32>
    %259 = arith.addf %253, %258 : vector<8x306xf32>
    %c17 = arith.constant 17 : index
    %260 = memref.load %arg4[%c17] : memref<150xf32, #tpu.memory_space<smem>>
    %261 = vector.extract_strided_slice %97 {offsets = [0, 0, 0], sizes = [1, 8, 306], strides = [1, 1, 1]} : vector<5x8x306xf32> to vector<1x8x306xf32>
    %262 = vector.shape_cast %261 : vector<1x8x306xf32> to vector<8x306xf32>
    %263 = vector.broadcast %260 : f32 to vector<8x306xf32>
    %264 = arith.mulf %263, %262 : vector<8x306xf32>
    %265 = arith.addf %259, %264 : vector<8x306xf32>
    %c20 = arith.constant 20 : index
    %266 = memref.load %arg4[%c20] : memref<150xf32, #tpu.memory_space<smem>>
    %267 = vector.extract_strided_slice %97 {offsets = [1, 0, 0], sizes = [1, 8, 306], strides = [1, 1, 1]} : vector<5x8x306xf32> to vector<1x8x306xf32>
    %268 = vector.shape_cast %267 : vector<1x8x306xf32> to vector<8x306xf32>
    %269 = vector.broadcast %266 : f32 to vector<8x306xf32>
    %270 = arith.mulf %269, %268 : vector<8x306xf32>
    %271 = arith.addf %265, %270 : vector<8x306xf32>
    %c23 = arith.constant 23 : index
    %272 = memref.load %arg4[%c23] : memref<150xf32, #tpu.memory_space<smem>>
    %273 = vector.extract_strided_slice %97 {offsets = [2, 0, 0], sizes = [1, 8, 306], strides = [1, 1, 1]} : vector<5x8x306xf32> to vector<1x8x306xf32>
    %274 = vector.shape_cast %273 : vector<1x8x306xf32> to vector<8x306xf32>
    %275 = vector.broadcast %272 : f32 to vector<8x306xf32>
    %276 = arith.mulf %275, %274 : vector<8x306xf32>
    %277 = arith.addf %271, %276 : vector<8x306xf32>
    %c26 = arith.constant 26 : index
    %278 = memref.load %arg4[%c26] : memref<150xf32, #tpu.memory_space<smem>>
    %279 = vector.extract_strided_slice %97 {offsets = [3, 0, 0], sizes = [1, 8, 306], strides = [1, 1, 1]} : vector<5x8x306xf32> to vector<1x8x306xf32>
    %280 = vector.shape_cast %279 : vector<1x8x306xf32> to vector<8x306xf32>
    %281 = vector.broadcast %278 : f32 to vector<8x306xf32>
    %282 = arith.mulf %281, %280 : vector<8x306xf32>
    %283 = arith.addf %277, %282 : vector<8x306xf32>
    %c29 = arith.constant 29 : index
    %284 = memref.load %arg4[%c29] : memref<150xf32, #tpu.memory_space<smem>>
    %285 = vector.extract_strided_slice %97 {offsets = [4, 0, 0], sizes = [1, 8, 306], strides = [1, 1, 1]} : vector<5x8x306xf32> to vector<1x8x306xf32>
    %286 = vector.shape_cast %285 : vector<1x8x306xf32> to vector<8x306xf32>
    %287 = vector.broadcast %284 : f32 to vector<8x306xf32>
    %288 = arith.mulf %287, %286 : vector<8x306xf32>
    %289 = arith.addf %283, %288 : vector<8x306xf32>
    %cst_34 = arith.constant 3.000000e-01 : f32
    %290 = vector.broadcast %cst_34 : f32 to vector<8x306xf32>
    %291 = arith.mulf %290, %289 : vector<8x306xf32>
    %292 = arith.maximumf %289, %291 : vector<8x306xf32>
    %c1_35 = arith.constant 1 : index
    %c0_36 = arith.constant 0 : index
    %c0_37 = arith.constant 0 : index
    %293 = vector.load %arg6[%c1_35, %c0_36, %c0_37] : memref<10x306x64xf32, #tpu.memory_space<vmem>>, vector<1x306x64xf32>
    %294 = vector.shape_cast %293 : vector<1x306x64xf32> to vector<306x64xf32>
    %cst_38 = arith.constant dense<0.000000e+00> : vector<8x64xf32>
    %295 = tpu.matmul %292, %294, %cst_38 {dimension_numbers = #tpu.dot_dimension_numbers<[1], [0], [0], [1], [0, 0, 1, 1], [], []>} : vector<8x306xf32>, vector<306x64xf32>, vector<8x64xf32> -> vector<8x64xf32>
    %296 = arith.addf %197, %295 : vector<8x64xf32>
    %c2_39 = arith.constant 2 : index
    %297 = memref.load %arg5[%c2_39] : memref<10xf32, #tpu.memory_space<smem>>
    %c30 = arith.constant 30 : index
    %298 = memref.load %arg4[%c30] : memref<150xf32, #tpu.memory_space<smem>>
    %299 = vector.extract_strided_slice %95 {offsets = [0, 0, 0], sizes = [1, 8, 306], strides = [1, 1, 1]} : vector<5x8x306xf32> to vector<1x8x306xf32>
    %300 = vector.shape_cast %299 : vector<1x8x306xf32> to vector<8x306xf32>
    %301 = vector.broadcast %298 : f32 to vector<8x306xf32>
    %302 = arith.mulf %301, %300 : vector<8x306xf32>
    %303 = vector.broadcast %297 : f32 to vector<8x306xf32>
    %304 = arith.addf %303, %302 : vector<8x306xf32>
    %c33 = arith.constant 33 : index
    %305 = memref.load %arg4[%c33] : memref<150xf32, #tpu.memory_space<smem>>
    %306 = vector.extract_strided_slice %95 {offsets = [1, 0, 0], sizes = [1, 8, 306], strides = [1, 1, 1]} : vector<5x8x306xf32> to vector<1x8x306xf32>
    %307 = vector.shape_cast %306 : vector<1x8x306xf32> to vector<8x306xf32>
    %308 = vector.broadcast %305 : f32 to vector<8x306xf32>
    %309 = arith.mulf %308, %307 : vector<8x306xf32>
    %310 = arith.addf %304, %309 : vector<8x306xf32>
    %c36 = arith.constant 36 : index
    %311 = memref.load %arg4[%c36] : memref<150xf32, #tpu.memory_space<smem>>
    %312 = vector.extract_strided_slice %95 {offsets = [2, 0, 0], sizes = [1, 8, 306], strides = [1, 1, 1]} : vector<5x8x306xf32> to vector<1x8x306xf32>
    %313 = vector.shape_cast %312 : vector<1x8x306xf32> to vector<8x306xf32>
    %314 = vector.broadcast %311 : f32 to vector<8x306xf32>
    %315 = arith.mulf %314, %313 : vector<8x306xf32>
    %316 = arith.addf %310, %315 : vector<8x306xf32>
    %c39 = arith.constant 39 : index
    %317 = memref.load %arg4[%c39] : memref<150xf32, #tpu.memory_space<smem>>
    %318 = vector.extract_strided_slice %95 {offsets = [3, 0, 0], sizes = [1, 8, 306], strides = [1, 1, 1]} : vector<5x8x306xf32> to vector<1x8x306xf32>
    %319 = vector.shape_cast %318 : vector<1x8x306xf32> to vector<8x306xf32>
    %320 = vector.broadcast %317 : f32 to vector<8x306xf32>
    %321 = arith.mulf %320, %319 : vector<8x306xf32>
    %322 = arith.addf %316, %321 : vector<8x306xf32>
    %c42 = arith.constant 42 : index
    %323 = memref.load %arg4[%c42] : memref<150xf32, #tpu.memory_space<smem>>
    %324 = vector.extract_strided_slice %95 {offsets = [4, 0, 0], sizes = [1, 8, 306], strides = [1, 1, 1]} : vector<5x8x306xf32> to vector<1x8x306xf32>
    %325 = vector.shape_cast %324 : vector<1x8x306xf32> to vector<8x306xf32>
    %326 = vector.broadcast %323 : f32 to vector<8x306xf32>
    %327 = arith.mulf %326, %325 : vector<8x306xf32>
    %328 = arith.addf %322, %327 : vector<8x306xf32>
    %c31 = arith.constant 31 : index
    %329 = memref.load %arg4[%c31] : memref<150xf32, #tpu.memory_space<smem>>
    %330 = vector.extract_strided_slice %96 {offsets = [0, 0, 0], sizes = [1, 8, 306], strides = [1, 1, 1]} : vector<5x8x306xf32> to vector<1x8x306xf32>
    %331 = vector.shape_cast %330 : vector<1x8x306xf32> to vector<8x306xf32>
    %332 = vector.broadcast %329 : f32 to vector<8x306xf32>
    %333 = arith.mulf %332, %331 : vector<8x306xf32>
    %334 = arith.addf %328, %333 : vector<8x306xf32>
    %c34 = arith.constant 34 : index
    %335 = memref.load %arg4[%c34] : memref<150xf32, #tpu.memory_space<smem>>
    %336 = vector.extract_strided_slice %96 {offsets = [1, 0, 0], sizes = [1, 8, 306], strides = [1, 1, 1]} : vector<5x8x306xf32> to vector<1x8x306xf32>
    %337 = vector.shape_cast %336 : vector<1x8x306xf32> to vector<8x306xf32>
    %338 = vector.broadcast %335 : f32 to vector<8x306xf32>
    %339 = arith.mulf %338, %337 : vector<8x306xf32>
    %340 = arith.addf %334, %339 : vector<8x306xf32>
    %c37 = arith.constant 37 : index
    %341 = memref.load %arg4[%c37] : memref<150xf32, #tpu.memory_space<smem>>
    %342 = vector.extract_strided_slice %96 {offsets = [2, 0, 0], sizes = [1, 8, 306], strides = [1, 1, 1]} : vector<5x8x306xf32> to vector<1x8x306xf32>
    %343 = vector.shape_cast %342 : vector<1x8x306xf32> to vector<8x306xf32>
    %344 = vector.broadcast %341 : f32 to vector<8x306xf32>
    %345 = arith.mulf %344, %343 : vector<8x306xf32>
    %346 = arith.addf %340, %345 : vector<8x306xf32>
    %c40 = arith.constant 40 : index
    %347 = memref.load %arg4[%c40] : memref<150xf32, #tpu.memory_space<smem>>
    %348 = vector.extract_strided_slice %96 {offsets = [3, 0, 0], sizes = [1, 8, 306], strides = [1, 1, 1]} : vector<5x8x306xf32> to vector<1x8x306xf32>
    %349 = vector.shape_cast %348 : vector<1x8x306xf32> to vector<8x306xf32>
    %350 = vector.broadcast %347 : f32 to vector<8x306xf32>
    %351 = arith.mulf %350, %349 : vector<8x306xf32>
    %352 = arith.addf %346, %351 : vector<8x306xf32>
    %c43 = arith.constant 43 : index
    %353 = memref.load %arg4[%c43] : memref<150xf32, #tpu.memory_space<smem>>
    %354 = vector.extract_strided_slice %96 {offsets = [4, 0, 0], sizes = [1, 8, 306], strides = [1, 1, 1]} : vector<5x8x306xf32> to vector<1x8x306xf32>
    %355 = vector.shape_cast %354 : vector<1x8x306xf32> to vector<8x306xf32>
    %356 = vector.broadcast %353 : f32 to vector<8x306xf32>
    %357 = arith.mulf %356, %355 : vector<8x306xf32>
    %358 = arith.addf %352, %357 : vector<8x306xf32>
    %c32 = arith.constant 32 : index
    %359 = memref.load %arg4[%c32] : memref<150xf32, #tpu.memory_space<smem>>
    %360 = vector.extract_strided_slice %97 {offsets = [0, 0, 0], sizes = [1, 8, 306], strides = [1, 1, 1]} : vector<5x8x306xf32> to vector<1x8x306xf32>
    %361 = vector.shape_cast %360 : vector<1x8x306xf32> to vector<8x306xf32>
    %362 = vector.broadcast %359 : f32 to vector<8x306xf32>
    %363 = arith.mulf %362, %361 : vector<8x306xf32>
    %364 = arith.addf %358, %363 : vector<8x306xf32>
    %c35 = arith.constant 35 : index
    %365 = memref.load %arg4[%c35] : memref<150xf32, #tpu.memory_space<smem>>
    %366 = vector.extract_strided_slice %97 {offsets = [1, 0, 0], sizes = [1, 8, 306], strides = [1, 1, 1]} : vector<5x8x306xf32> to vector<1x8x306xf32>
    %367 = vector.shape_cast %366 : vector<1x8x306xf32> to vector<8x306xf32>
    %368 = vector.broadcast %365 : f32 to vector<8x306xf32>
    %369 = arith.mulf %368, %367 : vector<8x306xf32>
    %370 = arith.addf %364, %369 : vector<8x306xf32>
    %c38 = arith.constant 38 : index
    %371 = memref.load %arg4[%c38] : memref<150xf32, #tpu.memory_space<smem>>
    %372 = vector.extract_strided_slice %97 {offsets = [2, 0, 0], sizes = [1, 8, 306], strides = [1, 1, 1]} : vector<5x8x306xf32> to vector<1x8x306xf32>
    %373 = vector.shape_cast %372 : vector<1x8x306xf32> to vector<8x306xf32>
    %374 = vector.broadcast %371 : f32 to vector<8x306xf32>
    %375 = arith.mulf %374, %373 : vector<8x306xf32>
    %376 = arith.addf %370, %375 : vector<8x306xf32>
    %c41 = arith.constant 41 : index
    %377 = memref.load %arg4[%c41] : memref<150xf32, #tpu.memory_space<smem>>
    %378 = vector.extract_strided_slice %97 {offsets = [3, 0, 0], sizes = [1, 8, 306], strides = [1, 1, 1]} : vector<5x8x306xf32> to vector<1x8x306xf32>
    %379 = vector.shape_cast %378 : vector<1x8x306xf32> to vector<8x306xf32>
    %380 = vector.broadcast %377 : f32 to vector<8x306xf32>
    %381 = arith.mulf %380, %379 : vector<8x306xf32>
    %382 = arith.addf %376, %381 : vector<8x306xf32>
    %c44 = arith.constant 44 : index
    %383 = memref.load %arg4[%c44] : memref<150xf32, #tpu.memory_space<smem>>
    %384 = vector.extract_strided_slice %97 {offsets = [4, 0, 0], sizes = [1, 8, 306], strides = [1, 1, 1]} : vector<5x8x306xf32> to vector<1x8x306xf32>
    %385 = vector.shape_cast %384 : vector<1x8x306xf32> to vector<8x306xf32>
    %386 = vector.broadcast %383 : f32 to vector<8x306xf32>
    %387 = arith.mulf %386, %385 : vector<8x306xf32>
    %388 = arith.addf %382, %387 : vector<8x306xf32>
    %cst_40 = arith.constant 3.000000e-01 : f32
    %389 = vector.broadcast %cst_40 : f32 to vector<8x306xf32>
    %390 = arith.mulf %389, %388 : vector<8x306xf32>
    %391 = arith.maximumf %388, %390 : vector<8x306xf32>
    %c2_41 = arith.constant 2 : index
    %c0_42 = arith.constant 0 : index
    %c0_43 = arith.constant 0 : index
    %392 = vector.load %arg6[%c2_41, %c0_42, %c0_43] : memref<10x306x64xf32, #tpu.memory_space<vmem>>, vector<1x306x64xf32>
    %393 = vector.shape_cast %392 : vector<1x306x64xf32> to vector<306x64xf32>
    %cst_44 = arith.constant dense<0.000000e+00> : vector<8x64xf32>
    %394 = tpu.matmul %391, %393, %cst_44 {dimension_numbers = #tpu.dot_dimension_numbers<[1], [0], [0], [1], [0, 0, 1, 1], [], []>} : vector<8x306xf32>, vector<306x64xf32>, vector<8x64xf32> -> vector<8x64xf32>
    %395 = arith.addf %296, %394 : vector<8x64xf32>
    %c3_45 = arith.constant 3 : index
    %396 = memref.load %arg5[%c3_45] : memref<10xf32, #tpu.memory_space<smem>>
    %c45 = arith.constant 45 : index
    %397 = memref.load %arg4[%c45] : memref<150xf32, #tpu.memory_space<smem>>
    %398 = vector.extract_strided_slice %95 {offsets = [0, 0, 0], sizes = [1, 8, 306], strides = [1, 1, 1]} : vector<5x8x306xf32> to vector<1x8x306xf32>
    %399 = vector.shape_cast %398 : vector<1x8x306xf32> to vector<8x306xf32>
    %400 = vector.broadcast %397 : f32 to vector<8x306xf32>
    %401 = arith.mulf %400, %399 : vector<8x306xf32>
    %402 = vector.broadcast %396 : f32 to vector<8x306xf32>
    %403 = arith.addf %402, %401 : vector<8x306xf32>
    %c48 = arith.constant 48 : index
    %404 = memref.load %arg4[%c48] : memref<150xf32, #tpu.memory_space<smem>>
    %405 = vector.extract_strided_slice %95 {offsets = [1, 0, 0], sizes = [1, 8, 306], strides = [1, 1, 1]} : vector<5x8x306xf32> to vector<1x8x306xf32>
    %406 = vector.shape_cast %405 : vector<1x8x306xf32> to vector<8x306xf32>
    %407 = vector.broadcast %404 : f32 to vector<8x306xf32>
    %408 = arith.mulf %407, %406 : vector<8x306xf32>
    %409 = arith.addf %403, %408 : vector<8x306xf32>
    %c51 = arith.constant 51 : index
    %410 = memref.load %arg4[%c51] : memref<150xf32, #tpu.memory_space<smem>>
    %411 = vector.extract_strided_slice %95 {offsets = [2, 0, 0], sizes = [1, 8, 306], strides = [1, 1, 1]} : vector<5x8x306xf32> to vector<1x8x306xf32>
    %412 = vector.shape_cast %411 : vector<1x8x306xf32> to vector<8x306xf32>
    %413 = vector.broadcast %410 : f32 to vector<8x306xf32>
    %414 = arith.mulf %413, %412 : vector<8x306xf32>
    %415 = arith.addf %409, %414 : vector<8x306xf32>
    %c54 = arith.constant 54 : index
    %416 = memref.load %arg4[%c54] : memref<150xf32, #tpu.memory_space<smem>>
    %417 = vector.extract_strided_slice %95 {offsets = [3, 0, 0], sizes = [1, 8, 306], strides = [1, 1, 1]} : vector<5x8x306xf32> to vector<1x8x306xf32>
    %418 = vector.shape_cast %417 : vector<1x8x306xf32> to vector<8x306xf32>
    %419 = vector.broadcast %416 : f32 to vector<8x306xf32>
    %420 = arith.mulf %419, %418 : vector<8x306xf32>
    %421 = arith.addf %415, %420 : vector<8x306xf32>
    %c57 = arith.constant 57 : index
    %422 = memref.load %arg4[%c57] : memref<150xf32, #tpu.memory_space<smem>>
    %423 = vector.extract_strided_slice %95 {offsets = [4, 0, 0], sizes = [1, 8, 306], strides = [1, 1, 1]} : vector<5x8x306xf32> to vector<1x8x306xf32>
    %424 = vector.shape_cast %423 : vector<1x8x306xf32> to vector<8x306xf32>
    %425 = vector.broadcast %422 : f32 to vector<8x306xf32>
    %426 = arith.mulf %425, %424 : vector<8x306xf32>
    %427 = arith.addf %421, %426 : vector<8x306xf32>
    %c46 = arith.constant 46 : index
    %428 = memref.load %arg4[%c46] : memref<150xf32, #tpu.memory_space<smem>>
    %429 = vector.extract_strided_slice %96 {offsets = [0, 0, 0], sizes = [1, 8, 306], strides = [1, 1, 1]} : vector<5x8x306xf32> to vector<1x8x306xf32>
    %430 = vector.shape_cast %429 : vector<1x8x306xf32> to vector<8x306xf32>
    %431 = vector.broadcast %428 : f32 to vector<8x306xf32>
    %432 = arith.mulf %431, %430 : vector<8x306xf32>
    %433 = arith.addf %427, %432 : vector<8x306xf32>
    %c49 = arith.constant 49 : index
    %434 = memref.load %arg4[%c49] : memref<150xf32, #tpu.memory_space<smem>>
    %435 = vector.extract_strided_slice %96 {offsets = [1, 0, 0], sizes = [1, 8, 306], strides = [1, 1, 1]} : vector<5x8x306xf32> to vector<1x8x306xf32>
    %436 = vector.shape_cast %435 : vector<1x8x306xf32> to vector<8x306xf32>
    %437 = vector.broadcast %434 : f32 to vector<8x306xf32>
    %438 = arith.mulf %437, %436 : vector<8x306xf32>
    %439 = arith.addf %433, %438 : vector<8x306xf32>
    %c52 = arith.constant 52 : index
    %440 = memref.load %arg4[%c52] : memref<150xf32, #tpu.memory_space<smem>>
    %441 = vector.extract_strided_slice %96 {offsets = [2, 0, 0], sizes = [1, 8, 306], strides = [1, 1, 1]} : vector<5x8x306xf32> to vector<1x8x306xf32>
    %442 = vector.shape_cast %441 : vector<1x8x306xf32> to vector<8x306xf32>
    %443 = vector.broadcast %440 : f32 to vector<8x306xf32>
    %444 = arith.mulf %443, %442 : vector<8x306xf32>
    %445 = arith.addf %439, %444 : vector<8x306xf32>
    %c55 = arith.constant 55 : index
    %446 = memref.load %arg4[%c55] : memref<150xf32, #tpu.memory_space<smem>>
    %447 = vector.extract_strided_slice %96 {offsets = [3, 0, 0], sizes = [1, 8, 306], strides = [1, 1, 1]} : vector<5x8x306xf32> to vector<1x8x306xf32>
    %448 = vector.shape_cast %447 : vector<1x8x306xf32> to vector<8x306xf32>
    %449 = vector.broadcast %446 : f32 to vector<8x306xf32>
    %450 = arith.mulf %449, %448 : vector<8x306xf32>
    %451 = arith.addf %445, %450 : vector<8x306xf32>
    %c58 = arith.constant 58 : index
    %452 = memref.load %arg4[%c58] : memref<150xf32, #tpu.memory_space<smem>>
    %453 = vector.extract_strided_slice %96 {offsets = [4, 0, 0], sizes = [1, 8, 306], strides = [1, 1, 1]} : vector<5x8x306xf32> to vector<1x8x306xf32>
    %454 = vector.shape_cast %453 : vector<1x8x306xf32> to vector<8x306xf32>
    %455 = vector.broadcast %452 : f32 to vector<8x306xf32>
    %456 = arith.mulf %455, %454 : vector<8x306xf32>
    %457 = arith.addf %451, %456 : vector<8x306xf32>
    %c47 = arith.constant 47 : index
    %458 = memref.load %arg4[%c47] : memref<150xf32, #tpu.memory_space<smem>>
    %459 = vector.extract_strided_slice %97 {offsets = [0, 0, 0], sizes = [1, 8, 306], strides = [1, 1, 1]} : vector<5x8x306xf32> to vector<1x8x306xf32>
    %460 = vector.shape_cast %459 : vector<1x8x306xf32> to vector<8x306xf32>
    %461 = vector.broadcast %458 : f32 to vector<8x306xf32>
    %462 = arith.mulf %461, %460 : vector<8x306xf32>
    %463 = arith.addf %457, %462 : vector<8x306xf32>
    %c50 = arith.constant 50 : index
    %464 = memref.load %arg4[%c50] : memref<150xf32, #tpu.memory_space<smem>>
    %465 = vector.extract_strided_slice %97 {offsets = [1, 0, 0], sizes = [1, 8, 306], strides = [1, 1, 1]} : vector<5x8x306xf32> to vector<1x8x306xf32>
    %466 = vector.shape_cast %465 : vector<1x8x306xf32> to vector<8x306xf32>
    %467 = vector.broadcast %464 : f32 to vector<8x306xf32>
    %468 = arith.mulf %467, %466 : vector<8x306xf32>
    %469 = arith.addf %463, %468 : vector<8x306xf32>
    %c53 = arith.constant 53 : index
    %470 = memref.load %arg4[%c53] : memref<150xf32, #tpu.memory_space<smem>>
    %471 = vector.extract_strided_slice %97 {offsets = [2, 0, 0], sizes = [1, 8, 306], strides = [1, 1, 1]} : vector<5x8x306xf32> to vector<1x8x306xf32>
    %472 = vector.shape_cast %471 : vector<1x8x306xf32> to vector<8x306xf32>
    %473 = vector.broadcast %470 : f32 to vector<8x306xf32>
    %474 = arith.mulf %473, %472 : vector<8x306xf32>
    %475 = arith.addf %469, %474 : vector<8x306xf32>
    %c56 = arith.constant 56 : index
    %476 = memref.load %arg4[%c56] : memref<150xf32, #tpu.memory_space<smem>>
    %477 = vector.extract_strided_slice %97 {offsets = [3, 0, 0], sizes = [1, 8, 306], strides = [1, 1, 1]} : vector<5x8x306xf32> to vector<1x8x306xf32>
    %478 = vector.shape_cast %477 : vector<1x8x306xf32> to vector<8x306xf32>
    %479 = vector.broadcast %476 : f32 to vector<8x306xf32>
    %480 = arith.mulf %479, %478 : vector<8x306xf32>
    %481 = arith.addf %475, %480 : vector<8x306xf32>
    %c59 = arith.constant 59 : index
    %482 = memref.load %arg4[%c59] : memref<150xf32, #tpu.memory_space<smem>>
    %483 = vector.extract_strided_slice %97 {offsets = [4, 0, 0], sizes = [1, 8, 306], strides = [1, 1, 1]} : vector<5x8x306xf32> to vector<1x8x306xf32>
    %484 = vector.shape_cast %483 : vector<1x8x306xf32> to vector<8x306xf32>
    %485 = vector.broadcast %482 : f32 to vector<8x306xf32>
    %486 = arith.mulf %485, %484 : vector<8x306xf32>
    %487 = arith.addf %481, %486 : vector<8x306xf32>
    %cst_46 = arith.constant 3.000000e-01 : f32
    %488 = vector.broadcast %cst_46 : f32 to vector<8x306xf32>
    %489 = arith.mulf %488, %487 : vector<8x306xf32>
    %490 = arith.maximumf %487, %489 : vector<8x306xf32>
    %c3_47 = arith.constant 3 : index
    %c0_48 = arith.constant 0 : index
    %c0_49 = arith.constant 0 : index
    %491 = vector.load %arg6[%c3_47, %c0_48, %c0_49] : memref<10x306x64xf32, #tpu.memory_space<vmem>>, vector<1x306x64xf32>
    %492 = vector.shape_cast %491 : vector<1x306x64xf32> to vector<306x64xf32>
    %cst_50 = arith.constant dense<0.000000e+00> : vector<8x64xf32>
    %493 = tpu.matmul %490, %492, %cst_50 {dimension_numbers = #tpu.dot_dimension_numbers<[1], [0], [0], [1], [0, 0, 1, 1], [], []>} : vector<8x306xf32>, vector<306x64xf32>, vector<8x64xf32> -> vector<8x64xf32>
    %494 = arith.addf %395, %493 : vector<8x64xf32>
    %c4_51 = arith.constant 4 : index
    %495 = memref.load %arg5[%c4_51] : memref<10xf32, #tpu.memory_space<smem>>
    %c60 = arith.constant 60 : index
    %496 = memref.load %arg4[%c60] : memref<150xf32, #tpu.memory_space<smem>>
    %497 = vector.extract_strided_slice %95 {offsets = [0, 0, 0], sizes = [1, 8, 306], strides = [1, 1, 1]} : vector<5x8x306xf32> to vector<1x8x306xf32>
    %498 = vector.shape_cast %497 : vector<1x8x306xf32> to vector<8x306xf32>
    %499 = vector.broadcast %496 : f32 to vector<8x306xf32>
    %500 = arith.mulf %499, %498 : vector<8x306xf32>
    %501 = vector.broadcast %495 : f32 to vector<8x306xf32>
    %502 = arith.addf %501, %500 : vector<8x306xf32>
    %c63 = arith.constant 63 : index
    %503 = memref.load %arg4[%c63] : memref<150xf32, #tpu.memory_space<smem>>
    %504 = vector.extract_strided_slice %95 {offsets = [1, 0, 0], sizes = [1, 8, 306], strides = [1, 1, 1]} : vector<5x8x306xf32> to vector<1x8x306xf32>
    %505 = vector.shape_cast %504 : vector<1x8x306xf32> to vector<8x306xf32>
    %506 = vector.broadcast %503 : f32 to vector<8x306xf32>
    %507 = arith.mulf %506, %505 : vector<8x306xf32>
    %508 = arith.addf %502, %507 : vector<8x306xf32>
    %c66 = arith.constant 66 : index
    %509 = memref.load %arg4[%c66] : memref<150xf32, #tpu.memory_space<smem>>
    %510 = vector.extract_strided_slice %95 {offsets = [2, 0, 0], sizes = [1, 8, 306], strides = [1, 1, 1]} : vector<5x8x306xf32> to vector<1x8x306xf32>
    %511 = vector.shape_cast %510 : vector<1x8x306xf32> to vector<8x306xf32>
    %512 = vector.broadcast %509 : f32 to vector<8x306xf32>
    %513 = arith.mulf %512, %511 : vector<8x306xf32>
    %514 = arith.addf %508, %513 : vector<8x306xf32>
    %c69 = arith.constant 69 : index
    %515 = memref.load %arg4[%c69] : memref<150xf32, #tpu.memory_space<smem>>
    %516 = vector.extract_strided_slice %95 {offsets = [3, 0, 0], sizes = [1, 8, 306], strides = [1, 1, 1]} : vector<5x8x306xf32> to vector<1x8x306xf32>
    %517 = vector.shape_cast %516 : vector<1x8x306xf32> to vector<8x306xf32>
    %518 = vector.broadcast %515 : f32 to vector<8x306xf32>
    %519 = arith.mulf %518, %517 : vector<8x306xf32>
    %520 = arith.addf %514, %519 : vector<8x306xf32>
    %c72 = arith.constant 72 : index
    %521 = memref.load %arg4[%c72] : memref<150xf32, #tpu.memory_space<smem>>
    %522 = vector.extract_strided_slice %95 {offsets = [4, 0, 0], sizes = [1, 8, 306], strides = [1, 1, 1]} : vector<5x8x306xf32> to vector<1x8x306xf32>
    %523 = vector.shape_cast %522 : vector<1x8x306xf32> to vector<8x306xf32>
    %524 = vector.broadcast %521 : f32 to vector<8x306xf32>
    %525 = arith.mulf %524, %523 : vector<8x306xf32>
    %526 = arith.addf %520, %525 : vector<8x306xf32>
    %c61 = arith.constant 61 : index
    %527 = memref.load %arg4[%c61] : memref<150xf32, #tpu.memory_space<smem>>
    %528 = vector.extract_strided_slice %96 {offsets = [0, 0, 0], sizes = [1, 8, 306], strides = [1, 1, 1]} : vector<5x8x306xf32> to vector<1x8x306xf32>
    %529 = vector.shape_cast %528 : vector<1x8x306xf32> to vector<8x306xf32>
    %530 = vector.broadcast %527 : f32 to vector<8x306xf32>
    %531 = arith.mulf %530, %529 : vector<8x306xf32>
    %532 = arith.addf %526, %531 : vector<8x306xf32>
    %c64 = arith.constant 64 : index
    %533 = memref.load %arg4[%c64] : memref<150xf32, #tpu.memory_space<smem>>
    %534 = vector.extract_strided_slice %96 {offsets = [1, 0, 0], sizes = [1, 8, 306], strides = [1, 1, 1]} : vector<5x8x306xf32> to vector<1x8x306xf32>
    %535 = vector.shape_cast %534 : vector<1x8x306xf32> to vector<8x306xf32>
    %536 = vector.broadcast %533 : f32 to vector<8x306xf32>
    %537 = arith.mulf %536, %535 : vector<8x306xf32>
    %538 = arith.addf %532, %537 : vector<8x306xf32>
    %c67 = arith.constant 67 : index
    %539 = memref.load %arg4[%c67] : memref<150xf32, #tpu.memory_space<smem>>
    %540 = vector.extract_strided_slice %96 {offsets = [2, 0, 0], sizes = [1, 8, 306], strides = [1, 1, 1]} : vector<5x8x306xf32> to vector<1x8x306xf32>
    %541 = vector.shape_cast %540 : vector<1x8x306xf32> to vector<8x306xf32>
    %542 = vector.broadcast %539 : f32 to vector<8x306xf32>
    %543 = arith.mulf %542, %541 : vector<8x306xf32>
    %544 = arith.addf %538, %543 : vector<8x306xf32>
    %c70 = arith.constant 70 : index
    %545 = memref.load %arg4[%c70] : memref<150xf32, #tpu.memory_space<smem>>
    %546 = vector.extract_strided_slice %96 {offsets = [3, 0, 0], sizes = [1, 8, 306], strides = [1, 1, 1]} : vector<5x8x306xf32> to vector<1x8x306xf32>
    %547 = vector.shape_cast %546 : vector<1x8x306xf32> to vector<8x306xf32>
    %548 = vector.broadcast %545 : f32 to vector<8x306xf32>
    %549 = arith.mulf %548, %547 : vector<8x306xf32>
    %550 = arith.addf %544, %549 : vector<8x306xf32>
    %c73 = arith.constant 73 : index
    %551 = memref.load %arg4[%c73] : memref<150xf32, #tpu.memory_space<smem>>
    %552 = vector.extract_strided_slice %96 {offsets = [4, 0, 0], sizes = [1, 8, 306], strides = [1, 1, 1]} : vector<5x8x306xf32> to vector<1x8x306xf32>
    %553 = vector.shape_cast %552 : vector<1x8x306xf32> to vector<8x306xf32>
    %554 = vector.broadcast %551 : f32 to vector<8x306xf32>
    %555 = arith.mulf %554, %553 : vector<8x306xf32>
    %556 = arith.addf %550, %555 : vector<8x306xf32>
    %c62 = arith.constant 62 : index
    %557 = memref.load %arg4[%c62] : memref<150xf32, #tpu.memory_space<smem>>
    %558 = vector.extract_strided_slice %97 {offsets = [0, 0, 0], sizes = [1, 8, 306], strides = [1, 1, 1]} : vector<5x8x306xf32> to vector<1x8x306xf32>
    %559 = vector.shape_cast %558 : vector<1x8x306xf32> to vector<8x306xf32>
    %560 = vector.broadcast %557 : f32 to vector<8x306xf32>
    %561 = arith.mulf %560, %559 : vector<8x306xf32>
    %562 = arith.addf %556, %561 : vector<8x306xf32>
    %c65 = arith.constant 65 : index
    %563 = memref.load %arg4[%c65] : memref<150xf32, #tpu.memory_space<smem>>
    %564 = vector.extract_strided_slice %97 {offsets = [1, 0, 0], sizes = [1, 8, 306], strides = [1, 1, 1]} : vector<5x8x306xf32> to vector<1x8x306xf32>
    %565 = vector.shape_cast %564 : vector<1x8x306xf32> to vector<8x306xf32>
    %566 = vector.broadcast %563 : f32 to vector<8x306xf32>
    %567 = arith.mulf %566, %565 : vector<8x306xf32>
    %568 = arith.addf %562, %567 : vector<8x306xf32>
    %c68 = arith.constant 68 : index
    %569 = memref.load %arg4[%c68] : memref<150xf32, #tpu.memory_space<smem>>
    %570 = vector.extract_strided_slice %97 {offsets = [2, 0, 0], sizes = [1, 8, 306], strides = [1, 1, 1]} : vector<5x8x306xf32> to vector<1x8x306xf32>
    %571 = vector.shape_cast %570 : vector<1x8x306xf32> to vector<8x306xf32>
    %572 = vector.broadcast %569 : f32 to vector<8x306xf32>
    %573 = arith.mulf %572, %571 : vector<8x306xf32>
    %574 = arith.addf %568, %573 : vector<8x306xf32>
    %c71 = arith.constant 71 : index
    %575 = memref.load %arg4[%c71] : memref<150xf32, #tpu.memory_space<smem>>
    %576 = vector.extract_strided_slice %97 {offsets = [3, 0, 0], sizes = [1, 8, 306], strides = [1, 1, 1]} : vector<5x8x306xf32> to vector<1x8x306xf32>
    %577 = vector.shape_cast %576 : vector<1x8x306xf32> to vector<8x306xf32>
    %578 = vector.broadcast %575 : f32 to vector<8x306xf32>
    %579 = arith.mulf %578, %577 : vector<8x306xf32>
    %580 = arith.addf %574, %579 : vector<8x306xf32>
    %c74 = arith.constant 74 : index
    %581 = memref.load %arg4[%c74] : memref<150xf32, #tpu.memory_space<smem>>
    %582 = vector.extract_strided_slice %97 {offsets = [4, 0, 0], sizes = [1, 8, 306], strides = [1, 1, 1]} : vector<5x8x306xf32> to vector<1x8x306xf32>
    %583 = vector.shape_cast %582 : vector<1x8x306xf32> to vector<8x306xf32>
    %584 = vector.broadcast %581 : f32 to vector<8x306xf32>
    %585 = arith.mulf %584, %583 : vector<8x306xf32>
    %586 = arith.addf %580, %585 : vector<8x306xf32>
    %cst_52 = arith.constant 3.000000e-01 : f32
    %587 = vector.broadcast %cst_52 : f32 to vector<8x306xf32>
    %588 = arith.mulf %587, %586 : vector<8x306xf32>
    %589 = arith.maximumf %586, %588 : vector<8x306xf32>
    %c4_53 = arith.constant 4 : index
    %c0_54 = arith.constant 0 : index
    %c0_55 = arith.constant 0 : index
    %590 = vector.load %arg6[%c4_53, %c0_54, %c0_55] : memref<10x306x64xf32, #tpu.memory_space<vmem>>, vector<1x306x64xf32>
    %591 = vector.shape_cast %590 : vector<1x306x64xf32> to vector<306x64xf32>
    %cst_56 = arith.constant dense<0.000000e+00> : vector<8x64xf32>
    %592 = tpu.matmul %589, %591, %cst_56 {dimension_numbers = #tpu.dot_dimension_numbers<[1], [0], [0], [1], [0, 0, 1, 1], [], []>} : vector<8x306xf32>, vector<306x64xf32>, vector<8x64xf32> -> vector<8x64xf32>
    %593 = arith.addf %494, %592 : vector<8x64xf32>
    %c5_57 = arith.constant 5 : index
    %594 = memref.load %arg5[%c5_57] : memref<10xf32, #tpu.memory_space<smem>>
    %c75 = arith.constant 75 : index
    %595 = memref.load %arg4[%c75] : memref<150xf32, #tpu.memory_space<smem>>
    %596 = vector.extract_strided_slice %95 {offsets = [0, 0, 0], sizes = [1, 8, 306], strides = [1, 1, 1]} : vector<5x8x306xf32> to vector<1x8x306xf32>
    %597 = vector.shape_cast %596 : vector<1x8x306xf32> to vector<8x306xf32>
    %598 = vector.broadcast %595 : f32 to vector<8x306xf32>
    %599 = arith.mulf %598, %597 : vector<8x306xf32>
    %600 = vector.broadcast %594 : f32 to vector<8x306xf32>
    %601 = arith.addf %600, %599 : vector<8x306xf32>
    %c78 = arith.constant 78 : index
    %602 = memref.load %arg4[%c78] : memref<150xf32, #tpu.memory_space<smem>>
    %603 = vector.extract_strided_slice %95 {offsets = [1, 0, 0], sizes = [1, 8, 306], strides = [1, 1, 1]} : vector<5x8x306xf32> to vector<1x8x306xf32>
    %604 = vector.shape_cast %603 : vector<1x8x306xf32> to vector<8x306xf32>
    %605 = vector.broadcast %602 : f32 to vector<8x306xf32>
    %606 = arith.mulf %605, %604 : vector<8x306xf32>
    %607 = arith.addf %601, %606 : vector<8x306xf32>
    %c81 = arith.constant 81 : index
    %608 = memref.load %arg4[%c81] : memref<150xf32, #tpu.memory_space<smem>>
    %609 = vector.extract_strided_slice %95 {offsets = [2, 0, 0], sizes = [1, 8, 306], strides = [1, 1, 1]} : vector<5x8x306xf32> to vector<1x8x306xf32>
    %610 = vector.shape_cast %609 : vector<1x8x306xf32> to vector<8x306xf32>
    %611 = vector.broadcast %608 : f32 to vector<8x306xf32>
    %612 = arith.mulf %611, %610 : vector<8x306xf32>
    %613 = arith.addf %607, %612 : vector<8x306xf32>
    %c84 = arith.constant 84 : index
    %614 = memref.load %arg4[%c84] : memref<150xf32, #tpu.memory_space<smem>>
    %615 = vector.extract_strided_slice %95 {offsets = [3, 0, 0], sizes = [1, 8, 306], strides = [1, 1, 1]} : vector<5x8x306xf32> to vector<1x8x306xf32>
    %616 = vector.shape_cast %615 : vector<1x8x306xf32> to vector<8x306xf32>
    %617 = vector.broadcast %614 : f32 to vector<8x306xf32>
    %618 = arith.mulf %617, %616 : vector<8x306xf32>
    %619 = arith.addf %613, %618 : vector<8x306xf32>
    %c87 = arith.constant 87 : index
    %620 = memref.load %arg4[%c87] : memref<150xf32, #tpu.memory_space<smem>>
    %621 = vector.extract_strided_slice %95 {offsets = [4, 0, 0], sizes = [1, 8, 306], strides = [1, 1, 1]} : vector<5x8x306xf32> to vector<1x8x306xf32>
    %622 = vector.shape_cast %621 : vector<1x8x306xf32> to vector<8x306xf32>
    %623 = vector.broadcast %620 : f32 to vector<8x306xf32>
    %624 = arith.mulf %623, %622 : vector<8x306xf32>
    %625 = arith.addf %619, %624 : vector<8x306xf32>
    %c76 = arith.constant 76 : index
    %626 = memref.load %arg4[%c76] : memref<150xf32, #tpu.memory_space<smem>>
    %627 = vector.extract_strided_slice %96 {offsets = [0, 0, 0], sizes = [1, 8, 306], strides = [1, 1, 1]} : vector<5x8x306xf32> to vector<1x8x306xf32>
    %628 = vector.shape_cast %627 : vector<1x8x306xf32> to vector<8x306xf32>
    %629 = vector.broadcast %626 : f32 to vector<8x306xf32>
    %630 = arith.mulf %629, %628 : vector<8x306xf32>
    %631 = arith.addf %625, %630 : vector<8x306xf32>
    %c79 = arith.constant 79 : index
    %632 = memref.load %arg4[%c79] : memref<150xf32, #tpu.memory_space<smem>>
    %633 = vector.extract_strided_slice %96 {offsets = [1, 0, 0], sizes = [1, 8, 306], strides = [1, 1, 1]} : vector<5x8x306xf32> to vector<1x8x306xf32>
    %634 = vector.shape_cast %633 : vector<1x8x306xf32> to vector<8x306xf32>
    %635 = vector.broadcast %632 : f32 to vector<8x306xf32>
    %636 = arith.mulf %635, %634 : vector<8x306xf32>
    %637 = arith.addf %631, %636 : vector<8x306xf32>
    %c82 = arith.constant 82 : index
    %638 = memref.load %arg4[%c82] : memref<150xf32, #tpu.memory_space<smem>>
    %639 = vector.extract_strided_slice %96 {offsets = [2, 0, 0], sizes = [1, 8, 306], strides = [1, 1, 1]} : vector<5x8x306xf32> to vector<1x8x306xf32>
    %640 = vector.shape_cast %639 : vector<1x8x306xf32> to vector<8x306xf32>
    %641 = vector.broadcast %638 : f32 to vector<8x306xf32>
    %642 = arith.mulf %641, %640 : vector<8x306xf32>
    %643 = arith.addf %637, %642 : vector<8x306xf32>
    %c85 = arith.constant 85 : index
    %644 = memref.load %arg4[%c85] : memref<150xf32, #tpu.memory_space<smem>>
    %645 = vector.extract_strided_slice %96 {offsets = [3, 0, 0], sizes = [1, 8, 306], strides = [1, 1, 1]} : vector<5x8x306xf32> to vector<1x8x306xf32>
    %646 = vector.shape_cast %645 : vector<1x8x306xf32> to vector<8x306xf32>
    %647 = vector.broadcast %644 : f32 to vector<8x306xf32>
    %648 = arith.mulf %647, %646 : vector<8x306xf32>
    %649 = arith.addf %643, %648 : vector<8x306xf32>
    %c88 = arith.constant 88 : index
    %650 = memref.load %arg4[%c88] : memref<150xf32, #tpu.memory_space<smem>>
    %651 = vector.extract_strided_slice %96 {offsets = [4, 0, 0], sizes = [1, 8, 306], strides = [1, 1, 1]} : vector<5x8x306xf32> to vector<1x8x306xf32>
    %652 = vector.shape_cast %651 : vector<1x8x306xf32> to vector<8x306xf32>
    %653 = vector.broadcast %650 : f32 to vector<8x306xf32>
    %654 = arith.mulf %653, %652 : vector<8x306xf32>
    %655 = arith.addf %649, %654 : vector<8x306xf32>
    %c77 = arith.constant 77 : index
    %656 = memref.load %arg4[%c77] : memref<150xf32, #tpu.memory_space<smem>>
    %657 = vector.extract_strided_slice %97 {offsets = [0, 0, 0], sizes = [1, 8, 306], strides = [1, 1, 1]} : vector<5x8x306xf32> to vector<1x8x306xf32>
    %658 = vector.shape_cast %657 : vector<1x8x306xf32> to vector<8x306xf32>
    %659 = vector.broadcast %656 : f32 to vector<8x306xf32>
    %660 = arith.mulf %659, %658 : vector<8x306xf32>
    %661 = arith.addf %655, %660 : vector<8x306xf32>
    %c80 = arith.constant 80 : index
    %662 = memref.load %arg4[%c80] : memref<150xf32, #tpu.memory_space<smem>>
    %663 = vector.extract_strided_slice %97 {offsets = [1, 0, 0], sizes = [1, 8, 306], strides = [1, 1, 1]} : vector<5x8x306xf32> to vector<1x8x306xf32>
    %664 = vector.shape_cast %663 : vector<1x8x306xf32> to vector<8x306xf32>
    %665 = vector.broadcast %662 : f32 to vector<8x306xf32>
    %666 = arith.mulf %665, %664 : vector<8x306xf32>
    %667 = arith.addf %661, %666 : vector<8x306xf32>
    %c83 = arith.constant 83 : index
    %668 = memref.load %arg4[%c83] : memref<150xf32, #tpu.memory_space<smem>>
    %669 = vector.extract_strided_slice %97 {offsets = [2, 0, 0], sizes = [1, 8, 306], strides = [1, 1, 1]} : vector<5x8x306xf32> to vector<1x8x306xf32>
    %670 = vector.shape_cast %669 : vector<1x8x306xf32> to vector<8x306xf32>
    %671 = vector.broadcast %668 : f32 to vector<8x306xf32>
    %672 = arith.mulf %671, %670 : vector<8x306xf32>
    %673 = arith.addf %667, %672 : vector<8x306xf32>
    %c86 = arith.constant 86 : index
    %674 = memref.load %arg4[%c86] : memref<150xf32, #tpu.memory_space<smem>>
    %675 = vector.extract_strided_slice %97 {offsets = [3, 0, 0], sizes = [1, 8, 306], strides = [1, 1, 1]} : vector<5x8x306xf32> to vector<1x8x306xf32>
    %676 = vector.shape_cast %675 : vector<1x8x306xf32> to vector<8x306xf32>
    %677 = vector.broadcast %674 : f32 to vector<8x306xf32>
    %678 = arith.mulf %677, %676 : vector<8x306xf32>
    %679 = arith.addf %673, %678 : vector<8x306xf32>
    %c89 = arith.constant 89 : index
    %680 = memref.load %arg4[%c89] : memref<150xf32, #tpu.memory_space<smem>>
    %681 = vector.extract_strided_slice %97 {offsets = [4, 0, 0], sizes = [1, 8, 306], strides = [1, 1, 1]} : vector<5x8x306xf32> to vector<1x8x306xf32>
    %682 = vector.shape_cast %681 : vector<1x8x306xf32> to vector<8x306xf32>
    %683 = vector.broadcast %680 : f32 to vector<8x306xf32>
    %684 = arith.mulf %683, %682 : vector<8x306xf32>
    %685 = arith.addf %679, %684 : vector<8x306xf32>
    %cst_58 = arith.constant 3.000000e-01 : f32
    %686 = vector.broadcast %cst_58 : f32 to vector<8x306xf32>
    %687 = arith.mulf %686, %685 : vector<8x306xf32>
    %688 = arith.maximumf %685, %687 : vector<8x306xf32>
    %c5_59 = arith.constant 5 : index
    %c0_60 = arith.constant 0 : index
    %c0_61 = arith.constant 0 : index
    %689 = vector.load %arg6[%c5_59, %c0_60, %c0_61] : memref<10x306x64xf32, #tpu.memory_space<vmem>>, vector<1x306x64xf32>
    %690 = vector.shape_cast %689 : vector<1x306x64xf32> to vector<306x64xf32>
    %cst_62 = arith.constant dense<0.000000e+00> : vector<8x64xf32>
    %691 = tpu.matmul %688, %690, %cst_62 {dimension_numbers = #tpu.dot_dimension_numbers<[1], [0], [0], [1], [0, 0, 1, 1], [], []>} : vector<8x306xf32>, vector<306x64xf32>, vector<8x64xf32> -> vector<8x64xf32>
    %692 = arith.addf %593, %691 : vector<8x64xf32>
    %c6_63 = arith.constant 6 : index
    %693 = memref.load %arg5[%c6_63] : memref<10xf32, #tpu.memory_space<smem>>
    %c90 = arith.constant 90 : index
    %694 = memref.load %arg4[%c90] : memref<150xf32, #tpu.memory_space<smem>>
    %695 = vector.extract_strided_slice %95 {offsets = [0, 0, 0], sizes = [1, 8, 306], strides = [1, 1, 1]} : vector<5x8x306xf32> to vector<1x8x306xf32>
    %696 = vector.shape_cast %695 : vector<1x8x306xf32> to vector<8x306xf32>
    %697 = vector.broadcast %694 : f32 to vector<8x306xf32>
    %698 = arith.mulf %697, %696 : vector<8x306xf32>
    %699 = vector.broadcast %693 : f32 to vector<8x306xf32>
    %700 = arith.addf %699, %698 : vector<8x306xf32>
    %c93 = arith.constant 93 : index
    %701 = memref.load %arg4[%c93] : memref<150xf32, #tpu.memory_space<smem>>
    %702 = vector.extract_strided_slice %95 {offsets = [1, 0, 0], sizes = [1, 8, 306], strides = [1, 1, 1]} : vector<5x8x306xf32> to vector<1x8x306xf32>
    %703 = vector.shape_cast %702 : vector<1x8x306xf32> to vector<8x306xf32>
    %704 = vector.broadcast %701 : f32 to vector<8x306xf32>
    %705 = arith.mulf %704, %703 : vector<8x306xf32>
    %706 = arith.addf %700, %705 : vector<8x306xf32>
    %c96 = arith.constant 96 : index
    %707 = memref.load %arg4[%c96] : memref<150xf32, #tpu.memory_space<smem>>
    %708 = vector.extract_strided_slice %95 {offsets = [2, 0, 0], sizes = [1, 8, 306], strides = [1, 1, 1]} : vector<5x8x306xf32> to vector<1x8x306xf32>
    %709 = vector.shape_cast %708 : vector<1x8x306xf32> to vector<8x306xf32>
    %710 = vector.broadcast %707 : f32 to vector<8x306xf32>
    %711 = arith.mulf %710, %709 : vector<8x306xf32>
    %712 = arith.addf %706, %711 : vector<8x306xf32>
    %c99 = arith.constant 99 : index
    %713 = memref.load %arg4[%c99] : memref<150xf32, #tpu.memory_space<smem>>
    %714 = vector.extract_strided_slice %95 {offsets = [3, 0, 0], sizes = [1, 8, 306], strides = [1, 1, 1]} : vector<5x8x306xf32> to vector<1x8x306xf32>
    %715 = vector.shape_cast %714 : vector<1x8x306xf32> to vector<8x306xf32>
    %716 = vector.broadcast %713 : f32 to vector<8x306xf32>
    %717 = arith.mulf %716, %715 : vector<8x306xf32>
    %718 = arith.addf %712, %717 : vector<8x306xf32>
    %c102 = arith.constant 102 : index
    %719 = memref.load %arg4[%c102] : memref<150xf32, #tpu.memory_space<smem>>
    %720 = vector.extract_strided_slice %95 {offsets = [4, 0, 0], sizes = [1, 8, 306], strides = [1, 1, 1]} : vector<5x8x306xf32> to vector<1x8x306xf32>
    %721 = vector.shape_cast %720 : vector<1x8x306xf32> to vector<8x306xf32>
    %722 = vector.broadcast %719 : f32 to vector<8x306xf32>
    %723 = arith.mulf %722, %721 : vector<8x306xf32>
    %724 = arith.addf %718, %723 : vector<8x306xf32>
    %c91 = arith.constant 91 : index
    %725 = memref.load %arg4[%c91] : memref<150xf32, #tpu.memory_space<smem>>
    %726 = vector.extract_strided_slice %96 {offsets = [0, 0, 0], sizes = [1, 8, 306], strides = [1, 1, 1]} : vector<5x8x306xf32> to vector<1x8x306xf32>
    %727 = vector.shape_cast %726 : vector<1x8x306xf32> to vector<8x306xf32>
    %728 = vector.broadcast %725 : f32 to vector<8x306xf32>
    %729 = arith.mulf %728, %727 : vector<8x306xf32>
    %730 = arith.addf %724, %729 : vector<8x306xf32>
    %c94 = arith.constant 94 : index
    %731 = memref.load %arg4[%c94] : memref<150xf32, #tpu.memory_space<smem>>
    %732 = vector.extract_strided_slice %96 {offsets = [1, 0, 0], sizes = [1, 8, 306], strides = [1, 1, 1]} : vector<5x8x306xf32> to vector<1x8x306xf32>
    %733 = vector.shape_cast %732 : vector<1x8x306xf32> to vector<8x306xf32>
    %734 = vector.broadcast %731 : f32 to vector<8x306xf32>
    %735 = arith.mulf %734, %733 : vector<8x306xf32>
    %736 = arith.addf %730, %735 : vector<8x306xf32>
    %c97 = arith.constant 97 : index
    %737 = memref.load %arg4[%c97] : memref<150xf32, #tpu.memory_space<smem>>
    %738 = vector.extract_strided_slice %96 {offsets = [2, 0, 0], sizes = [1, 8, 306], strides = [1, 1, 1]} : vector<5x8x306xf32> to vector<1x8x306xf32>
    %739 = vector.shape_cast %738 : vector<1x8x306xf32> to vector<8x306xf32>
    %740 = vector.broadcast %737 : f32 to vector<8x306xf32>
    %741 = arith.mulf %740, %739 : vector<8x306xf32>
    %742 = arith.addf %736, %741 : vector<8x306xf32>
    %c100 = arith.constant 100 : index
    %743 = memref.load %arg4[%c100] : memref<150xf32, #tpu.memory_space<smem>>
    %744 = vector.extract_strided_slice %96 {offsets = [3, 0, 0], sizes = [1, 8, 306], strides = [1, 1, 1]} : vector<5x8x306xf32> to vector<1x8x306xf32>
    %745 = vector.shape_cast %744 : vector<1x8x306xf32> to vector<8x306xf32>
    %746 = vector.broadcast %743 : f32 to vector<8x306xf32>
    %747 = arith.mulf %746, %745 : vector<8x306xf32>
    %748 = arith.addf %742, %747 : vector<8x306xf32>
    %c103 = arith.constant 103 : index
    %749 = memref.load %arg4[%c103] : memref<150xf32, #tpu.memory_space<smem>>
    %750 = vector.extract_strided_slice %96 {offsets = [4, 0, 0], sizes = [1, 8, 306], strides = [1, 1, 1]} : vector<5x8x306xf32> to vector<1x8x306xf32>
    %751 = vector.shape_cast %750 : vector<1x8x306xf32> to vector<8x306xf32>
    %752 = vector.broadcast %749 : f32 to vector<8x306xf32>
    %753 = arith.mulf %752, %751 : vector<8x306xf32>
    %754 = arith.addf %748, %753 : vector<8x306xf32>
    %c92 = arith.constant 92 : index
    %755 = memref.load %arg4[%c92] : memref<150xf32, #tpu.memory_space<smem>>
    %756 = vector.extract_strided_slice %97 {offsets = [0, 0, 0], sizes = [1, 8, 306], strides = [1, 1, 1]} : vector<5x8x306xf32> to vector<1x8x306xf32>
    %757 = vector.shape_cast %756 : vector<1x8x306xf32> to vector<8x306xf32>
    %758 = vector.broadcast %755 : f32 to vector<8x306xf32>
    %759 = arith.mulf %758, %757 : vector<8x306xf32>
    %760 = arith.addf %754, %759 : vector<8x306xf32>
    %c95 = arith.constant 95 : index
    %761 = memref.load %arg4[%c95] : memref<150xf32, #tpu.memory_space<smem>>
    %762 = vector.extract_strided_slice %97 {offsets = [1, 0, 0], sizes = [1, 8, 306], strides = [1, 1, 1]} : vector<5x8x306xf32> to vector<1x8x306xf32>
    %763 = vector.shape_cast %762 : vector<1x8x306xf32> to vector<8x306xf32>
    %764 = vector.broadcast %761 : f32 to vector<8x306xf32>
    %765 = arith.mulf %764, %763 : vector<8x306xf32>
    %766 = arith.addf %760, %765 : vector<8x306xf32>
    %c98 = arith.constant 98 : index
    %767 = memref.load %arg4[%c98] : memref<150xf32, #tpu.memory_space<smem>>
    %768 = vector.extract_strided_slice %97 {offsets = [2, 0, 0], sizes = [1, 8, 306], strides = [1, 1, 1]} : vector<5x8x306xf32> to vector<1x8x306xf32>
    %769 = vector.shape_cast %768 : vector<1x8x306xf32> to vector<8x306xf32>
    %770 = vector.broadcast %767 : f32 to vector<8x306xf32>
    %771 = arith.mulf %770, %769 : vector<8x306xf32>
    %772 = arith.addf %766, %771 : vector<8x306xf32>
    %c101 = arith.constant 101 : index
    %773 = memref.load %arg4[%c101] : memref<150xf32, #tpu.memory_space<smem>>
    %774 = vector.extract_strided_slice %97 {offsets = [3, 0, 0], sizes = [1, 8, 306], strides = [1, 1, 1]} : vector<5x8x306xf32> to vector<1x8x306xf32>
    %775 = vector.shape_cast %774 : vector<1x8x306xf32> to vector<8x306xf32>
    %776 = vector.broadcast %773 : f32 to vector<8x306xf32>
    %777 = arith.mulf %776, %775 : vector<8x306xf32>
    %778 = arith.addf %772, %777 : vector<8x306xf32>
    %c104 = arith.constant 104 : index
    %779 = memref.load %arg4[%c104] : memref<150xf32, #tpu.memory_space<smem>>
    %780 = vector.extract_strided_slice %97 {offsets = [4, 0, 0], sizes = [1, 8, 306], strides = [1, 1, 1]} : vector<5x8x306xf32> to vector<1x8x306xf32>
    %781 = vector.shape_cast %780 : vector<1x8x306xf32> to vector<8x306xf32>
    %782 = vector.broadcast %779 : f32 to vector<8x306xf32>
    %783 = arith.mulf %782, %781 : vector<8x306xf32>
    %784 = arith.addf %778, %783 : vector<8x306xf32>
    %cst_64 = arith.constant 3.000000e-01 : f32
    %785 = vector.broadcast %cst_64 : f32 to vector<8x306xf32>
    %786 = arith.mulf %785, %784 : vector<8x306xf32>
    %787 = arith.maximumf %784, %786 : vector<8x306xf32>
    %c6_65 = arith.constant 6 : index
    %c0_66 = arith.constant 0 : index
    %c0_67 = arith.constant 0 : index
    %788 = vector.load %arg6[%c6_65, %c0_66, %c0_67] : memref<10x306x64xf32, #tpu.memory_space<vmem>>, vector<1x306x64xf32>
    %789 = vector.shape_cast %788 : vector<1x306x64xf32> to vector<306x64xf32>
    %cst_68 = arith.constant dense<0.000000e+00> : vector<8x64xf32>
    %790 = tpu.matmul %787, %789, %cst_68 {dimension_numbers = #tpu.dot_dimension_numbers<[1], [0], [0], [1], [0, 0, 1, 1], [], []>} : vector<8x306xf32>, vector<306x64xf32>, vector<8x64xf32> -> vector<8x64xf32>
    %791 = arith.addf %692, %790 : vector<8x64xf32>
    %c7_69 = arith.constant 7 : index
    %792 = memref.load %arg5[%c7_69] : memref<10xf32, #tpu.memory_space<smem>>
    %c105 = arith.constant 105 : index
    %793 = memref.load %arg4[%c105] : memref<150xf32, #tpu.memory_space<smem>>
    %794 = vector.extract_strided_slice %95 {offsets = [0, 0, 0], sizes = [1, 8, 306], strides = [1, 1, 1]} : vector<5x8x306xf32> to vector<1x8x306xf32>
    %795 = vector.shape_cast %794 : vector<1x8x306xf32> to vector<8x306xf32>
    %796 = vector.broadcast %793 : f32 to vector<8x306xf32>
    %797 = arith.mulf %796, %795 : vector<8x306xf32>
    %798 = vector.broadcast %792 : f32 to vector<8x306xf32>
    %799 = arith.addf %798, %797 : vector<8x306xf32>
    %c108 = arith.constant 108 : index
    %800 = memref.load %arg4[%c108] : memref<150xf32, #tpu.memory_space<smem>>
    %801 = vector.extract_strided_slice %95 {offsets = [1, 0, 0], sizes = [1, 8, 306], strides = [1, 1, 1]} : vector<5x8x306xf32> to vector<1x8x306xf32>
    %802 = vector.shape_cast %801 : vector<1x8x306xf32> to vector<8x306xf32>
    %803 = vector.broadcast %800 : f32 to vector<8x306xf32>
    %804 = arith.mulf %803, %802 : vector<8x306xf32>
    %805 = arith.addf %799, %804 : vector<8x306xf32>
    %c111 = arith.constant 111 : index
    %806 = memref.load %arg4[%c111] : memref<150xf32, #tpu.memory_space<smem>>
    %807 = vector.extract_strided_slice %95 {offsets = [2, 0, 0], sizes = [1, 8, 306], strides = [1, 1, 1]} : vector<5x8x306xf32> to vector<1x8x306xf32>
    %808 = vector.shape_cast %807 : vector<1x8x306xf32> to vector<8x306xf32>
    %809 = vector.broadcast %806 : f32 to vector<8x306xf32>
    %810 = arith.mulf %809, %808 : vector<8x306xf32>
    %811 = arith.addf %805, %810 : vector<8x306xf32>
    %c114 = arith.constant 114 : index
    %812 = memref.load %arg4[%c114] : memref<150xf32, #tpu.memory_space<smem>>
    %813 = vector.extract_strided_slice %95 {offsets = [3, 0, 0], sizes = [1, 8, 306], strides = [1, 1, 1]} : vector<5x8x306xf32> to vector<1x8x306xf32>
    %814 = vector.shape_cast %813 : vector<1x8x306xf32> to vector<8x306xf32>
    %815 = vector.broadcast %812 : f32 to vector<8x306xf32>
    %816 = arith.mulf %815, %814 : vector<8x306xf32>
    %817 = arith.addf %811, %816 : vector<8x306xf32>
    %c117 = arith.constant 117 : index
    %818 = memref.load %arg4[%c117] : memref<150xf32, #tpu.memory_space<smem>>
    %819 = vector.extract_strided_slice %95 {offsets = [4, 0, 0], sizes = [1, 8, 306], strides = [1, 1, 1]} : vector<5x8x306xf32> to vector<1x8x306xf32>
    %820 = vector.shape_cast %819 : vector<1x8x306xf32> to vector<8x306xf32>
    %821 = vector.broadcast %818 : f32 to vector<8x306xf32>
    %822 = arith.mulf %821, %820 : vector<8x306xf32>
    %823 = arith.addf %817, %822 : vector<8x306xf32>
    %c106 = arith.constant 106 : index
    %824 = memref.load %arg4[%c106] : memref<150xf32, #tpu.memory_space<smem>>
    %825 = vector.extract_strided_slice %96 {offsets = [0, 0, 0], sizes = [1, 8, 306], strides = [1, 1, 1]} : vector<5x8x306xf32> to vector<1x8x306xf32>
    %826 = vector.shape_cast %825 : vector<1x8x306xf32> to vector<8x306xf32>
    %827 = vector.broadcast %824 : f32 to vector<8x306xf32>
    %828 = arith.mulf %827, %826 : vector<8x306xf32>
    %829 = arith.addf %823, %828 : vector<8x306xf32>
    %c109 = arith.constant 109 : index
    %830 = memref.load %arg4[%c109] : memref<150xf32, #tpu.memory_space<smem>>
    %831 = vector.extract_strided_slice %96 {offsets = [1, 0, 0], sizes = [1, 8, 306], strides = [1, 1, 1]} : vector<5x8x306xf32> to vector<1x8x306xf32>
    %832 = vector.shape_cast %831 : vector<1x8x306xf32> to vector<8x306xf32>
    %833 = vector.broadcast %830 : f32 to vector<8x306xf32>
    %834 = arith.mulf %833, %832 : vector<8x306xf32>
    %835 = arith.addf %829, %834 : vector<8x306xf32>
    %c112 = arith.constant 112 : index
    %836 = memref.load %arg4[%c112] : memref<150xf32, #tpu.memory_space<smem>>
    %837 = vector.extract_strided_slice %96 {offsets = [2, 0, 0], sizes = [1, 8, 306], strides = [1, 1, 1]} : vector<5x8x306xf32> to vector<1x8x306xf32>
    %838 = vector.shape_cast %837 : vector<1x8x306xf32> to vector<8x306xf32>
    %839 = vector.broadcast %836 : f32 to vector<8x306xf32>
    %840 = arith.mulf %839, %838 : vector<8x306xf32>
    %841 = arith.addf %835, %840 : vector<8x306xf32>
    %c115 = arith.constant 115 : index
    %842 = memref.load %arg4[%c115] : memref<150xf32, #tpu.memory_space<smem>>
    %843 = vector.extract_strided_slice %96 {offsets = [3, 0, 0], sizes = [1, 8, 306], strides = [1, 1, 1]} : vector<5x8x306xf32> to vector<1x8x306xf32>
    %844 = vector.shape_cast %843 : vector<1x8x306xf32> to vector<8x306xf32>
    %845 = vector.broadcast %842 : f32 to vector<8x306xf32>
    %846 = arith.mulf %845, %844 : vector<8x306xf32>
    %847 = arith.addf %841, %846 : vector<8x306xf32>
    %c118 = arith.constant 118 : index
    %848 = memref.load %arg4[%c118] : memref<150xf32, #tpu.memory_space<smem>>
    %849 = vector.extract_strided_slice %96 {offsets = [4, 0, 0], sizes = [1, 8, 306], strides = [1, 1, 1]} : vector<5x8x306xf32> to vector<1x8x306xf32>
    %850 = vector.shape_cast %849 : vector<1x8x306xf32> to vector<8x306xf32>
    %851 = vector.broadcast %848 : f32 to vector<8x306xf32>
    %852 = arith.mulf %851, %850 : vector<8x306xf32>
    %853 = arith.addf %847, %852 : vector<8x306xf32>
    %c107 = arith.constant 107 : index
    %854 = memref.load %arg4[%c107] : memref<150xf32, #tpu.memory_space<smem>>
    %855 = vector.extract_strided_slice %97 {offsets = [0, 0, 0], sizes = [1, 8, 306], strides = [1, 1, 1]} : vector<5x8x306xf32> to vector<1x8x306xf32>
    %856 = vector.shape_cast %855 : vector<1x8x306xf32> to vector<8x306xf32>
    %857 = vector.broadcast %854 : f32 to vector<8x306xf32>
    %858 = arith.mulf %857, %856 : vector<8x306xf32>
    %859 = arith.addf %853, %858 : vector<8x306xf32>
    %c110 = arith.constant 110 : index
    %860 = memref.load %arg4[%c110] : memref<150xf32, #tpu.memory_space<smem>>
    %861 = vector.extract_strided_slice %97 {offsets = [1, 0, 0], sizes = [1, 8, 306], strides = [1, 1, 1]} : vector<5x8x306xf32> to vector<1x8x306xf32>
    %862 = vector.shape_cast %861 : vector<1x8x306xf32> to vector<8x306xf32>
    %863 = vector.broadcast %860 : f32 to vector<8x306xf32>
    %864 = arith.mulf %863, %862 : vector<8x306xf32>
    %865 = arith.addf %859, %864 : vector<8x306xf32>
    %c113 = arith.constant 113 : index
    %866 = memref.load %arg4[%c113] : memref<150xf32, #tpu.memory_space<smem>>
    %867 = vector.extract_strided_slice %97 {offsets = [2, 0, 0], sizes = [1, 8, 306], strides = [1, 1, 1]} : vector<5x8x306xf32> to vector<1x8x306xf32>
    %868 = vector.shape_cast %867 : vector<1x8x306xf32> to vector<8x306xf32>
    %869 = vector.broadcast %866 : f32 to vector<8x306xf32>
    %870 = arith.mulf %869, %868 : vector<8x306xf32>
    %871 = arith.addf %865, %870 : vector<8x306xf32>
    %c116 = arith.constant 116 : index
    %872 = memref.load %arg4[%c116] : memref<150xf32, #tpu.memory_space<smem>>
    %873 = vector.extract_strided_slice %97 {offsets = [3, 0, 0], sizes = [1, 8, 306], strides = [1, 1, 1]} : vector<5x8x306xf32> to vector<1x8x306xf32>
    %874 = vector.shape_cast %873 : vector<1x8x306xf32> to vector<8x306xf32>
    %875 = vector.broadcast %872 : f32 to vector<8x306xf32>
    %876 = arith.mulf %875, %874 : vector<8x306xf32>
    %877 = arith.addf %871, %876 : vector<8x306xf32>
    %c119 = arith.constant 119 : index
    %878 = memref.load %arg4[%c119] : memref<150xf32, #tpu.memory_space<smem>>
    %879 = vector.extract_strided_slice %97 {offsets = [4, 0, 0], sizes = [1, 8, 306], strides = [1, 1, 1]} : vector<5x8x306xf32> to vector<1x8x306xf32>
    %880 = vector.shape_cast %879 : vector<1x8x306xf32> to vector<8x306xf32>
    %881 = vector.broadcast %878 : f32 to vector<8x306xf32>
    %882 = arith.mulf %881, %880 : vector<8x306xf32>
    %883 = arith.addf %877, %882 : vector<8x306xf32>
    %cst_70 = arith.constant 3.000000e-01 : f32
    %884 = vector.broadcast %cst_70 : f32 to vector<8x306xf32>
    %885 = arith.mulf %884, %883 : vector<8x306xf32>
    %886 = arith.maximumf %883, %885 : vector<8x306xf32>
    %c7_71 = arith.constant 7 : index
    %c0_72 = arith.constant 0 : index
    %c0_73 = arith.constant 0 : index
    %887 = vector.load %arg6[%c7_71, %c0_72, %c0_73] : memref<10x306x64xf32, #tpu.memory_space<vmem>>, vector<1x306x64xf32>
    %888 = vector.shape_cast %887 : vector<1x306x64xf32> to vector<306x64xf32>
    %cst_74 = arith.constant dense<0.000000e+00> : vector<8x64xf32>
    %889 = tpu.matmul %886, %888, %cst_74 {dimension_numbers = #tpu.dot_dimension_numbers<[1], [0], [0], [1], [0, 0, 1, 1], [], []>} : vector<8x306xf32>, vector<306x64xf32>, vector<8x64xf32> -> vector<8x64xf32>
    %890 = arith.addf %791, %889 : vector<8x64xf32>
    %c8_75 = arith.constant 8 : index
    %891 = memref.load %arg5[%c8_75] : memref<10xf32, #tpu.memory_space<smem>>
    %c120 = arith.constant 120 : index
    %892 = memref.load %arg4[%c120] : memref<150xf32, #tpu.memory_space<smem>>
    %893 = vector.extract_strided_slice %95 {offsets = [0, 0, 0], sizes = [1, 8, 306], strides = [1, 1, 1]} : vector<5x8x306xf32> to vector<1x8x306xf32>
    %894 = vector.shape_cast %893 : vector<1x8x306xf32> to vector<8x306xf32>
    %895 = vector.broadcast %892 : f32 to vector<8x306xf32>
    %896 = arith.mulf %895, %894 : vector<8x306xf32>
    %897 = vector.broadcast %891 : f32 to vector<8x306xf32>
    %898 = arith.addf %897, %896 : vector<8x306xf32>
    %c123 = arith.constant 123 : index
    %899 = memref.load %arg4[%c123] : memref<150xf32, #tpu.memory_space<smem>>
    %900 = vector.extract_strided_slice %95 {offsets = [1, 0, 0], sizes = [1, 8, 306], strides = [1, 1, 1]} : vector<5x8x306xf32> to vector<1x8x306xf32>
    %901 = vector.shape_cast %900 : vector<1x8x306xf32> to vector<8x306xf32>
    %902 = vector.broadcast %899 : f32 to vector<8x306xf32>
    %903 = arith.mulf %902, %901 : vector<8x306xf32>
    %904 = arith.addf %898, %903 : vector<8x306xf32>
    %c126 = arith.constant 126 : index
    %905 = memref.load %arg4[%c126] : memref<150xf32, #tpu.memory_space<smem>>
    %906 = vector.extract_strided_slice %95 {offsets = [2, 0, 0], sizes = [1, 8, 306], strides = [1, 1, 1]} : vector<5x8x306xf32> to vector<1x8x306xf32>
    %907 = vector.shape_cast %906 : vector<1x8x306xf32> to vector<8x306xf32>
    %908 = vector.broadcast %905 : f32 to vector<8x306xf32>
    %909 = arith.mulf %908, %907 : vector<8x306xf32>
    %910 = arith.addf %904, %909 : vector<8x306xf32>
    %c129 = arith.constant 129 : index
    %911 = memref.load %arg4[%c129] : memref<150xf32, #tpu.memory_space<smem>>
    %912 = vector.extract_strided_slice %95 {offsets = [3, 0, 0], sizes = [1, 8, 306], strides = [1, 1, 1]} : vector<5x8x306xf32> to vector<1x8x306xf32>
    %913 = vector.shape_cast %912 : vector<1x8x306xf32> to vector<8x306xf32>
    %914 = vector.broadcast %911 : f32 to vector<8x306xf32>
    %915 = arith.mulf %914, %913 : vector<8x306xf32>
    %916 = arith.addf %910, %915 : vector<8x306xf32>
    %c132 = arith.constant 132 : index
    %917 = memref.load %arg4[%c132] : memref<150xf32, #tpu.memory_space<smem>>
    %918 = vector.extract_strided_slice %95 {offsets = [4, 0, 0], sizes = [1, 8, 306], strides = [1, 1, 1]} : vector<5x8x306xf32> to vector<1x8x306xf32>
    %919 = vector.shape_cast %918 : vector<1x8x306xf32> to vector<8x306xf32>
    %920 = vector.broadcast %917 : f32 to vector<8x306xf32>
    %921 = arith.mulf %920, %919 : vector<8x306xf32>
    %922 = arith.addf %916, %921 : vector<8x306xf32>
    %c121 = arith.constant 121 : index
    %923 = memref.load %arg4[%c121] : memref<150xf32, #tpu.memory_space<smem>>
    %924 = vector.extract_strided_slice %96 {offsets = [0, 0, 0], sizes = [1, 8, 306], strides = [1, 1, 1]} : vector<5x8x306xf32> to vector<1x8x306xf32>
    %925 = vector.shape_cast %924 : vector<1x8x306xf32> to vector<8x306xf32>
    %926 = vector.broadcast %923 : f32 to vector<8x306xf32>
    %927 = arith.mulf %926, %925 : vector<8x306xf32>
    %928 = arith.addf %922, %927 : vector<8x306xf32>
    %c124 = arith.constant 124 : index
    %929 = memref.load %arg4[%c124] : memref<150xf32, #tpu.memory_space<smem>>
    %930 = vector.extract_strided_slice %96 {offsets = [1, 0, 0], sizes = [1, 8, 306], strides = [1, 1, 1]} : vector<5x8x306xf32> to vector<1x8x306xf32>
    %931 = vector.shape_cast %930 : vector<1x8x306xf32> to vector<8x306xf32>
    %932 = vector.broadcast %929 : f32 to vector<8x306xf32>
    %933 = arith.mulf %932, %931 : vector<8x306xf32>
    %934 = arith.addf %928, %933 : vector<8x306xf32>
    %c127 = arith.constant 127 : index
    %935 = memref.load %arg4[%c127] : memref<150xf32, #tpu.memory_space<smem>>
    %936 = vector.extract_strided_slice %96 {offsets = [2, 0, 0], sizes = [1, 8, 306], strides = [1, 1, 1]} : vector<5x8x306xf32> to vector<1x8x306xf32>
    %937 = vector.shape_cast %936 : vector<1x8x306xf32> to vector<8x306xf32>
    %938 = vector.broadcast %935 : f32 to vector<8x306xf32>
    %939 = arith.mulf %938, %937 : vector<8x306xf32>
    %940 = arith.addf %934, %939 : vector<8x306xf32>
    %c130 = arith.constant 130 : index
    %941 = memref.load %arg4[%c130] : memref<150xf32, #tpu.memory_space<smem>>
    %942 = vector.extract_strided_slice %96 {offsets = [3, 0, 0], sizes = [1, 8, 306], strides = [1, 1, 1]} : vector<5x8x306xf32> to vector<1x8x306xf32>
    %943 = vector.shape_cast %942 : vector<1x8x306xf32> to vector<8x306xf32>
    %944 = vector.broadcast %941 : f32 to vector<8x306xf32>
    %945 = arith.mulf %944, %943 : vector<8x306xf32>
    %946 = arith.addf %940, %945 : vector<8x306xf32>
    %c133 = arith.constant 133 : index
    %947 = memref.load %arg4[%c133] : memref<150xf32, #tpu.memory_space<smem>>
    %948 = vector.extract_strided_slice %96 {offsets = [4, 0, 0], sizes = [1, 8, 306], strides = [1, 1, 1]} : vector<5x8x306xf32> to vector<1x8x306xf32>
    %949 = vector.shape_cast %948 : vector<1x8x306xf32> to vector<8x306xf32>
    %950 = vector.broadcast %947 : f32 to vector<8x306xf32>
    %951 = arith.mulf %950, %949 : vector<8x306xf32>
    %952 = arith.addf %946, %951 : vector<8x306xf32>
    %c122 = arith.constant 122 : index
    %953 = memref.load %arg4[%c122] : memref<150xf32, #tpu.memory_space<smem>>
    %954 = vector.extract_strided_slice %97 {offsets = [0, 0, 0], sizes = [1, 8, 306], strides = [1, 1, 1]} : vector<5x8x306xf32> to vector<1x8x306xf32>
    %955 = vector.shape_cast %954 : vector<1x8x306xf32> to vector<8x306xf32>
    %956 = vector.broadcast %953 : f32 to vector<8x306xf32>
    %957 = arith.mulf %956, %955 : vector<8x306xf32>
    %958 = arith.addf %952, %957 : vector<8x306xf32>
    %c125 = arith.constant 125 : index
    %959 = memref.load %arg4[%c125] : memref<150xf32, #tpu.memory_space<smem>>
    %960 = vector.extract_strided_slice %97 {offsets = [1, 0, 0], sizes = [1, 8, 306], strides = [1, 1, 1]} : vector<5x8x306xf32> to vector<1x8x306xf32>
    %961 = vector.shape_cast %960 : vector<1x8x306xf32> to vector<8x306xf32>
    %962 = vector.broadcast %959 : f32 to vector<8x306xf32>
    %963 = arith.mulf %962, %961 : vector<8x306xf32>
    %964 = arith.addf %958, %963 : vector<8x306xf32>
    %c128 = arith.constant 128 : index
    %965 = memref.load %arg4[%c128] : memref<150xf32, #tpu.memory_space<smem>>
    %966 = vector.extract_strided_slice %97 {offsets = [2, 0, 0], sizes = [1, 8, 306], strides = [1, 1, 1]} : vector<5x8x306xf32> to vector<1x8x306xf32>
    %967 = vector.shape_cast %966 : vector<1x8x306xf32> to vector<8x306xf32>
    %968 = vector.broadcast %965 : f32 to vector<8x306xf32>
    %969 = arith.mulf %968, %967 : vector<8x306xf32>
    %970 = arith.addf %964, %969 : vector<8x306xf32>
    %c131 = arith.constant 131 : index
    %971 = memref.load %arg4[%c131] : memref<150xf32, #tpu.memory_space<smem>>
    %972 = vector.extract_strided_slice %97 {offsets = [3, 0, 0], sizes = [1, 8, 306], strides = [1, 1, 1]} : vector<5x8x306xf32> to vector<1x8x306xf32>
    %973 = vector.shape_cast %972 : vector<1x8x306xf32> to vector<8x306xf32>
    %974 = vector.broadcast %971 : f32 to vector<8x306xf32>
    %975 = arith.mulf %974, %973 : vector<8x306xf32>
    %976 = arith.addf %970, %975 : vector<8x306xf32>
    %c134 = arith.constant 134 : index
    %977 = memref.load %arg4[%c134] : memref<150xf32, #tpu.memory_space<smem>>
    %978 = vector.extract_strided_slice %97 {offsets = [4, 0, 0], sizes = [1, 8, 306], strides = [1, 1, 1]} : vector<5x8x306xf32> to vector<1x8x306xf32>
    %979 = vector.shape_cast %978 : vector<1x8x306xf32> to vector<8x306xf32>
    %980 = vector.broadcast %977 : f32 to vector<8x306xf32>
    %981 = arith.mulf %980, %979 : vector<8x306xf32>
    %982 = arith.addf %976, %981 : vector<8x306xf32>
    %cst_76 = arith.constant 3.000000e-01 : f32
    %983 = vector.broadcast %cst_76 : f32 to vector<8x306xf32>
    %984 = arith.mulf %983, %982 : vector<8x306xf32>
    %985 = arith.maximumf %982, %984 : vector<8x306xf32>
    %c8_77 = arith.constant 8 : index
    %c0_78 = arith.constant 0 : index
    %c0_79 = arith.constant 0 : index
    %986 = vector.load %arg6[%c8_77, %c0_78, %c0_79] : memref<10x306x64xf32, #tpu.memory_space<vmem>>, vector<1x306x64xf32>
    %987 = vector.shape_cast %986 : vector<1x306x64xf32> to vector<306x64xf32>
    %cst_80 = arith.constant dense<0.000000e+00> : vector<8x64xf32>
    %988 = tpu.matmul %985, %987, %cst_80 {dimension_numbers = #tpu.dot_dimension_numbers<[1], [0], [0], [1], [0, 0, 1, 1], [], []>} : vector<8x306xf32>, vector<306x64xf32>, vector<8x64xf32> -> vector<8x64xf32>
    %989 = arith.addf %890, %988 : vector<8x64xf32>
    %c9_81 = arith.constant 9 : index
    %990 = memref.load %arg5[%c9_81] : memref<10xf32, #tpu.memory_space<smem>>
    %c135 = arith.constant 135 : index
    %991 = memref.load %arg4[%c135] : memref<150xf32, #tpu.memory_space<smem>>
    %992 = vector.extract_strided_slice %95 {offsets = [0, 0, 0], sizes = [1, 8, 306], strides = [1, 1, 1]} : vector<5x8x306xf32> to vector<1x8x306xf32>
    %993 = vector.shape_cast %992 : vector<1x8x306xf32> to vector<8x306xf32>
    %994 = vector.broadcast %991 : f32 to vector<8x306xf32>
    %995 = arith.mulf %994, %993 : vector<8x306xf32>
    %996 = vector.broadcast %990 : f32 to vector<8x306xf32>
    %997 = arith.addf %996, %995 : vector<8x306xf32>
    %c138 = arith.constant 138 : index
    %998 = memref.load %arg4[%c138] : memref<150xf32, #tpu.memory_space<smem>>
    %999 = vector.extract_strided_slice %95 {offsets = [1, 0, 0], sizes = [1, 8, 306], strides = [1, 1, 1]} : vector<5x8x306xf32> to vector<1x8x306xf32>
    %1000 = vector.shape_cast %999 : vector<1x8x306xf32> to vector<8x306xf32>
    %1001 = vector.broadcast %998 : f32 to vector<8x306xf32>
    %1002 = arith.mulf %1001, %1000 : vector<8x306xf32>
    %1003 = arith.addf %997, %1002 : vector<8x306xf32>
    %c141 = arith.constant 141 : index
    %1004 = memref.load %arg4[%c141] : memref<150xf32, #tpu.memory_space<smem>>
    %1005 = vector.extract_strided_slice %95 {offsets = [2, 0, 0], sizes = [1, 8, 306], strides = [1, 1, 1]} : vector<5x8x306xf32> to vector<1x8x306xf32>
    %1006 = vector.shape_cast %1005 : vector<1x8x306xf32> to vector<8x306xf32>
    %1007 = vector.broadcast %1004 : f32 to vector<8x306xf32>
    %1008 = arith.mulf %1007, %1006 : vector<8x306xf32>
    %1009 = arith.addf %1003, %1008 : vector<8x306xf32>
    %c144 = arith.constant 144 : index
    %1010 = memref.load %arg4[%c144] : memref<150xf32, #tpu.memory_space<smem>>
    %1011 = vector.extract_strided_slice %95 {offsets = [3, 0, 0], sizes = [1, 8, 306], strides = [1, 1, 1]} : vector<5x8x306xf32> to vector<1x8x306xf32>
    %1012 = vector.shape_cast %1011 : vector<1x8x306xf32> to vector<8x306xf32>
    %1013 = vector.broadcast %1010 : f32 to vector<8x306xf32>
    %1014 = arith.mulf %1013, %1012 : vector<8x306xf32>
    %1015 = arith.addf %1009, %1014 : vector<8x306xf32>
    %c147 = arith.constant 147 : index
    %1016 = memref.load %arg4[%c147] : memref<150xf32, #tpu.memory_space<smem>>
    %1017 = vector.extract_strided_slice %95 {offsets = [4, 0, 0], sizes = [1, 8, 306], strides = [1, 1, 1]} : vector<5x8x306xf32> to vector<1x8x306xf32>
    %1018 = vector.shape_cast %1017 : vector<1x8x306xf32> to vector<8x306xf32>
    %1019 = vector.broadcast %1016 : f32 to vector<8x306xf32>
    %1020 = arith.mulf %1019, %1018 : vector<8x306xf32>
    %1021 = arith.addf %1015, %1020 : vector<8x306xf32>
    %c136 = arith.constant 136 : index
    %1022 = memref.load %arg4[%c136] : memref<150xf32, #tpu.memory_space<smem>>
    %1023 = vector.extract_strided_slice %96 {offsets = [0, 0, 0], sizes = [1, 8, 306], strides = [1, 1, 1]} : vector<5x8x306xf32> to vector<1x8x306xf32>
    %1024 = vector.shape_cast %1023 : vector<1x8x306xf32> to vector<8x306xf32>
    %1025 = vector.broadcast %1022 : f32 to vector<8x306xf32>
    %1026 = arith.mulf %1025, %1024 : vector<8x306xf32>
    %1027 = arith.addf %1021, %1026 : vector<8x306xf32>
    %c139 = arith.constant 139 : index
    %1028 = memref.load %arg4[%c139] : memref<150xf32, #tpu.memory_space<smem>>
    %1029 = vector.extract_strided_slice %96 {offsets = [1, 0, 0], sizes = [1, 8, 306], strides = [1, 1, 1]} : vector<5x8x306xf32> to vector<1x8x306xf32>
    %1030 = vector.shape_cast %1029 : vector<1x8x306xf32> to vector<8x306xf32>
    %1031 = vector.broadcast %1028 : f32 to vector<8x306xf32>
    %1032 = arith.mulf %1031, %1030 : vector<8x306xf32>
    %1033 = arith.addf %1027, %1032 : vector<8x306xf32>
    %c142 = arith.constant 142 : index
    %1034 = memref.load %arg4[%c142] : memref<150xf32, #tpu.memory_space<smem>>
    %1035 = vector.extract_strided_slice %96 {offsets = [2, 0, 0], sizes = [1, 8, 306], strides = [1, 1, 1]} : vector<5x8x306xf32> to vector<1x8x306xf32>
    %1036 = vector.shape_cast %1035 : vector<1x8x306xf32> to vector<8x306xf32>
    %1037 = vector.broadcast %1034 : f32 to vector<8x306xf32>
    %1038 = arith.mulf %1037, %1036 : vector<8x306xf32>
    %1039 = arith.addf %1033, %1038 : vector<8x306xf32>
    %c145 = arith.constant 145 : index
    %1040 = memref.load %arg4[%c145] : memref<150xf32, #tpu.memory_space<smem>>
    %1041 = vector.extract_strided_slice %96 {offsets = [3, 0, 0], sizes = [1, 8, 306], strides = [1, 1, 1]} : vector<5x8x306xf32> to vector<1x8x306xf32>
    %1042 = vector.shape_cast %1041 : vector<1x8x306xf32> to vector<8x306xf32>
    %1043 = vector.broadcast %1040 : f32 to vector<8x306xf32>
    %1044 = arith.mulf %1043, %1042 : vector<8x306xf32>
    %1045 = arith.addf %1039, %1044 : vector<8x306xf32>
    %c148 = arith.constant 148 : index
    %1046 = memref.load %arg4[%c148] : memref<150xf32, #tpu.memory_space<smem>>
    %1047 = vector.extract_strided_slice %96 {offsets = [4, 0, 0], sizes = [1, 8, 306], strides = [1, 1, 1]} : vector<5x8x306xf32> to vector<1x8x306xf32>
    %1048 = vector.shape_cast %1047 : vector<1x8x306xf32> to vector<8x306xf32>
    %1049 = vector.broadcast %1046 : f32 to vector<8x306xf32>
    %1050 = arith.mulf %1049, %1048 : vector<8x306xf32>
    %1051 = arith.addf %1045, %1050 : vector<8x306xf32>
    %c137 = arith.constant 137 : index
    %1052 = memref.load %arg4[%c137] : memref<150xf32, #tpu.memory_space<smem>>
    %1053 = vector.extract_strided_slice %97 {offsets = [0, 0, 0], sizes = [1, 8, 306], strides = [1, 1, 1]} : vector<5x8x306xf32> to vector<1x8x306xf32>
    %1054 = vector.shape_cast %1053 : vector<1x8x306xf32> to vector<8x306xf32>
    %1055 = vector.broadcast %1052 : f32 to vector<8x306xf32>
    %1056 = arith.mulf %1055, %1054 : vector<8x306xf32>
    %1057 = arith.addf %1051, %1056 : vector<8x306xf32>
    %c140 = arith.constant 140 : index
    %1058 = memref.load %arg4[%c140] : memref<150xf32, #tpu.memory_space<smem>>
    %1059 = vector.extract_strided_slice %97 {offsets = [1, 0, 0], sizes = [1, 8, 306], strides = [1, 1, 1]} : vector<5x8x306xf32> to vector<1x8x306xf32>
    %1060 = vector.shape_cast %1059 : vector<1x8x306xf32> to vector<8x306xf32>
    %1061 = vector.broadcast %1058 : f32 to vector<8x306xf32>
    %1062 = arith.mulf %1061, %1060 : vector<8x306xf32>
    %1063 = arith.addf %1057, %1062 : vector<8x306xf32>
    %c143 = arith.constant 143 : index
    %1064 = memref.load %arg4[%c143] : memref<150xf32, #tpu.memory_space<smem>>
    %1065 = vector.extract_strided_slice %97 {offsets = [2, 0, 0], sizes = [1, 8, 306], strides = [1, 1, 1]} : vector<5x8x306xf32> to vector<1x8x306xf32>
    %1066 = vector.shape_cast %1065 : vector<1x8x306xf32> to vector<8x306xf32>
    %1067 = vector.broadcast %1064 : f32 to vector<8x306xf32>
    %1068 = arith.mulf %1067, %1066 : vector<8x306xf32>
    %1069 = arith.addf %1063, %1068 : vector<8x306xf32>
    %c146 = arith.constant 146 : index
    %1070 = memref.load %arg4[%c146] : memref<150xf32, #tpu.memory_space<smem>>
    %1071 = vector.extract_strided_slice %97 {offsets = [3, 0, 0], sizes = [1, 8, 306], strides = [1, 1, 1]} : vector<5x8x306xf32> to vector<1x8x306xf32>
    %1072 = vector.shape_cast %1071 : vector<1x8x306xf32> to vector<8x306xf32>
    %1073 = vector.broadcast %1070 : f32 to vector<8x306xf32>
    %1074 = arith.mulf %1073, %1072 : vector<8x306xf32>
    %1075 = arith.addf %1069, %1074 : vector<8x306xf32>
    %c149 = arith.constant 149 : index
    %1076 = memref.load %arg4[%c149] : memref<150xf32, #tpu.memory_space<smem>>
    %1077 = vector.extract_strided_slice %97 {offsets = [4, 0, 0], sizes = [1, 8, 306], strides = [1, 1, 1]} : vector<5x8x306xf32> to vector<1x8x306xf32>
    %1078 = vector.shape_cast %1077 : vector<1x8x306xf32> to vector<8x306xf32>
    %1079 = vector.broadcast %1076 : f32 to vector<8x306xf32>
    %1080 = arith.mulf %1079, %1078 : vector<8x306xf32>
    %1081 = arith.addf %1075, %1080 : vector<8x306xf32>
    %cst_82 = arith.constant 3.000000e-01 : f32
    %1082 = vector.broadcast %cst_82 : f32 to vector<8x306xf32>
    %1083 = arith.mulf %1082, %1081 : vector<8x306xf32>
    %1084 = arith.maximumf %1081, %1083 : vector<8x306xf32>
    %c9_83 = arith.constant 9 : index
    %c0_84 = arith.constant 0 : index
    %c0_85 = arith.constant 0 : index
    %1085 = vector.load %arg6[%c9_83, %c0_84, %c0_85] : memref<10x306x64xf32, #tpu.memory_space<vmem>>, vector<1x306x64xf32>
    %1086 = vector.shape_cast %1085 : vector<1x306x64xf32> to vector<306x64xf32>
    %cst_86 = arith.constant dense<0.000000e+00> : vector<8x64xf32>
    %1087 = tpu.matmul %1084, %1086, %cst_86 {dimension_numbers = #tpu.dot_dimension_numbers<[1], [0], [0], [1], [0, 0, 1, 1], [], []>} : vector<8x306xf32>, vector<306x64xf32>, vector<8x64xf32> -> vector<8x64xf32>
    %1088 = arith.addf %989, %1087 : vector<8x64xf32>
    %c0_87 = arith.constant 0 : index
    %c0_88 = arith.constant 0 : index
    %1089 = vector.load %arg7[%c0_87, %c0_88] : memref<1x64xf32, #tpu.memory_space<vmem>>, vector<1x64xf32>
    %1090 = vector.broadcast %1089 : vector<1x64xf32> to vector<8x64xf32>
    %1091 = arith.addf %1088, %1090 : vector<8x64xf32>
    %cst_89 = arith.constant 0.000000e+00 : f32
    %1092 = vector.broadcast %cst_89 : f32 to vector<8x64xf32>
    %1093 = arith.maximumf %1091, %1092 : vector<8x64xf32>
    %c0_90 = arith.constant 0 : index
    %c0_91 = arith.constant 0 : index
    %1094 = vector.load %arg8[%c0_90, %c0_91] : memref<64x5xf32, #tpu.memory_space<vmem>>, vector<64x5xf32>
    %cst_92 = arith.constant dense<0.000000e+00> : vector<8x5xf32>
    %1095 = tpu.matmul %1093, %1094, %cst_92 {dimension_numbers = #tpu.dot_dimension_numbers<[1], [0], [0], [1], [0, 0, 1, 1], [], []>} : vector<8x64xf32>, vector<64x5xf32>, vector<8x5xf32> -> vector<8x5xf32>
    %c0_93 = arith.constant 0 : index
    %c0_94 = arith.constant 0 : index
    %1096 = vector.load %arg9[%c0_93, %c0_94] : memref<1x5xf32, #tpu.memory_space<vmem>>, vector<1x5xf32>
    %1097 = vector.broadcast %1096 : vector<1x5xf32> to vector<8x5xf32>
    %1098 = arith.addf %1095, %1097 : vector<8x5xf32>
    %c0_95 = arith.constant 0 : index
    %c0_96 = arith.constant 0 : index
    %1099 = vector.load %arg10[%c0_95, %c0_96] : memref<8x5xf32, #tpu.memory_space<vmem>>, vector<8x5xf32>
    tpu.vector_store %arg10[%c0_95, %c0_96], %1098 {strides = array<i32>} : memref<8x5xf32, #tpu.memory_space<vmem>>, vector<8x5xf32>,
    return
  }
  func.func @transform_0(%arg0: i32) -> (i32, i32) {
    %c0_i32 = arith.constant 0 : i32
    %c0_i32_0 = arith.constant 0 : i32
    return %arg0, %c0_i32 : i32, i32
  }
  func.func @transform_1(%arg0: i32) -> i32 {
    %c0_i32 = arith.constant 0 : i32
    %c0_i32_0 = arith.constant 0 : i32
    return %c0_i32 : i32
  }
  func.func @transform_2(%arg0: i32) -> i32 {
    %c0_i32 = arith.constant 0 : i32
    %c0_i32_0 = arith.constant 0 : i32
    return %c0_i32 : i32
  }
  func.func @transform_3(%arg0: i32) -> i32 {
    %c0_i32 = arith.constant 0 : i32
    %c0_i32_0 = arith.constant 0 : i32
    return %c0_i32 : i32
  }
  func.func @transform_4(%arg0: i32) -> i32 {
    %c0_i32 = arith.constant 0 : i32
    %c0_i32_0 = arith.constant 0 : i32
    return %c0_i32 : i32
  }
  func.func @transform_5(%arg0: i32) -> (i32, i32, i32) {
    %c0_i32 = arith.constant 0 : i32
    %c0_i32_0 = arith.constant 0 : i32
    %c0_i32_1 = arith.constant 0 : i32
    %c0_i32_2 = arith.constant 0 : i32
    return %c0_i32, %c0_i32_0, %c0_i32_1 : i32, i32, i32
  }
  func.func @transform_6(%arg0: i32) -> (i32, i32) {
    %c0_i32 = arith.constant 0 : i32
    %c0_i32_0 = arith.constant 0 : i32
    %c0_i32_1 = arith.constant 0 : i32
    return %c0_i32, %c0_i32_0 : i32, i32
  }
  func.func @transform_7(%arg0: i32) -> (i32, i32) {
    %c0_i32 = arith.constant 0 : i32
    %c0_i32_0 = arith.constant 0 : i32
    %c0_i32_1 = arith.constant 0 : i32
    return %c0_i32, %c0_i32_0 : i32, i32
  }
  func.func @transform_8(%arg0: i32) -> (i32, i32) {
    %c0_i32 = arith.constant 0 : i32
    %c0_i32_0 = arith.constant 0 : i32
    %c0_i32_1 = arith.constant 0 : i32
    return %c0_i32, %c0_i32_0 : i32, i32
  }
  func.func @transform_9(%arg0: i32) -> (i32, i32) {
    %c0_i32 = arith.constant 0 : i32
    %c0_i32_0 = arith.constant 0 : i32
    return %arg0, %c0_i32 : i32, i32
  }
}

</mosaic_0001>

<bundles_post_ra>
// kernel: conv_eeg_forward.1
= control target key start
LH: loop header
LB: loop body
LE: loop exit
PB: predicated region body
PF: predicated region fallthrough
CT: control target
= control target key end

     0   :  { %14 = vsyncpa [#allocation3], 0  ;;  %s10640_s0 = inlined_call_operand.vmem [shape: f32[8,310], index: 0, kind: input, shape index: {}]   ;;  %s10641_s1 = inlined_call_operand.vmem [shape: f32[15], index: 1, kind: input, shape index: {}]   ;;  %s10642_s2 = inlined_call_operand.vmem [shape: f32[5], index: 2, kind: input, shape index: {}]   ;;  %s10643_s3 = inlined_call_operand.vmem [shape: f32[150], index: 3, kind: input, shape index: {}]   ;;  %s10644_s4 = inlined_call_operand.vmem [shape: f32[10], index: 4, kind: input, shape index: {}]   ;;  %s10645_s5 = inlined_call_operand.vmem [shape: f32[10,306,64], index: 5, kind: input, shape index: {}]   ;;  %s10646_s6 = inlined_call_operand.vmem [shape: f32[1,64], index: 6, kind: input, shape index: {}]   ;;  %s10647_s7 = inlined_call_operand.vmem [shape: f32[64,5], index: 7, kind: input, shape index: {}]   ;;  %s10648_s8 = inlined_call_operand.vmem [shape: f32[1,5], index: 8, kind: input, shape index: {}]   ;;  %s10649_s9 = inlined_call_operand.vmem [shape: f32[8,5], index: 9, kind: output, shape index: {}]  }
   0x1   :  { %15 = vsyncpa [#allocation5], 0  ;;  %s35_s11 = sshll.u32 %s10642_s2, 4  ;;  %s36_s11 = int_to_ptr.vmem [resolvable:$true] %s35_s11 }
   0x2   :  { %16 = vsyncpa [#allocation8], 0  ;;  %s25_s14 = sshll.u32 %s10641_s1, 4  ;;  %s6227_s15 = scalar_lea.vmem %s36_s11, 16  ;;  %s26_s14 = int_to_ptr.vmem [resolvable:$true] %s25_s14 }
   0x3   :  { %p6228_p0 = scmp.ne.s32.totalorder %s36_s11, %s6227_s15  ;;  %p6232_p1 = scmp.lt.s32.totalorder %s36_s11, %s36_s11 }
   0x4   :  { %p6233_p2 = scmp.lt.s32.totalorder %s6227_s15, %s6227_s15 }
   0x6   :  { %p6234_p3 = por %p6233_p2, %p6232_p1 }
   0x8   :  { %p6235_p4 = pnand %p6234_p3, %p6228_p0 }
   0xa   :  { %6238 = shalt.err (!%p6235_p4)
}
   0xb   :  { %s6281_s16 = smov [#allocation4]   ;;  %s6239_s17 = scalar_lea.vmem %s26_s14, 16 }
   0xc   :  { %38 = dma.vmem_to_smem %s36_s11, 16, %s6281_s16, [#allocation5]  }
   0xd   :  { %p6240_p5 = scmp.ne.s32.totalorder %s26_s14, %s6239_s17  ;;  %p6244_p6 = scmp.lt.s32.totalorder %s26_s14, %s26_s14 }
   0xe   :  { %p6245_p7 = scmp.lt.s32.totalorder %s6239_s17, %s6239_s17 }
  0x10   :  { %p6246_p8 = por %p6245_p7, %p6244_p6 }
  0x12   :  { %p6247_p9 = pnand %p6246_p8, %p6240_p5 }
  0x14   :  { %6250 = shalt.err (!%p6247_p9)
}
  0x15   :  { %s6282_s2 = smov [#allocation2]   ;;  %s45_s19 = sshll.u32 %s10643_s3, 4  ;;  %s46_s19 = int_to_ptr.vmem [resolvable:$true] %s45_s19 }
  0x16   :  { %28 = dma.vmem_to_smem %s26_s14, 16, %s6282_s2, [#allocation3]  }
  0x17   :  { %s55_s22 = sshll.u32 %s10644_s4, 4  ;;  %s6251_s23 = scalar_lea.vmem %s46_s19, 32  ;;  %s56_s22 = int_to_ptr.vmem [resolvable:$true] %s55_s22 }
  0x18   :  { %p6252_p10 = scmp.ne.s32.totalorder %s46_s19, %s6251_s23  ;;  %p6256_p11 = scmp.lt.s32.totalorder %s46_s19, %s46_s19 }
  0x19   :  { %p6257_p12 = scmp.lt.s32.totalorder %s6251_s23, %s6251_s23 }
  0x1b   :  { %p6258_p13 = por %p6257_p12, %p6256_p11 }
  0x1d   :  { %p6259_p0 = pnand %p6258_p13, %p6252_p10 }
  0x1f   :  { %6262 = shalt.err (!%p6259_p0)
}
  0x20   :  { %s6283_s24 = smov [#allocation6]   ;;  %s6263_s25 = scalar_lea.vmem %s56_s22, 16 }
  0x21   :  { %48 = dma.vmem_to_smem %s46_s19, 32, %s6283_s24, [#allocation5]  }
  0x22   :  { %p6264_p1 = scmp.ne.s32.totalorder %s56_s22, %s6263_s25  ;;  %p6268_p2 = scmp.lt.s32.totalorder %s56_s22, %s56_s22 }
  0x23   :  { %p6269_p3 = scmp.lt.s32.totalorder %s6263_s25, %s6263_s25 }
  0x25   :  { %p6270_p4 = por %p6269_p3, %p6268_p2 }
  0x27   :  { %p6271_p5 = pnand %p6270_p4, %p6264_p1 }
  0x29   :  { %6274 = shalt.err (!%p6271_p5)
}
  0x2a   :  { %s6284_s3 = smov [#allocation7]  }
  0x2b   :  { %58 = dma.vmem_to_smem %s56_s22, 16, %s6284_s3, [#allocation8]  }
  0x2c   :  { %6275 = dma.done.wait [#allocation3], 16  }
  0x2d   :  { %6276 = vsyncadd [#allocation3], 4294967280 }
  0x2e   :  { %6277 = dma.done.wait [#allocation5], 48  }
  0x2f   :  { %6278 = vsyncadd [#allocation5], 4294967248 }
  0x30   :  { %6279 = dma.done.wait [#allocation8], 16  }
  0x31   :  { %6280 = vsyncadd [#allocation8], 4294967280 }
  0x32   :  { %79 = sfence }
  0x33   :  { %s5045_s4 = sld [smem:[#allocation2 + $0x4]]  ;;  %v6354_v0 = vld [vmem:[%s10640_s0 + $0x10] sm:$0xff]  ;;  %s6285_s14 = smov 127   ;;  %v6377_v21 = vld [vmem:[%s10640_s0] sm:$0xff]  ;;  %v6382_v22 = vld [vmem:[%s10640_s0 + $0x8] sm:$0xff]  ;;  %vm1004_vm0 = vcmask 1041408  }
  0x34   :  { %s5041_s26 = sld [smem:[#allocation2 + $0x1]]  ;;  %s6286_s17 = smov 126   ;;  %vm6288_vm1 = vmmov 0   ;;  %vm107_vm2 = vcmask 1039360   ;;  %vm130_vm3 = vcmask 1031168   ;;  %vm1000_vm4 = vcmask 408576  }
  0x35   :  { %s5046_s27 = sld [smem:[#allocation2 + $0x5]]  ;;  %vm4958_vm5 = vcmask 523264   ;;  %vm5032_vm6 = vcmask 39936  }
  0x36   :  { %s5042_s28 = sld [smem:[#allocation2 + $0x2]] }
  0x37   :  { %s5050_s10 = sld [smem:[#allocation2 + $0x8]] }
  0x38   :  { %s5049_s11 = sld [smem:[#allocation2 + $0x7]] }
  0x39   :  { %v156_v1 = vstv %s5045_s4  ;;  %s5054_s12 = sld [smem:[#allocation2 + $0xb]] }
  0x3a   :  { %v159_v2 = vmul.f32 %v156_v1, %v6354_v0  ;;  %v94_v3 = vstv %s5041_s26  ;;  %s5053_s13 = sld [smem:[#allocation2 + $0xa]]  ;;  %v158_v25 = vmul.f32 %v156_v1, %v6382_v22  ;;  %v157_v27 = vmul.f32 %v156_v1, %v6377_v21 }
  0x3b   :  { %v97_v4 = vmul.f32 %v94_v3, %v6354_v0  ;;  %v178_v5 = vstv %s5046_s27  ;;  %s5058_s15 = sld [smem:[#allocation2 + $0xe]]  ;;  %v95_v23 = vmul.f32 %v94_v3, %v6377_v21  ;;  %v96_v24 = vmul.f32 %v94_v3, %v6382_v22 }
  0x3c   :  { %167 = vrot.lane.b32.xlu1 %v159_v2, %s6285_s14  ;;  %v181_v6 = vmul.f32 %v178_v5, %v6354_v0  ;;  %v117_v7 = vstv %s5042_s28  ;;  %s5057_s16 = sld [smem:[#allocation2 + $0xd]]  ;;  %v180_v30 = vmul.f32 %v178_v5, %v6382_v22  ;;  %v179_v32 = vmul.f32 %v178_v5, %v6377_v21 }
  0x3d   :  { %105 = vrot.lane.b32.xlu0 %v97_v4, %s6285_s14  ;;  %v120_v8 = vmul.f32 %v117_v7, %v6354_v0  ;;  %v238_v9 = vstv %s5050_s10  ;;  %v119_v26 = vmul.f32 %v117_v7, %v6382_v22  ;;  %v118_v28 = vmul.f32 %v117_v7, %v6377_v21  ;;  %s5044_s0 = sld [smem:[#allocation2 + $0x3]] }
  0x3e   :  { %v216_v10 = vstv %s5049_s11  ;;  %v241_v11 = vmul.f32 %v238_v9, %v6354_v0  ;;  %v240_v34 = vmul.f32 %v238_v9, %v6382_v22  ;;  %v239_v36 = vmul.f32 %v238_v9, %v6377_v21  ;;  %s84_s20 = sld [smem:[#allocation2]] }
  0x3f   :  { %v219_v12 = vmul.f32 %v216_v10, %v6354_v0  ;;  %v298_v13 = vstv %s5054_s12  ;;  %v218_v29 = vmul.f32 %v216_v10, %v6382_v22  ;;  %v217_v31 = vmul.f32 %v216_v10, %v6377_v21  ;;  %s5043_s21 = sld [smem:[#allocation4 + $0x1]] }
  0x40   :  { %189 = vrot.lane.b32.xlu1 %v181_v6, %s6286_s17  ;;  %v276_v14 = vstv %s5053_s13  ;;  %v301_v15 = vmul.f32 %v298_v13, %v6354_v0  ;;  %v300_v38 = vmul.f32 %v298_v13, %v6382_v22  ;;  %v299_v40 = vmul.f32 %v298_v13, %v6377_v21  ;;  %s83_s22 = sld [smem:[#allocation4]] }
  0x41   :  { %128 = vrot.lane.b32.xlu0 %v120_v8, %s6286_s17  ;;  %v279_v16 = vmul.f32 %v276_v14, %v6354_v0  ;;  %v358_v17 = vstv %s5058_s15  ;;  %v278_v33 = vmul.f32 %v276_v14, %v6382_v22  ;;  %v277_v35 = vmul.f32 %v276_v14, %v6377_v21  ;;  %s5048_s23 = sld [smem:[#allocation2 + $0x6]] }
  0x42   :  { %v336_v18 = vstv %s5057_s16  ;;  %v361_v19 = vmul.f32 %v358_v17, %v6354_v0  ;;  %v359_v41 = vmul.f32 %v358_v17, %v6377_v21  ;;  %v360_v42 = vmul.f32 %v358_v17, %v6382_v22  ;;  %s5047_s24 = sld [smem:[#allocation4 + $0x2]] }
  0x43   :  { %v339_v20 = vmul.f32 %v336_v18, %v6354_v0  ;;  %v338_v37 = vmul.f32 %v336_v18, %v6382_v22  ;;  %v337_v39 = vmul.f32 %v336_v18, %v6377_v21  ;;  %v6426_v43 = vstv %s5044_s0  ;;  %s5052_s25 = sld [smem:[#allocation2 + $0x9]] }
  0x44   :  { %249 = vrot.lane.b32.xlu1 %v241_v11, %s6286_s17  ;;  %v150_v44 = vmul.f32 %v6426_v43, %v6354_v0  ;;  %v6430_v45 = vstv %s84_s20  ;;  %s5051_s3 = sld [smem:[#allocation4 + $0x3]] }
  0x45   :  { %227 = vrot.lane.b32.xlu0 %v219_v12, %s6285_s14  ;;  %v6432_v46 = vstv %s5043_s21  ;;  %v88_v47 = vmul.f32 %v6430_v45, %v6354_v0  ;;  %s5056_s4 = sld [smem:[#allocation2 + $0xc]] }
  0x46   :  { %v154_v48 = vadd.f32 %v6432_v46, %v150_v44  ;;  %v6437_v49 = vstv %s83_s22  ;;  %s5080_s26 = sld [smem:[#allocation6 + $0x13]]  ;;  %v5125_v44 = vld [vmem:[%s10645_s5 + $0x258] sm:$0xff] }
  0x47   :  { %v6439_v50 = vstv %s5048_s23  ;;  %v92_v52 = vadd.f32 %v6437_v49, %v88_v47  ;;  %s5079_s27 = sld [smem:[#allocation6 + $0x10]] }
  0x48   :  { %309 = vrot.lane.b32.xlu1 %v301_v15, %s6286_s17  ;;  %v210_v55 = vmul.f32 %v6439_v50, %v6354_v0  ;;  %v6449_v56 = vstv %s5047_s24  ;;  %s5055_s28 = sld [smem:[#allocation4 + $0x4]] }
  0x49   :  { %287 = vrot.lane.b32.xlu0 %v279_v16, %s6285_s14  ;;  %v6451_v57 = vstv %s5052_s25  ;;  %s5081_s29 = sld [smem:[#allocation6 + $0x16]] }
  0x4a   :  { %v214_v63 = vadd.f32 %v6449_v56, %v210_v55  ;;  %v270_v1 = vmul.f32 %v6451_v57, %v6354_v0  ;;  %v6463_v3 = vstv %s5051_s3  ;;  %s5082_s30 = sld [smem:[#allocation6 + $0x19]] }
  0x4b   :  { %v6465_v4 = vstv %s5056_s4  ;;  %s6498_s10 = sld [smem:[#allocation6 + $0x1c]] }
  0x4c   :  { %369 = vrot.lane.b32.xlu1 %v361_v19, %s6286_s17  ;;  %v6469_v7 = vstv %s5080_s26  ;;  %v274_v13 = vadd.f32 %v6463_v3, %v270_v1  ;;  %v330_v14 = vmul.f32 %v6465_v4, %v6354_v0  ;;  %s5084_s11 = sld [smem:[#allocation6 + $0x11]] }
  0x4d   :  { %347 = vrot.lane.b32.xlu0 %v339_v20, %s6285_s14  ;;  %v6475_v10 = vstv %s5079_s27  ;;  %s6515_s15 = sld [smem:[#allocation6 + $0x14]] }
  0x4e   :  { %v6485_v16 = vstv %s5055_s28  ;;  %s5086_s16 = sld [smem:[#allocation6 + $0x17]] }
  0x4f   :  { %s6535_s18 = sld [smem:[#allocation6 + $0x1a]] }
  0x50   :  { %101 = vrot.lane.b32.xlu1 %v95_v23, %s6285_s14  ;;  %s6545_s20 = sld [smem:[#allocation6 + $0x1d]] }
  0x51   :  { %103 = vrot.lane.b32.xlu0 %v96_v24, %s6285_s14  ;;  %v334_v24 = vadd.f32 %v6485_v16, %v330_v14  ;;  %v6541_v47 = vstv %s6498_s10  ;;  %s6559_s21 = sld [smem:[#allocation6 + $0x4]] }
  0x52   :  { %s6570_s24 = sld [smem:[#allocation6 + $0x1]] }
  0x53   :  { %s6586_s4 = sld [smem:[#allocation6 + $0xa]] }
  0x54   :  { %165 = vrot.lane.b32.xlu1 %v158_v25, %s6285_s14  ;;  %v6500_v25 = vstv %s5081_s29  ;;  %v6568_v1 = vstv %s5086_s16  ;;  %s6601_s28 = sld [smem:[#allocation6 + $0x7]] }
  0x55   :  { %126 = vrot.lane.b32.xlu0 %v119_v26, %s6286_s17  ;;  %s6621_s10 = sld [smem:[#allocation6 + $0x2]] }
  0x56   :  { %s6643_s12 = sld [smem:[#allocation6 + $0x8]] }
  0x57   :  { %s6651_s13 = sld [smem:[#allocation6 + $0x5]] }
  0x58   :  { %163 = vrot.lane.b32.xlu1 %v157_v27, %s6285_s14  ;;  %s6733_s16 = sld [smem:[#allocation6 + $0xf]] }
  0x59   :  { %124 = vrot.lane.b32.xlu0 %v118_v28, %s6286_s17  ;;  %s6757_s2 = sld [smem:[#allocation7 + $0x1]] }
  0x5a   :  { %s6763_s1 = sld [smem:[#allocation6 + $0x12]] }
  0x5b   :  { %s5077_s19 = sld [smem:[#allocation6 + $0x18]] }
  0x5c   :  { %225 = vrot.lane.b32.xlu1 %v218_v29, %s6285_s14  ;;  %s5132_s22 = sld [smem:[#allocation7 + $0x2]] }
  0x5d   :  { %187 = vrot.lane.b32.xlu0 %v180_v30, %s6286_s17  ;;  %v5127_v30 = vld [vmem:[%s10645_s5 + $0x268] sm:$0x3]  ;;  %s5133_s23 = sld [smem:[#allocation6 + $0x1e]] }
  0x5e   :  { %s5135_s25 = sld [smem:[#allocation6 + $0x24]] }
  0x5f   :  { %s5136_s3 = sld [smem:[#allocation6 + $0x27]] }
  0x60   :  { %223 = vrot.lane.b32.xlu1 %v217_v31, %s6285_s14  ;;  %s5072_s26 = sld [smem:[#allocation6 + $0xe]] }
  0x61   :  { %185 = vrot.lane.b32.xlu0 %v179_v32, %s6286_s17  ;;  %s6922_s27 = sld [smem:[#allocation7 + $0x4]] }
  0x62   :  { %s7084_s29 = sld [smem:[#allocation6 + $0x28]] }
  0x63   :  { %s7327_s0 = sld [smem:[#allocation6 + $0x9]] }
  0x64   :  { %285 = vrot.lane.b32.xlu1 %v278_v33, %s6285_s14 }
  0x65   :  { %247 = vrot.lane.b32.xlu0 %v240_v34, %s6286_s17  ;;  %v10650_v34 = vmov 0.0  }
  0x66   :  { %6030 = vmatprep.subr.mxu1 %v10650_v34  ;;  %6044 = vmatprep.mubr.msk.f32.mxu1 %vm6288_vm1, %v10650_v34 }
  0x67   :  { %6031 = vmatpush3.msk.msra.mxu1 %vm1004_vm0, %v5127_v30 }
  0x68   :  { %283 = vrot.lane.b32.xlu1 %v277_v35, %s6285_s14  ;;  %v6518_v35 = vstv %s5082_s30  ;;  %6032 = vmatprep.subr.mxu1 %v10650_v34  ;;  %s7150_s30 = sld [smem:[#allocation6 + $0x5d]] }
  0x69   :  { %245 = vrot.lane.b32.xlu0 %v239_v36, %s6286_s17 }
  0x6c   :  { %345 = vrot.lane.b32.xlu1 %v338_v37, %s6285_s14 }
  0x6d   :  { %307 = vrot.lane.b32.xlu0 %v300_v38, %s6286_s17 }
  0x70   :  { %343 = vrot.lane.b32.xlu1 %v337_v39, %s6285_s14 }
  0x71   :  { %305 = vrot.lane.b32.xlu0 %v299_v40, %s6286_s17  ;;  %v5126_v40 = vld [vmem:[%s10645_s5 + $0x260] sm:$0xff] }
  0x72   :  { %6033 = vmatpush3.msra.mxu1 %v5126_v40  ;;  %v6627_v40 = vstv %s6559_s21  ;;  %s5078_s21 = sld [smem:[#allocation6 + $0x1b]] }
  0x73   :  { %6034 = vmatprep.subr.mxu1 %v10650_v34 }
  0x74   :  { %365 = vrot.lane.b32.xlu1 %v359_v41, %s6286_s17  ;;  %6035 = vmatpush3.msra.mxu1 %v5125_v44  ;;  %v148_v44 = vmul.f32 %v6426_v43, %v6377_v21 }
  0x75   :  { %367 = vrot.lane.b32.xlu0 %v360_v42, %s6286_s17  ;;  %6036 = vmatprep.subr.mxu1 %v10650_v34 }
  0xae   :  { %v6441_v51 = vpop.permute.xlu1 %167 }
  0xaf   :  { %v176_v53 = vadd.f32 %v6441_v51, %v154_v48  ;;  %v6445_v54 = vpop.permute.xlu0 %105  ;;  %v6543_v48 = vstv %s5084_s11  ;;  %s6632_s11 = sld [smem:[#allocation6 + $0xd]] }
  0xb0   :  { %v115_v58 = vadd.f32 %v6445_v54, %v92_v52 }
  0xb2   :  { %v6454_v59 = vpop.permute.xlu1 %189 }
  0xb3   :  { %v198_v60 = vadd.f32 %v6454_v59, %v176_v53  ;;  %v6457_v61 = vpop.permute.xlu0 %128 }
  0xb4   :  { %v138_v62 = vadd.f32 %v6457_v61, %v115_v58 }
  0xb5   :  { %v201_v2 = vmul.f32 0.3, %v198_v60 }
  0xb6   :  { %v141_v5 = vmul.f32 0.3, %v138_v62  ;;  %v6467_v6 = vpop.permute.xlu1 %249 }
  0xb7   :  { %v6471_v8 = vmax.f32 %v198_v60, %v201_v2  ;;  %v6473_v9 = vpop.permute.xlu0 %227 }
  0xb8   :  { %v6477_v11 = vmax.f32 %v138_v62, %v141_v5  ;;  %v236_v12 = vadd.f32 %v6473_v9, %v214_v63  ;;  %v5124_v62 = vld [vmem:[%s10645_s5 + $0x250] sm:$0xff]  ;;  %v6566_v63 = vstv %s6515_s15  ;;  %v5123_v5 = vld [vmem:[%s10645_s5 + $0x248] sm:$0xff]  ;;  %s6671_s15 = sld [smem:[#allocation6 + $0xb]] }
  0xb9   :  { %v760_v15 = vmul.f32 %v6469_v7, %v6471_v8  ;;  %6037 = vmatpush3.msra.mxu1 %v5124_v62 }
  0xba   :  { %v258_v17 = vadd.f32 %v6467_v6, %v236_v12  ;;  %v6488_v18 = vpop.permute.xlu1 %309  ;;  %v738_v19 = vmul.f32 %v6475_v10, %v6477_v11  ;;  %v848_v60 = vmul.f32 %v6543_v48, %v6477_v11  ;;  %6038 = vmatprep.subr.mxu1 %v10650_v34 }
  0xbb   :  { %v6492_v20 = vpop.permute.xlu0 %287  ;;  %768 = vrot.lane.b32.xlu1 %v760_v15, %s6285_s14  ;;  %6039 = vmatpush3.msra.mxu1 %v5123_v5  ;;  %v5122_v15 = vld [vmem:[%s10645_s5 + $0x240] sm:$0xff] }
  0xbc   :  { %v261_v23 = vmul.f32 0.3, %v258_v17  ;;  %v296_v0 = vadd.f32 %v6492_v20, %v274_v13  ;;  %746 = vrot.lane.b32.xlu0 %v738_v19, %s6285_s14  ;;  %v870_v13 = vmul.f32 %v6566_v63, %v6471_v8  ;;  %v86_v19 = vmul.f32 %v6430_v45, %v6377_v21  ;;  %6040 = vmatprep.subr.mxu1 %v10650_v34 }
  0xbd   :  { %6041 = vmatpush3.msra.mxu1 %v5122_v15 }
  0xbe   :  { %v6502_v26 = vmax.f32 %v258_v17, %v261_v23  ;;  %v318_v27 = vadd.f32 %v6488_v18, %v296_v0  ;;  %v6505_v28 = vpop.permute.xlu1 %369  ;;  %v87_v17 = vmul.f32 %v6430_v45, %v6382_v22  ;;  %v6596_v23 = vstv %s6535_s18  ;;  %v5121_v45 = vld [vmem:[%s10645_s5 + $0x238] sm:$0xff]  ;;  %6042 = vmatprep.subr.mxu1 %v10650_v34  ;;  %s5076_s18 = sld [smem:[#allocation6 + $0x15]] }
  0xbf   :  { %v6507_v29 = vpop.permute.xlu0 %347  ;;  %v6599_v0 = vstv %s6545_s20  ;;  %6043 = vmatpush3.msra.mxu1 %v5121_v45  ;;  %s7879_s20 = sld [smem:[#allocation6 + $0x49]] }
  0xc0   :  { %v321_v31 = vmul.f32 0.3, %v318_v27  ;;  %v356_v32 = vadd.f32 %v6507_v29, %v334_v24  ;;  %v782_v33 = vmul.f32 %v6500_v25, %v6502_v26  ;;  %v892_v14 = vmul.f32 %v6568_v1, %v6502_v26 }
  0xc2   :  { %v6521_v36 = vmax.f32 %v318_v27, %v321_v31  ;;  %v378_v37 = vadd.f32 %v6505_v28, %v356_v32  ;;  %790 = vrot.lane.b32.xlu0 %v782_v33, %s6285_s14  ;;  %v6525_v38 = vpop.permute.xlu1 %101  ;;  %v149_v27 = vmul.f32 %v6426_v43, %v6382_v22  ;;  %v91_v33 = vadd.f32 %v6437_v49, %v87_v17 }
  0xc3   :  { %v6528_v39 = vpop.permute.xlu0 %103  ;;  %v269_v43 = vmul.f32 %v6451_v57, %v6382_v22  ;;  %v6666_v17 = vstv %s6586_s4  ;;  %s5137_s4 = sld [smem:[#allocation6 + $0x2a]] }
  0xc4   :  { %v381_v41 = vmul.f32 0.3, %v378_v37  ;;  %v804_v42 = vmul.f32 %v6518_v35, %v6521_v36  ;;  %v914_v31 = vmul.f32 %v6596_v23, %v6521_v36 }
  0xc6   :  { %v6548_v52 = vmax.f32 %v378_v37, %v381_v41  ;;  %812 = vrot.lane.b32.xlu1 %v804_v42, %s6285_s14  ;;  %v6551_v53 = vpop.permute.xlu1 %165  ;;  %v90_v37 = vadd.f32 %v6437_v49, %v86_v19  ;;  %v6630_v41 = vstv %s6570_s24  ;;  %v109_v42 = vsel %vm107_vm2, %v6528_v39, %v6445_v54  ;;  %s5134_s24 = sld [smem:[#allocation6 + $0x21]] }
  0xc7   :  { %v6553_v55 = vpop.permute.xlu0 %126  ;;  %v153_v54 = vadd.f32 %v6432_v46, %v149_v27  ;;  %v170_v15 = vsel %vm107_vm2, %v6551_v53, %v6441_v51  ;;  %v6669_v19 = vstv %s6601_s28  ;;  %s5247_s28 = sld [smem:[#allocation6 + $0x3c]] }
  0xc8   :  { %v826_v58 = vmul.f32 %v6541_v47, %v6548_v52  ;;  %v936_v32 = vmul.f32 %v6599_v0, %v6548_v52  ;;  %v132_v5 = vsel %vm130_vm3, %v6553_v55, %v6457_v61 }
  0xca   :  { %834 = vrot.lane.b32.xlu0 %v826_v58, %s6285_s14  ;;  %856 = vrot.lane.b32.xlu1 %v848_v60, %s6286_s17  ;;  %v6574_v2 = vpop.permute.xlu1 %163  ;;  %v209_v58 = vmul.f32 %v6439_v50, %v6382_v22  ;;  %v108_v60 = vsel %vm107_vm2, %v6525_v38, %v6528_v39  ;;  %v431_v38 = vmul.f32 %v6630_v41, %v6477_v11 }
  0xcb   :  { %v6579_v12 = vpop.permute.xlu0 %124  ;;  %v114_v39 = vadd.f32 %v109_v42, %v91_v33  ;;  %v113_v61 = vadd.f32 %v108_v60, %v90_v37  ;;  %v175_v37 = vadd.f32 %v170_v15, %v153_v54  ;;  %v169_v42 = vsel %vm107_vm2, %v6574_v2, %v6551_v53 }
  0xcc   :  { %v213_v45 = vadd.f32 %v6449_v56, %v209_v58  ;;  %v131_v51 = vsel %vm130_vm3, %v6579_v12, %v6553_v55  ;;  %v475_v58 = vmul.f32 %v6669_v19, %v6502_v26  ;;  %v6695_v12 = vstv %s6621_s10  ;;  %s5248_s10 = sld [smem:[#allocation6 + $0x3f]] }
  0xcd   :  { %v6698_v60 = vstv %s6632_s11  ;;  %v136_v54 = vadd.f32 %v131_v51, %v113_v61  ;;  %v329_v2 = vmul.f32 %v6465_v4, %v6382_v22  ;;  %v541_v22 = vmul.f32 %v6695_v12, %v6477_v11  ;;  %s6931_s11 = sld [smem:[#allocation6 + $0x42]] }
  0xce   :  { %878 = vrot.lane.b32.xlu0 %v870_v13, %s6286_s17  ;;  %900 = vrot.lane.b32.xlu1 %v892_v14, %s6286_s17  ;;  %v6608_v24 = vpop.permute.xlu1 %225  ;;  %v208_v13 = vmul.f32 %v6439_v50, %v6377_v21  ;;  %v453_v14 = vmul.f32 %v6627_v40, %v6471_v8  ;;  %v152_v50 = vadd.f32 %v6432_v46, %v148_v44 }
  0xcf   :  { %v6615_v30 = vpop.permute.xlu0 %187  ;;  %v273_v46 = vadd.f32 %v6463_v3, %v269_v43  ;;  %v497_v44 = vmul.f32 %v6666_v17, %v6521_v36  ;;  %v519_v61 = vmul.f32 %v6698_v60, %v6548_v52  ;;  %v328_v51 = vmul.f32 %v6465_v4, %v6377_v21 }
  0xd0   :  { %v212_v55 = vadd.f32 %v6449_v56, %v208_v13  ;;  %v174_v13 = vadd.f32 %v169_v42, %v152_v50 }
  0xd2   :  { %922 = vrot.lane.b32.xlu0 %v914_v31, %s6286_s17  ;;  %944 = vrot.lane.b32.xlu1 %v936_v32, %s6286_s17  ;;  %v224_v49 = vpop.permute.xlu1 %223  ;;  %v137_v31 = vadd.f32 %v132_v5, %v114_v39  ;;  %v192_v32 = vsel %vm130_vm3, %v6615_v30, %v6454_v59  ;;  %v268_v59 = vmul.f32 %v6451_v57, %v6377_v21  ;;  %v6705_v5 = vstv %s6643_s12  ;;  %s7095_s12 = sld [smem:[#allocation6 + $0x20]] }
  0xd3   :  { %v186_v62 = vpop.permute.xlu0 %185  ;;  %v197_v43 = vadd.f32 %v192_v32, %v175_v37  ;;  %v230_v57 = vsel %vm107_vm2, %v6608_v24, %v6473_v9  ;;  %v229_v15 = vsel %vm107_vm2, %v224_v49, %v6608_v24  ;;  %v6727_v32 = vstv %s6671_s15  ;;  %s7476_s15 = sld [smem:[#allocation6 + $0x84]] }
  0xd4   :  { %v140_v56 = vmul.f32 0.3, %v137_v31  ;;  %v191_v39 = vsel %vm130_vm3, %v186_v62, %v6615_v30  ;;  %v272_v9 = vadd.f32 %v6463_v3, %v268_v59  ;;  %v139_v30 = vmul.f32 0.3, %v136_v54 }
  0xd5   :  { %v200_v62 = vmul.f32 0.3, %v197_v43  ;;  %v235_v37 = vadd.f32 %v230_v57, %v213_v45  ;;  %v196_v3 = vadd.f32 %v191_v39, %v174_v13  ;;  %v234_v42 = vadd.f32 %v229_v15, %v212_v55 }
  0xd6   :  { %461 = vrot.lane.b32.xlu0 %v453_v14, %s6285_s14  ;;  %439 = vrot.lane.b32.xlu1 %v431_v38, %s6285_s14  ;;  %v286_v27 = vpop.permute.xlu1 %285  ;;  %v6711_v38 = vstv %s6651_s13  ;;  %v585_v59 = vmul.f32 %v6705_v5, %v6502_v26  ;;  %v607_v55 = vmul.f32 %v6727_v32, %v6521_v36  ;;  %s7103_s13 = sld [smem:[#allocation6 + $0x2b]] }
  0xd7   :  { %v248_v33 = vpop.permute.xlu0 %247  ;;  %v563_v49 = vmul.f32 %v6711_v38, %v6471_v8  ;;  %v290_v21 = vsel %vm107_vm2, %v286_v27, %v6492_v20  ;;  %v6749_v20 = vmax.f32 %v136_v54, %v139_v30  ;;  %v6751_v13 = vmax.f32 %v197_v43, %v200_v62 }
  0xd8   :  { %v252_v50 = vsel %vm130_vm3, %v248_v33, %v6467_v6  ;;  %v6735_v6 = vmax.f32 %v137_v31, %v140_v56  ;;  %v333_v31 = vadd.f32 %v6485_v16, %v329_v2  ;;  %v332_v56 = vadd.f32 %v6485_v16, %v328_v51 }
  0xda   :  { %505 = vrot.lane.b32.xlu0 %v497_v44, %s6285_s14  ;;  %483 = vrot.lane.b32.xlu1 %v475_v58, %s6285_s14  ;;  %v284_v53 = vpop.permute.xlu1 %283  ;;  %v257_v44 = vadd.f32 %v252_v50, %v235_v37  ;;  %v430_v16 = vmul.f32 %v6630_v41, %v6735_v6  ;;  %v429_v50 = vmul.f32 %v6630_v41, %v6749_v20 }
  0xdb   :  { %v246_v14 = vpop.permute.xlu0 %245  ;;  %v289_v58 = vsel %vm107_vm2, %v284_v53, %v286_v27  ;;  %v199_v53 = vmul.f32 0.3, %v196_v3 }
  0xdc   :  { %v251_v45 = vsel %vm130_vm3, %v246_v14, %v248_v33  ;;  %v295_v33 = vadd.f32 %v290_v21, %v273_v46  ;;  %v260_v54 = vmul.f32 0.3, %v257_v44 }
  0xdd   :  { %v256_v14 = vadd.f32 %v251_v45, %v234_v42 }
  0xde   :  { %549 = vrot.lane.b32.xlu0 %v541_v22, %s6286_s17  ;;  %527 = vrot.lane.b32.xlu1 %v519_v61, %s6285_s14  ;;  %v346_v24 = vpop.permute.xlu1 %345  ;;  %v452_v61 = vmul.f32 %v6627_v40, %v6751_v13 }
  0xdf   :  { %v308_v4 = vpop.permute.xlu0 %307  ;;  %v350_v46 = vsel %vm107_vm2, %v346_v24, %v6507_v29  ;;  %v6774_v29 = vmax.f32 %v196_v3, %v199_v53  ;;  %v259_v51 = vmul.f32 0.3, %v256_v14 }
  0xe0   :  { %v312_v57 = vsel %vm130_vm3, %v308_v4, %v6488_v18  ;;  %v294_v18 = vadd.f32 %v289_v58, %v272_v9  ;;  %v6772_v9 = vstv %s6733_s16  ;;  %v355_v30 = vadd.f32 %v350_v46, %v333_v31  ;;  %s8352_s16 = sld [smem:[#allocation6 + $0x30]] }
  0xe1   :  { %v317_v39 = vadd.f32 %v312_v57, %v295_v33  ;;  %10711 = vst [vmem:[#allocation12_spill] sm:$0xff] %v6774_v29  ;;  %v696_v3 = vmul.f32 %v6772_v9, %v6735_v6  ;;  %v6788_v45 = vmax.f32 %v256_v14, %v259_v51  ;;  %v6800_v33 = vstv %s6763_s1  ;;  %s7178_s1 = sld [smem:[#allocation6 + $0x63]] }
  0xe2   :  { %593 = vrot.lane.b32.xlu0 %v585_v59, %s6286_s17  ;;  %571 = vrot.lane.b32.xlu1 %v563_v49, %s6286_s17  ;;  %v344_v27 = vpop.permute.xlu1 %343  ;;  %v6793_v59 = vstv %s6757_s2  ;;  %v6819_v46 = vstv %s5077_s19  ;;  %s6950_s19 = sld [smem:[#allocation6 + $0x1f]] }
  0xe3   :  { %v306_v2 = vpop.permute.xlu0 %305  ;;  %v349_v15 = vsel %vm107_vm2, %v344_v27, %v346_v24  ;;  %v6776_v24 = vmax.f32 %v257_v44, %v260_v54  ;;  %v320_v49 = vmul.f32 0.3, %v317_v39  ;;  %v684_v44 = vld [vmem:[%s10645_s5 + $0xf8] sm:$0xff]  ;;  %v700_v27 = vadd.f32 %v6793_v59, %v696_v3  ;;  %s7108_s2 = sld [smem:[#allocation6 + $0x26]] }
  0xe4   :  { %v311_v43 = vsel %vm130_vm3, %v306_v2, %v308_v4  ;;  %v354_v42 = vadd.f32 %v349_v15, %v332_v56  ;;  %5634 = vmatprep.subr.mxu1 %v684_v44  ;;  %v473_v14 = vmul.f32 %v6669_v19, %v6788_v45 }
  0xe5   :  { %v316_v62 = vadd.f32 %v311_v43, %v294_v18  ;;  %10712 = vst [vmem:[#allocation13_spill] sm:$0xff] %v6776_v24  ;;  %v6795_v57 = vmax.f32 %v317_v39, %v320_v49  ;;  %v6811_v18 = vstv %s5076_s18  ;;  %s6944_s18 = sld [smem:[#allocation6 + $0x45]] }
  0xe6   :  { %437 = vrot.lane.b32.xlu0 %v430_v16, %s6285_s14  ;;  %615 = vrot.lane.b32.xlu1 %v607_v55, %s6286_s17  ;;  %v366_v22 = vpop.permute.xlu1 %365  ;;  %v474_v55 = vmul.f32 %v6669_v19, %v6776_v24  ;;  %v713_v39 = vmul.f32 %v6811_v18, %v6776_v24 }
  0xe7   :  { %v368_v37 = vpop.permute.xlu0 %367  ;;  %v319_v58 = vmul.f32 0.3, %v316_v62  ;;  %v496_v54 = vmul.f32 %v6666_v17, %v6795_v57  ;;  %v721_v19 = vmul.f32 %v6819_v46, %v6795_v57  ;;  %v7244_v34 = vstv %s7178_s1  ;;  %s7403_s1 = sld [smem:[#allocation6 + $0x78]] }
  0xe8   :  { %v372_v21 = vsel %vm130_vm3, %v368_v37, %v6505_v28  ;;  %v371_v41 = vsel %vm130_vm3, %v366_v22, %v368_v37  ;;  %v451_v28 = vmul.f32 %v6627_v40, %v6774_v29  ;;  %v705_v40 = vmul.f32 %v6800_v33, %v6751_v13  ;;  %10741 = vst [vmem:[#allocation42_spill] sm:$0xff] %v7244_v34 }
  0xe9   :  { %v377_v4 = vadd.f32 %v372_v21, %v355_v30  ;;  %v376_v56 = vadd.f32 %v371_v41, %v354_v42  ;;  %v6807_v53 = vmax.f32 %v316_v62, %v319_v58  ;;  %v6827_v22 = vstv %s5078_s21  ;;  %s6955_s21 = sld [smem:[#allocation6 + $0x48]] }
  0xea   :  { %459 = vrot.lane.b32.xlu1 %v452_v61, %s6285_s14  ;;  %435 = vrot.lane.b32.xlu0 %v429_v50, %s6285_s14  ;;  %v708_v43 = vadd.f32 %v705_v40, %v700_v27  ;;  %v695_v61 = vmul.f32 %v6772_v9, %v6749_v20  ;;  %v704_v50 = vmul.f32 %v6800_v33, %v6774_v29  ;;  %v6864_v27 = vstv %s5133_s23  ;;  %s386_s23 = sld [smem:[#allocation6]] }
  0xeb   :  { %v380_v31 = vmul.f32 0.3, %v377_v4  ;;  %v379_v16 = vmul.f32 0.3, %v376_v56  ;;  %v495_v15 = vmul.f32 %v6666_v17, %v6807_v53  ;;  %v712_v17 = vmul.f32 %v6811_v18, %v6788_v45  ;;  %10715 = vst [vmem:[#allocation16_spill] sm:$0xff] %v6864_v27 }
  0xec   :  { %v716_v62 = vadd.f32 %v713_v39, %v708_v43  ;;  %v699_v49 = vadd.f32 %v6793_v59, %v695_v61  ;;  %v540_v41 = vmul.f32 %v6695_v12, %v6735_v6  ;;  %v584_v40 = vmul.f32 %v6705_v5, %v6776_v24 }
  0xed   :  { %v6813_v2 = vmax.f32 %v377_v4, %v380_v31  ;;  %v6833_v51 = vmax.f32 %v376_v56, %v379_v16  ;;  %v720_v4 = vmul.f32 %v6819_v46, %v6807_v53  ;;  %v539_v56 = vmul.f32 %v6695_v12, %v6749_v20 }
  0xee   :  { %457 = vrot.lane.b32.xlu1 %v451_v28, %s6285_s14  ;;  %481 = vrot.lane.b32.xlu0 %v474_v55, %s6285_s14  ;;  %v724_v42 = vadd.f32 %v721_v19, %v716_v62  ;;  %v707_v21 = vadd.f32 %v704_v50, %v699_v49  ;;  %v6870_v12 = vstv %s5134_s24  ;;  %v1297_v16 = vmul.f32 %v6864_v27, %v6749_v20  ;;  %s7134_s24 = sld [smem:[#allocation7 + $0x6]] }
  0xef   :  { %v518_v30 = vmul.f32 %v6698_v60, %v6813_v2  ;;  %v729_v37 = vmul.f32 %v6827_v22, %v6813_v2  ;;  %v517_v3 = vmul.f32 %v6698_v60, %v6833_v51  ;;  %v728_v28 = vmul.f32 %v6827_v22, %v6833_v51  ;;  %10716 = vst [vmem:[#allocation17_spill] sm:$0xff] %v6870_v12 }
  0xf0   :  { %v715_v58 = vadd.f32 %v712_v17, %v707_v21  ;;  %v562_v60 = vmul.f32 %v6711_v38, %v6751_v13  ;;  %v6876_v39 = vstv %s5135_s25  ;;  %v1306_v43 = vmul.f32 %v6870_v12, %v6774_v29  ;;  %s9108_s25 = sld [smem:[#allocation6 + $0x76]] }
  0xf1   :  { %v6850_v44 = vadd.f32 %v729_v37, %v724_v42  ;;  %10718 = vst [vmem:[#allocation19_spill] sm:$0xff] %v6876_v39  ;;  %v583_v61 = vmul.f32 %v6705_v5, %v6788_v45  ;;  %v606_v50 = vmul.f32 %v6727_v32, %v6795_v57  ;;  %v6893_v37 = vstv %s5137_s4  ;;  %s7143_s4 = sld [smem:[#allocation6 + $0x5a]] }
  0xf2   :  { %503 = vrot.lane.b32.xlu1 %v496_v54, %s6285_s14  ;;  %479 = vrot.lane.b32.xlu0 %v473_v14, %s6285_s14  ;;  %v723_v31 = vadd.f32 %v720_v4, %v715_v58  ;;  %v561_v14 = vmul.f32 %v6711_v38, %v6774_v29  ;;  %v6874_v54 = vstv %s5132_s22  ;;  %v1314_v38 = vmul.f32 %v6876_v39, %v6788_v45  ;;  %s7899_s22 = sld [smem:[#allocation6 + $0x41]] }
  0xf3   :  { %10713 = vst [vmem:[#allocation14_spill] sm:$0xff] %v6850_v44  ;;  %10717 = vst [vmem:[#allocation18_spill] sm:$0xff] %v6874_v54  ;;  %v1301_v19 = vadd.f32 %v6874_v54, %v1297_v16  ;;  %v1330_v17 = vmul.f32 %v6893_v37, %v6833_v51  ;;  %v626_v42 = vstv %s5072_s26  ;;  %v605_v21 = vmul.f32 %v6727_v32, %v6807_v53  ;;  %s5200_s26 = sld [smem:[#allocation6 + $0x2f]] }
  0xf4   :  { %v6860_v55 = vadd.f32 %v728_v28, %v723_v31  ;;  %10720 = vst [vmem:[#allocation21_spill] sm:$0xff] %v6893_v37  ;;  %v628_v5 = vmul.f32 %v626_v42, %v6813_v2  ;;  %v629_v58 = vmul.f32 %v626_v42, %v6548_v52  ;;  %v736_v28 = vmul.f32 %v6475_v10, %v6749_v20 }
  0xf5   :  { %v627_v32 = vmul.f32 %v626_v42, %v6833_v51  ;;  %v758_v31 = vmul.f32 %v6469_v7, %v6774_v29  ;;  %v802_v16 = vmul.f32 %v6518_v35, %v6807_v53  ;;  %v5116_v42 = vld [vmem:[%s10645_s5 + $0x210] sm:$0xff] }
  0xf6   :  { %501 = vrot.lane.b32.xlu1 %v495_v15, %s6285_s14  ;;  %525 = vrot.lane.b32.xlu0 %v518_v30, %s6285_s14  ;;  %10714 = vst [vmem:[#allocation15_spill] sm:$0xff] %v6860_v55  ;;  %v6885_v15 = vstv %s5136_s3  ;;  %v1309_v30 = vadd.f32 %v1306_v43, %v1301_v19  ;;  %v803_v43 = vmul.f32 %v6518_v35, %v6795_v57  ;;  %v5118_v19 = vld [vmem:[%s10645_s5 + $0x220] sm:$0xff]  ;;  %s7587_s3 = sld [smem:[#allocation6 + $0x37]] }
  0xf7   :  { %10719 = vst [vmem:[#allocation20_spill] sm:$0xff] %v6885_v15  ;;  %v1322_v62 = vmul.f32 %v6885_v15, %v6807_v53  ;;  %v5102_v35 = vld [vmem:[%s10645_s5 + $0x1a0] sm:$0xff] }
  0xf8   :  { %v1317_v49 = vadd.f32 %v1314_v38, %v1309_v30  ;;  %v5117_v38 = vld [vmem:[%s10645_s5 + $0x218] sm:$0xff]  ;;  %v825_v30 = vmul.f32 %v6541_v47, %v6813_v2 }
  0xfa   :  { %547 = vrot.lane.b32.xlu1 %v540_v41, %s6286_s17  ;;  %523 = vrot.lane.b32.xlu0 %v517_v3, %s6285_s14  ;;  %v1325_v4 = vadd.f32 %v1322_v62, %v1317_v49  ;;  %v737_v3 = vmul.f32 %v6475_v10, %v6735_v6  ;;  %v780_v10 = vmul.f32 %v6500_v25, %v6788_v45  ;;  %v5101_v62 = vld [vmem:[%s10645_s5 + $0x198] sm:$0xff]  ;;  %v6974_v49 = vstv %s5248_s10  ;;  %s7309_s10 = sld [smem:[#allocation6 + $0x3]] }
  0xfb   :  { %10723 = vst [vmem:[#allocation24_spill] sm:$0xff] %v6974_v49 }
  0xfc   :  { %v6904_v41 = vadd.f32 %v1330_v17, %v1325_v4  ;;  %v5100_v4 = vld [vmem:[%s10645_s5 + $0x190] sm:$0xff] }
  0xfe   :  { %545 = vrot.lane.b32.xlu1 %v539_v56, %s6286_s17  ;;  %569 = vrot.lane.b32.xlu0 %v562_v60, %s6286_s17  ;;  %10721 = vst [vmem:[#allocation22_spill] sm:$0xff] %v6904_v41  ;;  %v759_v56 = vmul.f32 %v6469_v7, %v6751_v13  ;;  %v781_v60 = vmul.f32 %v6500_v25, %v6776_v24  ;;  %v5104_v7 = vld [vmem:[%s10645_s5 + $0x1b0] sm:$0xff]  ;;  %v5119_v25 = vld [vmem:[%s10645_s5 + $0x228] sm:$0xff] }
  0xff   :  { %v412_v41 = vstv %s7327_s0  ;;  %s8095_s0 = sld [smem:[#allocation6 + $0x4c]] }
 0x100   :  { %v415_v15 = vmul.f32 %v412_v41, %v6521_v36 }
 0x102   :  { %591 = vrot.lane.b32.xlu1 %v584_v40, %s6286_s17  ;;  %567 = vrot.lane.b32.xlu0 %v561_v14, %s6286_s17  ;;  %v5120_v40 = vld [vmem:[%s10645_s5 + $0x230] sm:$0xff]  ;;  %v5103_v14 = vld [vmem:[%s10645_s5 + $0x1a8] sm:$0xff] }
 0x103   :  { %5591 = vmatprep.subr.mxu0 %v5120_v40 }
 0x104   :  { %5592 = vmatpush3.msra.mxu0 %v5104_v7  ;;  %v7012_v7 = vstv %s6950_s19  ;;  %s7117_s19 = sld [smem:[#allocation6 + $0x23]] }
 0x105   :  { %5593 = vmatprep.subr.mxu0 %v5119_v25  ;;  %v7020_v25 = vstv %s6955_s21  ;;  %s7123_s21 = sld [smem:[#allocation6 + $0x2c]] }
 0x106   :  { %589 = vrot.lane.b32.xlu1 %v583_v61, %s6286_s17  ;;  %613 = vrot.lane.b32.xlu0 %v606_v50, %s6286_s17  ;;  %v6965_v61 = vstv %s5247_s28  ;;  %v824_v50 = vmul.f32 %v6541_v47, %v6833_v51  ;;  %v2216_v47 = vmul.f32 %v6974_v49, %v6774_v29  ;;  %10727 = vst [vmem:[#allocation28_spill] sm:$0xff] %v7020_v25  ;;  %s8476_s28 = sld [smem:[#allocation6 + $0x56]] }
 0x107   :  { %5594 = vmatpush3.msra.mxu0 %v5103_v14  ;;  %10722 = vst [vmem:[#allocation23_spill] sm:$0xff] %v6965_v61  ;;  %v2207_v17 = vmul.f32 %v6965_v61, %v6749_v20  ;;  %v677_v61 = vld [vmem:[%s10645_s5 + $0xc0] sm:$0xff] }
 0x108   :  { %5595 = vmatprep.subr.mxu0 %v5118_v19  ;;  %v1340_v19 = vmul.f32 %v7012_v7, %v6477_v11 }
 0x109   :  { %5596 = vmatpush3.msra.mxu0 %v5102_v35  ;;  %v869_v35 = vmul.f32 %v6566_v63, %v6751_v13 }
 0x10a   :  { %635 = vrot.lane.b32.xlu1 %v628_v5, %s6286_s17  ;;  %611 = vrot.lane.b32.xlu0 %v605_v21, %s6286_s17  ;;  %v6982_v5 = vstv %s6922_s27  ;;  %v6985_v21 = vstv %s6931_s11  ;;  %s7014_s11 = sld [smem:[#allocation6 + $0x22]] }
 0x10b   :  { %5597 = vmatprep.subr.mxu0 %v5117_v38  ;;  %10724 = vst [vmem:[#allocation25_spill] sm:$0xff] %v6982_v5  ;;  %10725 = vst [vmem:[#allocation26_spill] sm:$0xff] %v6985_v21  ;;  %v5098_v38 = vld [vmem:[%s10645_s5 + $0x180] sm:$0xff]  ;;  %s7163_s27 = sld [smem:[#allocation6 + $0x29]] }
 0x10c   :  { %5598 = vmatpush3.msra.mxu0 %v5101_v62  ;;  %v714_v62 = vmul.f32 %v6811_v18, %v6502_v26  ;;  %v722_v18 = vmul.f32 %v6819_v46, %v6521_v36  ;;  %v5096_v46 = vld [vmem:[%s10645_s5 + $0x170] sm:$0xff] }
 0x10d   :  { %5599 = vmatprep.subr.mxu0 %v5116_v42 }
 0x10e   :  { %744 = vrot.lane.b32.xlu1 %v737_v3, %s6285_s14  ;;  %637 = vrot.lane.b32.xlu0 %v629_v58, %s6286_s17  ;;  %v2211_v3 = vadd.f32 %v6982_v5, %v2207_v17  ;;  %v2224_v58 = vmul.f32 %v6985_v21, %v6788_v45  ;;  %v5097_v17 = vld [vmem:[%s10645_s5 + $0x178] sm:$0xff]  ;;  %v1338_v21 = vmul.f32 %v7012_v7, %v6749_v20 }
 0x10f   :  { %5600 = vmatpush3.msra.mxu0 %v5100_v4  ;;  %v868_v4 = vmul.f32 %v6566_v63, %v6774_v29  ;;  %v5111_v63 = vld [vmem:[%s10645_s5 + $0x1e8] sm:$0xff] }
 0x112   :  { %742 = vrot.lane.b32.xlu1 %v736_v28, %s6285_s14  ;;  %633 = vrot.lane.b32.xlu0 %v627_v32, %s6286_s17  ;;  %v697_v28 = vmul.f32 %v6772_v9, %v6477_v11  ;;  %v7000_v32 = vstv %s6944_s18  ;;  %v5099_v9 = vld [vmem:[%s10645_s5 + $0x188] sm:$0xff]  ;;  %s5140_s18 = sld [smem:[#allocation6 + $0x25]] }
 0x113   :  { %10726 = vst [vmem:[#allocation27_spill] sm:$0xff] %v7000_v32  ;;  %v2232_v40 = vmul.f32 %v7000_v32, %v6807_v53 }
 0x116   :  { %764 = vrot.lane.b32.xlu1 %v758_v31, %s6285_s14  ;;  %766 = vrot.lane.b32.xlu0 %v759_v56, %s6285_s14  ;;  %v846_v31 = vmul.f32 %v6543_v48, %v6749_v20  ;;  %v847_v56 = vmul.f32 %v6543_v48, %v6735_v6  ;;  %v5114_v48 = vld [vmem:[%s10645_s5 + $0x200] sm:$0xff] }
 0x11a   :  { %786 = vrot.lane.b32.xlu1 %v780_v10, %s6285_s14  ;;  %788 = vrot.lane.b32.xlu0 %v781_v60, %s6285_s14  ;;  %v5115_v10 = vld [vmem:[%s10645_s5 + $0x208] sm:$0xff]  ;;  %v2219_v60 = vadd.f32 %v2216_v47, %v2211_v3  ;;  %v891_v47 = vmul.f32 %v6568_v1, %v6776_v24  ;;  %v5112_v3 = vld [vmem:[%s10645_s5 + $0x1f0] sm:$0xff] }
 0x11b   :  { %5601 = vmatprep.subr.mxu0 %v5115_v10 }
 0x11c   :  { %v2227_v14 = vadd.f32 %v2224_v58, %v2219_v60  ;;  %5602 = vmatpush3.msra.mxu0 %v5099_v9 }
 0x11d   :  { %5603 = vmatprep.subr.mxu0 %v5114_v48  ;;  %v7082_v48 = vstv %s5140_s18  ;;  %s7408_s18 = sld [smem:[#allocation6 + $0x34]] }
 0x11e   :  { %808 = vrot.lane.b32.xlu1 %v802_v16, %s6285_s14  ;;  %810 = vrot.lane.b32.xlu0 %v803_v43, %s6285_s14  ;;  %v2240_v16 = vmul.f32 %v7020_v25, %v6833_v51  ;;  %v701_v43 = vadd.f32 %v6793_v59, %v697_v28  ;;  %v5113_v59 = vld [vmem:[%s10645_s5 + $0x1f8] sm:$0xff]  ;;  %v730_v28 = vmul.f32 %v6827_v22, %v6548_v52 }
 0x11f   :  { %5604 = vmatpush3.msra.mxu0 %v5098_v38  ;;  %v890_v22 = vmul.f32 %v6568_v1, %v6788_v45  ;;  %v5094_v1 = vld [vmem:[%s10645_s5 + $0x160] sm:$0xff]  ;;  %v5109_v38 = vld [vmem:[%s10645_s5 + $0x1d8] sm:$0xff] }
 0x120   :  { %5605 = vmatprep.subr.mxu0 %v5113_v59 }
 0x121   :  { %5606 = vmatpush3.msra.mxu0 %v5097_v17 }
 0x122   :  { %830 = vrot.lane.b32.xlu1 %v824_v50, %s6285_s14  ;;  %832 = vrot.lane.b32.xlu0 %v825_v30, %s6285_s14  ;;  %v2235_v50 = vadd.f32 %v2232_v40, %v2227_v14  ;;  %v706_v30 = vmul.f32 %v6800_v33, %v6471_v8  ;;  %v5095_v40 = vld [vmem:[%s10645_s5 + $0x168] sm:$0xff]  ;;  %v5110_v14 = vld [vmem:[%s10645_s5 + $0x1e0] sm:$0xff] }
 0x123   :  { %5607 = vmatprep.subr.mxu0 %v5112_v3  ;;  %v7138_v3 = vstv %s7084_s29  ;;  %s7153_s29 = sld [smem:[#allocation6 + $0x60]] }
 0x124   :  { %v7049_v42 = vadd.f32 %v2240_v16, %v2235_v50  ;;  %v709_v33 = vadd.f32 %v706_v30, %v701_v43  ;;  %5608 = vmatpush3.msra.mxu0 %v5096_v46  ;;  %v5093_v50 = vld [vmem:[%s10645_s5 + $0x158] sm:$0xff] }
 0x125   :  { %5609 = vmatprep.subr.mxu0 %v5111_v63 }
 0x126   :  { %852 = vrot.lane.b32.xlu1 %v846_v31, %s6286_s17  ;;  %854 = vrot.lane.b32.xlu0 %v847_v56, %s6286_s17  ;;  %10728 = vst [vmem:[#allocation29_spill] sm:$0xff] %v7049_v42  ;;  %v717_v58 = vadd.f32 %v714_v62, %v709_v33  ;;  %v7063_v31 = vstv %s7014_s11  ;;  %v5108_v62 = vld [vmem:[%s10645_s5 + $0x1d0] sm:$0xff]  ;;  %v935_v33 = vmul.f32 %v6599_v0, %v6813_v2  ;;  %s7311_s11 = sld [smem:[#allocation6 + $0x6]] }
 0x127   :  { %v1362_v60 = vmul.f32 %v7063_v31, %v6471_v8  ;;  %5610 = vmatpush3.msra.mxu0 %v5095_v40 }
 0x128   :  { %v725_v56 = vadd.f32 %v722_v18, %v717_v58  ;;  %5611 = vmatprep.subr.mxu0 %v5110_v14  ;;  %v912_v18 = vmul.f32 %v6596_v23, %v6807_v53  ;;  %v5107_v58 = vld [vmem:[%s10645_s5 + $0x1c8] sm:$0xff]  ;;  %v7173_v14 = vstv %s7103_s13  ;;  %s7859_s13 = sld [smem:[#allocation6 + $0x46]] }
 0x129   :  { %5612 = vmatpush3.msra.mxu0 %v5094_v1  ;;  %v5105_v1 = vld [vmem:[%s10645_s5 + $0x1b8] sm:$0xff]  ;;  %v1426_v5 = vmul.f32 %v7173_v14, %v6833_v51 }
 0x12a   :  { %1348 = vrot.lane.b32.xlu1 %v1340_v19, %s6285_s14  ;;  %876 = vrot.lane.b32.xlu0 %v869_v35, %s6286_s17  ;;  %v733_v9 = vadd.f32 %v730_v28, %v725_v56  ;;  %v1384_v19 = vmul.f32 %v7082_v48, %v6502_v26  ;;  %v913_v35 = vmul.f32 %v6596_v23, %v6795_v57  ;;  %v5091_v23 = vld [vmem:[%s10645_s5 + $0x148] sm:$0xff] }
 0x12b   :  { %5613 = vmatprep.subr.mxu0 %v5109_v38  ;;  %v934_v56 = vmul.f32 %v6599_v0, %v6833_v51  ;;  %v5090_v0 = vld [vmem:[%s10645_s5 + $0x140] sm:$0xff] }
 0x12c   :  { %5614 = vmatpush3.msra.mxu0 %v5093_v50 }
 0x12d   :  { %v7097_v43 = vpop.permute.xlu1 %768  ;;  %5615 = vmatprep.subr.mxu0 %v5108_v62  ;;  %v1428_v62 = vmul.f32 %v7173_v14, %v6548_v52 }
 0x12e   :  { %898 = vrot.lane.b32.xlu1 %v891_v47, %s6286_s17  ;;  %874 = vrot.lane.b32.xlu0 %v868_v4, %s6286_s17  ;;  %v7073_v10 = vpop.permute.xlu0 %746  ;;  %v5092_v47 = vld [vmem:[%s10645_s5 + $0x150] sm:$0xff] }
 0x12f   :  { %v755_v16 = vadd.f32 %v7073_v10, %v733_v9  ;;  %5616 = vmatpush3.msra.mxu0 %v5092_v47  ;;  %v7170_v9 = vstv %s7095_s12  ;;  %s7189_s12 = sld [smem:[#allocation6 + $0x66]]  ;;  %v7207_v47 = vstv %s7143_s4 }
 0x130   :  { %5617 = vmatprep.subr.mxu0 %v5107_v58  ;;  %v1450_v50 = vmul.f32 %v7170_v9, %v6477_v11  ;;  %10735 = vst [vmem:[#allocation36_spill] sm:$0xff] %v7207_v47  ;;  %v3117_v58 = vmul.f32 %v7207_v47, %v6749_v20  ;;  %s7445_s4 = sld [smem:[#allocation6 + $0x7e]] }
 0x131   :  { %v777_v59 = vadd.f32 %v7097_v43, %v755_v16  ;;  %5618 = vmatpush3.msra.mxu0 %v5091_v23 }
 0x132   :  { %896 = vrot.lane.b32.xlu1 %v890_v22, %s6286_s17  ;;  %1370 = vrot.lane.b32.xlu0 %v1362_v60, %s6285_s14  ;;  %v1406_v22 = vmul.f32 %v7138_v3, %v6521_v36  ;;  %v5106_v60 = vld [vmem:[%s10645_s5 + $0x1c0] sm:$0xff] }
 0x133   :  { %5619 = vmatprep.subr.mxu0 %v5106_v60 }
 0x134   :  { %v7113_v30 = vpop.permute.xlu0 %790  ;;  %5620 = vmatpush3.msra.mxu0 %v5090_v0 }
 0x135   :  { %10729 = vst [vmem:[#allocation30_spill] sm:$0xff] %v7113_v30  ;;  %v799_v4 = vadd.f32 %v7113_v30, %v777_v59  ;;  %v5089_v59 = vld [vmem:[%s10645_s5 + $0x138] sm:$0xff]  ;;  %5621 = vmatprep.subr.mxu0 %v5105_v1 }
 0x136   :  { %1392 = vrot.lane.b32.xlu1 %v1384_v19, %s6285_s14  ;;  %920 = vrot.lane.b32.xlu0 %v913_v35, %s6286_s17  ;;  %v7187_v19 = vstv %s7117_s19  ;;  %s7334_s19 = sld [smem:[#allocation6 + $0x2e]] }
 0x137   :  { %5622 = vmatpush3.msra.mxu0 %v5089_v59  ;;  %v7238_v59 = vstv %s7123_s21  ;;  %s7430_s21 = sld [smem:[#allocation7 + $0x8]] }
 0x138   :  { %v7125_v17 = vpop.permute.xlu1 %812  ;;  %v1538_v42 = vmul.f32 %v7238_v59, %v6548_v52 }
 0x139   :  { %10730 = vst [vmem:[#allocation31_spill] sm:$0xff] %v7125_v17  ;;  %v821_v28 = vadd.f32 %v7125_v17, %v799_v4  ;;  %v1472_v4 = vmul.f32 %v7187_v19, %v6471_v8 }
 0x13a   :  { %942 = vrot.lane.b32.xlu1 %v935_v33, %s6286_s17  ;;  %918 = vrot.lane.b32.xlu0 %v912_v18, %s6286_s17  ;;  %v7204_v18 = vstv %s7108_s2  ;;  %s7336_s2 = sld [smem:[#allocation6 + $0xc]] }
 0x13b   :  { %v1494_v0 = vmul.f32 %v7204_v18, %v6502_v26 }
 0x13c   :  { %v7155_v46 = vpop.permute.xlu0 %834  ;;  %v7157_v63 = vpop.permute.xlu1 %856 }
 0x13d   :  { %10731 = vst [vmem:[#allocation32_spill] sm:$0xff] %v7155_v46  ;;  %10732 = vst [vmem:[#allocation33_spill] sm:$0xff] %v7157_v63  ;;  %v843_v40 = vadd.f32 %v7155_v46, %v821_v28  ;;  %v7217_v28 = vstv %s7134_s24  ;;  %s7438_s24 = sld [smem:[#allocation6 + $0x7b]] }
 0x13e   :  { %940 = vrot.lane.b32.xlu1 %v934_v56, %s6286_s17  ;;  %1414 = vrot.lane.b32.xlu0 %v1406_v22, %s6285_s14  ;;  %10736 = vst [vmem:[#allocation37_spill] sm:$0xff] %v7217_v28  ;;  %v7220_v56 = vstv %s7150_s30  ;;  %v7223_v22 = vstv %s7153_s29  ;;  %v3121_v1 = vadd.f32 %v7217_v28, %v3117_v58  ;;  %v3142_v58 = vmul.f32 %v7244_v34, %v6807_v53  ;;  %s7302_s30 = sld [smem:[#allocation7]] }
 0x13f   :  { %v865_v16 = vadd.f32 %v7157_v63, %v843_v40  ;;  %10737 = vst [vmem:[#allocation38_spill] sm:$0xff] %v7220_v56  ;;  %10738 = vst [vmem:[#allocation39_spill] sm:$0xff] %v7223_v22  ;;  %v7252_v28 = vstv %s7189_s12  ;;  %v660_v63 = vld [vmem:[%s10645_s5 + $0x38] sm:$0xff]  ;;  %s5202_s12 = sld [smem:[#allocation6 + $0x35]] }
 0x140   :  { %v7191_v35 = vpop.permute.xlu0 %878  ;;  %v7193_v38 = vpop.permute.xlu1 %900  ;;  %10742 = vst [vmem:[#allocation43_spill] sm:$0xff] %v7252_v28  ;;  %s7784_s29 = sld [smem:[#allocation6 + $0x3b]] }
 0x141   :  { %10733 = vst [vmem:[#allocation34_spill] sm:$0xff] %v7191_v35  ;;  %10734 = vst [vmem:[#allocation35_spill] sm:$0xff] %v7193_v38  ;;  %v887_v33 = vadd.f32 %v7191_v35, %v865_v16  ;;  %v3126_v16 = vmul.f32 %v7220_v56, %v6774_v29  ;;  %v676_v35 = vld [vmem:[%s10645_s5 + $0xb8] sm:$0xff] }
 0x142   :  { %1458 = vrot.lane.b32.xlu1 %v1450_v50, %s6286_s17  ;;  %1436 = vrot.lane.b32.xlu0 %v1428_v62, %s6285_s14  ;;  %v3134_v50 = vmul.f32 %v7223_v22, %v6788_v45 }
 0x143   :  { %v909_v23 = vadd.f32 %v7193_v38, %v887_v33  ;;  %v7241_v33 = vstv %s7163_s27  ;;  %v3129_v47 = vadd.f32 %v3126_v16, %v3121_v1  ;;  %s7393_s27 = sld [smem:[#allocation6 + $0x31]] }
 0x144   :  { %v7225_v60 = vpop.permute.xlu0 %922  ;;  %v7227_v40 = vpop.permute.xlu1 %944 }
 0x145   :  { %10739 = vst [vmem:[#allocation40_spill] sm:$0xff] %v7225_v60  ;;  %10740 = vst [vmem:[#allocation41_spill] sm:$0xff] %v7227_v40  ;;  %v931_v62 = vadd.f32 %v7225_v60, %v909_v23  ;;  %v3137_v25 = vadd.f32 %v3134_v50, %v3129_v47  ;;  %v1339_v47 = vmul.f32 %v7012_v7, %v6735_v6  ;;  %v668_v50 = vld [vmem:[%s10645_s5 + $0x78] sm:$0xff]  ;;  %v667_v7 = vld [vmem:[%s10645_s5 + $0x70] sm:$0xff]  ;;  %v1792_v60 = vstv %s7334_s19  ;;  %s7862_s19 = sld [smem:[#allocation6 + $0x43]] }
 0x146   :  { %1502 = vrot.lane.b32.xlu1 %v1494_v0, %s6286_s17  ;;  %1480 = vrot.lane.b32.xlu0 %v1472_v4, %s6286_s17  ;;  %v1516_v0 = vmul.f32 %v7241_v33, %v6521_v36  ;;  %v3150_v4 = vmul.f32 %v7252_v28, %v6833_v51  ;;  %v404_v28 = vstv %s7311_s11  ;;  %v1795_v55 = vmul.f32 %v1792_v60, %v6477_v11  ;;  %s8345_s11 = sld [smem:[#allocation6 + $0x58]] }
 0x147   :  { %v953_v56 = vadd.f32 %v7227_v40, %v931_v62  ;;  %v3145_v16 = vadd.f32 %v3142_v58, %v3137_v25  ;;  %v683_v25 = vld [vmem:[%s10645_s5 + $0xf0] sm:$0xff]  ;;  %v407_v40 = vmul.f32 %v404_v28, %v6502_v26  ;;  %v406_v54 = vmul.f32 %v404_v28, %v6776_v24 }
 0x148   :  { %v7254_v22 = vpop.permute.xlu0 %461  ;;  %v7256_v23 = vpop.permute.xlu1 %439 }
 0x149   :  { %v956_v1 = vmul.f32 0.3, %v953_v56 }
 0x14a   :  { %1546 = vrot.lane.b32.xlu1 %v1538_v42, %s6286_s17  ;;  %1524 = vrot.lane.b32.xlu0 %v1516_v0, %s6286_s17  ;;  %v7277_v42 = vadd.f32 %v3150_v4, %v3145_v16  ;;  %v1360_v0 = vmul.f32 %v7063_v31, %v6774_v29  ;;  %v1361_v4 = vmul.f32 %v7063_v31, %v6751_v13  ;;  %v681_v31 = vld [vmem:[%s10645_s5 + $0xe0] sm:$0xff] }
 0x14b   :  { %v959_v62 = vmax.f32 %v953_v56, %v956_v1  ;;  %v666_v1 = vld [vmem:[%s10645_s5 + $0x68] sm:$0xff] }
 0x14c   :  { %v7266_v34 = vpop.permute.xlu0 %505  ;;  %v7268_v32 = vpop.permute.xlu1 %483  ;;  %10743 = vst [vmem:[#allocation44_spill] sm:$0xff] %v7277_v42  ;;  %v391_v42 = vstv %s7302_s30  ;;  %s7458_s30 = sld [smem:[#allocation6 + $0x81]] }
 0x14d   :  { %6045 = vmatmul.mubr.msk.f32.vlgmr.msra.gmra.mxu1 %vm1000_vm4, %v959_v62 }
 0x14e   :  { %1344 = vrot.lane.b32.xlu1 %v1338_v21, %s6285_s14  ;;  %1346 = vrot.lane.b32.xlu0 %v1339_v47, %s6285_s14  ;;  %v682_v21 = vld [vmem:[%s10645_s5 + $0xe8] sm:$0xff]  ;;  %v1382_v47 = vmul.f32 %v7082_v48, %v6788_v45 }
 0x14f   :  { %5635 = vmatpush3.msra.mxu1 %v668_v50  ;;  %v1383_v50 = vmul.f32 %v7082_v48, %v6776_v24  ;;  %v664_v48 = vld [vmem:[%s10645_s5 + $0x58] sm:$0xff] }
 0x150   :  { %v7288_v56 = vpop.permute.xlu0 %549  ;;  %v7290_v58 = vpop.permute.xlu1 %527  ;;  %5636 = vmatprep.subr.mxu1 %v683_v25  ;;  %v665_v25 = vld [vmem:[%s10645_s5 + $0x60] sm:$0xff] }
 0x151   :  { %5637 = vmatpush3.msra.mxu1 %v667_v7  ;;  %v680_v7 = vld [vmem:[%s10645_s5 + $0xd8] sm:$0xff] }
 0x152   :  { %1366 = vrot.lane.b32.xlu1 %v1360_v0, %s6285_s14  ;;  %1368 = vrot.lane.b32.xlu0 %v1361_v4, %s6285_s14  ;;  %v387_v0 = vstv %s386_s23  ;;  %s7915_s23 = sld [smem:[#allocation6 + $0x4a]] }
 0x153   :  { %5638 = vmatprep.subr.mxu1 %v682_v21  ;;  %v388_v39 = vmul.f32 %v387_v0, %v6749_v20 }
 0x154   :  { %v7313_v16 = vpop.permute.xlu0 %593  ;;  %v7315_v62 = vpop.permute.xlu1 %571  ;;  %5639 = vmatpush3.msra.mxu1 %v666_v1  ;;  %v1404_v1 = vmul.f32 %v7138_v3, %v6807_v53 }
 0x155   :  { %5640 = vmatprep.subr.mxu1 %v681_v31  ;;  %v1405_v31 = vmul.f32 %v7138_v3, %v6795_v57  ;;  %v678_v3 = vld [vmem:[%s10645_s5 + $0xc8] sm:$0xff] }
 0x156   :  { %1388 = vrot.lane.b32.xlu1 %v1382_v47, %s6285_s14  ;;  %1390 = vrot.lane.b32.xlu0 %v1383_v50, %s6285_s14  ;;  %v679_v47 = vld [vmem:[%s10645_s5 + $0xd0] sm:$0xff]  ;;  %v390_v50 = vmul.f32 %v387_v0, %v6477_v11 }
 0x157   :  { %5641 = vmatpush3.msra.mxu1 %v665_v25  ;;  %v663_v25 = vld [vmem:[%s10645_s5 + $0x50] sm:$0xff] }
 0x158   :  { %v7338_v4 = vpop.permute.xlu0 %437  ;;  %v7340_v21 = vpop.permute.xlu1 %615  ;;  %5642 = vmatprep.subr.mxu1 %v680_v7  ;;  %v396_v7 = vstv %s7309_s10  ;;  %s8290_s10 = sld [smem:[#allocation6 + $0x55]] }
 0x159   :  { %5643 = vmatpush3.msra.mxu1 %v664_v48  ;;  %v398_v12 = vmul.f32 %v396_v7, %v6751_v13 }
 0x15a   :  { %1410 = vrot.lane.b32.xlu1 %v1404_v1, %s6285_s14  ;;  %1412 = vrot.lane.b32.xlu0 %v1405_v31, %s6285_s14  ;;  %v1427_v1 = vmul.f32 %v7173_v14, %v6813_v2  ;;  %v662_v31 = vld [vmem:[%s10645_s5 + $0x48] sm:$0xff]  ;;  %v661_v14 = vld [vmem:[%s10645_s5 + $0x40] sm:$0xff] }
 0x15b   :  { %5644 = vmatprep.subr.mxu1 %v679_v47  ;;  %v394_v47 = vadd.f32 %v391_v42, %v390_v50  ;;  %v420_v50 = vstv %s7336_s2  ;;  %s7873_s2 = sld [smem:[#allocation6 + $0x3e]] }
 0x15c   :  { %v7361_v49 = vpop.permute.xlu1 %459  ;;  %v7363_v48 = vpop.permute.xlu0 %435  ;;  %5645 = vmatpush3.msra.mxu1 %v663_v25  ;;  %v399_v25 = vmul.f32 %v396_v7, %v6471_v8 }
 0x15d   :  { %5646 = vmatprep.subr.mxu1 %v678_v3  ;;  %v389_v3 = vmul.f32 %v387_v0, %v6735_v6  ;;  %v464_v27 = vsel %vm107_vm2, %v7361_v49, %v7254_v22 }
 0x15e   :  { %1432 = vrot.lane.b32.xlu1 %v1426_v5, %s6285_s14  ;;  %1434 = vrot.lane.b32.xlu0 %v1427_v1, %s6285_s14  ;;  %v1794_v5 = vmul.f32 %v1792_v60, %v6735_v6  ;;  %v1449_v1 = vmul.f32 %v7170_v9, %v6735_v6 }
 0x15f   :  { %5647 = vmatpush3.msra.mxu1 %v662_v31  ;;  %v402_v31 = vadd.f32 %v399_v25, %v394_v47  ;;  %v423_v47 = vmul.f32 %v420_v50, %v6548_v52  ;;  %v393_v25 = vadd.f32 %v391_v42, %v389_v3  ;;  %v674_v3 = vld [vmem:[%s10645_s5 + $0xa8] sm:$0xff] }
 0x160   :  { %v7386_v38 = vpop.permute.xlu1 %457  ;;  %v7388_v37 = vpop.permute.xlu0 %481  ;;  %5648 = vmatprep.subr.mxu1 %v677_v61  ;;  %v675_v61 = vld [vmem:[%s10645_s5 + $0xb0] sm:$0xff] }
 0x161   :  { %5649 = vmatpush3.msra.mxu1 %v661_v14  ;;  %v410_v0 = vadd.f32 %v407_v40, %v402_v31  ;;  %v397_v14 = vmul.f32 %v396_v7, %v6774_v29  ;;  %v659_v40 = vld [vmem:[%s10645_s5 + $0x30] sm:$0xff]  ;;  %v392_v7 = vadd.f32 %v391_v42, %v388_v39  ;;  %v401_v17 = vadd.f32 %v398_v12, %v393_v25  ;;  %v5179_v12 = vld [vmem:[%s10645_s5 + $0x368] sm:$0xff] }
 0x162   :  { %1801 = vrot.lane.b32.xlu1 %v1794_v5, %s6285_s14  ;;  %1456 = vrot.lane.b32.xlu0 %v1449_v1, %s6286_s17  ;;  %v1448_v1 = vmul.f32 %v7170_v9, %v6749_v20  ;;  %v414_v9 = vmul.f32 %v412_v41, %v6795_v57  ;;  %v1793_v42 = vmul.f32 %v1792_v60, %v6749_v20  ;;  %v1814_v60 = vstv %s7393_s27  ;;  %s5201_s27 = sld [smem:[#allocation6 + $0x32]] }
 0x163   :  { %5650 = vmatprep.subr.mxu1 %v676_v35  ;;  %v418_v31 = vadd.f32 %v415_v15, %v410_v0  ;;  %v405_v35 = vmul.f32 %v404_v28, %v6788_v45  ;;  %v658_v15 = vld [vmem:[%s10645_s5 + $0x28] sm:$0xff]  ;;  %v400_v28 = vadd.f32 %v397_v14, %v392_v7  ;;  %5677 = vmatprep.subr.mxu0 %v5179_v12  ;;  %v657_v14 = vld [vmem:[%s10645_s5 + $0x20] sm:$0xff]  ;;  %v7471_v7 = vstv %s7408_s18  ;;  %s7836_s18 = sld [smem:[#allocation6 + $0x40]] }
 0x164   :  { %v7416_v46 = vpop.permute.xlu1 %503  ;;  %v7418_v5 = vpop.permute.xlu0 %479  ;;  %5651 = vmatpush3.msra.mxu1 %v660_v63  ;;  %v413_v63 = vmul.f32 %v412_v41, %v6807_v53  ;;  %v1471_v41 = vmul.f32 %v7187_v19, %v6751_v13 }
 0x165   :  { %5652 = vmatprep.subr.mxu1 %v675_v61  ;;  %v426_v39 = vadd.f32 %v423_v47, %v418_v31  ;;  %v422_v61 = vmul.f32 %v420_v50, %v6813_v2  ;;  %v673_v47 = vld [vmem:[%s10645_s5 + $0xa0] sm:$0xff] }
 0x166   :  { %1454 = vrot.lane.b32.xlu1 %v1448_v1, %s6286_s17  ;;  %1803 = vrot.lane.b32.xlu0 %v1795_v55, %s6285_s14  ;;  %v409_v55 = vadd.f32 %v406_v54, %v401_v17  ;;  %v421_v54 = vmul.f32 %v420_v50, %v6833_v51  ;;  %v408_v17 = vadd.f32 %v405_v35, %v400_v28  ;;  %v7465_v1 = vstv %s7403_s1  ;;  %v672_v50 = vld [vmem:[%s10645_s5 + $0x98] sm:$0xff]  ;;  %s8222_s1 = sld [smem:[#allocation6 + $0x52]] }
 0x167   :  { %5653 = vmatpush3.msra.mxu1 %v659_v40  ;;  %10744 = vst [vmem:[#allocation45_spill] sm:$0xff] %v7465_v1  ;;  %v448_v40 = vadd.f32 %v7256_v23, %v426_v39  ;;  %v4027_v35 = vmul.f32 %v7465_v1, %v6749_v20  ;;  %v1815_v39 = vmul.f32 %v1814_v60, %v6774_v29 }
 0x168   :  { %v7448_v0 = vpop.permute.xlu1 %501  ;;  %v7450_v25 = vpop.permute.xlu0 %525  ;;  %5654 = vmatprep.subr.mxu1 %v674_v3  ;;  %v417_v31 = vadd.f32 %v414_v9, %v409_v55  ;;  %v416_v3 = vadd.f32 %v413_v63, %v408_v17  ;;  %v1816_v9 = vmul.f32 %v1814_v60, %v6751_v13  ;;  %v1470_v55 = vmul.f32 %v7187_v19, %v6774_v29 }
 0x169   :  { %5655 = vmatpush3.msra.mxu1 %v658_v15  ;;  %v1817_v15 = vmul.f32 %v1814_v60, %v6471_v8  ;;  %v7491_v63 = vmul.f32 %v7471_v7, %v6776_v24  ;;  %v442_v60 = vsel %vm107_vm2, %v7338_v4, %v7256_v23  ;;  %v7507_v17 = vstv %s7430_s21  ;;  %v655_v23 = vld [vmem:[%s10645_s5 + $0x10] sm:$0xff]  ;;  %s7724_s21 = sld [smem:[#allocation6 + $0x38]] }
 0x16a   :  { %1478 = vrot.lane.b32.xlu1 %v1471_v41, %s6286_s17  ;;  %1799 = vrot.lane.b32.xlu0 %v1793_v42, %s6285_s14  ;;  %v425_v28 = vadd.f32 %v422_v61, %v417_v31  ;;  %v7495_v41 = vmul.f32 %v7204_v18, %v6776_v24  ;;  %v656_v61 = vld [vmem:[%s10645_s5 + $0x18] sm:$0xff]  ;;  %v424_v19 = vadd.f32 %v421_v54, %v416_v3  ;;  %v7521_v54 = vstv %s7438_s24  ;;  %s7921_s24 = sld [smem:[#allocation6 + $0x47]] }
 0x16b   :  { %5656 = vmatprep.subr.mxu1 %v673_v47  ;;  %v671_v47 = vld [vmem:[%s10645_s5 + $0x90] sm:$0xff]  ;;  %10745 = vst [vmem:[#allocation46_spill] sm:$0xff] %v7507_v17  ;;  %v470_v31 = vadd.f32 %v7254_v22, %v448_v40  ;;  %10746 = vst [vmem:[#allocation47_spill] sm:$0xff] %v7521_v54  ;;  %v7525_v3 = vstv %s7445_s4  ;;  %v4036_v22 = vmul.f32 %v7521_v54, %v6774_v29  ;;  %s5199_s4 = sld [smem:[#allocation6 + $0x3a]] }
 0x16c   :  { %v7483_v42 = vpop.permute.xlu1 %547  ;;  %v7485_v12 = vpop.permute.xlu0 %523  ;;  %5657 = vmatpush3.msra.mxu1 %v657_v14  ;;  %v4028_v14 = vmul.f32 %v7465_v1, %v6735_v6  ;;  %10747 = vst [vmem:[#allocation48_spill] sm:$0xff] %v7525_v3 }
 0x16d   :  { %5658 = vmatprep.subr.mxu1 %v672_v50  ;;  %v4031_v50 = vadd.f32 %v7507_v17, %v4027_v35  ;;  %v670_v35 = vld [vmem:[%s10645_s5 + $0x88] sm:$0xff] }
 0x16e   :  { %1825 = vrot.lane.b32.xlu1 %v1817_v15, %s6285_s14  ;;  %1823 = vrot.lane.b32.xlu0 %v1816_v9, %s6285_s14  ;;  %v4032_v40 = vadd.f32 %v7507_v17, %v4028_v14  ;;  %v4037_v15 = vmul.f32 %v7521_v54, %v6751_v13  ;;  %v447_v9 = vadd.f32 %v442_v60, %v425_v28 }
 0x16f   :  { %5659 = vmatpush3.msra.mxu1 %v656_v61  ;;  %v7540_v61 = vstv %s7458_s30  ;;  %v4044_v14 = vmul.f32 %v7525_v3, %v6788_v45  ;;  %v4045_v17 = vmul.f32 %v7525_v3, %v6776_v24  ;;  %v441_v28 = vsel %vm107_vm2, %v7363_v48, %v7338_v4  ;;  %v669_v4 = vld [vmem:[%s10645_s5 + $0x80] sm:$0xff]  ;;  %s9139_s30 = sld [smem:[#allocation6 + $0x6b]] }
 0x170   :  { %v7532_v1 = vpop.permute.xlu1 %545  ;;  %v7534_v30 = vpop.permute.xlu0 %569  ;;  %5660 = vmatprep.subr.mxu1 %v671_v47  ;;  %10748 = vst [vmem:[#allocation49_spill] sm:$0xff] %v7540_v61  ;;  %v486_v60 = vsel %vm107_vm2, %v7388_v37, %v7268_v32  ;;  %v654_v47 = vld [vmem:[%s10645_s5 + $0x8] sm:$0xff]  ;;  %v4039_v54 = vadd.f32 %v4036_v22, %v4031_v50  ;;  %v4052_v29 = vmul.f32 %v7540_v61, %v6807_v53  ;;  %v7563_v48 = vstv %s7476_s15  ;;  %s8347_s15 = sld [smem:[#allocation7 + $0x3]] }
 0x171   :  { %5661 = vmatpush3.msra.mxu1 %v655_v23  ;;  %v469_v44 = vadd.f32 %v464_v27, %v447_v9  ;;  %10749 = vst [vmem:[#allocation50_spill] sm:$0xff] %v7563_v48  ;;  %v4040_v23 = vadd.f32 %v4037_v15, %v4032_v40  ;;  %v4053_v3 = vmul.f32 %v7540_v61, %v6795_v57  ;;  %v653_v15 = vld [vmem:[%s10645_s5] sm:$0xff] }
 0x172   :  { %1821 = vrot.lane.b32.xlu1 %v1815_v39, %s6285_s14  ;;  %1476 = vrot.lane.b32.xlu0 %v1470_v55, %s6286_s17  ;;  %v463_v50 = vsel %vm107_vm2, %v7386_v38, %v7361_v49  ;;  %v508_v27 = vsel %vm107_vm2, %v7416_v46, %v7266_v34  ;;  %v4047_v39 = vadd.f32 %v4044_v14, %v4039_v54 }
 0x173   :  { %5662 = vmatprep.subr.mxu1 %v670_v35  ;;  %v4060_v55 = vmul.f32 %v7563_v48, %v6833_v51  ;;  %v446_v22 = vadd.f32 %v441_v28, %v424_v19  ;;  %v491_v9 = vadd.f32 %v486_v60, %v469_v44  ;;  %v4048_v61 = vadd.f32 %v4045_v17, %v4040_v23 }
 0x174   :  { %v592_v24 = vpop.permute.xlu1 %591  ;;  %v568_v40 = vpop.permute.xlu0 %567  ;;  %5663 = vmatpush3.msra.mxu1 %v654_v47  ;;  %v4061_v49 = vmul.f32 %v7563_v48, %v6813_v2  ;;  %v492_v38 = vadd.f32 %v7268_v32, %v470_v31  ;;  %v485_v54 = vsel %vm107_vm2, %v7418_v5, %v7388_v37  ;;  %v530_v44 = vsel %vm107_vm2, %v7450_v25, %v7290_v58 }
 0x175   :  { %5664 = vmatprep.subr.mxu1 %v669_v4  ;;  %v4055_v19 = vadd.f32 %v4052_v29, %v4047_v39  ;;  %v468_v35 = vadd.f32 %v463_v50, %v446_v22  ;;  %v513_v14 = vadd.f32 %v508_v27, %v491_v9  ;;  %v4056_v32 = vadd.f32 %v4053_v3, %v4048_v61 }
 0x176   :  { %1845 = vrot.lane.b32.xlu1 %v7491_v63, %s6285_s14  ;;  %1500 = vrot.lane.b32.xlu0 %v7495_v41, %s6286_s17  ;;  %v507_v37 = vsel %vm107_vm2, %v7448_v0, %v7416_v46  ;;  %v552_v5 = vsel %vm130_vm3, %v7483_v42, %v7288_v56  ;;  %v1839_v29 = vmul.f32 %v7471_v7, %v6502_v26  ;;  %v10751_v3 = vmov 0.0  }
 0x177   :  { %5665 = vmatpush3.msra.mxu1 %v653_v15  ;;  %v7601_v17 = vadd.f32 %v4060_v55, %v4055_v19  ;;  %v490_v31 = vadd.f32 %v485_v54, %v468_v35  ;;  %v535_v63 = vadd.f32 %v530_v44, %v513_v14  ;;  %v1492_v41 = vmul.f32 %v7204_v18, %v6788_v45 }
 0x178   :  { %v590_v28 = vpop.permute.xlu1 %589  ;;  %v614_v60 = vpop.permute.xlu0 %613  ;;  %6047 = vmatprep.subr.mxu1 %v10751_v3  ;;  %v7606_v46 = vadd.f32 %v4061_v49, %v4056_v32  ;;  %v529_v0 = vsel %vm107_vm2, %v7485_v12, %v7450_v25  ;;  %v574_v61 = vsel %vm130_vm3, %v7534_v30, %v7315_v62  ;;  %v514_v47 = vadd.f32 %v7266_v34, %v492_v38 }
 0x179   :  { %10750 = vst [vmem:[#allocation51_spill] sm:$0xff] %v7601_v17  ;;  %v512_v4 = vadd.f32 %v507_v37, %v490_v31  ;;  %v557_v23 = vadd.f32 %v552_v5, %v535_v63  ;;  %v551_v18 = vsel %vm130_vm3, %v7532_v1, %v7483_v42  ;;  %v596_v25 = vsel %vm130_vm3, %v592_v24, %v7313_v16 }
 0x17a   :  { %10752 = vst [vmem:[#allocation52_spill] sm:$0xff] %v7606_v46  ;;  %1498 = vrot.lane.b32.xlu1 %v1492_v41, %s6286_s17  ;;  %1847 = vrot.lane.b32.xlu0 %v1839_v29, %s6285_s14  ;;  %v1515_v34 = vmul.f32 %v7241_v33, %v6795_v57  ;;  %v1837_v55 = vmul.f32 %v7471_v7, %v6788_v45  ;;  %v1858_v1 = vstv %s7587_s3  ;;  %s9110_s3 = sld [smem:[#allocation6 + $0x4e]] }
 0x17b   :  { %v534_v12 = vadd.f32 %v529_v0, %v512_v4  ;;  %v579_v50 = vadd.f32 %v574_v61, %v557_v23  ;;  %v573_v22 = vsel %vm130_vm3, %v568_v40, %v7534_v30  ;;  %v618_v9 = vsel %vm130_vm3, %v614_v60, %v7340_v21 }
 0x17c   :  { %v636_v27 = vpop.permute.xlu1 %635  ;;  %v612_v39 = vpop.permute.xlu0 %611  ;;  %v536_v42 = vadd.f32 %v7290_v58, %v514_v47  ;;  %v595_v38 = vsel %vm130_vm3, %v590_v28, %v592_v24  ;;  %v1861_v40 = vmul.f32 %v1858_v1, %v6521_v36  ;;  %v1860_v19 = vmul.f32 %v1858_v1, %v6795_v57 }
 0x17d   :  { %v556_v15 = vadd.f32 %v551_v18, %v534_v12  ;;  %v601_v49 = vadd.f32 %v596_v25, %v579_v50  ;;  %v617_v58 = vsel %vm130_vm3, %v612_v39, %v614_v60  ;;  %v1859_v31 = vmul.f32 %v1858_v1, %v6807_v53  ;;  %v691_v12 = vld [vmem:[%s10645_s5 + $0x130] sm:$0x3] }
 0x17e   :  { %1522 = vrot.lane.b32.xlu1 %v1515_v34, %s6286_s17  ;;  %1843 = vrot.lane.b32.xlu0 %v1837_v55, %s6285_s14  ;;  %v558_v14 = vadd.f32 %v7288_v56, %v536_v42  ;;  %v1514_v63 = vmul.f32 %v7241_v33, %v6807_v53  ;;  %v1880_v61 = vstv %s5199_s4  ;;  %v1537_v18 = vmul.f32 %v7238_v59, %v6813_v2  ;;  %s8629_s4 = sld [smem:[#allocation6 + $0x62]] }
 0x17f   :  { %v578_v54 = vadd.f32 %v573_v22, %v556_v15  ;;  %v623_v7 = vadd.f32 %v618_v9, %v601_v49  ;;  %v1882_v33 = vmul.f32 %v1880_v61, %v6813_v2  ;;  %v1536_v39 = vmul.f32 %v7238_v59, %v6833_v51  ;;  %v689_v59 = vld [vmem:[%s10645_s5 + $0x120] sm:$0xff]  ;;  %v688_v15 = vld [vmem:[%s10645_s5 + $0x118] sm:$0xff] }
 0x180   :  { %v7635_v44 = vpop.permute.xlu1 %744  ;;  %v638_v30 = vpop.permute.xlu0 %637  ;;  %v580_v56 = vadd.f32 %v7315_v62, %v558_v14  ;;  %v1883_v34 = vmul.f32 %v1880_v61, %v6548_v52  ;;  %v1902_v22 = vstv %s5200_s26  ;;  %v1881_v49 = vmul.f32 %v1880_v61, %v6833_v51  ;;  %v685_v14 = vld [vmem:[%s10645_s5 + $0x100] sm:$0xff]  ;;  %s7766_s26 = sld [smem:[#allocation6 + $0x3d]] }
 0x181   :  { %v640_v35 = vsel %vm130_vm3, %v636_v27, %v638_v30  ;;  %v600_v32 = vadd.f32 %v595_v38, %v578_v54  ;;  %v687_v38 = vld [vmem:[%s10645_s5 + $0x110] sm:$0xff] }
 0x182   :  { %v645_v37 = vadd.f32 %v640_v35, %v623_v7  ;;  %1869 = vrot.lane.b32.xlu1 %v1861_v40, %s6285_s14  ;;  %1867 = vrot.lane.b32.xlu0 %v1860_v19, %s6285_s14  ;;  %v602_v62 = vadd.f32 %v7313_v16, %v580_v56  ;;  %v690_v16 = vld [vmem:[%s10645_s5 + $0x128] sm:$0xff]  ;;  %v1903_v40 = vmul.f32 %v1902_v22, %v6749_v20  ;;  %v1924_v35 = vstv %s5201_s27  ;;  %s8321_s27 = sld [smem:[#allocation6 + $0x2d]] }
 0x183   :  { %v622_v24 = vadd.f32 %v617_v58, %v600_v32  ;;  %v686_v19 = vld [vmem:[%s10645_s5 + $0x108] sm:$0xff]  ;;  %v1905_v58 = vmul.f32 %v1902_v22, %v6477_v11  ;;  %v1946_v56 = vstv %s5202_s12  ;;  %s8377_s12 = sld [smem:[#allocation6 + $0x39]] }
 0x184   :  { %v7644_v5 = vpop.permute.xlu1 %742  ;;  %v634_v29 = vpop.permute.xlu0 %633  ;;  %v648_v28 = vmul.f32 0.3, %v645_v37  ;;  %v624_v55 = vadd.f32 %v7340_v21, %v602_v62  ;;  %v1904_v21 = vmul.f32 %v1902_v22, %v6735_v6  ;;  %v10755_v62 = vld [vmem:[#allocation30_spill] sm:$0xff] }
 0x185   :  { %v639_v60 = vsel %vm130_vm3, %v634_v29, %v636_v27  ;;  %v1927_v29 = vmul.f32 %v1924_v35, %v6471_v8 }
 0x186   :  { %v644_v41 = vadd.f32 %v639_v60, %v622_v24  ;;  %1865 = vrot.lane.b32.xlu1 %v1859_v31, %s6285_s14  ;;  %1520 = vrot.lane.b32.xlu0 %v1514_v63, %s6286_s17  ;;  %v651_v0 = vmax.f32 %v645_v37, %v648_v28  ;;  %v646_v9 = vadd.f32 %v638_v30, %v624_v55  ;;  %v5186_v28 = vld [vmem:[%s10645_s5 + $0x3a0] sm:$0x3]  ;;  %v5184_v55 = vld [vmem:[%s10645_s5 + $0x390] sm:$0xff] }
 0x187   :  { %v749_v31 = vsel %vm107_vm2, %v7635_v44, %v7073_v10  ;;  %v1926_v63 = vmul.f32 %v1924_v35, %v6751_v13  ;;  %v5185_v10 = vld [vmem:[%s10645_s5 + $0x398] sm:$0xff] }
 0x188   :  { %v647_v47 = vmul.f32 0.3, %v644_v41  ;;  %v7653_v4 = vpop.permute.xlu1 %764  ;;  %1218 = vmatprep.mubr.f32.mxu1 %v651_v0  ;;  %v7655_v23 = vpop.permute.xlu0 %766  ;;  %v649_v54 = vmul.f32 0.3, %v646_v9 }
 0x189   :  { %v771_v60 = vsel %vm107_vm2, %v7655_v23, %v7097_v43  ;;  %v748_v43 = vsel %vm107_vm2, %v7644_v5, %v7635_v44  ;;  %v770_v44 = vsel %vm107_vm2, %v7653_v4, %v7655_v23  ;;  %v10758_v5 = vld [vmem:[#allocation31_spill] sm:$0xff]  ;;  %v1947_v4 = vmul.f32 %v1946_v56, %v6788_v45 }
 0x18a   :  { %v650_v25 = vmax.f32 %v644_v41, %v647_v47  ;;  %1889 = vrot.lane.b32.xlu1 %v1882_v33, %s6285_s14  ;;  %1544 = vrot.lane.b32.xlu0 %v1537_v18, %s6286_s17  ;;  %v652_v32 = vmax.f32 %v646_v9, %v649_v54  ;;  %v10753_v41 = vld [vmem:[#allocation14_spill] sm:$0xff]  ;;  %v10754_v33 = vld [vmem:[#allocation13_spill] sm:$0xff]  ;;  %v1968_v23 = vstv %s7724_s21  ;;  %s7893_s21 = sld [smem:[#allocation6 + $0x44]] }
 0x18b   :  { %v754_v0 = vadd.f32 %v749_v31, %v10753_v41  ;;  %v1948_v18 = vmul.f32 %v1946_v56, %v10754_v33  ;;  %v5183_v9 = vld [vmem:[%s10645_s5 + $0x388] sm:$0xff] }
 0x18c   :  { %v7666_v50 = vpop.permute.xlu1 %786  ;;  %v7668_v27 = vpop.permute.xlu0 %788  ;;  %1219 = vmatmul.mubr.f32.vlgmr.msra.gmra.mxu1 %v650_v25 }
 0x18d   :  { %6048 = vmatpush3.msk.msra.mxu1 %vm1004_vm0, %v691_v12  ;;  %6061 = vmatprep.mubr.msk.f32.mxu1 %vm6288_vm1, %v10751_v3  ;;  %v793_v25 = vsel %vm107_vm2, %v7668_v27, %v10755_v62  ;;  %v10756_v12 = vld [vmem:[#allocation16_spill] sm:$0xff] }
 0x18e   :  { %6049 = vmatprep.subr.mxu1 %v10751_v3  ;;  %1542 = vrot.lane.b32.xlu1 %v1536_v39, %s6286_s17  ;;  %v1299_v39 = vmul.f32 %v10756_v12, %v6477_v11  ;;  %v10765_v62 = vld [vmem:[#allocation20_spill] sm:$0xff] }
 0x18f   :  { %1891 = vrot.lane.b32.xlu0 %v1883_v34, %s6285_s14  ;;  %6050 = vmatpush3.msra.mxu1 %v690_v16  ;;  %v10757_v16 = vld [vmem:[#allocation12_spill] sm:$0xff] }
 0x190   :  { %6051 = vmatprep.subr.mxu1 %v10751_v3  ;;  %v7687_v1 = vpop.permute.xlu1 %808  ;;  %v7689_v42 = vpop.permute.xlu0 %810  ;;  %v1925_v34 = vmul.f32 %v1924_v35, %v10757_v16  ;;  %v10761_v35 = vld [vmem:[#allocation18_spill] sm:$0xff] }
 0x191   :  { %6052 = vmatpush3.msra.mxu1 %v689_v59  ;;  %v776_v59 = vadd.f32 %v771_v60, %v754_v0  ;;  %v815_v22 = vsel %vm107_vm2, %v7689_v42, %v10758_v5  ;;  %v5181_v0 = vld [vmem:[%s10645_s5 + $0x378] sm:$0xff]  ;;  %v1970_v5 = vmul.f32 %v1968_v23, %v6795_v57 }
 0x192   :  { %6053 = vmatprep.subr.mxu1 %v10751_v3  ;;  %1911 = vrot.lane.b32.xlu1 %v1904_v21, %s6286_s17  ;;  %v10759_v21 = vld [vmem:[#allocation15_spill] sm:$0xff] }
 0x193   :  { %1887 = vrot.lane.b32.xlu0 %v1881_v49, %s6285_s14  ;;  %6054 = vmatpush3.msra.mxu1 %v688_v15  ;;  %v753_v15 = vadd.f32 %v748_v43, %v10759_v21  ;;  %v798_v49 = vadd.f32 %v793_v25, %v776_v59  ;;  %v10766_v59 = vld [vmem:[#allocation34_spill] sm:$0xff] }
 0x194   :  { %6055 = vmatprep.subr.mxu1 %v10751_v3  ;;  %v7703_v7 = vpop.permute.xlu1 %830  ;;  %v7705_v30 = vpop.permute.xlu0 %832 }
 0x195   :  { %6056 = vmatpush3.msra.mxu1 %v687_v38  ;;  %v775_v31 = vadd.f32 %v770_v44, %v753_v15  ;;  %v10767_v15 = vld [vmem:[#allocation21_spill] sm:$0xff] }
 0x196   :  { %6057 = vmatprep.subr.mxu1 %v10751_v3  ;;  %1909 = vrot.lane.b32.xlu1 %v1903_v40, %s6286_s17  ;;  %v792_v40 = vsel %vm107_vm2, %v7666_v50, %v7668_v27  ;;  %v814_v50 = vsel %vm107_vm2, %v7687_v1, %v7689_v42  ;;  %v10763_v27 = vld [vmem:[#allocation33_spill] sm:$0xff]  ;;  %v1324_v1 = vmul.f32 %v10765_v62, %v6521_v36 }
 0x197   :  { %1913 = vrot.lane.b32.xlu0 %v1905_v58, %s6286_s17  ;;  %6058 = vmatpush3.msra.mxu1 %v686_v19  ;;  %v10760_v19 = vld [vmem:[#allocation32_spill] sm:$0xff] }
 0x198   :  { %6059 = vmatprep.subr.mxu1 %v10751_v3  ;;  %v7719_v37 = vpop.permute.xlu1 %852  ;;  %v7721_v24 = vpop.permute.xlu0 %854  ;;  %v837_v58 = vsel %vm107_vm2, %v7705_v30, %v10760_v19  ;;  %v10768_v19 = vld [vmem:[#allocation35_spill] sm:$0xff] }
 0x199   :  { %6060 = vmatpush3.msra.mxu1 %v685_v14  ;;  %v1303_v14 = vadd.f32 %v10761_v35, %v1299_v39  ;;  %v1971_v39 = vmul.f32 %v1968_v23, %v6521_v36 }
 0x19a   :  { %6062 = vmatmul.mubr.msk.f32.vlgmr.msra.gmra.mxu1 %vm1000_vm4, %v652_v32  ;;  %1935 = vrot.lane.b32.xlu1 %v1927_v29, %s6286_s17  ;;  %v1949_v32 = vmul.f32 %v1946_v56, %v6502_v26  ;;  %v5182_v29 = vld [vmem:[%s10645_s5 + $0x380] sm:$0xff]  ;;  %v859_v56 = vsel %vm130_vm3, %v7721_v24, %v10763_v27 }
 0x19b   :  { %1933 = vrot.lane.b32.xlu0 %v1926_v63, %s6286_s17  ;;  %6064 = vmatprep.subr.mxu1 %v10751_v3  ;;  %v820_v63 = vadd.f32 %v815_v22, %v798_v49  ;;  %v5180_v22 = vld [vmem:[%s10645_s5 + $0x370] sm:$0xff]  ;;  %v1332_v49 = vmul.f32 %v10767_v15, %v6548_v52 }
 0x19c   :  { %v7744_v61 = vpop.permute.xlu1 %1348  ;;  %v7746_v47 = vpop.permute.xlu0 %876  ;;  %6065 = vmatpush3.msk.msra.mxu1 %vm1004_vm0, %v5186_v28  ;;  %6078 = vmatprep.mubr.msk.f32.mxu1 %vm6288_vm1, %v10751_v3  ;;  %v10762_v28 = vld [vmem:[#allocation17_spill] sm:$0xff] }
 0x19d   :  { %6066 = vmatprep.subr.mxu1 %v10751_v3  ;;  %v1308_v60 = vmul.f32 %v10762_v28, %v6471_v8  ;;  %v842_v43 = vadd.f32 %v837_v58, %v820_v63  ;;  %v881_v44 = vsel %vm130_vm3, %v7746_v47, %v10766_v59  ;;  %v1969_v63 = vmul.f32 %v1968_v23, %v6807_v53 }
 0x19e   :  { %1955 = vrot.lane.b32.xlu1 %v1948_v18, %s6286_s17  ;;  %6067 = vmatpush3.msra.mxu1 %v5185_v10  ;;  %v10764_v10 = vld [vmem:[#allocation19_spill] sm:$0xff]  ;;  %v797_v18 = vadd.f32 %v792_v40, %v775_v31 }
 0x19f   :  { %1931 = vrot.lane.b32.xlu0 %v1925_v34, %s6286_s17  ;;  %6068 = vmatprep.subr.mxu1 %v10751_v3  ;;  %v1316_v41 = vmul.f32 %v10764_v10, %v6502_v26  ;;  %v836_v34 = vsel %vm107_vm2, %v7703_v7, %v7705_v30  ;;  %v864_v21 = vadd.f32 %v859_v56, %v842_v43  ;;  %v7834_v7 = vstv %s7766_s26  ;;  %v5236_v30 = vld [vmem:[%s10645_s5 + $0x4a0] sm:$0xff]  ;;  %s9124_s26 = sld [smem:[#allocation6 + $0x54]] }
 0x1a0   :  { %v7780_v38 = vpop.permute.xlu1 %898  ;;  %v875_v54 = vpop.permute.xlu0 %874  ;;  %6069 = vmatpush3.msra.mxu1 %v5184_v55  ;;  %v1311_v55 = vadd.f32 %v1308_v60, %v1303_v14  ;;  %v1990_v60 = vstv %s7784_s29  ;;  %v2250_v56 = vmul.f32 %v7834_v7, %v6477_v11  ;;  %s8856_s29 = sld [smem:[#allocation6 + $0x6a]] }
 0x1a1   :  { %6070 = vmatprep.subr.mxu1 %v10751_v3  ;;  %v903_v58 = vsel %vm130_vm3, %v7780_v38, %v10768_v19  ;;  %v1992_v59 = vmul.f32 %v1990_v60, %v6813_v2 }
 0x1a2   :  { %1953 = vrot.lane.b32.xlu1 %v1947_v4, %s6286_s17  ;;  %6071 = vmatpush3.msra.mxu1 %v5183_v9  ;;  %v819_v9 = vadd.f32 %v814_v50, %v797_v18  ;;  %v858_v4 = vsel %vm130_vm3, %v7719_v37, %v7721_v24  ;;  %v1319_v40 = vadd.f32 %v1316_v41, %v1311_v55  ;;  %v10769_v24 = vld [vmem:[#allocation40_spill] sm:$0xff] }
 0x1a3   :  { %1957 = vrot.lane.b32.xlu0 %v1949_v32, %s6286_s17  ;;  %6072 = vmatprep.subr.mxu1 %v10751_v3  ;;  %v886_v32 = vadd.f32 %v881_v44, %v864_v21  ;;  %v880_v37 = vsel %vm130_vm3, %v875_v54, %v7746_v47  ;;  %v10770_v44 = vld [vmem:[#allocation41_spill] sm:$0xff] }
 0x1a4   :  { %v897_v42 = vpop.permute.xlu1 %896  ;;  %v7816_v25 = vpop.permute.xlu0 %1370  ;;  %6073 = vmatpush3.msra.mxu1 %v5182_v29  ;;  %v841_v14 = vadd.f32 %v836_v34, %v819_v9  ;;  %v1327_v50 = vadd.f32 %v1324_v1, %v1319_v40  ;;  %v1993_v1 = vmul.f32 %v1990_v60, %v6548_v52 }
 0x1a5   :  { %6074 = vmatprep.subr.mxu1 %v10751_v3  ;;  %v902_v47 = vsel %vm130_vm3, %v897_v42, %v7780_v38  ;;  %v7877_v42 = vstv %s7836_s18  ;;  %s8367_s18 = sld [smem:[#allocation6 + $0x36]] }
 0x1a6   :  { %1979 = vrot.lane.b32.xlu1 %v1971_v39, %s6286_s17  ;;  %6075 = vmatpush3.msra.mxu1 %v5181_v0  ;;  %v863_v41 = vadd.f32 %v858_v4, %v841_v14  ;;  %v908_v0 = vadd.f32 %v903_v58, %v886_v32  ;;  %v1335_v23 = vadd.f32 %v1332_v49, %v1327_v50  ;;  %v7891_v32 = vstv %s7859_s13  ;;  %s8408_s13 = sld [smem:[#allocation6 + $0x50]] }
 0x1a7   :  { %1977 = vrot.lane.b32.xlu0 %v1970_v5, %s6286_s17  ;;  %6076 = vmatprep.subr.mxu1 %v10751_v3  ;;  %v1991_v4 = vmul.f32 %v1990_v60, %v6833_v51  ;;  %v2272_v14 = vmul.f32 %v7877_v42, %v6471_v8  ;;  %v7897_v50 = vstv %s7862_s19  ;;  %s9897_s19 = sld [smem:[#allocation6 + $0x6f]] }
 0x1a8   :  { %v7849_v29 = vpop.permute.xlu1 %1392  ;;  %v921_v31 = vpop.permute.xlu0 %920  ;;  %6077 = vmatpush3.msra.mxu1 %v5180_v22  ;;  %v885_v54 = vadd.f32 %v880_v37, %v863_v41  ;;  %v1357_v34 = vadd.f32 %v7744_v61, %v1335_v23  ;;  %v7913_v23 = vstv %s7873_s2  ;;  %s9251_s2 = sld [smem:[#allocation6 + $0x74]] }
 0x1a9   :  { %v925_v27 = vsel %vm130_vm3, %v921_v31, %v10769_v24  ;;  %5720 = vmatprep.subr.mxu1 %v5236_v30  ;;  %v2358_v17 = vmul.f32 %v7913_v23, %v6749_v20 }
 0x1aa   :  { %1975 = vrot.lane.b32.xlu1 %v1969_v63, %s6286_s17  ;;  %v930_v39 = vadd.f32 %v925_v27, %v908_v0  ;;  %v907_v38 = vadd.f32 %v902_v47, %v885_v54  ;;  %v1379_v9 = vadd.f32 %v7816_v25, %v1357_v34  ;;  %v2294_v0 = vmul.f32 %v7897_v50, %v6502_v26 }
 0x1ab   :  { %2258 = vrot.lane.b32.xlu0 %v2250_v56, %s6285_s14  ;;  %v2316_v56 = vmul.f32 %v7891_v32, %v6521_v36  ;;  %v7919_v54 = vstv %s7879_s20  ;;  %s8605_s20 = sld [smem:[#allocation6 + $0x67]] }
 0x1ac   :  { %v943_v18 = vpop.permute.xlu1 %942  ;;  %v919_v43 = vpop.permute.xlu0 %918  ;;  %v1401_v19 = vadd.f32 %v7849_v29, %v1379_v9  ;;  %v7951_v9 = vstv %s7899_s22  ;;  %s9051_s22 = sld [smem:[#allocation6 + $0x73]] }
 0x1ad   :  { %v924_v55 = vsel %vm130_vm3, %v919_v43, %v921_v31  ;;  %v947_v5 = vsel %vm130_vm3, %v943_v18, %v10770_v44 }
 0x1ae   :  { %2001 = vrot.lane.b32.xlu1 %v1993_v1, %s6286_s17  ;;  %v952_v22 = vadd.f32 %v947_v5, %v930_v39  ;;  %v929_v21 = vadd.f32 %v924_v55, %v907_v38  ;;  %v5178_v1 = vld [vmem:[%s10645_s5 + $0x360] sm:$0xff]  ;;  %v2360_v55 = vmul.f32 %v7913_v23, %v6477_v11  ;;  %v2338_v5 = vmul.f32 %v7919_v54, %v6548_v52 }
 0x1af   :  { %1999 = vrot.lane.b32.xlu0 %v1992_v59, %s6286_s17  ;;  %v5162_v59 = vld [vmem:[%s10645_s5 + $0x2e0] sm:$0xff]  ;;  %v7944_v38 = vstv %s7893_s21  ;;  %s9950_s21 = sld [smem:[#allocation6 + $0x8c]] }
 0x1b0   :  { %v941_v49 = vpop.permute.xlu1 %940  ;;  %v7883_v30 = vpop.permute.xlu0 %1414  ;;  %v955_v40 = vmul.f32 0.3, %v952_v22 }
 0x1b1   :  { %v946_v58 = vsel %vm130_vm3, %v941_v49, %v943_v18  ;;  %v1423_v60 = vadd.f32 %v7883_v30, %v1401_v19  ;;  %v5163_v18 = vld [vmem:[%s10645_s5 + $0x2e8] sm:$0xff] }
 0x1b2   :  { %v951_v31 = vadd.f32 %v946_v58, %v929_v21  ;;  %1997 = vrot.lane.b32.xlu1 %v1991_v4, %s6286_s17  ;;  %v958_v63 = vmax.f32 %v952_v22, %v955_v40  ;;  %v5177_v22 = vld [vmem:[%s10645_s5 + $0x358] sm:$0xff]  ;;  %v5176_v4 = vld [vmem:[%s10645_s5 + $0x350] sm:$0xff]  ;;  %v2404_v58 = vmul.f32 %v7944_v38, %v6502_v26 }
 0x1b3   :  { %2280 = vrot.lane.b32.xlu0 %v2272_v14, %s6285_s14  ;;  %v5161_v21 = vld [vmem:[%s10645_s5 + $0x2d8] sm:$0xff]  ;;  %v5160_v14 = vld [vmem:[%s10645_s5 + $0x2d0] sm:$0xff] }
 0x1b4   :  { %v954_v37 = vmul.f32 0.3, %v951_v31  ;;  %v7903_v24 = vpop.permute.xlu1 %1458  ;;  %1072 = vmatprep.mubr.f32.mxu0 %v958_v63  ;;  %v7905_v27 = vpop.permute.xlu0 %1436  ;;  %v2382_v63 = vmul.f32 %v7951_v9, %v6471_v8 }
 0x1b5   :  { %v1445_v41 = vadd.f32 %v7905_v27, %v1423_v60  ;;  %v7974_v60 = vstv %s7915_s23  ;;  %s9085_s23 = sld [smem:[#allocation6 + $0x4b]] }
 0x1b6   :  { %2324 = vrot.lane.b32.xlu1 %v2316_v56, %s6285_s14  ;;  %v957_v47 = vmax.f32 %v951_v31, %v954_v37  ;;  %v5175_v37 = vld [vmem:[%s10645_s5 + $0x348] sm:$0xff]  ;;  %v7981_v56 = vstv %s7921_s24  ;;  %s8443_s24 = sld [smem:[#allocation6 + $0x53]] }
 0x1b7   :  { %2302 = vrot.lane.b32.xlu0 %v2294_v0, %s6285_s14  ;;  %v1467_v43 = vadd.f32 %v7903_v24, %v1445_v41  ;;  %v5159_v41 = vld [vmem:[%s10645_s5 + $0x2c8] sm:$0xff] }
 0x1b8   :  { %v7931_v39 = vpop.permute.xlu1 %1502  ;;  %1073 = vmatmul.mubr.f32.vlgmr.msra.gmra.mxu0 %v957_v47  ;;  %v7933_v34 = vpop.permute.xlu0 %1480  ;;  %v5174_v47 = vld [vmem:[%s10645_s5 + $0x340] sm:$0xff] }
 0x1b9   :  { %v1489_v44 = vadd.f32 %v7933_v34, %v1467_v43  ;;  %5678 = vmatpush3.msra.mxu0 %v5163_v18 }
 0x1ba   :  { %2368 = vrot.lane.b32.xlu1 %v2360_v55, %s6286_s17  ;;  %5679 = vmatprep.subr.mxu0 %v5178_v1  ;;  %v2448_v1 = vmul.f32 %v7974_v60, %v6548_v52  ;;  %v5158_v55 = vld [vmem:[%s10645_s5 + $0x2c0] sm:$0xff] }
 0x1bb   :  { %2346 = vrot.lane.b32.xlu0 %v2338_v5, %s6285_s14  ;;  %v1511_v49 = vadd.f32 %v7931_v39, %v1489_v44  ;;  %5680 = vmatpush3.msra.mxu0 %v5162_v59  ;;  %v2426_v44 = vmul.f32 %v7981_v56, %v6521_v36  ;;  %v5173_v5 = vld [vmem:[%s10645_s5 + $0x338] sm:$0xff] }
 0x1bc   :  { %v7961_v40 = vpop.permute.xlu1 %1546  ;;  %v7963_v19 = vpop.permute.xlu0 %1524  ;;  %5681 = vmatprep.subr.mxu0 %v5177_v22  ;;  %v5157_v22 = vld [vmem:[%s10645_s5 + $0x2b8] sm:$0xff] }
 0x1bd   :  { %v1533_v31 = vadd.f32 %v7963_v19, %v1511_v49  ;;  %5682 = vmatpush3.msra.mxu0 %v5161_v21  ;;  %v5172_v49 = vld [vmem:[%s10645_s5 + $0x330] sm:$0xff] }
 0x1be   :  { %2412 = vrot.lane.b32.xlu1 %v2404_v58, %s6286_s17  ;;  %5683 = vmatprep.subr.mxu0 %v5176_v4 }
 0x1bf   :  { %v1555_v0 = vadd.f32 %v7961_v40, %v1533_v31  ;;  %2390 = vrot.lane.b32.xlu0 %v2382_v63, %s6286_s17  ;;  %5684 = vmatpush3.msra.mxu0 %v5160_v14  ;;  %v2248_v14 = vmul.f32 %v7834_v7, %v6749_v20  ;;  %v5156_v31 = vld [vmem:[%s10645_s5 + $0x2b0] sm:$0xff]  ;;  %v2249_v63 = vmul.f32 %v7834_v7, %v6735_v6  ;;  %v5235_v7 = vld [vmem:[%s10645_s5 + $0x498] sm:$0xff] }
 0x1c0   :  { %v7991_v18 = vpop.permute.xlu1 %1344  ;;  %v7993_v43 = vpop.permute.xlu0 %1346  ;;  %5685 = vmatprep.subr.mxu0 %v5175_v37  ;;  %v5171_v37 = vld [vmem:[%s10645_s5 + $0x328] sm:$0xff] }
 0x1c1   :  { %v1558_v59 = vmul.f32 0.3, %v1555_v0  ;;  %5686 = vmatpush3.msra.mxu0 %v5159_v41  ;;  %v5220_v41 = vld [vmem:[%s10645_s5 + $0x420] sm:$0xff] }
 0x1c2   :  { %2456 = vrot.lane.b32.xlu1 %v2448_v1, %s6286_s17  ;;  %5687 = vmatprep.subr.mxu0 %v5174_v47  ;;  %v5170_v47 = vld [vmem:[%s10645_s5 + $0x320] sm:$0xff] }
 0x1c3   :  { %v1561_v21 = vmax.f32 %v1555_v0, %v1558_v59  ;;  %2434 = vrot.lane.b32.xlu0 %v2426_v44, %s6286_s17  ;;  %5688 = vmatpush3.msra.mxu0 %v5158_v55  ;;  %v5155_v0 = vld [vmem:[%s10645_s5 + $0x2a8] sm:$0xff]  ;;  %v2270_v59 = vmul.f32 %v7877_v42, %v10757_v16  ;;  %v5154_v44 = vld [vmem:[%s10645_s5 + $0x2a0] sm:$0xff] }
 0x1c4   :  { %v8013_v4 = vpop.permute.xlu1 %1366  ;;  %v8015_v58 = vpop.permute.xlu0 %1368  ;;  %5689 = vmatprep.subr.mxu0 %v5173_v5  ;;  %v2271_v5 = vmul.f32 %v7877_v42, %v6751_v13  ;;  %v5234_v42 = vld [vmem:[%s10645_s5 + $0x490] sm:$0xff] }
 0x1c5   :  { %6079 = vmatmul.mubr.msk.f32.vlgmr.msra.gmra.mxu1 %vm1000_vm4, %v1561_v21  ;;  %5690 = vmatpush3.msra.mxu0 %v5157_v22  ;;  %v5169_v22 = vld [vmem:[%s10645_s5 + $0x318] sm:$0xff] }
 0x1c6   :  { %2254 = vrot.lane.b32.xlu1 %v2248_v14, %s6285_s14  ;;  %5691 = vmatprep.subr.mxu0 %v5172_v49  ;;  %v5219_v21 = vld [vmem:[%s10645_s5 + $0x418] sm:$0xff]  ;;  %v5168_v14 = vld [vmem:[%s10645_s5 + $0x310] sm:$0xff] }
 0x1c7   :  { %2256 = vrot.lane.b32.xlu0 %v2249_v63, %s6285_s14  ;;  %5692 = vmatpush3.msra.mxu0 %v5156_v31  ;;  %v5153_v49 = vld [vmem:[%s10645_s5 + $0x298] sm:$0xff] }
 0x1c8   :  { %v8042_v1 = vpop.permute.xlu1 %1388  ;;  %v8044_v55 = vpop.permute.xlu0 %1390  ;;  %5693 = vmatprep.subr.mxu0 %v5171_v37  ;;  %5721 = vmatpush3.msra.mxu1 %v5220_v41  ;;  %v2292_v37 = vmul.f32 %v7897_v50, %v6788_v45  ;;  %v5152_v41 = vld [vmem:[%s10645_s5 + $0x290] sm:$0xff] }
 0x1c9   :  { %5694 = vmatpush3.msra.mxu0 %v5155_v0  ;;  %5722 = vmatprep.subr.mxu1 %v5235_v7  ;;  %v2293_v0 = vmul.f32 %v7897_v50, %v10754_v33  ;;  %v5167_v7 = vld [vmem:[%s10645_s5 + $0x308] sm:$0xff] }
 0x1ca   :  { %2276 = vrot.lane.b32.xlu1 %v2270_v59, %s6285_s14  ;;  %5695 = vmatprep.subr.mxu0 %v5170_v47  ;;  %v5218_v47 = vld [vmem:[%s10645_s5 + $0x410] sm:$0xff]  ;;  %v5151_v59 = vld [vmem:[%s10645_s5 + $0x288] sm:$0xff] }
 0x1cb   :  { %2278 = vrot.lane.b32.xlu0 %v2271_v5, %s6285_s14  ;;  %5696 = vmatpush3.msra.mxu0 %v5154_v44  ;;  %v5233_v50 = vld [vmem:[%s10645_s5 + $0x488] sm:$0xff]  ;;  %v5166_v44 = vld [vmem:[%s10645_s5 + $0x300] sm:$0xff] }
 0x1cc   :  { %v8070_v31 = vpop.permute.xlu1 %1410  ;;  %v8072_v63 = vpop.permute.xlu0 %1412  ;;  %5697 = vmatprep.subr.mxu0 %v5169_v22  ;;  %5723 = vmatpush3.msra.mxu1 %v5219_v21  ;;  %v2314_v21 = vmul.f32 %v7891_v32, %v6807_v53 }
 0x1cd   :  { %5698 = vmatpush3.msra.mxu0 %v5153_v49  ;;  %5724 = vmatprep.subr.mxu1 %v5234_v42  ;;  %v5150_v49 = vld [vmem:[%s10645_s5 + $0x280] sm:$0xff]  ;;  %v2315_v42 = vmul.f32 %v7891_v32, %v6795_v57 }
 0x1ce   :  { %2298 = vrot.lane.b32.xlu1 %v2292_v37, %s6285_s14  ;;  %5699 = vmatprep.subr.mxu0 %v5168_v14  ;;  %v5165_v14 = vld [vmem:[%s10645_s5 + $0x2f8] sm:$0xff]  ;;  %v5217_v37 = vld [vmem:[%s10645_s5 + $0x408] sm:$0xff]  ;;  %v5232_v32 = vld [vmem:[%s10645_s5 + $0x480] sm:$0xff] }
 0x1cf   :  { %2300 = vrot.lane.b32.xlu0 %v2293_v0, %s6285_s14  ;;  %5700 = vmatpush3.msra.mxu0 %v5152_v41  ;;  %v5149_v41 = vld [vmem:[%s10645_s5 + $0x278] sm:$0xff]  ;;  %v5164_v0 = vld [vmem:[%s10645_s5 + $0x2f0] sm:$0xff] }
 0x1d0   :  { %v8100_v5 = vpop.permute.xlu1 %1432  ;;  %v8102_v22 = vpop.permute.xlu0 %1434  ;;  %5701 = vmatprep.subr.mxu0 %v5167_v7  ;;  %5725 = vmatpush3.msra.mxu1 %v5218_v47 }
 0x1d1   :  { %5702 = vmatpush3.msra.mxu0 %v5151_v59  ;;  %5726 = vmatprep.subr.mxu1 %v5233_v50  ;;  %v2336_v59 = vmul.f32 %v7919_v54, %v6833_v51  ;;  %v5148_v50 = vld [vmem:[%s10645_s5 + $0x270] sm:$0xff] }
 0x1d2   :  { %2320 = vrot.lane.b32.xlu1 %v2314_v21, %s6285_s14  ;;  %5703 = vmatprep.subr.mxu0 %v5166_v44  ;;  %v2337_v44 = vmul.f32 %v7919_v54, %v6813_v2  ;;  %v5216_v21 = vld [vmem:[%s10645_s5 + $0x400] sm:$0xff]  ;;  %v5215_v54 = vld [vmem:[%s10645_s5 + $0x3f8] sm:$0xff] }
 0x1d3   :  { %2322 = vrot.lane.b32.xlu0 %v2315_v42, %s6285_s14  ;;  %5704 = vmatpush3.msra.mxu0 %v5150_v49  ;;  %v5231_v49 = vld [vmem:[%s10645_s5 + $0x478] sm:$0xff]  ;;  %v2702_v42 = vstv %s8095_s0  ;;  %s8162_s0 = sld [smem:[#allocation6 + $0x4f]] }
 0x1d4   :  { %v8128_v7 = vpop.permute.xlu1 %1801  ;;  %v8130_v47 = vpop.permute.xlu0 %1456  ;;  %5705 = vmatprep.subr.mxu0 %v5165_v14  ;;  %5727 = vmatpush3.msra.mxu1 %v5217_v37 }
 0x1d5   :  { %5706 = vmatpush3.msra.mxu0 %v5149_v41  ;;  %5728 = vmatprep.subr.mxu1 %v5232_v32  ;;  %v2704_v41 = vmul.f32 %v2702_v42, %v6735_v6  ;;  %v5230_v32 = vld [vmem:[%s10645_s5 + $0x470] sm:$0xff] }
 0x1d6   :  { %2342 = vrot.lane.b32.xlu1 %v2336_v59, %s6285_s14  ;;  %5707 = vmatprep.subr.mxu0 %v5164_v0  ;;  %v2359_v0 = vmul.f32 %v7913_v23, %v6735_v6  ;;  %v5214_v59 = vld [vmem:[%s10645_s5 + $0x3f0] sm:$0xff]  ;;  %v5227_v23 = vld [vmem:[%s10645_s5 + $0x458] sm:$0xff] }
 0x1d7   :  { %2344 = vrot.lane.b32.xlu0 %v2337_v44, %s6285_s14  ;;  %5708 = vmatpush3.msra.mxu0 %v5148_v50  ;;  %v5229_v50 = vld [vmem:[%s10645_s5 + $0x468] sm:$0xff] }
 0x1d8   :  { %v8151_v14 = vpop.permute.xlu1 %1454  ;;  %v8153_v37 = vpop.permute.xlu0 %1803  ;;  %5729 = vmatpush3.msra.mxu1 %v5216_v21  ;;  %6081 = vmatprep.subr.mxu0 %v10751_v3  ;;  %v5213_v44 = vld [vmem:[%s10645_s5 + $0x3e8] sm:$0xff] }
 0x1d9   :  { %5730 = vmatprep.subr.mxu1 %v5231_v49 }
 0x1da   :  { %2711 = vrot.lane.b32.xlu1 %v2704_v41, %s6285_s14  ;;  %5731 = vmatpush3.msra.mxu1 %v5215_v54  ;;  %v5228_v54 = vld [vmem:[%s10645_s5 + $0x460] sm:$0xff]  ;;  %v2705_v41 = vmul.f32 %v2702_v42, %v6477_v11 }
 0x1db   :  { %2366 = vrot.lane.b32.xlu0 %v2359_v0, %s6286_s17  ;;  %5732 = vmatprep.subr.mxu1 %v5230_v32  ;;  %v5212_v32 = vld [vmem:[%s10645_s5 + $0x3e0] sm:$0xff]  ;;  %v1298_v0 = vmul.f32 %v10756_v12, %v6735_v6 }
 0x1dc   :  { %v8175_v21 = vpop.permute.xlu1 %1478  ;;  %v8177_v49 = vpop.permute.xlu0 %1799  ;;  %5733 = vmatpush3.msra.mxu1 %v5214_v59  ;;  %v5211_v59 = vld [vmem:[%s10645_s5 + $0x3d8] sm:$0xff] }
 0x1dd   :  { %10771 = vst [vmem:[#allocation14_spill] sm:$0xff] %v8177_v49  ;;  %5734 = vmatprep.subr.mxu1 %v5229_v50  ;;  %v1307_v50 = vmul.f32 %v10762_v28, %v6751_v13  ;;  %v5210_v28 = vld [vmem:[%s10645_s5 + $0x3d0] sm:$0xff]  ;;  %v1302_v48 = vadd.f32 %v10761_v35, %v1298_v0  ;;  %v1315_v49 = vmul.f32 %v10764_v10, %v10754_v33 }
 0x1de   :  { %2364 = vrot.lane.b32.xlu1 %v2358_v17, %s6286_s17  ;;  %5735 = vmatpush3.msra.mxu1 %v5213_v44  ;;  %v2381_v17 = vmul.f32 %v7951_v9, %v6751_v13  ;;  %v5226_v44 = vld [vmem:[%s10645_s5 + $0x450] sm:$0xff]  ;;  %v1323_v10 = vmul.f32 %v10765_v62, %v6795_v57  ;;  %v1331_v62 = vmul.f32 %v10767_v15, %v6813_v2 }
 0x1df   :  { %2713 = vrot.lane.b32.xlu0 %v2705_v41, %s6285_s14  ;;  %5736 = vmatprep.subr.mxu1 %v5228_v54  ;;  %v2703_v54 = vmul.f32 %v2702_v42, %v6749_v20  ;;  %v2724_v41 = vstv %s8162_s0  ;;  %v5209_v42 = vld [vmem:[%s10645_s5 + $0x3c8] sm:$0xff]  ;;  %v1310_v35 = vadd.f32 %v1307_v50, %v1302_v48  ;;  %v5208_v48 = vld [vmem:[%s10645_s5 + $0x3c0] sm:$0xff]  ;;  %s8383_s0 = sld [smem:[#allocation6 + $0x4d]] }
 0x1e0   :  { %v8200_v46 = vpop.permute.xlu1 %1825  ;;  %v8202_v12 = vpop.permute.xlu0 %1823  ;;  %5737 = vmatpush3.msra.mxu1 %v5212_v32  ;;  %v5225_v32 = vld [vmem:[%s10645_s5 + $0x448] sm:$0xff]  ;;  %v2725_v15 = vmul.f32 %v2724_v41, %v10757_v16 }
 0x1e1   :  { %5738 = vmatprep.subr.mxu1 %v5227_v23  ;;  %v1318_v50 = vadd.f32 %v1315_v49, %v1310_v35 }
 0x1e2   :  { %2388 = vrot.lane.b32.xlu1 %v2381_v17, %s6286_s17  ;;  %5739 = vmatpush3.msra.mxu1 %v5211_v59  ;;  %v2727_v59 = vmul.f32 %v2724_v41, %v6471_v8  ;;  %v5224_v17 = vld [vmem:[%s10645_s5 + $0x440] sm:$0xff] }
 0x1e3   :  { %2709 = vrot.lane.b32.xlu0 %v2703_v54, %s6285_s14  ;;  %5740 = vmatprep.subr.mxu1 %v5226_v44  ;;  %v2726_v44 = vmul.f32 %v2724_v41, %v6751_v13  ;;  %v5223_v54 = vld [vmem:[%s10645_s5 + $0x438] sm:$0xff]  ;;  %v5221_v41 = vld [vmem:[%s10645_s5 + $0x428] sm:$0xff] }
 0x1e4   :  { %v8229_v0 = vpop.permute.xlu1 %1821  ;;  %v8231_v23 = vpop.permute.xlu0 %1476  ;;  %5741 = vmatpush3.msra.mxu1 %v5210_v28  ;;  %v5207_v28 = vld [vmem:[%s10645_s5 + $0x3b8] sm:$0xff] }
 0x1e5   :  { %5742 = vmatprep.subr.mxu1 %v5225_v32  ;;  %v1326_v32 = vadd.f32 %v1323_v10, %v1318_v50  ;;  %v5206_v10 = vld [vmem:[%s10645_s5 + $0x3b0] sm:$0xff] }
 0x1e6   :  { %2735 = vrot.lane.b32.xlu1 %v2727_v59, %s6285_s14  ;;  %5743 = vmatpush3.msra.mxu1 %v5209_v42  ;;  %v5222_v42 = vld [vmem:[%s10645_s5 + $0x430] sm:$0xff]  ;;  %v1351_v59 = vsel %vm107_vm2, %v7993_v43, %v7744_v61  ;;  %v1373_v61 = vsel %vm107_vm2, %v8015_v58, %v7816_v25  ;;  %v1395_v25 = vsel %vm107_vm2, %v8044_v55, %v7849_v29 }
 0x1e7   :  { %2733 = vrot.lane.b32.xlu0 %v2726_v44, %s6285_s14  ;;  %5744 = vmatprep.subr.mxu1 %v5224_v17  ;;  %v2380_v17 = vmul.f32 %v7951_v9, %v10757_v16  ;;  %v1334_v44 = vadd.f32 %v1331_v62, %v1326_v32  ;;  %v2746_v9 = vstv %s8222_s1  ;;  %v1350_v32 = vsel %vm107_vm2, %v7991_v18, %v7993_v43  ;;  %v10772_v29 = vld [vmem:[#allocation22_spill] sm:$0xff]  ;;  %s8360_s1 = sld [smem:[#allocation6 + $0x33]] }
 0x1e8   :  { %v8251_v49 = vpop.permute.xlu1 %1845  ;;  %v8253_v35 = vpop.permute.xlu0 %1500  ;;  %5745 = vmatpush3.msra.mxu1 %v5208_v48  ;;  %v5205_v48 = vld [vmem:[%s10645_s5 + $0x3a8] sm:$0xff]  ;;  %v1417_v18 = vsel %vm107_vm2, %v8072_v63, %v7883_v30  ;;  %v1355_v43 = vadd.f32 %v1350_v32, %v10772_v29  ;;  %v1439_v30 = vsel %vm107_vm2, %v8102_v22, %v7905_v27  ;;  %v2425_v32 = vmul.f32 %v7981_v56, %v6795_v57 }
 0x1e9   :  { %5746 = vmatprep.subr.mxu1 %v5223_v54  ;;  %v1356_v50 = vadd.f32 %v1351_v59, %v1334_v44  ;;  %v1372_v59 = vsel %vm107_vm2, %v8013_v4, %v8015_v58  ;;  %v1394_v4 = vsel %vm107_vm2, %v8042_v1, %v8044_v55  ;;  %v2749_v58 = vmul.f32 %v2746_v9, %v6502_v26 }
 0x1ea   :  { %2731 = vrot.lane.b32.xlu1 %v2725_v15, %s6285_s14  ;;  %5747 = vmatpush3.msra.mxu1 %v5207_v28  ;;  %v2748_v28 = vmul.f32 %v2746_v9, %v10754_v33  ;;  %v2403_v15 = vmul.f32 %v7944_v38, %v10754_v33 }
 0x1eb   :  { %2386 = vrot.lane.b32.xlu0 %v2380_v17, %s6286_s17  ;;  %5748 = vmatprep.subr.mxu1 %v5222_v42  ;;  %v1378_v42 = vadd.f32 %v1373_v61, %v1356_v50  ;;  %v1377_v61 = vadd.f32 %v1372_v59, %v1355_v43  ;;  %v1416_v50 = vsel %vm107_vm2, %v8070_v31, %v8072_v63 }
 0x1ec   :  { %v1499_v62 = vpop.permute.xlu1 %1498  ;;  %v8279_v54 = vpop.permute.xlu0 %1847  ;;  %5749 = vmatpush3.msra.mxu1 %v5206_v10  ;;  %v1438_v31 = vsel %vm107_vm2, %v8100_v5, %v8102_v22  ;;  %v2747_v63 = vmul.f32 %v2746_v9, %v6788_v45  ;;  %v1460_v59 = vsel %vm130_vm3, %v8151_v14, %v8130_v47 }
 0x1ed   :  { %5750 = vmatprep.subr.mxu1 %v5221_v41  ;;  %v1400_v17 = vadd.f32 %v1395_v25, %v1378_v42  ;;  %v2402_v41 = vmul.f32 %v7944_v38, %v6788_v45  ;;  %v1461_v38 = vsel %vm130_vm3, %v8130_v47, %v7903_v24  ;;  %v1399_v1 = vadd.f32 %v1394_v4, %v1377_v61 }
 0x1ee   :  { %2755 = vrot.lane.b32.xlu1 %v2748_v28, %s6285_s14  ;;  %5751 = vmatpush3.msra.mxu1 %v5205_v48  ;;  %v1483_v24 = vsel %vm130_vm3, %v8175_v21, %v7933_v34  ;;  %v2768_v25 = vstv %s8290_s10  ;;  %v1751_v4 = vstv %s8321_s27  ;;  %s8493_s10 = sld [smem:[#allocation6 + $0x5b]] }
 0x1ef   :  { %2410 = vrot.lane.b32.xlu0 %v2403_v15, %s6286_s17  ;;  %6098 = vmatprep.subr.mxu1 %v10751_v3  ;;  %v1422_v48 = vadd.f32 %v1417_v18, %v1400_v17  ;;  %v1421_v15 = vadd.f32 %v1416_v50, %v1399_v1  ;;  %v1505_v18 = vsel %vm130_vm3, %v8253_v35, %v7931_v39  ;;  %v2790_v1 = vstv %s8345_s11  ;;  %s9380_s11 = sld [smem:[#allocation6 + $0x85]] }
 0x1f0   :  { %v1523_v10 = vpop.permute.xlu1 %1522  ;;  %v8302_v44 = vpop.permute.xlu0 %1843  ;;  %v2771_v29 = vmul.f32 %v2768_v25, %v6521_v36  ;;  %v1482_v39 = vsel %vm130_vm3, %v8231_v23, %v8175_v21  ;;  %v2770_v14 = vmul.f32 %v2768_v25, %v6795_v57 }
 0x1f1   :  { %v1444_v55 = vadd.f32 %v1439_v30, %v1422_v48  ;;  %v1443_v34 = vadd.f32 %v1438_v31, %v1421_v15  ;;  %v1527_v47 = vsel %vm130_vm3, %v1523_v10, %v7963_v19  ;;  %v1760_v31 = vstv %s8352_s16  ;;  %s9813_s16 = sld [smem:[#allocation6 + $0x91]] }
 0x1f2   :  { %2408 = vrot.lane.b32.xlu1 %v2402_v41, %s6286_s17  ;;  %v1504_v41 = vsel %vm130_vm3, %v1499_v62, %v8253_v35  ;;  %v2424_v62 = vmul.f32 %v7981_v56, %v6807_v53  ;;  %v2792_v56 = vmul.f32 %v2790_v1, %v6813_v2  ;;  %v1753_v15 = vmul.f32 %v1751_v4, %v6735_v6 }
 0x1f3   :  { %2757 = vrot.lane.b32.xlu0 %v2749_v58, %s6285_s14  ;;  %v1466_v42 = vadd.f32 %v1461_v38, %v1444_v55  ;;  %v1465_v43 = vadd.f32 %v1460_v59, %v1443_v34  ;;  %v2769_v58 = vmul.f32 %v2768_v25, %v6807_v53  ;;  %v1754_v38 = vmul.f32 %v1751_v4, %v6477_v11 }
 0x1f4   :  { %v8323_v27 = vpop.permute.xlu1 %1869  ;;  %v8325_v28 = vpop.permute.xlu0 %1867  ;;  %v2447_v25 = vmul.f32 %v7974_v60, %v6813_v2 }
 0x1f5   :  { %v1488_v5 = vadd.f32 %v1483_v24, %v1466_v42  ;;  %v1487_v21 = vadd.f32 %v1482_v39, %v1465_v43  ;;  %v1768_v42 = vstv %s8360_s1  ;;  %s8529_s1 = sld [smem:[#allocation6 + $0x59]] }
 0x1f6   :  { %2432 = vrot.lane.b32.xlu1 %v2425_v32, %s6286_s17  ;;  %v1771_v43 = vmul.f32 %v1768_v42, %v6502_v26 }
 0x1f7   :  { %2753 = vrot.lane.b32.xlu0 %v2747_v63, %s6285_s14  ;;  %v1510_v17 = vadd.f32 %v1505_v18, %v1488_v5  ;;  %v1509_v48 = vadd.f32 %v1504_v41, %v1487_v21  ;;  %v1762_v5 = vmul.f32 %v1760_v31, %v6751_v13  ;;  %v2793_v41 = vmul.f32 %v2790_v1, %v6548_v52 }
 0x1f8   :  { %v8349_v22 = vpop.permute.xlu1 %1865  ;;  %v1521_v9 = vpop.permute.xlu0 %1520 }
 0x1f9   :  { %v1532_v19 = vadd.f32 %v1527_v47, %v1510_v17  ;;  %v1526_v61 = vsel %vm130_vm3, %v1521_v9, %v1523_v10  ;;  %v1755_v10 = vstv %s8347_s15  ;;  %v1776_v9 = vstv %s8367_s18  ;;  %s8571_s18 = sld [smem:[#allocation6 + $0x5e]] }
 0x1fa   :  { %2779 = vrot.lane.b32.xlu1 %v2771_v29, %s6285_s14  ;;  %v1531_v55 = vadd.f32 %v1526_v61, %v1509_v48  ;;  %v1758_v34 = vadd.f32 %v1755_v10, %v1754_v38  ;;  %v2446_v47 = vmul.f32 %v7974_v60, %v6833_v51  ;;  %v1757_v21 = vadd.f32 %v1755_v10, %v1753_v15  ;;  %v5243_v60 = vld [vmem:[%s10645_s5 + $0x4d8] sm:$0x3]  ;;  %s8661_s15 = sld [smem:[#allocation6 + $0x68]] }
 0x1fb   :  { %2777 = vrot.lane.b32.xlu0 %v2770_v14, %s6285_s14  ;;  %v1763_v14 = vmul.f32 %v1760_v31, %v6471_v8  ;;  %v2812_v48 = vstv %s8383_s0  ;;  %v1778_v38 = vmul.f32 %v1776_v9, %v6795_v57  ;;  %v2791_v15 = vmul.f32 %v2790_v1, %v6833_v51  ;;  %s8587_s0 = sld [smem:[#allocation6 + $0x61]] }
 0x1fc   :  { %v8369_v23 = vpop.permute.xlu1 %1889  ;;  %v1545_v30 = vpop.permute.xlu0 %1544 }
 0x1fd   :  { %v1549_v35 = vsel %vm130_vm3, %v1545_v30, %v7961_v40  ;;  %v1766_v61 = vadd.f32 %v1763_v14, %v1758_v34  ;;  %v5240_v14 = vld [vmem:[%s10645_s5 + $0x4c0] sm:$0xff] }
 0x1fe   :  { %v1554_v50 = vadd.f32 %v1549_v35, %v1532_v19  ;;  %2775 = vrot.lane.b32.xlu1 %v2769_v58, %s6285_s14  ;;  %v1784_v19 = vstv %s8377_s12  ;;  %v1770_v35 = vmul.f32 %v1768_v42, %v10754_v33  ;;  %s8583_s12 = sld [smem:[#allocation6 + $0x64]] }
 0x1ff   :  { %2430 = vrot.lane.b32.xlu0 %v2424_v62, %s6286_s17  ;;  %v1779_v62 = vmul.f32 %v1776_v9, %v6521_v36  ;;  %v1786_v1 = vmul.f32 %v1784_v19, %v6813_v2 }
 0x200   :  { %v1543_v40 = vpop.permute.xlu1 %1542  ;;  %v1557_v32 = vmul.f32 0.3, %v1554_v50 }
 0x201   :  { %v1548_v24 = vsel %vm130_vm3, %v1543_v40, %v1545_v30  ;;  %v8389_v63 = vpop.permute.xlu0 %1891  ;;  %v1752_v30 = vmul.f32 %v1751_v4, %v6749_v20  ;;  %v1761_v4 = vmul.f32 %v1760_v31, %v10757_v16  ;;  %v2814_v40 = vmul.f32 %v2812_v48, %v6735_v6 }
 0x202   :  { %v1553_v59 = vadd.f32 %v1548_v24, %v1531_v55  ;;  %2799 = vrot.lane.b32.xlu1 %v2792_v56, %s6285_s14  ;;  %v1560_v18 = vmax.f32 %v1554_v50, %v1557_v32  ;;  %v1765_v50 = vadd.f32 %v1762_v5, %v1757_v21  ;;  %v5242_v56 = vld [vmem:[%s10645_s5 + $0x4d0] sm:$0xff]  ;;  %v1774_v32 = vadd.f32 %v1771_v43, %v1766_v61 }
 0x203   :  { %2454 = vrot.lane.b32.xlu0 %v2447_v25, %s6286_s17  ;;  %v1787_v24 = vmul.f32 %v1784_v19, %v6548_v52  ;;  %v1756_v31 = vadd.f32 %v1755_v10, %v1752_v30 }
 0x204   :  { %v1556_v29 = vmul.f32 0.3, %v1553_v59  ;;  %v8399_v39 = vpop.permute.xlu1 %1911  ;;  %1672 = vmatprep.mubr.f32.mxu0 %v1560_v18  ;;  %v5241_v18 = vld [vmem:[%s10645_s5 + $0x4c8] sm:$0xff]  ;;  %v1773_v34 = vadd.f32 %v1770_v35, %v1765_v50  ;;  %v1782_v5 = vadd.f32 %v1779_v62, %v1774_v32  ;;  %v1785_v35 = vmul.f32 %v1784_v19, %v6833_v51  ;;  %v5239_v62 = vld [vmem:[%s10645_s5 + $0x4b8] sm:$0xff] }
 0x205   :  { %v8405_v17 = vpop.permute.xlu0 %1887  ;;  %v1764_v10 = vadd.f32 %v1761_v4, %v1756_v31  ;;  %v1828_v19 = vsel %vm107_vm2, %v8202_v12, %v8200_v46 }
 0x206   :  { %v1559_v58 = vmax.f32 %v1553_v59, %v1556_v29  ;;  %2452 = vrot.lane.b32.xlu1 %v2446_v47, %s6286_s17  ;;  %v1769_v59 = vmul.f32 %v1768_v42, %v6788_v45  ;;  %v1777_v42 = vmul.f32 %v1776_v9, %v6807_v53  ;;  %v2813_v47 = vmul.f32 %v2812_v48, %v6749_v20 }
 0x207   :  { %2801 = vrot.lane.b32.xlu0 %v2793_v41, %s6285_s14  ;;  %v1781_v43 = vadd.f32 %v1778_v38, %v1773_v34  ;;  %v1790_v41 = vadd.f32 %v1787_v24, %v1782_v5  ;;  %v1806_v9 = vsel %vm107_vm2, %v8128_v7, %v8153_v37  ;;  %v10773_v24 = vld [vmem:[#allocation14_spill] sm:$0xff]  ;;  %v1850_v5 = vsel %vm107_vm2, %v8251_v49, %v8279_v54 }
 0x208   :  { %v8422_v55 = vpop.permute.xlu1 %1909  ;;  %1673 = vmatmul.mubr.f32.vlgmr.msra.gmra.mxu0 %v1559_v58  ;;  %v2815_v58 = vmul.f32 %v2812_v48, %v6477_v11  ;;  %v1772_v61 = vadd.f32 %v1769_v59, %v1764_v10 }
 0x209   :  { %v8429_v25 = vpop.permute.xlu0 %1913  ;;  %6082 = vmatpush3.msk.msra.mxu0 %vm1004_vm0, %v5243_v60  ;;  %6095 = vmatprep.mubr.msk.f32.mxu0 %vm6288_vm1, %v10751_v3  ;;  %v2834_v60 = vstv %s8408_s13  ;;  %v1789_v50 = vadd.f32 %v1786_v1, %v1781_v43  ;;  %v1812_v48 = vadd.f32 %v8153_v37, %v1790_v41  ;;  %v5238_v37 = vld [vmem:[%s10645_s5 + $0x4b0] sm:$0xff]  ;;  %v1827_v1 = vsel %vm107_vm2, %v8229_v0, %v8202_v12  ;;  %s8595_s13 = sld [smem:[#allocation6 + $0x5c]] }
 0x20a   :  { %2821 = vrot.lane.b32.xlu1 %v2814_v40, %s6286_s17  ;;  %6083 = vmatprep.subr.mxu0 %v10751_v3  ;;  %v1780_v4 = vadd.f32 %v1777_v42, %v1772_v61  ;;  %v2856_v42 = vstv %s8443_s24  ;;  %v1872_v43 = vsel %vm107_vm2, %v8325_v28, %v8323_v27  ;;  %v1849_v0 = vsel %vm107_vm2, %v8302_v44, %v8251_v49  ;;  %s9098_s24 = sld [smem:[#allocation7 + $0x5]] }
 0x20b   :  { %2797 = vrot.lane.b32.xlu0 %v2791_v15, %s6285_s14  ;;  %6084 = vmatpush3.msra.mxu0 %v5242_v56  ;;  %v2837_v56 = vmul.f32 %v2834_v60, %v6471_v8  ;;  %v1811_v32 = vadd.f32 %v1806_v9, %v1789_v50  ;;  %v1805_v15 = vsel %vm107_vm2, %v10773_v24, %v8128_v7  ;;  %v10774_v50 = vld [vmem:[#allocation23_spill] sm:$0xff] }
 0x20c   :  { %v8446_v29 = vpop.permute.xlu1 %1935  ;;  %6085 = vmatprep.subr.mxu0 %v10751_v3  ;;  %v1834_v31 = vadd.f32 %v8200_v46, %v1812_v48  ;;  %v1788_v34 = vadd.f32 %v1785_v35, %v1780_v4  ;;  %v5237_v46 = vld [vmem:[%s10645_s5 + $0x4a8] sm:$0xff]  ;;  %v2835_v61 = vmul.f32 %v2834_v60, %v10757_v16  ;;  %v2209_v48 = vmul.f32 %v10774_v50, %v6477_v11 }
 0x20d   :  { %v8453_v21 = vpop.permute.xlu0 %1933  ;;  %v8455_v30 = vpop.f32.mrf.mxu1  ;;  %6086 = vmatpush3.msra.mxu0 %v5241_v18  ;;  %v2836_v18 = vmul.f32 %v2834_v60, %v6751_v13  ;;  %v1833_v7 = vadd.f32 %v1828_v19, %v1811_v32  ;;  %v1871_v49 = vsel %vm107_vm2, %v8349_v22, %v8325_v28  ;;  %v1916_v60 = vsel %vm130_vm3, %v8399_v39, %v8429_v25 }
 0x20e   :  { %2819 = vrot.lane.b32.xlu1 %v2813_v47, %s6286_s17  ;;  %6087 = vmatprep.subr.mxu0 %v10751_v3  ;;  %v1856_v10 = vadd.f32 %v8279_v54, %v1834_v31  ;;  %v5293_v47 = vld [vmem:[%s10645_s5 + $0x5d8] sm:$0xff]  ;;  %v2857_v19 = vmul.f32 %v2856_v42, %v6788_v45  ;;  %v1893_v28 = vsel %vm107_vm2, %v8405_v17, %v8369_v23  ;;  %v10775_v31 = vld [vmem:[#allocation25_spill] sm:$0xff] }
 0x20f   :  { %2823 = vrot.lane.b32.xlu0 %v2815_v58, %s6286_s17  ;;  %v6046_v38 = vpop.f32.mrf.mxu1  ;;  %6088 = vmatpush3.msra.mxu0 %v5240_v14  ;;  %v1810_v14 = vadd.f32 %v1805_v15, %v1788_v34  ;;  %v2858_v58 = vmul.f32 %v2856_v42, %v10754_v33  ;;  %v1855_v12 = vadd.f32 %v1850_v5, %v1833_v7  ;;  %v8547_v34 = vstv %s8493_s10  ;;  %v10776_v5 = vld [vmem:[#allocation24_spill] sm:$0xff]  ;;  %s8642_s10 = sld [smem:[#allocation6 + $0x5f]] }
 0x210   :  { %v8473_v40 = vpop.permute.xlu1 %1955  ;;  %6089 = vmatprep.subr.mxu0 %v10751_v3  ;;  %v1878_v54 = vadd.f32 %v8323_v27, %v1856_v10  ;;  %v2859_v32 = vmul.f32 %v2856_v42, %v6502_v26  ;;  %v1938_v15 = vsel %vm130_vm3, %v8453_v21, %v8446_v29  ;;  %v10777_v42 = vld [vmem:[#allocation26_spill] sm:$0xff] }
 0x211   :  { %v8486_v59 = vpop.permute.xlu0 %1931  ;;  %6090 = vmatpush3.msra.mxu0 %v5239_v62  ;;  %v1832_v35 = vadd.f32 %v1827_v1, %v1810_v14  ;;  %v1894_v62 = vsel %vm107_vm2, %v8369_v23, %v8389_v63  ;;  %v1877_v38 = vadd.f32 %v1872_v43, %v1855_v12  ;;  %v1915_v23 = vsel %vm130_vm3, %v8422_v55, %v8399_v39 }
 0x212   :  { %2845 = vrot.lane.b32.xlu1 %v2837_v56, %s6286_s17  ;;  %6091 = vmatprep.subr.mxu0 %v10751_v3  ;;  %v1900_v44 = vadd.f32 %v8389_v63, %v1878_v54  ;;  %v2878_v56 = vstv %s8476_s28  ;;  %v1937_v55 = vsel %vm130_vm3, %v8486_v59, %v8453_v21  ;;  %s8987_s28 = sld [smem:[#allocation6 + $0x70]] }
 0x213   :  { %2843 = vrot.lane.b32.xlu0 %v2836_v18, %s6286_s17  ;;  %6092 = vmatpush3.msra.mxu0 %v5238_v37  ;;  %v1854_v27 = vadd.f32 %v1849_v0, %v1832_v35  ;;  %v1899_v37 = vadd.f32 %v1894_v62, %v1877_v38  ;;  %v2213_v18 = vadd.f32 %v10775_v31, %v2209_v48 }
 0x214   :  { %v1954_v41 = vpop.permute.xlu1 %1953  ;;  %6093 = vmatprep.subr.mxu0 %v10751_v3  ;;  %v1922_v22 = vadd.f32 %v8429_v25, %v1900_v44  ;;  %v2881_v14 = vmul.f32 %v2878_v56, %v6521_v36 }
 0x215   :  { %v1958_v9 = vpop.permute.xlu0 %1957  ;;  %6094 = vmatpush3.msra.mxu0 %v5237_v46  ;;  %v1876_v24 = vadd.f32 %v1871_v49, %v1854_v27  ;;  %v1921_v17 = vadd.f32 %v1916_v60, %v1899_v37  ;;  %v2218_v46 = vmul.f32 %v10776_v5, %v6471_v8  ;;  %v1959_v62 = vsel %vm130_vm3, %v1954_v41, %v8473_v40  ;;  %v10779_v49 = vld [vmem:[#allocation28_spill] sm:$0xff] }
 0x216   :  { %2865 = vrot.lane.b32.xlu1 %v2858_v58, %s6286_s17  ;;  %5763 = vmatprep.subr.mxu0 %v5293_v47  ;;  %v1944_v25 = vadd.f32 %v8446_v29, %v1922_v22  ;;  %v1960_v1 = vsel %vm130_vm3, %v8473_v40, %v1958_v9  ;;  %v2226_v47 = vmul.f32 %v10777_v42, %v6502_v26 }
 0x217   :  { %2841 = vrot.lane.b32.xlu0 %v2835_v61, %s6286_s17  ;;  %v1898_v7 = vadd.f32 %v1893_v28, %v1876_v24  ;;  %v1943_v39 = vadd.f32 %v1938_v15, %v1921_v17  ;;  %v2880_v58 = vmul.f32 %v2878_v56, %v6795_v57  ;;  %v2221_v54 = vadd.f32 %v2218_v46, %v2213_v18  ;;  %v10778_v61 = vld [vmem:[#allocation27_spill] sm:$0xff] }
 0x218   :  { %v1980_v4 = vpop.permute.xlu1 %1979  ;;  %v1966_v29 = vadd.f32 %v1958_v9, %v1944_v25  ;;  %v2234_v35 = vmul.f32 %v10778_v61, %v6521_v36  ;;  %v2900_v9 = vstv %s8529_s1  ;;  %v2242_v44 = vmul.f32 %v10779_v49, %v6548_v52  ;;  %s9617_s1 = sld [smem:[#allocation6 + $0x88]] }
 0x219   :  { %v1978_v63 = vpop.permute.xlu0 %1977  ;;  %v1920_v12 = vadd.f32 %v1915_v23, %v1898_v7  ;;  %v1965_v21 = vadd.f32 %v1960_v1, %v1943_v39  ;;  %v2229_v38 = vadd.f32 %v2226_v47, %v2221_v54  ;;  %v2879_v60 = vmul.f32 %v2878_v56, %v6807_v53 }
 0x21a   :  { %2863 = vrot.lane.b32.xlu1 %v2857_v19, %s6286_s17  ;;  %v1982_v0 = vsel %vm130_vm3, %v1978_v63, %v1980_v4  ;;  %v1988_v59 = vadd.f32 %v1980_v4, %v1966_v29  ;;  %v3160_v40 = vmul.f32 %v8547_v34, %v6477_v11  ;;  %v2903_v23 = vmul.f32 %v2900_v9, %v6548_v52 }
 0x21b   :  { %2867 = vrot.lane.b32.xlu0 %v2859_v32, %s6286_s17  ;;  %v1942_v48 = vadd.f32 %v1937_v55, %v1920_v12  ;;  %v1987_v19 = vadd.f32 %v1982_v0, %v1965_v21  ;;  %v2237_v4 = vadd.f32 %v2234_v35, %v2229_v38  ;;  %v2902_v7 = vmul.f32 %v2900_v9, %v6813_v2  ;;  %v5292_v55 = vld [vmem:[%s10645_s5 + $0x5d0] sm:$0xff] }
 0x21c   :  { %v1976_v10 = vpop.permute.xlu1 %1975  ;;  %v8603_v39 = vstv %s8571_s18  ;;  %v2901_v35 = vmul.f32 %v2900_v9, %v6833_v51  ;;  %v5275_v9 = vld [vmem:[%s10645_s5 + $0x548] sm:$0xff]  ;;  %s9217_s18 = sld [smem:[#allocation6 + $0x71]] }
 0x21d   :  { %v8564_v43 = vpop.permute.xlu0 %2258  ;;  %v1981_v37 = vsel %vm130_vm3, %v1976_v10, %v1978_v63  ;;  %v1964_v41 = vadd.f32 %v1959_v62, %v1942_v48  ;;  %v2245_v15 = vadd.f32 %v2242_v44, %v2237_v4  ;;  %v5277_v10 = vld [vmem:[%s10645_s5 + $0x558] sm:$0xff]  ;;  %v5291_v62 = vld [vmem:[%s10645_s5 + $0x5c8] sm:$0xff]  ;;  %v8627_v48 = vstv %s8583_s12  ;;  %s9872_s12 = sld [smem:[#allocation6 + $0x94]] }
 0x21e   :  { %2889 = vrot.lane.b32.xlu1 %v2881_v14, %s6286_s17  ;;  %v8659_v4 = vstv %s8595_s13  ;;  %s9404_s13 = sld [smem:[#allocation6 + $0x80]] }
 0x21f   :  { %2887 = vrot.lane.b32.xlu0 %v2880_v58, %s6286_s17  ;;  %v1986_v63 = vadd.f32 %v1981_v37, %v1964_v41  ;;  %v2267_v47 = vadd.f32 %v8564_v43, %v2245_v15  ;;  %v5276_v58 = vld [vmem:[%s10645_s5 + $0x550] sm:$0xff]  ;;  %v5274_v15 = vld [vmem:[%s10645_s5 + $0x540] sm:$0xff] }
 0x220   :  { %v2002_v27 = vpop.permute.xlu1 %2001 }
 0x221   :  { %v2010_v28 = vadd.f32 %v2002_v27, %v1988_v59  ;;  %v2000_v22 = vpop.permute.xlu0 %1999  ;;  %v3182_v59 = vmul.f32 %v8603_v39, %v6471_v8 }
 0x222   :  { %v2004_v32 = vsel %vm130_vm3, %v2000_v22, %v2002_v27  ;;  %2885 = vrot.lane.b32.xlu1 %v2879_v60, %s6286_s17  ;;  %v8637_v27 = vstv %s8587_s0  ;;  %v5300_v60 = vld [vmem:[%s10645_s5 + $0x610] sm:$0x3]  ;;  %s8677_s0 = sld [smem:[#allocation6 + $0x65]] }
 0x223   :  { %v2013_v24 = vmul.f32 0.3, %v2010_v28  ;;  %v2009_v56 = vadd.f32 %v2004_v32, %v1987_v19  ;;  %3168 = vrot.lane.b32.xlu0 %v3160_v40, %s6285_s14  ;;  %v3204_v41 = vmul.f32 %v8637_v27, %v6502_v26  ;;  %v5290_v32 = vld [vmem:[%s10645_s5 + $0x5c0] sm:$0xff] }
 0x224   :  { %v1998_v18 = vpop.permute.xlu1 %1997 }
 0x225   :  { %v2016_v17 = vmax.f32 %v2010_v28, %v2013_v24  ;;  %v2003_v25 = vsel %vm130_vm3, %v1998_v18, %v2000_v22  ;;  %v8592_v46 = vpop.permute.xlu0 %2280  ;;  %v2012_v1 = vmul.f32 0.3, %v2009_v56  ;;  %v3226_v28 = vmul.f32 %v8627_v48, %v6521_v36  ;;  %v5299_v22 = vld [vmem:[%s10645_s5 + $0x608] sm:$0xff] }
 0x226   :  { %v2008_v14 = vadd.f32 %v2003_v25, %v1986_v63  ;;  %2911 = vrot.lane.b32.xlu1 %v2903_v23, %s6286_s17  ;;  %v2289_v0 = vadd.f32 %v8592_v46, %v2267_v47  ;;  %v5298_v63 = vld [vmem:[%s10645_s5 + $0x600] sm:$0xff]  ;;  %v5297_v25 = vld [vmem:[%s10645_s5 + $0x5f8] sm:$0xff] }
 0x227   :  { %2909 = vrot.lane.b32.xlu0 %v2902_v7, %s6286_s17  ;;  %6096 = vmatmul.mubr.msk.f32.vlgmr.msra.gmra.mxu0 %vm1000_vm4, %v2016_v17  ;;  %v2015_v29 = vmax.f32 %v2009_v56, %v2012_v1  ;;  %v8672_v56 = vstv %s8605_s20  ;;  %v3270_v17 = vmul.f32 %v8659_v4, %v6477_v11  ;;  %v5289_v47 = vld [vmem:[%s10645_s5 + $0x5b8] sm:$0xff]  ;;  %s9916_s20 = sld [smem:[#allocation6 + $0x75]] }
 0x228   :  { %v2011_v12 = vmul.f32 0.3, %v2008_v14  ;;  %v8616_v54 = vpop.permute.xlu1 %2324  ;;  %5764 = vmatpush3.msra.mxu0 %v5277_v10  ;;  %v3248_v1 = vmul.f32 %v8672_v56, %v6548_v52  ;;  %v8697_v10 = vstv %s8629_s4  ;;  %s9118_s4 = sld [smem:[#allocation6 + $0x51]] }
 0x229   :  { %v8622_v21 = vpop.permute.xlu0 %2302  ;;  %2127 = vmatprep.mubr.f32.mxu1 %v2015_v29  ;;  %5765 = vmatprep.subr.mxu0 %v5292_v55  ;;  %v8706_v55 = vstv %s8642_s10  ;;  %v5296_v29 = vld [vmem:[%s10645_s5 + $0x5f0] sm:$0xff]  ;;  %s9178_s10 = sld [smem:[#allocation6 + $0x6e]] }
 0x22a   :  { %v2014_v38 = vmax.f32 %v2008_v14, %v2011_v12  ;;  %v2311_v44 = vadd.f32 %v8622_v21, %v2289_v0  ;;  %2907 = vrot.lane.b32.xlu1 %v2901_v35, %s6286_s17  ;;  %5766 = vmatpush3.msra.mxu0 %v5276_v58  ;;  %v5273_v58 = vld [vmem:[%s10645_s5 + $0x538] sm:$0xff]  ;;  %v3314_v35 = vmul.f32 %v8697_v10, %v6502_v26 }
 0x22b   :  { %3190 = vrot.lane.b32.xlu0 %v3182_v59, %s6285_s14  ;;  %5767 = vmatprep.subr.mxu0 %v5291_v62  ;;  %v5295_v62 = vld [vmem:[%s10645_s5 + $0x5e8] sm:$0xff] }
 0x22c   :  { %v8645_v19 = vpop.permute.xlu1 %2368  ;;  %v2333_v37 = vadd.f32 %v8616_v54, %v2311_v44  ;;  %2128 = vmatmul.mubr.f32.vlgmr.msra.gmra.mxu1 %v2014_v38  ;;  %5768 = vmatpush3.msra.mxu0 %v5275_v9  ;;  %v3292_v9 = vmul.f32 %v8706_v55, %v6471_v8  ;;  %v8729_v38 = vstv %s8661_s15  ;;  %v5288_v44 = vld [vmem:[%s10645_s5 + $0x5b0] sm:$0xff] }
 0x22d   :  { %v8653_v40 = vpop.permute.xlu0 %2346  ;;  %6099 = vmatpush3.msk.msra.mxu1 %vm1004_vm0, %v5300_v60  ;;  %6112 = vmatprep.mubr.msk.f32.mxu1 %vm6288_vm1, %v10751_v3 }
 0x22e   :  { %v2355_v24 = vadd.f32 %v8653_v40, %v2333_v37  ;;  %3234 = vrot.lane.b32.xlu1 %v3226_v28, %s6285_s14  ;;  %6100 = vmatprep.subr.mxu1 %v10751_v3  ;;  %v8738_v37 = vstv %s8677_s0  ;;  %v5294_v28 = vld [vmem:[%s10645_s5 + $0x5e0] sm:$0xff]  ;;  %s9750_s0 = sld [smem:[#allocation6 + $0x8e]] }
 0x22f   :  { %3212 = vrot.lane.b32.xlu0 %v3204_v41, %s6285_s14  ;;  %6101 = vmatpush3.msra.mxu1 %v5299_v22  ;;  %v5272_v22 = vld [vmem:[%s10645_s5 + $0x530] sm:$0xff]  ;;  %v5287_v41 = vld [vmem:[%s10645_s5 + $0x5a8] sm:$0xff] }
 0x230   :  { %v8683_v18 = vpop.permute.xlu1 %2412  ;;  %v2377_v23 = vadd.f32 %v8645_v19, %v2355_v24  ;;  %6102 = vmatprep.subr.mxu1 %v10751_v3  ;;  %5769 = vmatprep.subr.mxu0 %v5290_v32 }
 0x231   :  { %v8692_v7 = vpop.permute.xlu0 %2390  ;;  %6103 = vmatpush3.msra.mxu1 %v5298_v63  ;;  %5770 = vmatpush3.msra.mxu0 %v5274_v15  ;;  %v3358_v63 = vmul.f32 %v8729_v38, %v6548_v52  ;;  %v5271_v15 = vld [vmem:[%s10645_s5 + $0x528] sm:$0xff] }
 0x232   :  { %v2399_v14 = vadd.f32 %v8692_v7, %v2377_v23  ;;  %3278 = vrot.lane.b32.xlu1 %v3270_v17, %s6286_s17  ;;  %6104 = vmatprep.subr.mxu1 %v10751_v3  ;;  %v3336_v17 = vmul.f32 %v8738_v37, %v6521_v36 }
 0x233   :  { %3256 = vrot.lane.b32.xlu0 %v3248_v1, %s6285_s14  ;;  %6105 = vmatpush3.msra.mxu1 %v5297_v25  ;;  %v5286_v25 = vld [vmem:[%s10645_s5 + $0x5a0] sm:$0xff]  ;;  %v5350_v1 = vld [vmem:[%s10645_s5 + $0x710] sm:$0xff] }
 0x234   :  { %v8715_v12 = vpop.permute.xlu1 %2456  ;;  %v2421_v0 = vadd.f32 %v8683_v18, %v2399_v14  ;;  %6106 = vmatprep.subr.mxu1 %v10751_v3  ;;  %5771 = vmatprep.subr.mxu0 %v5289_v47  ;;  %v5270_v14 = vld [vmem:[%s10645_s5 + $0x520] sm:$0xff] }
 0x235   :  { %v8724_v59 = vpop.permute.xlu0 %2434  ;;  %6107 = vmatpush3.msra.mxu1 %v5296_v29  ;;  %5772 = vmatpush3.msra.mxu0 %v5273_v58 }
 0x236   :  { %v2443_v60 = vadd.f32 %v8724_v59, %v2421_v0  ;;  %3322 = vrot.lane.b32.xlu1 %v3314_v35, %s6286_s17  ;;  %6108 = vmatprep.subr.mxu1 %v10751_v3  ;;  %v3158_v0 = vmul.f32 %v8547_v34, %v6749_v20  ;;  %v5285_v35 = vld [vmem:[%s10645_s5 + $0x598] sm:$0xff] }
 0x237   :  { %3300 = vrot.lane.b32.xlu0 %v3292_v9, %s6286_s17  ;;  %6109 = vmatpush3.msra.mxu1 %v5295_v62  ;;  %v3159_v9 = vmul.f32 %v8547_v34, %v6735_v6  ;;  %v5349_v34 = vld [vmem:[%s10645_s5 + $0x708] sm:$0xff] }
 0x238   :  { %v2465_v32 = vadd.f32 %v8715_v12, %v2443_v60  ;;  %v8751_v24 = vpop.permute.xlu1 %2254  ;;  %6110 = vmatprep.subr.mxu1 %v10751_v3  ;;  %5773 = vmatprep.subr.mxu0 %v5288_v44  ;;  %v5269_v44 = vld [vmem:[%s10645_s5 + $0x518] sm:$0xff]  ;;  %v5334_v60 = vld [vmem:[%s10645_s5 + $0x690] sm:$0xff] }
 0x239   :  { %v8759_v23 = vpop.permute.xlu0 %2256  ;;  %6111 = vmatpush3.msra.mxu1 %v5294_v28  ;;  %5774 = vmatpush3.msra.mxu0 %v5272_v22  ;;  %v5284_v28 = vld [vmem:[%s10645_s5 + $0x590] sm:$0xff] }
 0x23a   :  { %v2468_v47 = vmul.f32 0.3, %v2465_v32  ;;  %3366 = vrot.lane.b32.xlu1 %v3358_v63, %s6286_s17  ;;  %5775 = vmatprep.subr.mxu0 %v5287_v41  ;;  %v5268_v22 = vld [vmem:[%s10645_s5 + $0x510] sm:$0xff]  ;;  %v5283_v63 = vld [vmem:[%s10645_s5 + $0x588] sm:$0xff] }
 0x23b   :  { %3344 = vrot.lane.b32.xlu0 %v3336_v17, %s6286_s17  ;;  %5776 = vmatpush3.msra.mxu0 %v5271_v15  ;;  %v3181_v17 = vmul.f32 %v8603_v39, %v6751_v13 }
 0x23c   :  { %v2471_v29 = vmax.f32 %v2465_v32, %v2468_v47  ;;  %v8774_v58 = vpop.permute.xlu1 %2276  ;;  %5777 = vmatprep.subr.mxu0 %v5286_v25  ;;  %5806 = vmatprep.subr.mxu1 %v5350_v1  ;;  %v3180_v32 = vmul.f32 %v8603_v39, %v10757_v16  ;;  %v5267_v25 = vld [vmem:[%s10645_s5 + $0x508] sm:$0xff]  ;;  %v5282_v47 = vld [vmem:[%s10645_s5 + $0x580] sm:$0xff] }
 0x23d   :  { %v8781_v62 = vpop.permute.xlu0 %2278  ;;  %5778 = vmatpush3.msra.mxu0 %v5270_v14  ;;  %v5333_v1 = vld [vmem:[%s10645_s5 + $0x688] sm:$0xff]  ;;  %v5348_v39 = vld [vmem:[%s10645_s5 + $0x700] sm:$0xff] }
 0x23e   :  { %6113 = vmatmul.mubr.msk.f32.vlgmr.msra.gmra.mxu1 %vm1000_vm4, %v2471_v29  ;;  %3164 = vrot.lane.b32.xlu1 %v3158_v0, %s6285_s14  ;;  %v5266_v14 = vld [vmem:[%s10645_s5 + $0x500] sm:$0xff]  ;;  %v3202_v0 = vmul.f32 %v8637_v27, %v6788_v45 }
 0x23f   :  { %3166 = vrot.lane.b32.xlu0 %v3159_v9, %s6285_s14  ;;  %5779 = vmatprep.subr.mxu0 %v5285_v35  ;;  %v5281_v35 = vld [vmem:[%s10645_s5 + $0x578] sm:$0xff] }
 0x240   :  { %v8803_v41 = vpop.permute.xlu1 %2298  ;;  %5780 = vmatpush3.msra.mxu0 %v5269_v44  ;;  %5807 = vmatpush3.msra.mxu1 %v5334_v60  ;;  %v3203_v44 = vmul.f32 %v8637_v27, %v10754_v33  ;;  %v5265_v60 = vld [vmem:[%s10645_s5 + $0x4f8] sm:$0xff] }
 0x241   :  { %v8810_v15 = vpop.permute.xlu0 %2300  ;;  %5781 = vmatprep.subr.mxu0 %v5284_v28  ;;  %5808 = vmatprep.subr.mxu1 %v5349_v34  ;;  %v5332_v28 = vld [vmem:[%s10645_s5 + $0x680] sm:$0xff]  ;;  %v5280_v34 = vld [vmem:[%s10645_s5 + $0x570] sm:$0xff]  ;;  %v5347_v27 = vld [vmem:[%s10645_s5 + $0x6f8] sm:$0xff] }
 0x242   :  { %3186 = vrot.lane.b32.xlu1 %v3180_v32, %s6285_s14  ;;  %5782 = vmatpush3.msra.mxu0 %v5268_v22  ;;  %v5264_v22 = vld [vmem:[%s10645_s5 + $0x4f0] sm:$0xff] }
 0x243   :  { %3188 = vrot.lane.b32.xlu0 %v3181_v17, %s6285_s14  ;;  %5783 = vmatprep.subr.mxu0 %v5283_v63  ;;  %v3224_v63 = vmul.f32 %v8627_v48, %v6807_v53  ;;  %v5279_v17 = vld [vmem:[%s10645_s5 + $0x568] sm:$0xff] }
 0x244   :  { %v8831_v29 = vpop.permute.xlu1 %2320  ;;  %5784 = vmatpush3.msra.mxu0 %v5267_v25  ;;  %5809 = vmatpush3.msra.mxu1 %v5333_v1  ;;  %v3225_v1 = vmul.f32 %v8627_v48, %v6795_v57  ;;  %v5346_v48 = vld [vmem:[%s10645_s5 + $0x6f0] sm:$0xff] }
 0x245   :  { %v8838_v9 = vpop.permute.xlu0 %2322  ;;  %5785 = vmatprep.subr.mxu0 %v5282_v47  ;;  %5810 = vmatprep.subr.mxu1 %v5348_v39  ;;  %v5263_v47 = vld [vmem:[%s10645_s5 + $0x4e8] sm:$0xff]  ;;  %v5331_v39 = vld [vmem:[%s10645_s5 + $0x678] sm:$0xff] }
 0x246   :  { %3208 = vrot.lane.b32.xlu1 %v3202_v0, %s6285_s14  ;;  %5786 = vmatpush3.msra.mxu0 %v5266_v14  ;;  %v5278_v14 = vld [vmem:[%s10645_s5 + $0x560] sm:$0xff] }
 0x247   :  { %3210 = vrot.lane.b32.xlu0 %v3203_v44, %s6285_s14  ;;  %5787 = vmatprep.subr.mxu0 %v5281_v35  ;;  %v5262_v0 = vld [vmem:[%s10645_s5 + $0x4e0] sm:$0xff] }
 0x248   :  { %v8861_v32 = vpop.permute.xlu1 %2342  ;;  %5788 = vmatpush3.msra.mxu0 %v5265_v60  ;;  %5811 = vmatpush3.msra.mxu1 %v5332_v28  ;;  %v3246_v60 = vmul.f32 %v8672_v56, %v6833_v51  ;;  %v5330_v28 = vld [vmem:[%s10645_s5 + $0x670] sm:$0xff] }
 0x249   :  { %v8868_v25 = vpop.permute.xlu0 %2344  ;;  %5789 = vmatprep.subr.mxu0 %v5280_v34  ;;  %5812 = vmatprep.subr.mxu1 %v5347_v27  ;;  %v3247_v27 = vmul.f32 %v8672_v56, %v6813_v2  ;;  %v5344_v56 = vld [vmem:[%s10645_s5 + $0x6e0] sm:$0xff] }
 0x24a   :  { %3230 = vrot.lane.b32.xlu1 %v3224_v63, %s6285_s14  ;;  %5790 = vmatpush3.msra.mxu0 %v5264_v22  ;;  %v5345_v22 = vld [vmem:[%s10645_s5 + $0x6e8] sm:$0xff] }
 0x24b   :  { %3232 = vrot.lane.b32.xlu0 %v3225_v1, %s6285_s14  ;;  %5791 = vmatprep.subr.mxu0 %v5279_v17  ;;  %v5329_v17 = vld [vmem:[%s10645_s5 + $0x668] sm:$0xff] }
 0x24c   :  { %v8889_v35 = vpop.permute.xlu1 %2711  ;;  %v5666_v44 = vpop.f32.mrf.mxu1  ;;  %5792 = vmatpush3.msra.mxu0 %v5263_v47  ;;  %5813 = vmatpush3.msra.mxu1 %v5331_v39  ;;  %v3612_v47 = vstv %s8856_s29  ;;  %s8925_s29 = sld [smem:[#allocation6 + $0x6d]] }
 0x24d   :  { %10780 = vst [vmem:[#allocation13_spill] sm:$0xff] %v8889_v35  ;;  %v8896_v34 = vpop.permute.xlu0 %2366  ;;  %5793 = vmatprep.subr.mxu0 %v5278_v14  ;;  %5814 = vmatprep.subr.mxu1 %v5346_v48  ;;  %v3614_v14 = vmul.f32 %v3612_v47, %v6735_v6  ;;  %v5328_v48 = vld [vmem:[%s10645_s5 + $0x660] sm:$0xff] }
 0x24e   :  { %3252 = vrot.lane.b32.xlu1 %v3246_v60, %s6285_s14  ;;  %v5667_v63 = vpop.f32.mrf.mxu1  ;;  %5794 = vmatpush3.msra.mxu0 %v5262_v0  ;;  %v5343_v60 = vld [vmem:[%s10645_s5 + $0x6d8] sm:$0xff] }
 0x24f   :  { %3254 = vrot.lane.b32.xlu0 %v3247_v27, %s6285_s14  ;;  %v8908_v1 = vadd.f32 %v5667_v63, %v5666_v44  ;;  %5815 = vmatpush3.msra.mxu1 %v5330_v28  ;;  %v3269_v44 = vmul.f32 %v8659_v4, %v6735_v6  ;;  %v5327_v28 = vld [vmem:[%s10645_s5 + $0x658] sm:$0xff]  ;;  %v5342_v27 = vld [vmem:[%s10645_s5 + $0x6d0] sm:$0xff]  ;;  %v3268_v63 = vmul.f32 %v8659_v4, %v6749_v20  ;;  %v5325_v4 = vld [vmem:[%s10645_s5 + $0x648] sm:$0xff] }
 0x250   :  { %v8914_v39 = vpop.permute.xlu1 %2364  ;;  %5816 = vmatprep.subr.mxu1 %v5345_v22  ;;  %6115 = vmatprep.subr.mxu0 %v10751_v3 }
 0x251   :  { %v8921_v0 = vpop.permute.xlu0 %2713  ;;  %5817 = vmatpush3.msra.mxu1 %v5329_v17  ;;  %v5326_v17 = vld [vmem:[%s10645_s5 + $0x650] sm:$0xff] }
 0x252   :  { %3621 = vrot.lane.b32.xlu1 %v3614_v14, %s6285_s14  ;;  %5818 = vmatprep.subr.mxu1 %v5344_v56  ;;  %v3615_v14 = vmul.f32 %v3612_v47, %v6477_v11 }
 0x253   :  { %3276 = vrot.lane.b32.xlu0 %v3269_v44, %s6286_s17  ;;  %5819 = vmatpush3.msra.mxu1 %v5328_v48  ;;  %v5341_v48 = vld [vmem:[%s10645_s5 + $0x6c8] sm:$0xff]  ;;  %v2208_v44 = vmul.f32 %v10774_v50, %v6735_v6  ;;  %v2217_v50 = vmul.f32 %v10776_v5, %v6751_v13 }
 0x254   :  { %v8938_v22 = vpop.permute.xlu1 %2388  ;;  %5820 = vmatprep.subr.mxu1 %v5343_v60  ;;  %v5340_v60 = vld [vmem:[%s10645_s5 + $0x6c0] sm:$0xff] }
 0x255   :  { %v8945_v56 = vpop.permute.xlu0 %2709  ;;  %5821 = vmatpush3.msra.mxu1 %v5327_v28  ;;  %v2212_v5 = vadd.f32 %v10775_v31, %v2208_v44  ;;  %v5322_v31 = vld [vmem:[%s10645_s5 + $0x630] sm:$0xff]  ;;  %v2233_v44 = vmul.f32 %v10778_v61, %v6795_v57  ;;  %v2241_v61 = vmul.f32 %v10779_v49, %v6813_v2  ;;  %v3290_v49 = vmul.f32 %v8706_v55, %v10757_v16 }
 0x256   :  { %10781 = vst [vmem:[#allocation30_spill] sm:$0xff] %v8945_v56  ;;  %3274 = vrot.lane.b32.xlu1 %v3268_v63, %s6286_s17  ;;  %5822 = vmatprep.subr.mxu1 %v5342_v27  ;;  %v3291_v63 = vmul.f32 %v8706_v55, %v6751_v13  ;;  %v5324_v27 = vld [vmem:[%s10645_s5 + $0x640] sm:$0xff]  ;;  %v3656_v55 = vstv %s8987_s28  ;;  %s9129_s28 = sld [smem:[#allocation6 + $0x57]] }
 0x257   :  { %3623 = vrot.lane.b32.xlu0 %v3615_v14, %s6285_s14  ;;  %5823 = vmatpush3.msra.mxu1 %v5326_v17  ;;  %v3613_v17 = vmul.f32 %v3612_v47, %v6749_v20  ;;  %v3634_v14 = vstv %s8925_s29  ;;  %v2225_v47 = vmul.f32 %v10777_v42, %v10754_v33  ;;  %v2220_v42 = vadd.f32 %v2217_v50, %v2212_v5 }
 0x258   :  { %v8961_v28 = vpop.permute.xlu1 %2735  ;;  %5824 = vmatprep.subr.mxu1 %v5341_v48  ;;  %v5323_v48 = vld [vmem:[%s10645_s5 + $0x638] sm:$0xff] }
 0x259   :  { %10782 = vst [vmem:[#allocation16_spill] sm:$0xff] %v8961_v28  ;;  %v8970_v56 = vpop.permute.xlu0 %2733  ;;  %5825 = vmatpush3.msra.mxu1 %v5325_v4  ;;  %v5339_v28 = vld [vmem:[%s10645_s5 + $0x6b8] sm:$0xff]  ;;  %v5338_v4 = vld [vmem:[%s10645_s5 + $0x6b0] sm:$0xff]  ;;  %v2228_v50 = vadd.f32 %v2225_v47, %v2220_v42  ;;  %v5320_v47 = vld [vmem:[%s10645_s5 + $0x620] sm:$0xff] }
 0x25a   :  { %10783 = vst [vmem:[#allocation12_spill] sm:$0xff] %v8970_v56  ;;  %v8977_v35 = vpop.f32.mrf.mxu1  ;;  %3298 = vrot.lane.b32.xlu1 %v3291_v63, %s6286_s17  ;;  %5826 = vmatprep.subr.mxu1 %v5340_v60  ;;  %v3637_v56 = vmul.f32 %v3634_v14, %v6471_v8 }
 0x25b   :  { %3619 = vrot.lane.b32.xlu0 %v3613_v17, %s6285_s14  ;;  %5827 = vmatpush3.msra.mxu1 %v5324_v27  ;;  %v3636_v27 = vmul.f32 %v3634_v14, %v6751_v13 }
 0x25c   :  { %v6063_v63 = vpop.f32.mrf.mxu1  ;;  %v8992_v60 = vpop.permute.xlu1 %2731  ;;  %5828 = vmatprep.subr.mxu1 %v5339_v28  ;;  %v5321_v28 = vld [vmem:[%s10645_s5 + $0x628] sm:$0xff] }
 0x25d   :  { %v9000_v17 = vpop.permute.xlu0 %2386  ;;  %5829 = vmatpush3.msra.mxu1 %v5323_v48  ;;  %v5337_v63 = vld [vmem:[%s10645_s5 + $0x6a8] sm:$0xff]  ;;  %v5336_v48 = vld [vmem:[%s10645_s5 + $0x6a0] sm:$0xff] }
 0x25e   :  { %3645 = vrot.lane.b32.xlu1 %v3637_v56, %s6285_s14  ;;  %5830 = vmatprep.subr.mxu1 %v5338_v4  ;;  %v3635_v56 = vmul.f32 %v3634_v14, %v10757_v16  ;;  %v2236_v4 = vadd.f32 %v2233_v44, %v2228_v50  ;;  %v2261_v14 = vsel %vm107_vm2, %v8759_v23, %v8564_v43  ;;  %v5319_v44 = vld [vmem:[%s10645_s5 + $0x618] sm:$0xff] }
 0x25f   :  { %3643 = vrot.lane.b32.xlu0 %v3636_v27, %s6285_s14  ;;  %5831 = vmatpush3.msra.mxu1 %v5322_v31  ;;  %v5335_v31 = vld [vmem:[%s10645_s5 + $0x698] sm:$0xff]  ;;  %v3658_v43 = vmul.f32 %v3656_v55, %v10754_v33  ;;  %v2260_v50 = vsel %vm107_vm2, %v8751_v24, %v8759_v23  ;;  %v2282_v24 = vsel %vm107_vm2, %v8774_v58, %v8781_v62 }
 0x260   :  { %v9016_v5 = vpop.permute.xlu1 %2755  ;;  %5832 = vmatprep.subr.mxu1 %v5337_v63  ;;  %v2244_v27 = vadd.f32 %v2241_v61, %v2236_v4  ;;  %v2283_v63 = vsel %vm107_vm2, %v8781_v62, %v8592_v46  ;;  %v3313_v61 = vmul.f32 %v8697_v10, %v10754_v33  ;;  %v2305_v46 = vsel %vm107_vm2, %v8810_v15, %v8622_v21 }
 0x261   :  { %v9022_v42 = vpop.permute.xlu0 %2410  ;;  %5833 = vmatpush3.msra.mxu1 %v5321_v28  ;;  %v3312_v21 = vmul.f32 %v8697_v10, %v6788_v45  ;;  %v3659_v58 = vmul.f32 %v3656_v55, %v6502_v26 }
 0x262   :  { %3641 = vrot.lane.b32.xlu1 %v3635_v56, %s6285_s14  ;;  %5834 = vmatprep.subr.mxu1 %v5336_v48  ;;  %v2266_v48 = vadd.f32 %v2261_v14, %v2244_v27  ;;  %v2304_v14 = vsel %vm107_vm2, %v8803_v41, %v8810_v15  ;;  %v2371_v15 = vsel %vm130_vm3, %v8896_v34, %v8645_v19 }
 0x263   :  { %3296 = vrot.lane.b32.xlu0 %v3290_v49, %s6286_s17  ;;  %5835 = vmatpush3.msra.mxu1 %v5320_v47  ;;  %v10784_v47 = vld [vmem:[#allocation29_spill] sm:$0xff]  ;;  %v2327_v49 = vsel %vm107_vm2, %v8838_v9, %v8616_v54  ;;  %v2326_v54 = vsel %vm107_vm2, %v8831_v29, %v8838_v9  ;;  %v2393_v19 = vsel %vm130_vm3, %v8938_v22, %v8692_v7 }
 0x264   :  { %v9041_v28 = vpop.permute.xlu1 %2408  ;;  %5836 = vmatprep.subr.mxu1 %v5335_v31  ;;  %v2288_v23 = vadd.f32 %v2283_v63, %v2266_v48  ;;  %v2265_v4 = vadd.f32 %v2260_v50, %v10784_v47  ;;  %v2349_v63 = vsel %vm107_vm2, %v8868_v25, %v8653_v40  ;;  %v3335_v40 = vmul.f32 %v8738_v37, %v6795_v57 }
 0x265   :  { %v9047_v56 = vpop.permute.xlu0 %2757  ;;  %5837 = vmatpush3.msra.mxu1 %v5319_v44  ;;  %v2348_v50 = vsel %vm107_vm2, %v8861_v32, %v8868_v25  ;;  %v3657_v48 = vmul.f32 %v3656_v55, %v6788_v45  ;;  %v2370_v32 = vsel %vm130_vm3, %v8914_v39, %v8896_v34  ;;  %v2415_v55 = vsel %vm130_vm3, %v9022_v42, %v8683_v18 }
 0x266   :  { %3665 = vrot.lane.b32.xlu1 %v3658_v43, %s6285_s14  ;;  %6132 = vmatprep.subr.mxu1 %v10751_v3  ;;  %v2310_v44 = vadd.f32 %v2305_v46, %v2288_v23  ;;  %v2287_v62 = vadd.f32 %v2282_v24, %v2265_v4  ;;  %v2392_v34 = vsel %vm130_vm3, %v9000_v17, %v8938_v22  ;;  %v2661_v22 = vstv %s9085_s23 }
 0x267   :  { %3320 = vrot.lane.b32.xlu0 %v3313_v61, %s6286_s17  ;;  %v3678_v61 = vstv %s9051_s22  ;;  %s9268_s22 = sld [smem:[#allocation6 + $0x79]] }
 0x268   :  { %v2433_v31 = vpop.permute.xlu1 %2432  ;;  %v2332_v10 = vadd.f32 %v2327_v49, %v2310_v44  ;;  %v2309_v41 = vadd.f32 %v2304_v14, %v2287_v62  ;;  %v3681_v23 = vmul.f32 %v3678_v61, %v6521_v36  ;;  %v3680_v4 = vmul.f32 %v3678_v61, %v6795_v57 }
 0x269   :  { %v9071_v27 = vpop.permute.xlu0 %2753  ;;  %v2437_v18 = vsel %vm130_vm3, %v2433_v31, %v8724_v59  ;;  %v2414_v14 = vsel %vm130_vm3, %v9041_v28, %v9022_v42  ;;  %v3334_v42 = vmul.f32 %v8738_v37, %v6807_v53 }
 0x26a   :  { %3318 = vrot.lane.b32.xlu1 %v3312_v21, %s6286_s17  ;;  %v2354_v29 = vadd.f32 %v2349_v63, %v2332_v10  ;;  %v2331_v46 = vadd.f32 %v2326_v54, %v2309_v41  ;;  %v2664_v10 = vmul.f32 %v2661_v22, %v6477_v11 }
 0x26b   :  { %3667 = vrot.lane.b32.xlu0 %v3659_v58, %s6285_s14  ;;  %v3679_v58 = vmul.f32 %v3678_v61, %v6807_v53 }
 0x26c   :  { %v9087_v43 = vpop.permute.xlu1 %2779  ;;  %v2376_v24 = vadd.f32 %v2371_v15, %v2354_v29  ;;  %v2353_v25 = vadd.f32 %v2348_v50, %v2331_v46  ;;  %v3700_v15 = vstv %s9108_s25  ;;  %v3357_v46 = vmul.f32 %v8729_v38, %v6813_v2  ;;  %s9436_s25 = sld [smem:[#allocation6 + $0x86]] }
 0x26d   :  { %v9094_v9 = vpop.permute.xlu0 %2777  ;;  %v3702_v37 = vmul.f32 %v3700_v15, %v6813_v2 }
 0x26e   :  { %3342 = vrot.lane.b32.xlu1 %v3335_v40, %s6286_s17  ;;  %v2398_v47 = vadd.f32 %v2393_v19, %v2376_v24  ;;  %v2375_v49 = vadd.f32 %v2370_v32, %v2353_v25  ;;  %v2665_v40 = vstv %s9098_s24  ;;  %v2663_v24 = vmul.f32 %v2661_v22, %v6735_v6  ;;  %s5532_s24 = sld [smem:[#allocation6 + $0x87]] }
 0x26f   :  { %3663 = vrot.lane.b32.xlu0 %v3657_v48, %s6285_s14  ;;  %v2670_v48 = vstv %s9110_s3  ;;  %v2678_v32 = vstv %s9118_s4  ;;  %v2686_v25 = vstv %s9124_s26  ;;  %s9304_s4 = sld [smem:[#allocation6 + $0x77]] }
 0x270   :  { %v9115_v7 = vpop.permute.xlu1 %2775  ;;  %v2420_v21 = vadd.f32 %v2415_v55, %v2398_v47  ;;  %v2397_v17 = vadd.f32 %v2392_v34, %v2375_v49  ;;  %v2668_v47 = vadd.f32 %v2665_v40, %v2664_v10  ;;  %v9163_v34 = vstv %s9129_s28  ;;  %s9346_s26 = sld [smem:[#allocation6 + $0x7c]] }
 0x271   :  { %v2431_v39 = vpop.permute.xlu0 %2430  ;;  %v2672_v49 = vmul.f32 %v2670_v48, %v6751_v13  ;;  %v2662_v10 = vmul.f32 %v2661_v22, %v6749_v20  ;;  %v2697_v22 = vmul.f32 %v9163_v34, %v6548_v52  ;;  %s9358_s28 = sld [smem:[#allocation6 + $0x82]] }
 0x272   :  { %3689 = vrot.lane.b32.xlu1 %v3681_v23, %s6285_s14  ;;  %v2442_v59 = vadd.f32 %v2437_v18, %v2420_v21  ;;  %v2436_v62 = vsel %vm130_vm3, %v2431_v39, %v2433_v31  ;;  %v2419_v28 = vadd.f32 %v2414_v14, %v2397_v17  ;;  %v3356_v14 = vmul.f32 %v8729_v38, %v6833_v51  ;;  %s5533_s3 = sld [smem:[#allocation6 + $0x8a]] }
 0x273   :  { %3687 = vrot.lane.b32.xlu0 %v3680_v4, %s6285_s14  ;;  %v3722_v17 = vstv %s9139_s30  ;;  %s9362_s30 = sld [smem:[#allocation6 + $0x7f]] }
 0x274   :  { %v9136_v44 = vpop.permute.xlu1 %2799  ;;  %v2441_v31 = vadd.f32 %v2436_v62, %v2419_v28  ;;  %v2667_v28 = vadd.f32 %v2665_v40, %v2663_v24  ;;  %v5356_v24 = vld [vmem:[%s10645_s5 + $0x740] sm:$0xff] }
 0x275   :  { %v2455_v63 = vpop.permute.xlu0 %2454 }
 0x276   :  { %v2459_v54 = vsel %vm130_vm3, %v2455_v63, %v8715_v12  ;;  %3685 = vrot.lane.b32.xlu1 %v3679_v58, %s6285_s14  ;;  %v2673_v58 = vmul.f32 %v2670_v48, %v6471_v8 }
 0x277   :  { %v2464_v41 = vadd.f32 %v2459_v54, %v2442_v59  ;;  %3340 = vrot.lane.b32.xlu0 %v3334_v42, %s6286_s17  ;;  %v2681_v59 = vmul.f32 %v2678_v32, %v6502_v26  ;;  %v3703_v42 = vmul.f32 %v3700_v15, %v6548_v52  ;;  %v2680_v54 = vmul.f32 %v2678_v32, %v10754_v33 }
 0x278   :  { %v2453_v50 = vpop.permute.xlu1 %2452  ;;  %v5623_v29 = vpop.f32.mrf.mxu0 }
 0x279   :  { %v2458_v12 = vsel %vm130_vm3, %v2453_v50, %v2455_v63  ;;  %v9154_v61 = vpop.permute.xlu0 %2801  ;;  %v2467_v19 = vmul.f32 0.3, %v2464_v41  ;;  %v2689_v50 = vmul.f32 %v2686_v25, %v6521_v36 }
 0x27a   :  { %v2463_v55 = vadd.f32 %v2458_v12, %v2441_v31  ;;  %3709 = vrot.lane.b32.xlu1 %v3702_v37, %s6285_s14  ;;  %v5624_v23 = vpop.f32.mrf.mxu0  ;;  %v2688_v31 = vmul.f32 %v2686_v25, %v6795_v57  ;;  %v2675_v37 = vadd.f32 %v2672_v49, %v2667_v28  ;;  %v2671_v12 = vmul.f32 %v2670_v48, %v10757_v16 }
 0x27b   :  { %v5625_v39 = vadd.f32 %v5624_v23, %v5623_v29  ;;  %3364 = vrot.lane.b32.xlu0 %v3357_v46, %s6286_s17  ;;  %v2470_v4 = vmax.f32 %v2464_v41, %v2467_v19  ;;  %v5357_v41 = vld [vmem:[%s10645_s5 + $0x748] sm:$0x3]  ;;  %v3724_v19 = vmul.f32 %v3722_v17, %v6735_v6 }
 0x27c   :  { %v2466_v18 = vmul.f32 0.3, %v2463_v55  ;;  %v9167_v21 = vpop.permute.xlu1 %2821 }
 0x27d   :  { %v1145_v62 = vadd.f32 %v5625_v39, %v8455_v30  ;;  %2582 = vmatprep.mubr.f32.mxu0 %v2470_v4  ;;  %v9175_v63 = vpop.permute.xlu0 %2797  ;;  %v2676_v30 = vadd.f32 %v2673_v58, %v2668_v47  ;;  %v2666_v47 = vadd.f32 %v2665_v40, %v2662_v10  ;;  %v2679_v39 = vmul.f32 %v2678_v32, %v6788_v45  ;;  %v5355_v4 = vld [vmem:[%s10645_s5 + $0x738] sm:$0xff]  ;;  %v5354_v58 = vld [vmem:[%s10645_s5 + $0x730] sm:$0xff] }
 0x27e   :  { %v2469_v38 = vmax.f32 %v2463_v55, %v2466_v18  ;;  %3362 = vrot.lane.b32.xlu1 %v3356_v14, %s6286_s17  ;;  %v2696_v18 = vmul.f32 %v9163_v34, %v6813_v2  ;;  %v2687_v40 = vmul.f32 %v2686_v25, %v6807_v53  ;;  %v3723_v14 = vmul.f32 %v3722_v17, %v6749_v20  ;;  %v10785_v25 = vld [vmem:[#allocation13_spill] sm:$0xff] }
 0x27f   :  { %v1221_v29 = vadd.f32 %v8908_v1, %v1145_v62  ;;  %3711 = vrot.lane.b32.xlu0 %v3703_v42, %s6285_s14  ;;  %v2684_v55 = vadd.f32 %v2681_v59, %v2676_v30  ;;  %v3701_v1 = vmul.f32 %v3700_v15, %v6833_v51  ;;  %v2683_v15 = vadd.f32 %v2680_v54, %v2675_v37 }
 0x280   :  { %v9193_v46 = vpop.permute.xlu1 %2819  ;;  %2583 = vmatmul.mubr.f32.vlgmr.msra.gmra.mxu0 %v2469_v38  ;;  %v3725_v54 = vmul.f32 %v3722_v17, %v6477_v11  ;;  %v3744_v10 = vstv %s9178_s10  ;;  %v2716_v38 = vsel %vm107_vm2, %v10785_v25, %v8921_v0  ;;  %v2695_v30 = vmul.f32 %v9163_v34, %v6833_v51  ;;  %s9370_s10 = sld [smem:[#allocation6 + $0x7a]] }
 0x281   :  { %v9199_v23 = vpop.permute.xlu0 %2823  ;;  %6116 = vmatpush3.msk.msra.mxu0 %vm1004_vm0, %v5357_v41  ;;  %6129 = vmatprep.mubr.msk.f32.mxu0 %vm6288_vm1, %v10751_v3  ;;  %v9206_v48 = vadd.f32 %v8977_v35, %v1221_v29  ;;  %v2692_v49 = vadd.f32 %v2689_v50, %v2684_v55  ;;  %v2674_v35 = vadd.f32 %v2671_v12, %v2666_v47  ;;  %v10787_v12 = vld [vmem:[#allocation12_spill] sm:$0xff] }
 0x282   :  { %3731 = vrot.lane.b32.xlu1 %v3724_v19, %s6286_s17  ;;  %6117 = vmatprep.subr.mxu0 %v10751_v3  ;;  %v2691_v59 = vadd.f32 %v2688_v31, %v2683_v15  ;;  %v5353_v31 = vld [vmem:[%s10645_s5 + $0x728] sm:$0xff]  ;;  %v3746_v15 = vmul.f32 %v3744_v10, %v6751_v13 }
 0x283   :  { %3707 = vrot.lane.b32.xlu0 %v3701_v1, %s6285_s14  ;;  %6118 = vmatpush3.msra.mxu0 %v5356_v24  ;;  %v2700_v62 = vadd.f32 %v2697_v22, %v2692_v49  ;;  %v2682_v41 = vadd.f32 %v2679_v39, %v2674_v35  ;;  %v10786_v22 = vld [vmem:[#allocation16_spill] sm:$0xff]  ;;  %v3747_v24 = vmul.f32 %v3744_v10, %v6471_v8  ;;  %v10788_v1 = vld [vmem:[#allocation30_spill] sm:$0xff]  ;;  %v5351_v35 = vld [vmem:[%s10645_s5 + $0x718] sm:$0xff] }
 0x284   :  { %v9220_v32 = vpop.permute.xlu1 %2845  ;;  %6119 = vmatprep.subr.mxu0 %v10751_v3  ;;  %v2699_v50 = vadd.f32 %v2696_v18, %v2691_v59  ;;  %v2738_v34 = vsel %vm107_vm2, %v10787_v12, %v10786_v22  ;;  %v2715_v47 = vsel %vm107_vm2, %v10788_v1, %v10785_v25  ;;  %v2760_v18 = vsel %vm107_vm2, %v9016_v5, %v9047_v56 }
 0x285   :  { %v9227_v42 = vpop.permute.xlu0 %2843  ;;  %v9229_v28 = vpop.f32.mrf.mxu1  ;;  %6120 = vmatpush3.msra.mxu0 %v5355_v4  ;;  %v2722_v17 = vadd.f32 %v8921_v0, %v2700_v62  ;;  %v2690_v37 = vadd.f32 %v2687_v40, %v2682_v41  ;;  %v5352_v0 = vld [vmem:[%s10645_s5 + $0x720] sm:$0xff]  ;;  %v3766_v59 = vstv %s9217_s18  ;;  %v5407_v62 = vld [vmem:[%s10645_s5 + $0x848] sm:$0xff]  ;;  %v2782_v25 = vsel %vm107_vm2, %v9094_v9, %v9087_v43  ;;  %s9860_s18 = sld [smem:[#allocation6 + $0x69]] }
 0x286   :  { %3729 = vrot.lane.b32.xlu1 %v3723_v14, %s6286_s17  ;;  %6121 = vmatprep.subr.mxu0 %v10751_v3  ;;  %v2721_v55 = vadd.f32 %v2716_v38, %v2699_v50  ;;  %v2737_v14 = vsel %vm107_vm2, %v8992_v60, %v10787_v12  ;;  %v3768_v41 = vmul.f32 %v3766_v59, %v10754_v33 }
 0x287   :  { %3733 = vrot.lane.b32.xlu0 %v3725_v54, %s6286_s17  ;;  %v6080_v29 = vpop.f32.mrf.mxu1  ;;  %6122 = vmatpush3.msra.mxu0 %v5354_v58  ;;  %v2744_v39 = vadd.f32 %v10786_v22, %v2722_v17  ;;  %v2698_v49 = vadd.f32 %v2695_v30, %v2690_v37  ;;  %v3745_v50 = vmul.f32 %v3744_v10, %v10757_v16  ;;  %v10789_v37 = vld [vmem:[#allocation36_spill] sm:$0xff] }
 0x288   :  { %v9248_v19 = vpop.permute.xlu1 %2865  ;;  %6123 = vmatprep.subr.mxu0 %v10751_v3  ;;  %v2743_v40 = vadd.f32 %v2738_v34, %v2721_v55  ;;  %v2804_v29 = vsel %vm107_vm2, %v9136_v44, %v9154_v61  ;;  %v3119_v22 = vmul.f32 %v10789_v37, %v6477_v11  ;;  %v2826_v10 = vsel %vm130_vm3, %v9167_v21, %v9199_v23 }
 0x289   :  { %v9261_v4 = vpop.permute.xlu0 %2841  ;;  %6124 = vmatpush3.msra.mxu0 %v5353_v31  ;;  %v2766_v58 = vadd.f32 %v9047_v56, %v2744_v39  ;;  %v2720_v54 = vadd.f32 %v2715_v47, %v2698_v49  ;;  %v2759_v56 = vsel %vm107_vm2, %v9071_v27, %v9016_v5  ;;  %v2781_v5 = vsel %vm107_vm2, %v9115_v7, %v9094_v9 }
 0x28a   :  { %3755 = vrot.lane.b32.xlu1 %v3747_v24, %s6286_s17  ;;  %6125 = vmatprep.subr.mxu0 %v10751_v3  ;;  %v2765_v60 = vadd.f32 %v2760_v18, %v2743_v40  ;;  %v3767_v24 = vmul.f32 %v3766_v59, %v6788_v45  ;;  %v2803_v9 = vsel %vm107_vm2, %v9175_v63, %v9136_v44  ;;  %v9322_v18 = vstv %s9268_s22  ;;  %s9417_s22 = sld [smem:[#allocation6 + $0x7d]] }
 0x28b   :  { %3753 = vrot.lane.b32.xlu0 %v3746_v15, %s6286_s17  ;;  %6126 = vmatpush3.msra.mxu0 %v5352_v0  ;;  %v2788_v30 = vadd.f32 %v9087_v43, %v2766_v58  ;;  %v2742_v17 = vadd.f32 %v2737_v14, %v2720_v54  ;;  %v3788_v0 = vstv %s9251_s2  ;;  %v3769_v1 = vmul.f32 %v3766_v59, %v6502_v26  ;;  %v10790_v15 = vld [vmem:[#allocation37_spill] sm:$0xff]  ;;  %s9684_s2 = sld [smem:[#allocation6 + $0x8b]] }
 0x28c   :  { %v2864_v38 = vpop.permute.xlu1 %2863  ;;  %6127 = vmatprep.subr.mxu0 %v10751_v3  ;;  %v2787_v12 = vadd.f32 %v2782_v25, %v2765_v60  ;;  %v2848_v39 = vsel %vm130_vm3, %v9227_v42, %v9220_v32  ;;  %v3123_v49 = vadd.f32 %v10790_v15, %v3119_v22  ;;  %v2825_v44 = vsel %vm130_vm3, %v9193_v46, %v9167_v21 }
 0x28d   :  { %v2868_v31 = vpop.permute.xlu0 %2867  ;;  %6128 = vmatpush3.msra.mxu0 %v5351_v35  ;;  %v2810_v27 = vadd.f32 %v9154_v61, %v2788_v30  ;;  %v2764_v43 = vadd.f32 %v2759_v56, %v2742_v17  ;;  %v10791_v35 = vld [vmem:[#allocation38_spill] sm:$0xff]  ;;  %v3791_v25 = vmul.f32 %v3788_v0, %v6521_v36  ;;  %v2847_v46 = vsel %vm130_vm3, %v9261_v4, %v9227_v42 }
 0x28e   :  { %3775 = vrot.lane.b32.xlu1 %v3768_v41, %s6286_s17  ;;  %5849 = vmatprep.subr.mxu0 %v5407_v62  ;;  %v2809_v55 = vadd.f32 %v2804_v29, %v2787_v12  ;;  %v3128_v40 = vmul.f32 %v10791_v35, %v6471_v8  ;;  %v2870_v58 = vsel %vm130_vm3, %v9248_v19, %v2868_v31  ;;  %v10792_v62 = vld [vmem:[#allocation39_spill] sm:$0xff]  ;;  %v10793_v17 = vld [vmem:[#allocation42_spill] sm:$0xff] }
 0x28f   :  { %3751 = vrot.lane.b32.xlu0 %v3745_v50, %s6286_s17  ;;  %v2832_v7 = vadd.f32 %v9199_v23, %v2810_v27  ;;  %v2786_v47 = vadd.f32 %v2781_v5, %v2764_v43  ;;  %v3136_v54 = vmul.f32 %v10792_v62, %v6502_v26  ;;  %v3790_v60 = vmul.f32 %v3788_v0, %v6795_v57  ;;  %v10794_v27 = vld [vmem:[#allocation43_spill] sm:$0xff] }
 0x290   :  { %v2890_v34 = vpop.permute.xlu1 %2889  ;;  %v2831_v63 = vadd.f32 %v2826_v10, %v2809_v55  ;;  %v3131_v50 = vadd.f32 %v3128_v40, %v3123_v49  ;;  %v3144_v29 = vmul.f32 %v10793_v17, %v6521_v36  ;;  %v2869_v22 = vsel %vm130_vm3, %v2864_v38, %v9248_v19 }
 0x291   :  { %v2888_v61 = vpop.permute.xlu0 %2887  ;;  %v2854_v23 = vadd.f32 %v9220_v32, %v2832_v7  ;;  %v2808_v14 = vadd.f32 %v2803_v9, %v2786_v47  ;;  %v3152_v43 = vmul.f32 %v10794_v27, %v6548_v52  ;;  %v4070_v19 = vmul.f32 %v9322_v18, %v6477_v11 }
 0x292   :  { %3773 = vrot.lane.b32.xlu1 %v3767_v24, %s6286_s17  ;;  %v2853_v21 = vadd.f32 %v2848_v39, %v2831_v63  ;;  %v2892_v30 = vsel %vm130_vm3, %v2888_v61, %v2890_v34  ;;  %v3139_v5 = vadd.f32 %v3136_v54, %v3131_v50  ;;  %v3789_v24 = vmul.f32 %v3788_v0, %v6807_v53  ;;  %v5391_v54 = vld [vmem:[%s10645_s5 + $0x7c8] sm:$0xff] }
 0x293   :  { %3777 = vrot.lane.b32.xlu0 %v3769_v1, %s6286_s17  ;;  %v2876_v32 = vadd.f32 %v2868_v31, %v2854_v23  ;;  %v2830_v56 = vadd.f32 %v2825_v44, %v2808_v14  ;;  %v3810_v31 = vstv %s9304_s4  ;;  %s9986_s4 = sld [smem:[#allocation6 + $0x8f]] }
 0x294   :  { %v2886_v59 = vpop.permute.xlu1 %2885  ;;  %v2875_v42 = vadd.f32 %v2870_v58, %v2853_v21  ;;  %v3813_v63 = vmul.f32 %v3810_v31, %v6548_v52  ;;  %v3812_v58 = vmul.f32 %v3810_v31, %v6813_v2 }
 0x295   :  { %v9339_v41 = vpop.permute.xlu0 %3168  ;;  %v2898_v4 = vadd.f32 %v2890_v34, %v2876_v32  ;;  %v2852_v12 = vadd.f32 %v2847_v46, %v2830_v56  ;;  %v2891_v9 = vsel %vm130_vm3, %v2886_v59, %v2888_v61  ;;  %v3147_v34 = vadd.f32 %v3144_v29, %v3139_v5  ;;  %v5406_v32 = vld [vmem:[%s10645_s5 + $0x840] sm:$0xff] }
 0x296   :  { %3799 = vrot.lane.b32.xlu1 %v3791_v25, %s6286_s17  ;;  %v2897_v55 = vadd.f32 %v2892_v30, %v2875_v42  ;;  %v9378_v46 = vstv %s9346_s26  ;;  %v5390_v56 = vld [vmem:[%s10645_s5 + $0x7c0] sm:$0xff]  ;;  %v5405_v42 = vld [vmem:[%s10645_s5 + $0x838] sm:$0xff]  ;;  %s5535_s26 = sld [smem:[#allocation6 + $0x90]] }
 0x297   :  { %3797 = vrot.lane.b32.xlu0 %v3790_v60, %s6286_s17  ;;  %v2874_v38 = vadd.f32 %v2869_v22, %v2852_v12  ;;  %v3155_v49 = vadd.f32 %v3152_v43, %v3147_v34  ;;  %v3811_v22 = vmul.f32 %v3810_v31, %v6833_v51  ;;  %v4092_v12 = vmul.f32 %v9378_v46, %v6471_v8  ;;  %v5389_v31 = vld [vmem:[%s10645_s5 + $0x7b8] sm:$0xff] }
 0x298   :  { %v2912_v10 = vpop.permute.xlu1 %2911  ;;  %v9402_v5 = vstv %s9358_s28  ;;  %s10473_s28 = sld [smem:[#allocation6 + $0x93]] }
 0x299   :  { %v2920_v7 = vadd.f32 %v2912_v10, %v2898_v4  ;;  %v2910_v1 = vpop.permute.xlu0 %2909  ;;  %v2896_v61 = vadd.f32 %v2891_v9, %v2874_v38  ;;  %v3177_v25 = vadd.f32 %v9339_v41, %v3155_v49  ;;  %v5412_v49 = vld [vmem:[%s10645_s5 + $0x870] sm:$0xff] }
 0x29a   :  { %v2914_v47 = vsel %vm130_vm3, %v2910_v1, %v2912_v10  ;;  %3795 = vrot.lane.b32.xlu1 %v3789_v24, %s6286_s17  ;;  %v9412_v24 = vstv %s9362_s30  ;;  %s9452_s30 = sld [smem:[#allocation6 + $0x83]] }
 0x29b   :  { %v2923_v39 = vmul.f32 0.3, %v2920_v7  ;;  %v2919_v0 = vadd.f32 %v2914_v47, %v2897_v55  ;;  %4078 = vrot.lane.b32.xlu0 %v4070_v19, %s6285_s14  ;;  %v5414_v55 = vld [vmem:[%s10645_s5 + $0x880] sm:$0x3]  ;;  %v5413_v19 = vld [vmem:[%s10645_s5 + $0x878] sm:$0xff]  ;;  %v4114_v34 = vmul.f32 %v9412_v24, %v6502_v26  ;;  %v9434_v47 = vstv %s9370_s10 }
 0x29c   :  { %v2908_v44 = vpop.permute.xlu1 %2907 }
 0x29d   :  { %v2926_v23 = vmax.f32 %v2920_v7, %v2923_v39  ;;  %v2913_v40 = vsel %vm130_vm3, %v2908_v44, %v2910_v1  ;;  %v9367_v14 = vpop.permute.xlu0 %3190  ;;  %v2922_v59 = vmul.f32 0.3, %v2919_v0  ;;  %v4136_v1 = vmul.f32 %v9402_v5, %v6521_v36  ;;  %v5404_v39 = vld [vmem:[%s10645_s5 + $0x830] sm:$0xff] }
 0x29e   :  { %v2918_v21 = vadd.f32 %v2913_v40, %v2896_v61  ;;  %3821 = vrot.lane.b32.xlu1 %v3813_v63, %s6286_s17  ;;  %v3199_v50 = vadd.f32 %v9367_v14, %v3177_v25  ;;  %v9447_v61 = vstv %s9380_s11  ;;  %v5388_v44 = vld [vmem:[%s10645_s5 + $0x7b0] sm:$0xff]  ;;  %v4180_v40 = vmul.f32 %v9434_v47, %v6477_v11  ;;  %s10030_s11 = sld [smem:[#allocation6 + $0x92]] }
 0x29f   :  { %3819 = vrot.lane.b32.xlu0 %v3812_v58, %s6286_s17  ;;  %6130 = vmatmul.mubr.msk.f32.vlgmr.msra.gmra.mxu0 %vm1000_vm4, %v2926_v23  ;;  %v2925_v60 = vmax.f32 %v2919_v0, %v2922_v59  ;;  %v5411_v58 = vld [vmem:[%s10645_s5 + $0x868] sm:$0xff]  ;;  %v9472_v25 = vstv %s9404_s13  ;;  %s9891_s13 = sld [smem:[#allocation6 + $0x6c]] }
 0x2a0   :  { %v2921_v30 = vmul.f32 0.3, %v2918_v21  ;;  %v9391_v29 = vpop.permute.xlu1 %3234  ;;  %5850 = vmatpush3.msra.mxu0 %v5391_v54  ;;  %v4158_v54 = vmul.f32 %v9447_v61, %v6548_v52 }
 0x2a1   :  { %v9397_v4 = vpop.permute.xlu0 %3212  ;;  %3037 = vmatprep.mubr.f32.mxu1 %v2925_v60  ;;  %5851 = vmatprep.subr.mxu0 %v5406_v32  ;;  %v9481_v60 = vstv %s9417_s22 }
 0x2a2   :  { %v2924_v43 = vmax.f32 %v2918_v21, %v2921_v30  ;;  %v3221_v10 = vadd.f32 %v9397_v4, %v3199_v50  ;;  %3817 = vrot.lane.b32.xlu1 %v3811_v22, %s6286_s17  ;;  %5852 = vmatpush3.msra.mxu0 %v5390_v56  ;;  %v5403_v21 = vld [vmem:[%s10645_s5 + $0x828] sm:$0xff]  ;;  %v5410_v56 = vld [vmem:[%s10645_s5 + $0x860] sm:$0xff] }
 0x2a3   :  { %4100 = vrot.lane.b32.xlu0 %v4092_v12, %s6285_s14  ;;  %5853 = vmatprep.subr.mxu0 %v5405_v42  ;;  %v5387_v30 = vld [vmem:[%s10645_s5 + $0x7a8] sm:$0xff]  ;;  %v4224_v42 = vmul.f32 %v9472_v25, %v6502_v26  ;;  %v5409_v12 = vld [vmem:[%s10645_s5 + $0x858] sm:$0xff] }
 0x2a4   :  { %v9420_v9 = vpop.permute.xlu1 %3278  ;;  %v3243_v7 = vadd.f32 %v9391_v29, %v3221_v10  ;;  %3038 = vmatmul.mubr.f32.vlgmr.msra.gmra.mxu1 %v2924_v43  ;;  %5854 = vmatpush3.msra.mxu0 %v5389_v31  ;;  %v4202_v43 = vmul.f32 %v9481_v60, %v6471_v8  ;;  %v9504_v10 = vstv %s9436_s25  ;;  %s5531_s25 = sld [smem:[#allocation7 + $0x9]] }
 0x2a5   :  { %v9428_v38 = vpop.permute.xlu0 %3256  ;;  %6133 = vmatpush3.msk.msra.mxu1 %vm1004_vm0, %v5414_v55  ;;  %6146 = vmatprep.mubr.msk.f32.mxu1 %vm6288_vm1, %v10751_v3  ;;  %v5402_v55 = vld [vmem:[%s10645_s5 + $0x820] sm:$0xff] }
 0x2a6   :  { %v3265_v0 = vadd.f32 %v9428_v38, %v3243_v7  ;;  %4144 = vrot.lane.b32.xlu1 %v4136_v1, %s6285_s14  ;;  %6134 = vmatprep.subr.mxu1 %v10751_v3  ;;  %v9513_v1 = vstv %s9452_s30 }
 0x2a7   :  { %4122 = vrot.lane.b32.xlu0 %v4114_v34, %s6285_s14  ;;  %6135 = vmatpush3.msra.mxu1 %v5413_v19  ;;  %v5408_v19 = vld [vmem:[%s10645_s5 + $0x850] sm:$0xff]  ;;  %v5386_v34 = vld [vmem:[%s10645_s5 + $0x7a0] sm:$0xff] }
 0x2a8   :  { %v9458_v63 = vpop.permute.xlu1 %3322  ;;  %v3287_v23 = vadd.f32 %v9420_v9, %v3265_v0  ;;  %6136 = vmatprep.subr.mxu1 %v10751_v3  ;;  %5855 = vmatprep.subr.mxu0 %v5404_v39  ;;  %v5401_v39 = vld [vmem:[%s10645_s5 + $0x818] sm:$0xff] }
 0x2a9   :  { %v9467_v59 = vpop.permute.xlu0 %3300  ;;  %6137 = vmatpush3.msra.mxu1 %v5412_v49  ;;  %5856 = vmatpush3.msra.mxu0 %v5388_v44  ;;  %v4268_v44 = vmul.f32 %v9504_v10, %v6548_v52 }
 0x2aa   :  { %v3309_v32 = vadd.f32 %v9467_v59, %v3287_v23  ;;  %4188 = vrot.lane.b32.xlu1 %v4180_v40, %s6286_s17  ;;  %6138 = vmatprep.subr.mxu1 %v10751_v3  ;;  %v5385_v23 = vld [vmem:[%s10645_s5 + $0x798] sm:$0xff] }
 0x2ab   :  { %4166 = vrot.lane.b32.xlu0 %v4158_v54, %s6285_s14  ;;  %6139 = vmatpush3.msra.mxu1 %v5411_v58  ;;  %v4246_v58 = vmul.f32 %v9513_v1, %v6521_v36  ;;  %v5400_v54 = vld [vmem:[%s10645_s5 + $0x810] sm:$0xff] }
 0x2ac   :  { %v9490_v50 = vpop.permute.xlu1 %3366  ;;  %v3331_v22 = vadd.f32 %v9458_v63, %v3309_v32  ;;  %6140 = vmatprep.subr.mxu1 %v10751_v3  ;;  %5857 = vmatprep.subr.mxu0 %v5403_v21  ;;  %v5464_v21 = vld [vmem:[%s10645_s5 + $0x980] sm:$0xff] }
 0x2ad   :  { %v9499_v31 = vpop.permute.xlu0 %3344  ;;  %6141 = vmatpush3.msra.mxu1 %v5410_v56  ;;  %5858 = vmatpush3.msra.mxu0 %v5387_v30  ;;  %v5384_v56 = vld [vmem:[%s10645_s5 + $0x790] sm:$0xff] }
 0x2ae   :  { %v3353_v7 = vadd.f32 %v9499_v31, %v3331_v22  ;;  %4232 = vrot.lane.b32.xlu1 %v4224_v42, %s6286_s17  ;;  %6142 = vmatprep.subr.mxu1 %v10751_v3  ;;  %v4068_v42 = vmul.f32 %v9322_v18, %v6749_v20 }
 0x2af   :  { %4210 = vrot.lane.b32.xlu0 %v4202_v43, %s6286_s17  ;;  %6143 = vmatpush3.msra.mxu1 %v5409_v12  ;;  %v5399_v12 = vld [vmem:[%s10645_s5 + $0x808] sm:$0xff] }
 0x2b0   :  { %v3375_v0 = vadd.f32 %v9490_v50, %v3353_v7  ;;  %v9526_v49 = vpop.permute.xlu1 %3164  ;;  %6144 = vmatprep.subr.mxu1 %v10751_v3  ;;  %5859 = vmatprep.subr.mxu0 %v5402_v55  ;;  %v4069_v55 = vmul.f32 %v9322_v18, %v6735_v6  ;;  %v5383_v7 = vld [vmem:[%s10645_s5 + $0x788] sm:$0xff]  ;;  %v5463_v18 = vld [vmem:[%s10645_s5 + $0x978] sm:$0xff] }
 0x2b1   :  { %v9534_v40 = vpop.permute.xlu0 %3166  ;;  %6145 = vmatpush3.msra.mxu1 %v5408_v19  ;;  %5860 = vmatpush3.msra.mxu0 %v5386_v34  ;;  %v5448_v19 = vld [vmem:[%s10645_s5 + $0x900] sm:$0xff] }
 0x2b2   :  { %v3378_v32 = vmul.f32 0.3, %v3375_v0  ;;  %4276 = vrot.lane.b32.xlu1 %v4268_v44, %s6286_s17  ;;  %5861 = vmatprep.subr.mxu0 %v5401_v39  ;;  %v5398_v34 = vld [vmem:[%s10645_s5 + $0x800] sm:$0xff]  ;;  %v4090_v44 = vmul.f32 %v9378_v46, %v10757_v16 }
 0x2b3   :  { %4254 = vrot.lane.b32.xlu0 %v4246_v58, %s6286_s17  ;;  %5862 = vmatpush3.msra.mxu0 %v5385_v23  ;;  %v5382_v39 = vld [vmem:[%s10645_s5 + $0x780] sm:$0xff]  ;;  %v5397_v23 = vld [vmem:[%s10645_s5 + $0x7f8] sm:$0xff] }
 0x2b4   :  { %v3381_v30 = vmax.f32 %v3375_v0, %v3378_v32  ;;  %v9549_v22 = vpop.permute.xlu1 %3186  ;;  %5863 = vmatprep.subr.mxu0 %v5400_v54  ;;  %5892 = vmatprep.subr.mxu1 %v5464_v21  ;;  %v4091_v54 = vmul.f32 %v9378_v46, %v6751_v13  ;;  %v5381_v21 = vld [vmem:[%s10645_s5 + $0x778] sm:$0xff]  ;;  %v5462_v46 = vld [vmem:[%s10645_s5 + $0x970] sm:$0xff] }
 0x2b5   :  { %v9556_v43 = vpop.permute.xlu0 %3188  ;;  %5864 = vmatpush3.msra.mxu0 %v5384_v56  ;;  %v5447_v32 = vld [vmem:[%s10645_s5 + $0x8f8] sm:$0xff]  ;;  %v5396_v56 = vld [vmem:[%s10645_s5 + $0x7f0] sm:$0xff] }
 0x2b6   :  { %6147 = vmatmul.mubr.msk.f32.vlgmr.msra.gmra.mxu1 %vm1000_vm4, %v3381_v30  ;;  %4074 = vrot.lane.b32.xlu1 %v4068_v42, %s6285_s14  ;;  %v5380_v30 = vld [vmem:[%s10645_s5 + $0x770] sm:$0xff] }
 0x2b7   :  { %4076 = vrot.lane.b32.xlu0 %v4069_v55, %s6285_s14  ;;  %5865 = vmatprep.subr.mxu0 %v5399_v12  ;;  %v4112_v12 = vmul.f32 %v9412_v24, %v6788_v45  ;;  %v5395_v55 = vld [vmem:[%s10645_s5 + $0x7e8] sm:$0xff] }
 0x2b8   :  { %v9578_v0 = vpop.permute.xlu1 %3208  ;;  %5866 = vmatpush3.msra.mxu0 %v5383_v7  ;;  %5893 = vmatpush3.msra.mxu1 %v5448_v19  ;;  %v4113_v19 = vmul.f32 %v9412_v24, %v10754_v33  ;;  %v5461_v24 = vld [vmem:[%s10645_s5 + $0x968] sm:$0xff] }
 0x2b9   :  { %v9585_v58 = vpop.permute.xlu0 %3210  ;;  %5867 = vmatprep.subr.mxu0 %v5398_v34  ;;  %5894 = vmatprep.subr.mxu1 %v5463_v18  ;;  %v5379_v34 = vld [vmem:[%s10645_s5 + $0x768] sm:$0xff]  ;;  %v5446_v18 = vld [vmem:[%s10645_s5 + $0x8f0] sm:$0xff] }
 0x2ba   :  { %4096 = vrot.lane.b32.xlu1 %v4090_v44, %s6285_s14  ;;  %5868 = vmatpush3.msra.mxu0 %v5382_v39  ;;  %v5394_v39 = vld [vmem:[%s10645_s5 + $0x7e0] sm:$0xff] }
 0x2bb   :  { %4098 = vrot.lane.b32.xlu0 %v4091_v54, %s6285_s14  ;;  %5869 = vmatprep.subr.mxu0 %v5397_v23  ;;  %v5378_v44 = vld [vmem:[%s10645_s5 + $0x760] sm:$0xff]  ;;  %v4134_v54 = vmul.f32 %v9402_v5, %v6807_v53 }
 0x2bc   :  { %v9606_v42 = vpop.permute.xlu1 %3230  ;;  %5870 = vmatpush3.msra.mxu0 %v5381_v21  ;;  %5895 = vmatpush3.msra.mxu1 %v5447_v32  ;;  %v5393_v21 = vld [vmem:[%s10645_s5 + $0x7d8] sm:$0xff] }
 0x2bd   :  { %v9613_v7 = vpop.permute.xlu0 %3232  ;;  %5871 = vmatprep.subr.mxu0 %v5396_v56  ;;  %5896 = vmatprep.subr.mxu1 %v5462_v46  ;;  %v4135_v56 = vmul.f32 %v9402_v5, %v6795_v57  ;;  %v5377_v46 = vld [vmem:[%s10645_s5 + $0x758] sm:$0xff]  ;;  %v5460_v5 = vld [vmem:[%s10645_s5 + $0x960] sm:$0xff] }
 0x2be   :  { %4118 = vrot.lane.b32.xlu1 %v4112_v12, %s6285_s14  ;;  %5872 = vmatpush3.msra.mxu0 %v5380_v30  ;;  %v5445_v30 = vld [vmem:[%s10645_s5 + $0x8e8] sm:$0xff]  ;;  %v5392_v12 = vld [vmem:[%s10645_s5 + $0x7d0] sm:$0xff] }
 0x2bf   :  { %4120 = vrot.lane.b32.xlu0 %v4113_v19, %s6285_s14  ;;  %5873 = vmatprep.subr.mxu0 %v5395_v55  ;;  %v5376_v55 = vld [vmem:[%s10645_s5 + $0x750] sm:$0xff] }
 0x2c0   :  { %v9636_v23 = vpop.permute.xlu1 %3252  ;;  %5874 = vmatpush3.msra.mxu0 %v5379_v34  ;;  %5897 = vmatpush3.msra.mxu1 %v5446_v18  ;;  %v4156_v34 = vmul.f32 %v9447_v61, %v6833_v51  ;;  %v5444_v18 = vld [vmem:[%s10645_s5 + $0x8e0] sm:$0xff] }
 0x2c1   :  { %v9643_v32 = vpop.permute.xlu0 %3254  ;;  %5875 = vmatprep.subr.mxu0 %v5394_v39  ;;  %5898 = vmatprep.subr.mxu1 %v5461_v24  ;;  %v4157_v24 = vmul.f32 %v9447_v61, %v6813_v2  ;;  %v5458_v61 = vld [vmem:[%s10645_s5 + $0x950] sm:$0xff] }
 0x2c2   :  { %4140 = vrot.lane.b32.xlu1 %v4134_v54, %s6285_s14  ;;  %5876 = vmatpush3.msra.mxu0 %v5378_v44  ;;  %v4522_v44 = vstv %s9617_s1  ;;  %v5459_v54 = vld [vmem:[%s10645_s5 + $0x958] sm:$0xff]  ;;  %s9923_s1 = sld [smem:[#allocation6 + $0x89]] }
 0x2c3   :  { %4142 = vrot.lane.b32.xlu0 %v4135_v56, %s6285_s14  ;;  %5877 = vmatprep.subr.mxu0 %v5393_v21  ;;  %v5443_v21 = vld [vmem:[%s10645_s5 + $0x8d8] sm:$0xff] }
 0x2c4   :  { %v9664_v19 = vpop.permute.xlu1 %3621  ;;  %5878 = vmatpush3.msra.mxu0 %v5377_v46  ;;  %5899 = vmatpush3.msra.mxu1 %v5445_v30  ;;  %v4525_v30 = vmul.f32 %v4522_v44, %v6477_v11 }
 0x2c5   :  { %10795 = vst [vmem:[#allocation31_spill] sm:$0xff] %v9664_v19  ;;  %v9671_v39 = vpop.permute.xlu0 %3276  ;;  %5879 = vmatprep.subr.mxu0 %v5392_v12  ;;  %5900 = vmatprep.subr.mxu1 %v5460_v5  ;;  %v5442_v12 = vld [vmem:[%s10645_s5 + $0x8d0] sm:$0xff] }
 0x2c6   :  { %4162 = vrot.lane.b32.xlu1 %v4156_v34, %s6285_s14  ;;  %5880 = vmatpush3.msra.mxu0 %v5376_v55  ;;  %v4524_v55 = vmul.f32 %v4522_v44, %v6735_v6  ;;  %v5457_v34 = vld [vmem:[%s10645_s5 + $0x948] sm:$0xff] }
 0x2c7   :  { %4164 = vrot.lane.b32.xlu0 %v4157_v24, %s6285_s14  ;;  %5901 = vmatpush3.msra.mxu1 %v5444_v18  ;;  %v5441_v24 = vld [vmem:[%s10645_s5 + $0x8c8] sm:$0xff] }
 0x2c8   :  { %v9689_v56 = vpop.permute.xlu1 %3274  ;;  %v5709_v46 = vpop.f32.mrf.mxu0  ;;  %5902 = vmatprep.subr.mxu1 %v5459_v54  ;;  %6149 = vmatprep.subr.mxu0 %v10751_v3 }
 0x2c9   :  { %v9696_v5 = vpop.permute.xlu0 %3623  ;;  %5903 = vmatpush3.msra.mxu1 %v5443_v21  ;;  %v5456_v21 = vld [vmem:[%s10645_s5 + $0x940] sm:$0xff] }
 0x2ca   :  { %10796 = vst [vmem:[#allocation15_spill] sm:$0xff] %v9696_v5  ;;  %4533 = vrot.lane.b32.xlu1 %v4525_v30, %s6285_s14  ;;  %v5710_v18 = vpop.f32.mrf.mxu0  ;;  %5904 = vmatprep.subr.mxu1 %v5458_v61  ;;  %v4523_v5 = vmul.f32 %v4522_v44, %v6749_v20  ;;  %v5440_v61 = vld [vmem:[%s10645_s5 + $0x8c0] sm:$0xff]  ;;  %v5439_v44 = vld [vmem:[%s10645_s5 + $0x8b8] sm:$0xff] }
 0x2cb   :  { %v5711_v54 = vadd.f32 %v5710_v18, %v5709_v46  ;;  %4531 = vrot.lane.b32.xlu0 %v4524_v55, %s6285_s14  ;;  %5905 = vmatpush3.msra.mxu1 %v5442_v12  ;;  %v4179_v12 = vmul.f32 %v9434_v47, %v6735_v6  ;;  %v5455_v55 = vld [vmem:[%s10645_s5 + $0x938] sm:$0xff]  ;;  %v4544_v18 = vstv %s9684_s2  ;;  %s9907_s2 = sld [smem:[#allocation6 + $0x72]] }
 0x2cc   :  { %v9710_v19 = vpop.permute.xlu1 %3298  ;;  %5906 = vmatprep.subr.mxu1 %v5457_v34 }
 0x2cd   :  { %v1745_v30 = vadd.f32 %v5711_v54, %v9229_v28  ;;  %v9717_v46 = vpop.permute.xlu0 %3619  ;;  %5907 = vmatpush3.msra.mxu1 %v5441_v24  ;;  %v3118_v28 = vmul.f32 %v10789_v37, %v6735_v6  ;;  %v5454_v24 = vld [vmem:[%s10645_s5 + $0x930] sm:$0xff]  ;;  %v4546_v54 = vmul.f32 %v4544_v18, %v6751_v13 }
 0x2ce   :  { %4529 = vrot.lane.b32.xlu1 %v4523_v5, %s6285_s14  ;;  %5908 = vmatprep.subr.mxu1 %v5456_v21  ;;  %v5438_v37 = vld [vmem:[%s10645_s5 + $0x8b0] sm:$0xff] }
 0x2cf   :  { %v9731_v34 = vadd.f32 %v1745_v30, %v9206_v48  ;;  %4186 = vrot.lane.b32.xlu0 %v4179_v12, %s6286_s17  ;;  %5909 = vmatpush3.msra.mxu1 %v5440_v61  ;;  %v3127_v48 = vmul.f32 %v10791_v35, %v6751_v13  ;;  %v4178_v61 = vmul.f32 %v9434_v47, %v6749_v20  ;;  %v5453_v30 = vld [vmem:[%s10645_s5 + $0x928] sm:$0xff]  ;;  %v5452_v47 = vld [vmem:[%s10645_s5 + $0x920] sm:$0xff] }
 0x2d0   :  { %v9738_v5 = vpop.permute.xlu1 %3645  ;;  %5910 = vmatprep.subr.mxu1 %v5455_v55  ;;  %v5437_v12 = vld [vmem:[%s10645_s5 + $0x8a8] sm:$0xff]  ;;  %v3122_v35 = vadd.f32 %v10790_v15, %v3118_v28  ;;  %v3135_v55 = vmul.f32 %v10792_v62, %v10754_v33  ;;  %v5436_v15 = vld [vmem:[%s10645_s5 + $0x8a0] sm:$0xff]  ;;  %v3143_v62 = vmul.f32 %v10793_v17, %v6795_v57  ;;  %v3151_v17 = vmul.f32 %v10794_v27, %v6813_v2 }
 0x2d1   :  { %v9746_v21 = vpop.permute.xlu0 %3643  ;;  %5911 = vmatpush3.msra.mxu1 %v5439_v44  ;;  %v4545_v27 = vmul.f32 %v4544_v18, %v10757_v16 }
 0x2d2   :  { %4553 = vrot.lane.b32.xlu1 %v4546_v54, %s6285_s14  ;;  %5912 = vmatprep.subr.mxu1 %v5454_v24  ;;  %v4201_v24 = vmul.f32 %v9481_v60, %v6751_v13  ;;  %v3130_v28 = vadd.f32 %v3127_v48, %v3122_v35  ;;  %v5435_v48 = vld [vmem:[%s10645_s5 + $0x898] sm:$0xff] }
 0x2d3   :  { %4184 = vrot.lane.b32.xlu0 %v4178_v61, %s6286_s17  ;;  %5913 = vmatpush3.msra.mxu1 %v5438_v37  ;;  %v4547_v37 = vmul.f32 %v4544_v18, %v6471_v8  ;;  %v5451_v61 = vld [vmem:[%s10645_s5 + $0x918] sm:$0xff]  ;;  %v3193_v18 = vsel %vm107_vm2, %v9556_v43, %v9367_v14  ;;  %v3192_v14 = vsel %vm107_vm2, %v9549_v22, %v9556_v43 }
 0x2d4   :  { %v9766_v44 = vpop.permute.xlu1 %3641  ;;  %5914 = vmatprep.subr.mxu1 %v5453_v30  ;;  %v3138_v30 = vadd.f32 %v3135_v55, %v3130_v28  ;;  %v5434_v55 = vld [vmem:[%s10645_s5 + $0x890] sm:$0xff]  ;;  %v4223_v22 = vmul.f32 %v9472_v25, %v10754_v33 }
 0x2d5   :  { %v9775_v54 = vpop.permute.xlu0 %3296  ;;  %5915 = vmatpush3.msra.mxu1 %v5437_v12  ;;  %v5450_v12 = vld [vmem:[%s10645_s5 + $0x910] sm:$0xff] }
 0x2d6   :  { %4208 = vrot.lane.b32.xlu1 %v4201_v24, %s6286_s17  ;;  %5916 = vmatprep.subr.mxu1 %v5452_v47  ;;  %v4200_v47 = vmul.f32 %v9481_v60, %v10757_v16  ;;  %v3146_v24 = vadd.f32 %v3143_v62, %v3138_v30  ;;  %v3171_v60 = vsel %vm107_vm2, %v9534_v40, %v9339_v41  ;;  %v5433_v62 = vld [vmem:[%s10645_s5 + $0x888] sm:$0xff] }
 0x2d7   :  { %4555 = vrot.lane.b32.xlu0 %v4547_v37, %s6285_s14  ;;  %5917 = vmatpush3.msra.mxu1 %v5436_v15  ;;  %v4566_v15 = vstv %s9750_s0  ;;  %v5449_v37 = vld [vmem:[%s10645_s5 + $0x908] sm:$0xff]  ;;  %v3170_v30 = vsel %vm107_vm2, %v9526_v49, %v9534_v40  ;;  %v10797_v49 = vld [vmem:[#allocation44_spill] sm:$0xff]  ;;  %s9882_s0 = sld [smem:[#allocation7 + $0x7]] }
 0x2d8   :  { %v9791_v35 = vpop.permute.xlu1 %3665  ;;  %5918 = vmatprep.subr.mxu1 %v5451_v61  ;;  %v3154_v61 = vadd.f32 %v3151_v17, %v3146_v24  ;;  %v4569_v41 = vmul.f32 %v4566_v15, %v6502_v26  ;;  %v3175_v40 = vadd.f32 %v3170_v30, %v10797_v49 }
 0x2d9   :  { %v9798_v28 = vpop.permute.xlu0 %3320  ;;  %5919 = vmatpush3.msra.mxu1 %v5435_v48 }
 0x2da   :  { %4206 = vrot.lane.b32.xlu1 %v4200_v47, %s6286_s17  ;;  %5920 = vmatprep.subr.mxu1 %v5450_v12  ;;  %v3176_v12 = vadd.f32 %v3171_v60, %v3154_v61  ;;  %v4568_v47 = vmul.f32 %v4566_v15, %v10754_v33  ;;  %v3214_v60 = vsel %vm107_vm2, %v9578_v0, %v9585_v58  ;;  %v4588_v0 = vstv %s9813_s16 }
 0x2db   :  { %4551 = vrot.lane.b32.xlu0 %v4545_v27, %s6285_s14  ;;  %5921 = vmatpush3.msra.mxu1 %v5434_v55  ;;  %v3215_v55 = vsel %vm107_vm2, %v9585_v58, %v9397_v4  ;;  %v3237_v27 = vsel %vm107_vm2, %v9613_v7, %v9391_v29  ;;  %v4567_v4 = vmul.f32 %v4566_v15, %v6788_v45 }
 0x2dc   :  { %v9818_v48 = vpop.permute.xlu1 %3318  ;;  %5922 = vmatprep.subr.mxu1 %v5449_v37  ;;  %v3198_v24 = vadd.f32 %v3193_v18, %v3176_v12  ;;  %v3197_v43 = vadd.f32 %v3192_v14, %v3175_v40  ;;  %v3259_v18 = vsel %vm107_vm2, %v9643_v32, %v9428_v38  ;;  %v3236_v29 = vsel %vm107_vm2, %v9606_v42, %v9613_v7 }
 0x2dd   :  { %v9824_v17 = vpop.permute.xlu0 %3667  ;;  %5923 = vmatpush3.msra.mxu1 %v5433_v62  ;;  %v4590_v38 = vmul.f32 %v4588_v0, %v6795_v57  ;;  %v3258_v12 = vsel %vm107_vm2, %v9636_v23, %v9643_v32  ;;  %v3280_v23 = vsel %vm130_vm3, %v9689_v56, %v9671_v39 }
 0x2de   :  { %4577 = vrot.lane.b32.xlu1 %v4569_v41, %s6285_s14  ;;  %6166 = vmatprep.subr.mxu1 %v10751_v3  ;;  %v3220_v62 = vadd.f32 %v3215_v55, %v3198_v24  ;;  %v3219_v58 = vadd.f32 %v3214_v60, %v3197_v43  ;;  %v3281_v41 = vsel %vm130_vm3, %v9671_v39, %v9420_v9 }
 0x2df   :  { %4575 = vrot.lane.b32.xlu0 %v4568_v47, %s6285_s14  ;;  %v4222_v47 = vmul.f32 %v9472_v25, %v6788_v45  ;;  %v3303_v9 = vsel %vm130_vm3, %v9710_v19, %v9467_v59  ;;  %v3325_v25 = vsel %vm130_vm3, %v9798_v28, %v9458_v63  ;;  %v4245_v59 = vmul.f32 %v9513_v1, %v6795_v57 }
 0x2e0   :  { %v3343_v37 = vpop.permute.xlu1 %3342  ;;  %v3242_v15 = vadd.f32 %v3237_v27, %v3220_v62  ;;  %v3241_v55 = vadd.f32 %v3236_v29, %v3219_v58  ;;  %v3302_v39 = vsel %vm130_vm3, %v9775_v54, %v9710_v19  ;;  %v3571_v19 = vstv %s9860_s18 }
 0x2e1   :  { %v9844_v61 = vpop.permute.xlu0 %3663  ;;  %v3347_v63 = vsel %vm130_vm3, %v3343_v37, %v9499_v31  ;;  %v4244_v29 = vmul.f32 %v9513_v1, %v6807_v53  ;;  %v3574_v1 = vmul.f32 %v3571_v19, %v6477_v11 }
 0x2e2   :  { %4573 = vrot.lane.b32.xlu1 %v4567_v4, %s6285_s14  ;;  %v3264_v42 = vadd.f32 %v3259_v18, %v3242_v15  ;;  %v3263_v24 = vadd.f32 %v3258_v12, %v3241_v55  ;;  %v4591_v4 = vmul.f32 %v4588_v0, %v6521_v36 }
 0x2e3   :  { %4230 = vrot.lane.b32.xlu0 %v4223_v22, %s6286_s17  ;;  %v3324_v22 = vsel %vm130_vm3, %v9818_v48, %v9798_v28  ;;  %v4610_v28 = vstv %s9872_s12 }
 0x2e4   :  { %v9862_v30 = vpop.permute.xlu1 %3689  ;;  %v3286_v14 = vadd.f32 %v3281_v41, %v3264_v42  ;;  %v3285_v60 = vadd.f32 %v3280_v23, %v3263_v24  ;;  %v4589_v41 = vmul.f32 %v4588_v0, %v6807_v53  ;;  %v3575_v0 = vstv %s9882_s0  ;;  %s10070_s0 = sld [smem:[#allocation6 + $0x95]] }
 0x2e5   :  { %v9868_v7 = vpop.permute.xlu0 %3687 }
 0x2e6   :  { %4597 = vrot.lane.b32.xlu1 %v4590_v38, %s6285_s14  ;;  %v3308_v40 = vadd.f32 %v3303_v9, %v3286_v14  ;;  %v3307_v54 = vadd.f32 %v3302_v39, %v3285_v60  ;;  %v4613_v9 = vmul.f32 %v4610_v28, %v6548_v52  ;;  %v3588_v39 = vstv %s9897_s19 }
 0x2e7   :  { %4228 = vrot.lane.b32.xlu0 %v4222_v47, %s6286_s17  ;;  %v2199_v32 = vpop.f32.mrf.mxu0 }
 0x2e8   :  { %v9887_v49 = vpop.permute.xlu1 %3685  ;;  %v3330_v62 = vadd.f32 %v3325_v25, %v3308_v40  ;;  %v3329_v48 = vadd.f32 %v3324_v22, %v3307_v54  ;;  %v4612_v25 = vmul.f32 %v4610_v28, %v6813_v2  ;;  %v3580_v40 = vstv %s9891_s13 }
 0x2e9   :  { %v3341_v56 = vpop.permute.xlu0 %3340  ;;  %v6097_v27 = vpop.f32.mrf.mxu0  ;;  %v3582_v60 = vmul.f32 %v3580_v40, %v6751_v13  ;;  %v4611_v54 = vmul.f32 %v4610_v28, %v6833_v51  ;;  %v5471_v28 = vld [vmem:[%s10645_s5 + $0x9b8] sm:$0x3] }
 0x2ea   :  { %4252 = vrot.lane.b32.xlu1 %v4245_v59, %s6286_s17  ;;  %v3352_v31 = vadd.f32 %v3347_v63, %v3330_v62  ;;  %v3346_v15 = vsel %vm130_vm3, %v3341_v56, %v3343_v37  ;;  %v3573_v59 = vmul.f32 %v3571_v19, %v6735_v6  ;;  %v3578_v27 = vadd.f32 %v3575_v0, %v3574_v1 }
 0x2eb   :  { %4599 = vrot.lane.b32.xlu0 %v4591_v4, %s6285_s14  ;;  %v3351_v47 = vadd.f32 %v3346_v15, %v3329_v48  ;;  %v3596_v63 = vstv %s9907_s2 }
 0x2ec   :  { %v9909_v43 = vpop.permute.xlu1 %3709  ;;  %v5752_v18 = vpop.f32.mrf.mxu1  ;;  %v3577_v15 = vadd.f32 %v3575_v0, %v3573_v59  ;;  %v3599_v1 = vmul.f32 %v3596_v63, %v6521_v36  ;;  %v4266_v59 = vmul.f32 %v9504_v10, %v6833_v51 }
 0x2ed   :  { %v3365_v58 = vpop.permute.xlu0 %3364 }
 0x2ee   :  { %v3369_v38 = vsel %vm130_vm3, %v3365_v58, %v9490_v50  ;;  %4250 = vrot.lane.b32.xlu1 %v4244_v29, %s6286_s17  ;;  %v5753_v12 = vpop.f32.mrf.mxu1  ;;  %v3591_v29 = vmul.f32 %v3588_v39, %v6502_v26 }
 0x2ef   :  { %v3374_v42 = vadd.f32 %v3369_v38, %v3352_v31  ;;  %4595 = vrot.lane.b32.xlu0 %v4589_v41, %s6285_s14  ;;  %v5754_v37 = vadd.f32 %v5753_v12, %v5752_v18  ;;  %v3583_v18 = vmul.f32 %v3580_v40, %v6471_v8  ;;  %v3572_v41 = vmul.f32 %v3571_v19, %v6749_v20 }
 0x2f0   :  { %v3363_v55 = vpop.permute.xlu1 %3362  ;;  %v3590_v12 = vmul.f32 %v3588_v39, %v10754_v33  ;;  %v3581_v19 = vmul.f32 %v3580_v40, %v10757_v16 }
 0x2f1   :  { %v3377_v50 = vmul.f32 0.3, %v3374_v42  ;;  %v2200_v14 = vadd.f32 %v5754_v37, %v2199_v32  ;;  %v3368_v23 = vsel %vm130_vm3, %v3363_v55, %v3365_v58  ;;  %v9928_v24 = vpop.permute.xlu0 %3711  ;;  %v3604_v58 = vstv %s9916_s20 }
 0x2f2   :  { %v3373_v56 = vadd.f32 %v3368_v23, %v3351_v47  ;;  %4621 = vrot.lane.b32.xlu1 %v4613_v9, %s6285_s14  ;;  %v3586_v38 = vadd.f32 %v3583_v18, %v3578_v27  ;;  %v3585_v37 = vadd.f32 %v3582_v60, %v3577_v15  ;;  %v3598_v47 = vmul.f32 %v3596_v63, %v6795_v57  ;;  %v5469_v27 = vld [vmem:[%s10645_s5 + $0x9a8] sm:$0xff]  ;;  %v5468_v18 = vld [vmem:[%s10645_s5 + $0x9a0] sm:$0xff] }
 0x2f3   :  { %v9936_v4 = vadd.f32 %v2200_v14, %v9731_v34  ;;  %4619 = vrot.lane.b32.xlu0 %v4612_v25, %s6285_s14  ;;  %v3380_v32 = vmax.f32 %v3374_v42, %v3377_v50  ;;  %v4267_v34 = vmul.f32 %v9504_v10, %v6813_v2  ;;  %v4632_v42 = vstv %s9923_s1  ;;  %v5470_v50 = vld [vmem:[%s10645_s5 + $0x9b0] sm:$0xff] }
 0x2f4   :  { %v3376_v62 = vmul.f32 0.3, %v3373_v56  ;;  %v9941_v22 = vpop.permute.xlu1 %3731  ;;  %v4634_v9 = vmul.f32 %v4632_v42, %v6735_v6  ;;  %v3594_v14 = vadd.f32 %v3591_v29, %v3586_v38  ;;  %v3607_v23 = vmul.f32 %v3604_v58, %v6548_v52 }
 0x2f5   :  { %3492 = vmatprep.mubr.f32.mxu0 %v3380_v32  ;;  %v9946_v31 = vpop.permute.xlu0 %3707  ;;  %v3576_v40 = vadd.f32 %v3575_v0, %v3572_v41  ;;  %v3593_v32 = vadd.f32 %v3590_v12, %v3585_v37  ;;  %v3606_v10 = vmul.f32 %v3604_v58, %v6813_v2  ;;  %v4635_v41 = vmul.f32 %v4632_v42, %v6477_v11 }
 0x2f6   :  { %v3379_v48 = vmax.f32 %v3373_v56, %v3376_v62  ;;  %4617 = vrot.lane.b32.xlu1 %v4611_v54, %s6285_s14  ;;  %v3589_v56 = vmul.f32 %v3588_v39, %v6788_v45  ;;  %v3602_v60 = vadd.f32 %v3599_v1, %v3594_v14  ;;  %v3597_v39 = vmul.f32 %v3596_v63, %v6807_v53  ;;  %v10799_v63 = vld [vmem:[#allocation31_spill] sm:$0xff] }
 0x2f7   :  { %4274 = vrot.lane.b32.xlu0 %v4267_v34, %s6286_s17  ;;  %v3584_v0 = vadd.f32 %v3581_v19, %v3576_v40  ;;  %v4633_v54 = vmul.f32 %v4632_v42, %v6749_v20  ;;  %v3601_v29 = vadd.f32 %v3598_v47, %v3593_v32  ;;  %v3605_v1 = vmul.f32 %v3604_v58, %v6833_v51  ;;  %v5467_v47 = vld [vmem:[%s10645_s5 + $0x998] sm:$0xff] }
 0x2f8   :  { %v9964_v55 = vpop.permute.xlu1 %3729  ;;  %3493 = vmatmul.mubr.f32.vlgmr.msra.gmra.mxu0 %v3379_v48  ;;  %v3610_v34 = vadd.f32 %v3607_v23, %v3602_v60  ;;  %v4654_v48 = vstv %s9950_s21  ;;  %v3648_v58 = vsel %vm107_vm2, %v9746_v21, %v9738_v5 }
 0x2f9   :  { %v9971_v25 = vpop.permute.xlu0 %3733  ;;  %6150 = vmatpush3.msk.msra.mxu0 %vm1004_vm0, %v5471_v28  ;;  %6163 = vmatprep.mubr.msk.f32.mxu0 %vm6288_vm1, %v10751_v3  ;;  %v10798_v28 = vld [vmem:[#allocation15_spill] sm:$0xff]  ;;  %v3592_v12 = vadd.f32 %v3589_v56, %v3584_v0  ;;  %v3609_v42 = vadd.f32 %v3606_v10, %v3601_v29  ;;  %v4657_v23 = vmul.f32 %v4654_v48, %v6471_v8 }
 0x2fa   :  { %4641 = vrot.lane.b32.xlu1 %v4634_v9, %s6286_s17  ;;  %6151 = vmatprep.subr.mxu0 %v10751_v3  ;;  %v3626_v38 = vsel %vm107_vm2, %v10799_v63, %v10798_v28  ;;  %v3632_v19 = vadd.f32 %v10798_v28, %v3610_v34  ;;  %v3625_v56 = vsel %vm107_vm2, %v9717_v46, %v10799_v63  ;;  %v5465_v46 = vld [vmem:[%s10645_s5 + $0x988] sm:$0xff]  ;;  %v5521_v29 = vld [vmem:[%s10645_s5 + $0xab8] sm:$0xff] }
 0x2fb   :  { %4272 = vrot.lane.b32.xlu0 %v4266_v59, %s6286_s17  ;;  %6152 = vmatpush3.msra.mxu0 %v5470_v50  ;;  %v3600_v9 = vadd.f32 %v3597_v39, %v3592_v12  ;;  %v5466_v59 = vld [vmem:[%s10645_s5 + $0x990] sm:$0xff]  ;;  %v3631_v40 = vadd.f32 %v3626_v38, %v3609_v42  ;;  %v4656_v60 = vmul.f32 %v4654_v48, %v6751_v13  ;;  %v10800_v42 = vld [vmem:[#allocation45_spill] sm:$0xff] }
 0x2fc   :  { %v9989_v62 = vpop.permute.xlu1 %3755  ;;  %6153 = vmatprep.subr.mxu0 %v10751_v3  ;;  %v3670_v0 = vsel %vm107_vm2, %v9791_v35, %v9824_v17  ;;  %v3647_v39 = vsel %vm107_vm2, %v9766_v44, %v9746_v21  ;;  %v3669_v44 = vsel %vm107_vm2, %v9844_v61, %v9791_v35  ;;  %v4655_v12 = vmul.f32 %v4654_v48, %v10757_v16 }
 0x2fd   :  { %v9996_v15 = vpop.permute.xlu0 %3753  ;;  %6154 = vmatpush3.msra.mxu0 %v5469_v27  ;;  %v3654_v27 = vadd.f32 %v9738_v5, %v3632_v19  ;;  %v3608_v10 = vadd.f32 %v3605_v1, %v3600_v9  ;;  %v3653_v5 = vadd.f32 %v3648_v58, %v3631_v40  ;;  %v4029_v19 = vmul.f32 %v10800_v42, %v6477_v11 }
 0x2fe   :  { %v10004_v37 = vpop.f32.mrf.mxu1  ;;  %4639 = vrot.lane.b32.xlu1 %v4633_v54, %s6286_s17  ;;  %6155 = vmatprep.subr.mxu0 %v10751_v3  ;;  %v3691_v35 = vsel %vm107_vm2, %v9887_v49, %v9868_v7  ;;  %v3736_v48 = vsel %vm130_vm3, %v9941_v22, %v9971_v25  ;;  %v4698_v40 = vstv %s10030_s11 }
 0x2ff   :  { %4643 = vrot.lane.b32.xlu0 %v4635_v41, %s6286_s17  ;;  %6156 = vmatpush3.msra.mxu0 %v5468_v18  ;;  %v3676_v54 = vadd.f32 %v9824_v17, %v3654_v27  ;;  %v4676_v18 = vstv %s9986_s4  ;;  %v3630_v34 = vadd.f32 %v3625_v56, %v3608_v10  ;;  %v3692_v41 = vsel %vm107_vm2, %v9868_v7, %v9862_v30  ;;  %s5534_s4 = sld [smem:[#allocation6 + $0x8d]] }
 0x300   :  { %v6114_v50 = vpop.f32.mrf.mxu1  ;;  %v10016_v14 = vpop.permute.xlu1 %3775  ;;  %6157 = vmatprep.subr.mxu0 %v10751_v3  ;;  %v4678_v63 = vmul.f32 %v4676_v18, %v10754_v33  ;;  %v3675_v21 = vadd.f32 %v3670_v0, %v3653_v5  ;;  %v3713_v7 = vsel %vm107_vm2, %v9946_v31, %v9909_v43  ;;  %v3758_v27 = vsel %vm130_vm3, %v9996_v15, %v9989_v62  ;;  %v10802_v31 = vld [vmem:[#allocation47_spill] sm:$0xff] }
 0x301   :  { %v10027_v32 = vpop.permute.xlu0 %3751  ;;  %6158 = vmatpush3.msra.mxu0 %v5467_v47  ;;  %v3698_v17 = vadd.f32 %v9862_v30, %v3676_v54  ;;  %v3652_v1 = vadd.f32 %v3647_v39, %v3630_v34  ;;  %v3714_v47 = vsel %vm107_vm2, %v9909_v43, %v9928_v24  ;;  %v4677_v50 = vmul.f32 %v4676_v18, %v6788_v45 }
 0x302   :  { %4665 = vrot.lane.b32.xlu1 %v4657_v23, %s6286_s17  ;;  %6159 = vmatprep.subr.mxu0 %v10751_v3  ;;  %v3697_v9 = vadd.f32 %v3692_v41, %v3675_v21  ;;  %v4679_v23 = vmul.f32 %v4676_v18, %v6502_v26  ;;  %v3735_v0 = vsel %vm130_vm3, %v9964_v55, %v9941_v22  ;;  %v10803_v18 = vld [vmem:[#allocation48_spill] sm:$0xff] }
 0x303   :  { %4663 = vrot.lane.b32.xlu0 %v4656_v60, %s6286_s17  ;;  %6160 = vmatpush3.msra.mxu0 %v5466_v59  ;;  %v3720_v61 = vadd.f32 %v9928_v24, %v3698_v17  ;;  %v3674_v30 = vadd.f32 %v3669_v44, %v3652_v1  ;;  %v10801_v60 = vld [vmem:[#allocation46_spill] sm:$0xff]  ;;  %v4701_v34 = vmul.f32 %v4698_v40, %v6521_v36 }
 0x304   :  { %v3774_v28 = vpop.permute.xlu1 %3773  ;;  %6161 = vmatprep.subr.mxu0 %v10751_v3  ;;  %v3719_v59 = vadd.f32 %v3714_v47, %v3697_v9  ;;  %v4033_v10 = vadd.f32 %v10801_v60, %v4029_v19  ;;  %v3757_v55 = vsel %vm130_vm3, %v10027_v32, %v9996_v15  ;;  %v4720_v15 = vstv %s10070_s0  ;;  %v10805_v9 = vld [vmem:[#allocation50_spill] sm:$0xff] }
 0x305   :  { %v3778_v38 = vpop.permute.xlu0 %3777  ;;  %6162 = vmatpush3.msra.mxu0 %v5465_v46  ;;  %v3742_v49 = vadd.f32 %v9971_v25, %v3720_v61  ;;  %v3696_v56 = vadd.f32 %v3691_v35, %v3674_v30  ;;  %v4038_v25 = vmul.f32 %v10802_v31, %v6471_v8  ;;  %v3779_v47 = vsel %vm130_vm3, %v3774_v28, %v10016_v14 }
 0x306   :  { %4685 = vrot.lane.b32.xlu1 %v4678_v63, %s6286_s17  ;;  %5935 = vmatprep.subr.mxu0 %v5521_v29  ;;  %v3741_v46 = vadd.f32 %v3736_v48, %v3719_v59  ;;  %v3780_v39 = vsel %vm130_vm3, %v10016_v14, %v3778_v38  ;;  %v4046_v29 = vmul.f32 %v10803_v18, %v6502_v26 }
 0x307   :  { %4661 = vrot.lane.b32.xlu0 %v4655_v12, %s6286_s17  ;;  %v3764_v43 = vadd.f32 %v9989_v62, %v3742_v49  ;;  %v3718_v5 = vadd.f32 %v3713_v7, %v3696_v56  ;;  %v4700_v63 = vmul.f32 %v4698_v40, %v6795_v57  ;;  %v4041_v17 = vadd.f32 %v4038_v25, %v4033_v10  ;;  %v10804_v12 = vld [vmem:[#allocation49_spill] sm:$0xff]  ;;  %v5505_v25 = vld [vmem:[%s10645_s5 + $0xa38] sm:$0xff] }
 0x308   :  { %v3800_v58 = vpop.permute.xlu1 %3799  ;;  %v3763_v22 = vadd.f32 %v3758_v27, %v3741_v46  ;;  %v4054_v1 = vmul.f32 %v10804_v12, %v6521_v36  ;;  %v4062_v35 = vmul.f32 %v10805_v9, %v6548_v52  ;;  %v4722_v30 = vmul.f32 %v4720_v15, %v6813_v2  ;;  %v5528_v12 = vld [vmem:[%s10645_s5 + $0xaf0] sm:$0x3] }
 0x309   :  { %v3798_v24 = vpop.permute.xlu0 %3797  ;;  %v3786_v62 = vadd.f32 %v3778_v38, %v3764_v43  ;;  %v3740_v21 = vadd.f32 %v3735_v0, %v3718_v5  ;;  %v4049_v38 = vadd.f32 %v4046_v29, %v4041_v17  ;;  %v4699_v14 = vmul.f32 %v4698_v40, %v6807_v53  ;;  %v5504_v29 = vld [vmem:[%s10645_s5 + $0xa30] sm:$0xff] }
 0x30a   :  { %4683 = vrot.lane.b32.xlu1 %v4677_v50, %s6286_s17  ;;  %v3802_v44 = vsel %vm130_vm3, %v3798_v24, %v3800_v58  ;;  %v3785_v42 = vadd.f32 %v3780_v39, %v3763_v22  ;;  %v4721_v0 = vmul.f32 %v4720_v15, %v6833_v51  ;;  %v4723_v31 = vmul.f32 %v4720_v15, %v6548_v52  ;;  %v5502_v15 = vld [vmem:[%s10645_s5 + $0xa20] sm:$0xff] }
 0x30b   :  { %4687 = vrot.lane.b32.xlu0 %v4679_v23, %s6286_s17  ;;  %v3808_v19 = vadd.f32 %v3800_v58, %v3786_v62  ;;  %v3762_v32 = vadd.f32 %v3757_v55, %v3740_v21  ;;  %v4057_v58 = vadd.f32 %v4054_v1, %v4049_v38  ;;  %v5519_v62 = vld [vmem:[%s10645_s5 + $0xaa8] sm:$0xff]  ;;  %v5518_v1 = vld [vmem:[%s10645_s5 + $0xaa0] sm:$0xff]  ;;  %v5517_v38 = vld [vmem:[%s10645_s5 + $0xa98] sm:$0xff] }
 0x30c   :  { %v3796_v54 = vpop.permute.xlu1 %3795  ;;  %v3807_v48 = vadd.f32 %v3802_v44, %v3785_v42  ;;  %v5503_v21 = vld [vmem:[%s10645_s5 + $0xa28] sm:$0xff] }
 0x30d   :  { %v10102_v41 = vpop.permute.xlu0 %4078  ;;  %v3801_v50 = vsel %vm130_vm3, %v3796_v54, %v3798_v24  ;;  %v3784_v28 = vadd.f32 %v3779_v47, %v3762_v32  ;;  %v4065_v60 = vadd.f32 %v4062_v35, %v4057_v58  ;;  %v5520_v54 = vld [vmem:[%s10645_s5 + $0xab0] sm:$0xff]  ;;  %v5526_v35 = vld [vmem:[%s10645_s5 + $0xae0] sm:$0xff] }
 0x30e   :  { %4709 = vrot.lane.b32.xlu1 %v4701_v34, %s6286_s17 }
 0x30f   :  { %4707 = vrot.lane.b32.xlu0 %v4700_v63, %s6286_s17  ;;  %v3806_v27 = vadd.f32 %v3801_v50, %v3784_v28  ;;  %v4087_v5 = vadd.f32 %v10102_v41, %v4065_v60  ;;  %v5515_v28 = vld [vmem:[%s10645_s5 + $0xa88] sm:$0xff] }
 0x310   :  { %v3822_v61 = vpop.permute.xlu1 %3821 }
 0x311   :  { %v3830_v23 = vadd.f32 %v3822_v61, %v3808_v19  ;;  %v3820_v59 = vpop.permute.xlu0 %3819  ;;  %v5527_v19 = vld [vmem:[%s10645_s5 + $0xae8] sm:$0xff] }
 0x312   :  { %v3824_v7 = vsel %vm130_vm3, %v3820_v59, %v3822_v61  ;;  %4729 = vrot.lane.b32.xlu1 %v4722_v30, %s6286_s17  ;;  %v5501_v61 = vld [vmem:[%s10645_s5 + $0xa18] sm:$0xff]  ;;  %v5516_v30 = vld [vmem:[%s10645_s5 + $0xa90] sm:$0xff] }
 0x313   :  { %v3833_v49 = vmul.f32 0.3, %v3830_v23  ;;  %v3829_v56 = vadd.f32 %v3824_v7, %v3807_v48  ;;  %4705 = vrot.lane.b32.xlu0 %v4699_v14, %s6286_s17  ;;  %v5524_v7 = vld [vmem:[%s10645_s5 + $0xad0] sm:$0xff] }
 0x314   :  { %v3818_v10 = vpop.permute.xlu1 %3817 }
 0x315   :  { %v3836_v24 = vmax.f32 %v3830_v23, %v3833_v49  ;;  %v3832_v46 = vmul.f32 0.3, %v3829_v56  ;;  %v3823_v43 = vsel %vm130_vm3, %v3818_v10, %v3820_v59  ;;  %v10123_v40 = vpop.permute.xlu0 %4100  ;;  %v5525_v23 = vld [vmem:[%s10645_s5 + $0xad8] sm:$0xff]  ;;  %v5500_v59 = vld [vmem:[%s10645_s5 + $0xa10] sm:$0xff]  ;;  %v5499_v49 = vld [vmem:[%s10645_s5 + $0xa08] sm:$0xff] }
 0x316   :  { %v3828_v39 = vadd.f32 %v3823_v43, %v3806_v27  ;;  %4727 = vrot.lane.b32.xlu1 %v4721_v0, %s6286_s17  ;;  %v4109_v22 = vadd.f32 %v10123_v40, %v4087_v5  ;;  %v5523_v10 = vld [vmem:[%s10645_s5 + $0xac8] sm:$0xff]  ;;  %v5498_v0 = vld [vmem:[%s10645_s5 + $0xa00] sm:$0xff]  ;;  %v5512_v5 = vld [vmem:[%s10645_s5 + $0xa70] sm:$0xff] }
 0x317   :  { %4731 = vrot.lane.b32.xlu0 %v4723_v31, %s6286_s17  ;;  %6164 = vmatmul.mubr.msk.f32.vlgmr.msra.gmra.mxu0 %vm1000_vm4, %v3836_v24  ;;  %v3835_v18 = vmax.f32 %v3829_v56, %v3832_v46  ;;  %v5514_v56 = vld [vmem:[%s10645_s5 + $0xa80] sm:$0xff]  ;;  %v5513_v46 = vld [vmem:[%s10645_s5 + $0xa78] sm:$0xff] }
 0x318   :  { %v3831_v34 = vmul.f32 0.3, %v3828_v39  ;;  %v10140_v55 = vpop.permute.xlu1 %4144  ;;  %5936 = vmatpush3.msra.mxu0 %v5505_v25  ;;  %v5522_v31 = vld [vmem:[%s10645_s5 + $0xac0] sm:$0xff]  ;;  %v5497_v25 = vld [vmem:[%s10645_s5 + $0x9f8] sm:$0xff] }
 0x319   :  { %v10145_v63 = vpop.permute.xlu0 %4122  ;;  %3947 = vmatprep.mubr.f32.mxu1 %v3835_v18  ;;  %5937 = vmatprep.subr.mxu0 %v5520_v54 }
 0x31a   :  { %v3834_v44 = vmax.f32 %v3828_v39, %v3831_v34  ;;  %v4131_v17 = vadd.f32 %v10145_v63, %v4109_v22  ;;  %5938 = vmatpush3.msra.mxu0 %v5504_v29  ;;  %v5578_v39 = vld [vmem:[%s10645_s5 + $0xbf0] sm:$0xff]  ;;  %v5511_v22 = vld [vmem:[%s10645_s5 + $0xa68] sm:$0xff] }
 0x31b   :  { %5939 = vmatprep.subr.mxu0 %v5519_v62  ;;  %v5496_v29 = vld [vmem:[%s10645_s5 + $0x9f0] sm:$0xff] }
 0x31c   :  { %v10157_v47 = vpop.permute.xlu1 %4188  ;;  %v4153_v42 = vadd.f32 %v10140_v55, %v4131_v17  ;;  %3948 = vmatmul.mubr.f32.vlgmr.msra.gmra.mxu1 %v3834_v44  ;;  %5940 = vmatpush3.msra.mxu0 %v5503_v21  ;;  %v5495_v44 = vld [vmem:[%s10645_s5 + $0x9e8] sm:$0xff]  ;;  %v10806_v17 = vld [vmem:[#allocation52_spill] sm:$0xff] }
 0x31d   :  { %v10166_v32 = vpop.permute.xlu0 %4166  ;;  %6167 = vmatpush3.msk.msra.mxu1 %vm1004_vm0, %v5528_v12  ;;  %6180 = vmatprep.mubr.msk.f32.mxu1 %vm6288_vm1, %v10751_v3 }
 0x31e   :  { %v4175_v9 = vadd.f32 %v10166_v32, %v4153_v42  ;;  %6168 = vmatprep.subr.mxu1 %v10751_v3  ;;  %5941 = vmatprep.subr.mxu0 %v5518_v1  ;;  %v5510_v1 = vld [vmem:[%s10645_s5 + $0xa60] sm:$0xff] }
 0x31f   :  { %6169 = vmatpush3.msra.mxu1 %v5527_v19  ;;  %5942 = vmatpush3.msra.mxu0 %v5502_v15  ;;  %v5562_v15 = vld [vmem:[%s10645_s5 + $0xb70] sm:$0xff] }
 0x320   :  { %v10185_v48 = vpop.permute.xlu1 %4232  ;;  %v4197_v50 = vadd.f32 %v10157_v47, %v4175_v9  ;;  %6170 = vmatprep.subr.mxu1 %v10751_v3  ;;  %5943 = vmatprep.subr.mxu0 %v5517_v38  ;;  %v5509_v9 = vld [vmem:[%s10645_s5 + $0xa58] sm:$0xff] }
 0x321   :  { %v10195_v14 = vpop.permute.xlu0 %4210  ;;  %6171 = vmatpush3.msra.mxu1 %v5526_v35  ;;  %5944 = vmatpush3.msra.mxu0 %v5501_v61  ;;  %v5577_v35 = vld [vmem:[%s10645_s5 + $0xbe8] sm:$0xff] }
 0x322   :  { %v4219_v58 = vadd.f32 %v10195_v14, %v4197_v50  ;;  %6172 = vmatprep.subr.mxu1 %v10751_v3  ;;  %5945 = vmatprep.subr.mxu0 %v5516_v30  ;;  %v5493_v30 = vld [vmem:[%s10645_s5 + $0x9d8] sm:$0xff]  ;;  %v5561_v50 = vld [vmem:[%s10645_s5 + $0xb68] sm:$0xff] }
 0x323   :  { %6173 = vmatpush3.msra.mxu1 %v5525_v23  ;;  %5946 = vmatpush3.msra.mxu0 %v5500_v59  ;;  %v5508_v59 = vld [vmem:[%s10645_s5 + $0xa50] sm:$0xff] }
 0x324   :  { %v10211_v27 = vpop.permute.xlu1 %4276  ;;  %v4241_v60 = vadd.f32 %v10185_v48, %v4219_v58  ;;  %6174 = vmatprep.subr.mxu1 %v10751_v3  ;;  %5947 = vmatprep.subr.mxu0 %v5515_v28  ;;  %v5492_v58 = vld [vmem:[%s10645_s5 + $0x9d0] sm:$0xff] }
 0x325   :  { %v10221_v24 = vpop.permute.xlu0 %4254  ;;  %6175 = vmatpush3.msra.mxu1 %v5524_v7  ;;  %5948 = vmatpush3.msra.mxu0 %v5499_v49  ;;  %v5560_v7 = vld [vmem:[%s10645_s5 + $0xb60] sm:$0xff] }
 0x326   :  { %v4263_v43 = vadd.f32 %v10221_v24, %v4241_v60  ;;  %6176 = vmatprep.subr.mxu1 %v10751_v3  ;;  %5949 = vmatprep.subr.mxu0 %v5514_v56  ;;  %v5507_v56 = vld [vmem:[%s10645_s5 + $0xa48] sm:$0xff]  ;;  %v5575_v60 = vld [vmem:[%s10645_s5 + $0xbd8] sm:$0xff] }
 0x327   :  { %6177 = vmatpush3.msra.mxu1 %v5523_v10  ;;  %5950 = vmatpush3.msra.mxu0 %v5498_v0  ;;  %v5491_v0 = vld [vmem:[%s10645_s5 + $0x9c8] sm:$0xff] }
 0x328   :  { %v4285_v54 = vadd.f32 %v10211_v27, %v4263_v43  ;;  %v10241_v18 = vpop.permute.xlu1 %4074  ;;  %6178 = vmatprep.subr.mxu1 %v10751_v3  ;;  %5951 = vmatprep.subr.mxu0 %v5513_v46  ;;  %v5559_v46 = vld [vmem:[%s10645_s5 + $0xb58] sm:$0xff] }
 0x329   :  { %v10247_v34 = vpop.permute.xlu0 %4076  ;;  %6179 = vmatpush3.msra.mxu1 %v5522_v31  ;;  %5952 = vmatpush3.msra.mxu0 %v5497_v25  ;;  %v5506_v31 = vld [vmem:[%s10645_s5 + $0xa40] sm:$0xff] }
 0x32a   :  { %v4288_v62 = vmul.f32 0.3, %v4285_v54  ;;  %v4081_v21 = vsel %vm107_vm2, %v10247_v34, %v10102_v41  ;;  %5953 = vmatprep.subr.mxu0 %v5512_v5  ;;  %5978 = vmatprep.subr.mxu1 %v5578_v39  ;;  %v5494_v41 = vld [vmem:[%s10645_s5 + $0x9e0] sm:$0xff]  ;;  %v5558_v39 = vld [vmem:[%s10645_s5 + $0xb50] sm:$0xff] }
 0x32b   :  { %v4086_v12 = vadd.f32 %v4081_v21, %v10806_v17  ;;  %5954 = vmatpush3.msra.mxu0 %v5496_v29  ;;  %v5490_v5 = vld [vmem:[%s10645_s5 + $0x9c0] sm:$0xff]  ;;  %v5573_v29 = vld [vmem:[%s10645_s5 + $0xbc8] sm:$0xff] }
 0x32c   :  { %v4291_v42 = vmax.f32 %v4285_v54, %v4288_v62  ;;  %v10262_v19 = vpop.permute.xlu1 %4096  ;;  %5955 = vmatprep.subr.mxu0 %v5511_v22  ;;  %v5557_v62 = vld [vmem:[%s10645_s5 + $0xb48] sm:$0xff] }
 0x32d   :  { %v10270_v38 = vpop.permute.xlu0 %4098  ;;  %5956 = vmatpush3.msra.mxu0 %v5495_v44  ;;  %v5572_v44 = vld [vmem:[%s10645_s5 + $0xbc0] sm:$0xff] }
 0x32e   :  { %v4103_v61 = vsel %vm107_vm2, %v10270_v38, %v10123_v40  ;;  %6181 = vmatmul.mubr.msk.f32.vlgmr.msra.gmra.mxu1 %vm1000_vm4, %v4291_v42  ;;  %5957 = vmatprep.subr.mxu0 %v5510_v1  ;;  %v5576_v40 = vld [vmem:[%s10645_s5 + $0xbe0] sm:$0xff]  ;;  %v5571_v1 = vld [vmem:[%s10645_s5 + $0xbb8] sm:$0xff] }
 0x32f   :  { %v4108_v23 = vadd.f32 %v4103_v61, %v4086_v12  ;;  %5958 = vmatpush3.msra.mxu0 %v5494_v41  ;;  %5979 = vmatpush3.msra.mxu1 %v5562_v15  ;;  %v5555_v41 = vld [vmem:[%s10645_s5 + $0xb38] sm:$0xff]  ;;  %v5554_v61 = vld [vmem:[%s10645_s5 + $0xb30] sm:$0xff] }
 0x330   :  { %v10294_v28 = vpop.permute.xlu1 %4118  ;;  %5959 = vmatprep.subr.mxu0 %v5509_v9  ;;  %5980 = vmatprep.subr.mxu1 %v5577_v35  ;;  %v5570_v9 = vld [vmem:[%s10645_s5 + $0xbb0] sm:$0xff] }
 0x331   :  { %v10302_v49 = vpop.permute.xlu0 %4120  ;;  %5960 = vmatpush3.msra.mxu0 %v5493_v30  ;;  %5981 = vmatpush3.msra.mxu1 %v5561_v50  ;;  %v5553_v50 = vld [vmem:[%s10645_s5 + $0xb28] sm:$0xff] }
 0x332   :  { %v4125_v10 = vsel %vm107_vm2, %v10302_v49, %v10145_v63  ;;  %5961 = vmatprep.subr.mxu0 %v5508_v59  ;;  %5982 = vmatprep.subr.mxu1 %v5576_v40  ;;  %v5574_v63 = vld [vmem:[%s10645_s5 + $0xbd0] sm:$0xff] }
 0x333   :  { %v4130_v43 = vadd.f32 %v4125_v10, %v4108_v23  ;;  %5962 = vmatpush3.msra.mxu0 %v5492_v58  ;;  %5983 = vmatpush3.msra.mxu1 %v5560_v7  ;;  %v5568_v23 = vld [vmem:[%s10645_s5 + $0xba0] sm:$0xff] }
 0x334   :  { %v10325_v25 = vpop.permute.xlu1 %4140  ;;  %5963 = vmatprep.subr.mxu0 %v5507_v56  ;;  %5984 = vmatprep.subr.mxu1 %v5575_v60  ;;  %v5552_v58 = vld [vmem:[%s10645_s5 + $0xb20] sm:$0xff]  ;;  %v5567_v56 = vld [vmem:[%s10645_s5 + $0xb98] sm:$0xff] }
 0x335   :  { %v10333_v54 = vpop.permute.xlu0 %4142  ;;  %5964 = vmatpush3.msra.mxu0 %v5491_v0  ;;  %5985 = vmatpush3.msra.mxu1 %v5559_v46  ;;  %v5551_v0 = vld [vmem:[%s10645_s5 + $0xb18] sm:$0xff] }
 0x336   :  { %v4147_v22 = vsel %vm107_vm2, %v10333_v54, %v10140_v55  ;;  %5965 = vmatprep.subr.mxu0 %v5506_v31  ;;  %5986 = vmatprep.subr.mxu1 %v5574_v63  ;;  %v5556_v55 = vld [vmem:[%s10645_s5 + $0xb40] sm:$0xff]  ;;  %v5566_v31 = vld [vmem:[%s10645_s5 + $0xb90] sm:$0xff] }
 0x337   :  { %v4152_v21 = vadd.f32 %v4147_v22, %v4130_v43  ;;  %5966 = vmatpush3.msra.mxu0 %v5490_v5  ;;  %5987 = vmatpush3.msra.mxu1 %v5558_v39  ;;  %v5549_v22 = vld [vmem:[%s10645_s5 + $0xb08] sm:$0xff] }
 0x338   :  { %v10347_v17 = vpop.permute.xlu1 %4162  ;;  %5988 = vmatprep.subr.mxu1 %v5573_v29  ;;  %6183 = vmatprep.subr.mxu0 %v10751_v3  ;;  %v5565_v29 = vld [vmem:[%s10645_s5 + $0xb88] sm:$0xff] }
 0x339   :  { %v10353_v12 = vpop.permute.xlu0 %4164  ;;  %5989 = vmatpush3.msra.mxu1 %v5557_v62 }
 0x33a   :  { %v4169_v42 = vsel %vm107_vm2, %v10353_v12, %v10166_v32  ;;  %5990 = vmatprep.subr.mxu1 %v5572_v44  ;;  %v5569_v32 = vld [vmem:[%s10645_s5 + $0xba8] sm:$0xff]  ;;  %v5548_v44 = vld [vmem:[%s10645_s5 + $0xb00] sm:$0xff] }
 0x33b   :  { %v4174_v15 = vadd.f32 %v4169_v42, %v4152_v21  ;;  %5991 = vmatpush3.msra.mxu1 %v5556_v55  ;;  %v5564_v21 = vld [vmem:[%s10645_s5 + $0xb80] sm:$0xff] }
 0x33c   :  { %v10367_v35 = vpop.permute.xlu1 %4533  ;;  %5992 = vmatprep.subr.mxu1 %v5571_v1 }
 0x33d   :  { %v10372_v30 = vpop.permute.xlu0 %4531  ;;  %5993 = vmatpush3.msra.mxu1 %v5555_v41  ;;  %v5547_v41 = vld [vmem:[%s10645_s5 + $0xaf8] sm:$0xff] }
 0x33e   :  { %5994 = vmatprep.subr.mxu1 %v5570_v9 }
 0x33f   :  { %5995 = vmatpush3.msra.mxu1 %v5554_v61 }
 0x340   :  { %v10383_v59 = vpop.permute.xlu1 %4529  ;;  %v5795_v40 = vpop.f32.mrf.mxu0  ;;  %5996 = vmatprep.subr.mxu1 %v5569_v32 }
 0x341   :  { %v10388_v7 = vpop.permute.xlu0 %4186  ;;  %5997 = vmatpush3.msra.mxu1 %v5553_v50 }
 0x342   :  { %v4191_v60 = vsel %vm130_vm3, %v10388_v7, %v10157_v47  ;;  %v5796_v10 = vpop.f32.mrf.mxu0  ;;  %5998 = vmatprep.subr.mxu1 %v5568_v23  ;;  %v5550_v47 = vld [vmem:[%s10645_s5 + $0xb10] sm:$0xff] }
 0x343   :  { %v4196_v46 = vadd.f32 %v4191_v60, %v4174_v15  ;;  %v5797_v43 = vadd.f32 %v5796_v10, %v5795_v40  ;;  %5999 = vmatpush3.msra.mxu1 %v5552_v58  ;;  %v4080_v60 = vsel %vm107_vm2, %v10241_v18, %v10247_v34  ;;  %v4102_v10 = vsel %vm107_vm2, %v10262_v19, %v10270_v38 }
 0x344   :  { %v10402_v63 = vpop.permute.xlu1 %4553  ;;  %6000 = vmatprep.subr.mxu1 %v5567_v56  ;;  %v4146_v34 = vsel %vm107_vm2, %v10325_v25, %v10333_v54  ;;  %v4481_v25 = vstv %s5532_s24 }
 0x345   :  { %v2655_v5 = vadd.f32 %v5797_v43, %v10004_v37  ;;  %v4185_v39 = vpop.permute.xlu0 %4184  ;;  %6001 = vmatpush3.msra.mxu1 %v5551_v0 }
 0x346   :  { %6002 = vmatprep.subr.mxu1 %v5566_v31 }
 0x347   :  { %v10415_v62 = vadd.f32 %v2655_v5, %v9936_v4  ;;  %6003 = vmatpush3.msra.mxu1 %v5550_v47  ;;  %v5563_v4 = vld [vmem:[%s10645_s5 + $0xb78] sm:$0xff]  ;;  %v4124_v47 = vsel %vm107_vm2, %v10294_v28, %v10302_v49  ;;  %v4190_v49 = vsel %vm130_vm3, %v4185_v39, %v10388_v7 }
 0x348   :  { %v4209_v37 = vpop.permute.xlu1 %4208  ;;  %6004 = vmatprep.subr.mxu1 %v5565_v29 }
 0x349   :  { %v4213_v55 = vsel %vm130_vm3, %v4209_v37, %v10195_v14  ;;  %v10425_v1 = vpop.permute.xlu0 %4555  ;;  %6005 = vmatpush3.msra.mxu1 %v5549_v22 }
 0x34a   :  { %v4218_v42 = vadd.f32 %v4213_v55, %v4196_v46  ;;  %6006 = vmatprep.subr.mxu1 %v5564_v21  ;;  %v10807_v46 = vld [vmem:[#allocation51_spill] sm:$0xff]  ;;  %v4168_v21 = vsel %vm107_vm2, %v10347_v17, %v10353_v12  ;;  %v4484_v17 = vmul.f32 %v4481_v25, %v6477_v11  ;;  %v4485_v12 = vstv %s5531_s25 }
 0x34b   :  { %6007 = vmatpush3.msra.mxu1 %v5548_v44  ;;  %v4085_v43 = vadd.f32 %v4080_v60, %v10807_v46  ;;  %v4490_v60 = vstv %s5533_s3  ;;  %v4483_v11 = vmul.f32 %v4481_v25, %v6735_v6 }
 0x34c   :  { %v4207_v15 = vpop.permute.xlu1 %4206  ;;  %6008 = vmatprep.subr.mxu1 %v5563_v4 }
 0x34d   :  { %v10433_v9 = vpop.permute.xlu0 %4551  ;;  %6009 = vmatpush3.msra.mxu1 %v5547_v41  ;;  %v4107_v29 = vadd.f32 %v4102_v10, %v4085_v43  ;;  %v4498_v10 = vstv %s5534_s4 }
 0x34f   :  { %v4129_v38 = vadd.f32 %v4124_v47, %v4107_v29  ;;  %v4482_v47 = vmul.f32 %v4481_v25, %v6749_v20  ;;  %v4491_v20 = vmul.f32 %v4490_v60, %v10757_v16 }
 0x350   :  { %v10435_v14 = vpop.permute.xlu1 %4577 }
 0x351   :  { %v10437_v61 = vpop.permute.xlu0 %4575  ;;  %v4151_v28 = vadd.f32 %v4146_v34, %v4129_v38  ;;  %v4488_v34 = vadd.f32 %v4485_v12, %v4484_v17  ;;  %v4493_v38 = vmul.f32 %v4490_v60, %v6471_v8  ;;  %v4500_v8 = vmul.f32 %v4498_v10, %v10754_v33 }
 0x353   :  { %v4173_v4 = vadd.f32 %v4168_v21, %v4151_v28  ;;  %v4514_v28 = vstv %s10473_s28  ;;  %v4496_v16 = vadd.f32 %v4493_v38, %v4488_v34  ;;  %v5583_v34 = vld [vmem:[%s10645_s5 + $0xc18] sm:$0xff] }
 0x354   :  { %v10439_v32 = vpop.permute.xlu1 %4573  ;;  %v4517_v33 = vmul.f32 %v4514_v28, %v6548_v52  ;;  %v4535_v52 = vsel %vm107_vm2, %v10383_v59, %v10372_v30 }
 0x355   :  { %v4231_v50 = vpop.permute.xlu0 %4230 }
 0x356   :  { %v4235_v23 = vsel %vm130_vm3, %v4231_v50, %v10185_v48 }
 0x357   :  { %v4240_v40 = vadd.f32 %v4235_v23, %v4218_v42  ;;  %v4212_v42 = vsel %vm130_vm3, %v4207_v15, %v4209_v37  ;;  %v4195_v23 = vadd.f32 %v4190_v49, %v4173_v4  ;;  %v4486_v49 = vadd.f32 %v4485_v12, %v4482_v47 }
 0x358   :  { %v10443_v58 = vpop.permute.xlu1 %4597 }
 0x359   :  { %v4229_v56 = vpop.permute.xlu0 %4228  ;;  %v4217_v46 = vadd.f32 %v4212_v42, %v4195_v23  ;;  %v4494_v42 = vadd.f32 %v4491_v20, %v4486_v49  ;;  %v5581_v49 = vld [vmem:[%s10645_s5 + $0xc08] sm:$0xff] }
 0x35a   :  { %v4234_v7 = vsel %vm130_vm3, %v4229_v56, %v4231_v50 }
 0x35b   :  { %v4239_v15 = vadd.f32 %v4234_v7, %v4217_v46 }
 0x35c   :  { %v4253_v0 = vpop.permute.xlu1 %4252 }
 0x35d   :  { %v4257_v31 = vsel %vm130_vm3, %v4253_v0, %v10221_v24  ;;  %v10454_v48 = vpop.permute.xlu0 %4599 }
 0x35e   :  { %v4262_v5 = vadd.f32 %v4257_v31, %v4240_v40 }
 0x35f   :  { %v3109_v18 = vpop.f32.mrf.mxu0 }
 0x360   :  { %v4251_v19 = vpop.permute.xlu1 %4250 }
 0x361   :  { %v10462_v22 = vpop.permute.xlu0 %4595  ;;  %v6131_v24 = vpop.f32.mrf.mxu0  ;;  %v4256_v29 = vsel %vm130_vm3, %v4251_v19, %v4253_v0  ;;  %v4506_v0 = vstv %s5535_s26  ;;  %v4492_v19 = vmul.f32 %v4490_v60, %v6751_v13  ;;  %v4515_v60 = vmul.f32 %v4514_v28, %v6833_v51 }
 0x362   :  { %v4509_v25 = vmul.f32 %v4506_v0, %v6521_v36  ;;  %v4507_v13 = vmul.f32 %v4506_v0, %v6807_v53  ;;  %v4516_v36 = vmul.f32 %v4514_v28, %v6813_v2  ;;  %v5585_v53 = vld [vmem:[%s10645_s5 + $0xc28] sm:$0x3]  ;;  %v5584_v2 = vld [vmem:[%s10645_s5 + $0xc20] sm:$0xff] }
 0x364   :  { %v10469_v44 = vpop.permute.xlu1 %4621  ;;  %v5838_v55 = vpop.f32.mrf.mxu1 }
 0x365   :  { %v10471_v54 = vpop.permute.xlu0 %4619 }
 0x366   :  { %v5839_v41 = vpop.f32.mrf.mxu1 }
 0x367   :  { %v5840_v40 = vadd.f32 %v5839_v41, %v5838_v55  ;;  %v4487_v55 = vadd.f32 %v4485_v12, %v4483_v11 }
 0x368   :  { %v10478_v39 = vpop.permute.xlu1 %4617 }
 0x369   :  { %v3110_v43 = vadd.f32 %v5840_v40, %v3109_v18  ;;  %v4275_v31 = vpop.permute.xlu0 %4274  ;;  %v4501_v18 = vmul.f32 %v4498_v10, %v6502_v26  ;;  %v4495_v23 = vadd.f32 %v4492_v19, %v4487_v55  ;;  %v4508_v40 = vmul.f32 %v4506_v0, %v6795_v57 }
 0x36a   :  { %v4279_v37 = vsel %vm130_vm3, %v4275_v31, %v10211_v27  ;;  %v4261_v27 = vadd.f32 %v4256_v29, %v4239_v15 }
 0x36b   :  { %v10486_v50 = vadd.f32 %v3110_v43, %v10415_v62  ;;  %v4284_v56 = vadd.f32 %v4279_v37, %v4262_v5  ;;  %v4499_v62 = vmul.f32 %v4498_v10, %v6788_v45  ;;  %v4504_v12 = vadd.f32 %v4501_v18, %v4496_v16 }
 0x36c   :  { %v10491_v24 = vpop.permute.xlu1 %4641  ;;  %v4503_v10 = vadd.f32 %v4500_v8, %v4495_v23  ;;  %v4536_v37 = vsel %vm107_vm2, %v10372_v30, %v10367_v35  ;;  %v4558_v18 = vsel %vm107_vm2, %v10402_v63, %v10425_v1 }
 0x36d   :  { %v4287_v21 = vmul.f32 0.3, %v4284_v56  ;;  %v4273_v6 = vpop.permute.xlu0 %4272  ;;  %v4502_v7 = vadd.f32 %v4499_v62, %v4494_v42  ;;  %v4512_v43 = vadd.f32 %v4509_v25, %v4504_v12  ;;  %v5579_v25 = vld [vmem:[%s10645_s5 + $0xbf8] sm:$0xff] }
 0x36e   :  { %v4278_v5 = vsel %vm130_vm3, %v4273_v6, %v4275_v31  ;;  %v4511_v47 = vadd.f32 %v4508_v40, %v4503_v10 }
 0x36f   :  { %v4283_v26 = vadd.f32 %v4278_v5, %v4261_v27  ;;  %v4290_v4 = vmax.f32 %v4284_v56, %v4287_v21  ;;  %v4510_v57 = vadd.f32 %v4507_v13, %v4502_v7  ;;  %v4520_v51 = vadd.f32 %v4517_v33, %v4512_v43 }
 0x370   :  { %v10500_v41 = vpop.permute.xlu1 %4639  ;;  %v4519_v59 = vadd.f32 %v4516_v36, %v4511_v47  ;;  %v4557_v56 = vsel %vm107_vm2, %v10433_v9, %v10402_v63  ;;  %v4579_v9 = vsel %vm107_vm2, %v10439_v32, %v10437_v61  ;;  %v4580_v63 = vsel %vm107_vm2, %v10437_v61, %v10435_v14 }
 0x371   :  { %v4286_v17 = vmul.f32 0.3, %v4283_v26  ;;  %4402 = vmatprep.mubr.f32.mxu0 %v4290_v4  ;;  %v10503_v45 = vpop.permute.xlu0 %4643  ;;  %v4518_v11 = vadd.f32 %v4515_v60, %v4510_v57  ;;  %v4542_v30 = vadd.f32 %v10367_v35, %v4520_v51  ;;  %v5582_v35 = vld [vmem:[%s10645_s5 + $0xc10] sm:$0xff]  ;;  %v4601_v32 = vsel %vm107_vm2, %v10462_v22, %v10443_v58 }
 0x372   :  { %v4541_v19 = vadd.f32 %v4536_v37, %v4519_v59  ;;  %v4602_v5 = vsel %vm107_vm2, %v10443_v58, %v10454_v48  ;;  %v4623_v22 = vsel %vm107_vm2, %v10478_v39, %v10471_v54  ;;  %v4624_v58 = vsel %vm107_vm2, %v10471_v54, %v10469_v44 }
 0x373   :  { %v4289_v46 = vmax.f32 %v4283_v26, %v4286_v17  ;;  %v4540_v38 = vadd.f32 %v4535_v52, %v4518_v11  ;;  %v4564_v21 = vadd.f32 %v10425_v1, %v4542_v30  ;;  %v5580_v26 = vld [vmem:[%s10645_s5 + $0xc00] sm:$0xff]  ;;  %v4645_v39 = vsel %vm130_vm3, %v10500_v41, %v10491_v24 }
 0x374   :  { %v10511_v31 = vpop.permute.xlu1 %4665  ;;  %v4563_v28 = vadd.f32 %v4558_v18, %v4541_v19  ;;  %v4646_v13 = vsel %vm130_vm3, %v10491_v24, %v10503_v45 }
 0x375   :  { %4403 = vmatmul.mubr.f32.vlgmr.msra.gmra.mxu0 %v4289_v46  ;;  %v4664_v29 = vpop.permute.xlu0 %4663  ;;  %v4562_v6 = vadd.f32 %v4557_v56, %v4540_v38  ;;  %v4586_v62 = vadd.f32 %v10435_v14, %v4564_v21 }
 0x376   :  { %v10522_v15 = vpop.f32.mrf.mxu1  ;;  %6184 = vmatpush3.msk.msra.mxu0 %vm1004_vm0, %v5585_v53  ;;  %6197 = vmatprep.mubr.msk.f32.mxu0 %vm6288_vm1, %v10751_v3  ;;  %v4585_v55 = vadd.f32 %v4580_v63, %v4563_v28  ;;  %v4668_v33 = vsel %vm130_vm3, %v4664_v29, %v10511_v31  ;;  %v4950_v28 = vld [vmem:[%s10647_s7 + $0x38] sm:$0xff] }
 0x377   :  { %6185 = vmatprep.subr.mxu0 %v10751_v3  ;;  %v4584_v1 = vadd.f32 %v4579_v9, %v4562_v6  ;;  %v4608_v14 = vadd.f32 %v10454_v48, %v4586_v62 }
 0x378   :  { %v6148_v20 = vpop.f32.mrf.mxu1  ;;  %v4686_v0 = vpop.permute.xlu1 %4685  ;;  %6186 = vmatpush3.msra.mxu0 %v5584_v2  ;;  %v4607_v16 = vadd.f32 %v4602_v5, %v4585_v55  ;;  %v4946_v55 = vld [vmem:[%s10647_s7 + $0x18] sm:$0xff] }
 0x379   :  { %v4662_v27 = vpop.permute.xlu0 %4661  ;;  %6187 = vmatprep.subr.mxu0 %v10751_v3  ;;  %v4606_v4 = vadd.f32 %v4601_v32, %v4584_v1  ;;  %v4630_v42 = vadd.f32 %v10469_v44, %v4608_v14  ;;  %v4949_v32 = vld [vmem:[%s10647_s7 + $0x30] sm:$0xff]  ;;  %v4944_v14 = vld [vmem:[%s10647_s7 + $0x8] sm:$0xff] }
 0x37a   :  { %6188 = vmatpush3.msra.mxu0 %v5583_v34  ;;  %v4629_v23 = vadd.f32 %v4624_v58, %v4607_v16  ;;  %v4667_v40 = vsel %vm130_vm3, %v4662_v27, %v4664_v29 }
 0x37b   :  { %6189 = vmatprep.subr.mxu0 %v10751_v3  ;;  %v4628_v48 = vadd.f32 %v4623_v22, %v4606_v4  ;;  %v4652_v12 = vadd.f32 %v10503_v45, %v4630_v42  ;;  %v4943_v4 = vld [vmem:[%s10647_s7] sm:$0xff] }
 0x37c   :  { %v4684_v61 = vpop.permute.xlu1 %4683  ;;  %6190 = vmatpush3.msra.mxu0 %v5582_v35  ;;  %v4651_v44 = vadd.f32 %v4646_v13, %v4629_v23 }
 0x37d   :  { %v4688_v8 = vpop.permute.xlu0 %4687  ;;  %6191 = vmatprep.subr.mxu0 %v10751_v3  ;;  %v4650_v41 = vadd.f32 %v4645_v39, %v4628_v48  ;;  %v4689_v7 = vsel %vm130_vm3, %v4684_v61, %v4686_v0  ;;  %v4674_v24 = vadd.f32 %v10511_v31, %v4652_v12 }
 0x37e   :  { %6192 = vmatpush3.msra.mxu0 %v5581_v49  ;;  %v4690_v10 = vsel %vm130_vm3, %v4686_v0, %v4688_v8  ;;  %v4673_v46 = vadd.f32 %v4668_v33, %v4651_v44  ;;  %v5588_v33 = vld [vmem:[%s10646_s6] ss:$0 sm:$0xff] }
 0x37f   :  { %6193 = vmatprep.subr.mxu0 %v10751_v3  ;;  %v4672_v60 = vadd.f32 %v4667_v40, %v4650_v41  ;;  %v4696_v57 = vadd.f32 %v4688_v8, %v4674_v24  ;;  %v4945_v8 = vld [vmem:[%s10647_s7 + $0x10] sm:$0xff]  ;;  %v5589_v24 = vld [vmem:[%s10648_s8] ss:$0 sm:$0xff] }
 0x380   :  { %v4710_v54 = vpop.permute.xlu1 %4709  ;;  %6194 = vmatpush3.msra.mxu0 %v5580_v26  ;;  %v4695_v52 = vadd.f32 %v4690_v10, %v4673_v46 }
 0x381   :  { %v4708_v17 = vpop.permute.xlu0 %4707  ;;  %6195 = vmatprep.subr.mxu0 %v10751_v3  ;;  %v4694_v43 = vadd.f32 %v4689_v7, %v4672_v60  ;;  %v4718_v29 = vadd.f32 %v4710_v54, %v4696_v57 }
 0x382   :  { %6196 = vmatpush3.msra.mxu0 %v5579_v25  ;;  %v4712_v45 = vsel %vm130_vm3, %v4708_v17, %v4710_v54 }
 0x383   :  { %6200 = vmatprep.subr.mxu0 %v10751_v3  ;;  %v4717_v37 = vadd.f32 %v4712_v45, %v4695_v52 }
 0x384   :  { %v4730_v36 = vpop.permute.xlu1 %4729 }
 0x385   :  { %v4706_v53 = vpop.permute.xlu0 %4705 }
 0x386   :  { %v4711_v47 = vsel %vm130_vm3, %v4706_v53, %v4708_v17 }
 0x387   :  { %v4716_v2 = vadd.f32 %v4711_v47, %v4694_v43 }
 0x388   :  { %v4728_v51 = vpop.permute.xlu1 %4727 }
 0x389   :  { %v4733_v11 = vsel %vm130_vm3, %v4728_v51, %v4730_v36  ;;  %v4732_v31 = vpop.permute.xlu0 %4731 }
 0x38a   :  { %v4738_v59 = vadd.f32 %v4733_v11, %v4716_v2  ;;  %v4734_v56 = vsel %vm130_vm3, %v4730_v36, %v4732_v31  ;;  %v4740_v34 = vadd.f32 %v4732_v31, %v4718_v29 }
 0x38b   :  { %v4739_v30 = vadd.f32 %v4734_v56, %v4717_v37 }
 0x38c   :  { %v4741_v38 = vmul.f32 0.3, %v4738_v59  ;;  %v4743_v18 = vmul.f32 0.3, %v4740_v34 }
 0x38d   :  { %v4742_v20 = vmul.f32 0.3, %v4739_v30 }
 0x38e   :  { %v4744_v0 = vmax.f32 %v4738_v59, %v4741_v38  ;;  %v4746_v19 = vmax.f32 %v4740_v34, %v4743_v18 }
 0x38f   :  { %v4745_v9 = vmax.f32 %v4739_v30, %v4742_v20 }
 0x390   :  { %6198 = vmatmul.mubr.msk.f32.vlgmr.msra.gmra.mxu0 %vm1000_vm4, %v4746_v19 }
 0x391   :  { %4857 = vmatprep.mubr.f32.mxu1 %v4745_v9  ;;  %6216 = vmatprep.mubr.msk.f32.mxu0 %vm6288_vm1, %v10751_v3 }
 0x392   :  { %4858 = vmatmul.mubr.f32.vlgmr.msra.gmra.mxu1 %v4744_v0  ;;  %6201 = vmatpush3.msra.mxu0 %v4950_v28 }
 0x393   :  { %6202 = vmatprep.subr.mxu0 %v10751_v3 }
 0x394   :  { %6203 = vmatpush3.msra.mxu0 %v4949_v32 }
 0x395   :  { %6204 = vmatprep.subr.mxu0 %v10751_v3 }
 0x3b8   :  { %v5881_v27 = vpop.f32.mrf.mxu0 }
 0x3ba   :  { %v5882_v35 = vpop.f32.mrf.mxu0 }
 0x3bb   :  { %v5883_v21 = vadd.f32 %v5882_v35, %v5881_v27 }
 0x3bd   :  { %v3565_v6 = vadd.f32 %v5883_v21, %v10522_v15  ;;  %v4947_v15 = vld [vmem:[%s10647_s7 + $0x20] sm:$0xff] }
 0x3bf   :  { %v3568_v63 = vadd.f32 %v3565_v6, %v10486_v50  ;;  %v4948_v50 = vld [vmem:[%s10647_s7 + $0x28] sm:$0xff] }
 0x3c0   :  { %6205 = vmatpush3.msra.mxu0 %v4948_v50 }
 0x3c1   :  { %6206 = vmatprep.subr.mxu0 %v10751_v3 }
 0x3c2   :  { %6207 = vmatpush3.msra.mxu0 %v4947_v15 }
 0x3c3   :  { %6208 = vmatprep.subr.mxu0 %v10751_v3 }
 0x3c4   :  { %6209 = vmatpush3.msra.mxu0 %v4946_v55 }
 0x3c5   :  { %6210 = vmatprep.subr.mxu0 %v10751_v3 }
 0x3c6   :  { %6211 = vmatpush3.msra.mxu0 %v4945_v8 }
 0x3c7   :  { %6212 = vmatprep.subr.mxu0 %v10751_v3 }
 0x3c8   :  { %6213 = vmatpush3.msra.mxu0 %v4944_v14 }
 0x3c9   :  { %6214 = vmatprep.subr.mxu0 %v10751_v3 }
 0x3ca   :  { %6215 = vmatpush3.msra.mxu0 %v4943_v4 }
 0x3d7   :  { %v4019_v49 = vpop.f32.mrf.mxu0 }
 0x3d9   :  { %v6165_v62 = vpop.f32.mrf.mxu0 }
 0x3dc   :  { %v5924_v1 = vpop.f32.mrf.mxu1 }
 0x3de   :  { %v5925_v5 = vpop.f32.mrf.mxu1 }
 0x3df   :  { %v5926_v61 = vadd.f32 %v5925_v5, %v5924_v1 }
 0x3e1   :  { %v4020_v22 = vadd.f32 %v5926_v61, %v4019_v49 }
 0x3e3   :  { %v4023_v26 = vadd.f32 %v4020_v22, %v3568_v63 }
 0x3ee   :  { %v4474_v58 = vpop.f32.mrf.mxu1 }
 0x3f0   :  { %v6182_v16 = vpop.f32.mrf.mxu1 }
 0x435   :  { %v5967_v39 = vpop.f32.mrf.mxu0 }
 0x437   :  { %v5968_v25 = vpop.f32.mrf.mxu0 }
 0x438   :  { %v5969_v42 = vadd.f32 %v5968_v25, %v5967_v39 }
 0x43a   :  { %v4475_v23 = vadd.f32 %v5969_v42, %v4474_v58 }
 0x43c   :  { %v4478_v41 = vadd.f32 %v4475_v23, %v4023_v26 }
 0x450   :  { %v4929_v48 = vpop.f32.mrf.mxu0 }
 0x452   :  { %v6010_v13 = vpop.f32.mrf.mxu1  ;;  %v6199_v54 = vpop.f32.mrf.mxu0 }
 0x454   :  { %v6011_v40 = vpop.f32.mrf.mxu1 }
 0x455   :  { %v6012_v17 = vadd.f32 %v6011_v40, %v6010_v13 }
 0x457   :  { %v4930_v12 = vadd.f32 %v6012_v17, %v4929_v48 }
 0x459   :  { %v4933_v44 = vadd.f32 %v4930_v12, %v4478_v41 }
 0x45b   :  { %v4941_v3 = vadd.f32 %v5588_v33, %v4933_v44 }
 0x45d   :  { %v4942_v7 = vmax.f32 %v4941_v3, 0.0 }
 0x45f   :  { %6217 = vmatmul.mubr.msk.f32.vlgmr.msra.gmra.mxu0 %vm4958_vm5, %v4942_v7 }
 0x51f   :  { %v5028_v60 = vpop.f32.mrf.mxu0 }
 0x520   :  { %v5029_v10 = vadd.f32 %v5589_v24, %v5028_v60 }
 0x521   :  { %v6218_v36 = vpop.f32.mrf.mxu0 }
 0x522   :  { %5033 = vst.msk [vmem:[%s10649_s9] sm:$0xff] %vm5032_vm6, %v5029_v10 }
 0x523   :  { %5038 = vsyncpa [#allocation3], 1 }
 0x524   :  { %5039 = vsyncpa [#allocation5], 1 }
 0x525   :  { %5040 = vsyncpa [#allocation8], 1 }

</bundles_post_ra>
